<compile_context>
chip_gen: v7x
topology: tpu7x:2x2x1
jax: 0.10.0
libtpu: 0.0.40
codegen_flags: <defaults>
</compile_context>

<pallas_src>
import functools

import jax
import jax.numpy as jnp
from jax import lax
from jax.experimental import pallas as pl
from jax.experimental.pallas import tpu as pltpu


def _rup(n, m):
    return -(-n // m) * m


# ---------------------------------------------------------------------------
# Pallas kernel: one QRNNConv3D layer (conv + fo-pool) for one batch element
# ---------------------------------------------------------------------------
def _qrnn_conv3d_kernel(x_ref, w_ref, b_ref, o_ref, gates_ref, z_ref, f_ref, *,
                        kd, kh, kw, sh, sw, wph, s_plane, d_out, c_in, c_out,
                        reverse):
    # x_ref     : (Cp, Lin)              bf16  flattened padded input, Cp = sh*sw*Cin,
    #                                          Lin = (Dp+1)*S, per-plane stride S (x128)
    # w_ref     : (kd*kh*kw, 2Cout, Cin) bf16  per-tap weights
    # b_ref     : (2Cout, 1)             f32   bias
    # o_ref     : (Dout, Cout, S)        f32   output (junk lanes sliced off by wrapper)
    # gates_ref : (2Cout, Dout*S)        f32   scratch: conv gates for ALL bands
    # z_ref/f_ref: (Dout, Cout, S)       f32   scratch: activated gates, depth-major
    c_out2 = 2 * c_out
    n_tot = d_out * s_plane

    # ---- Phase 1: all conv gates via kd*kh*kw fat MXU dots (N = Dout*S). ----------
    # Bias hoisted: a single broadcast initializes the accumulator.
    gates_ref[...] = jnp.broadcast_to(b_ref[...], (c_out2, n_tot))
    t = 0
    for a in range(kd):                       # depth taps (zero planes pre-padded)
        for b in range(kh):                   # spatial taps: contiguous flat slices
            for c in range(kw):
                off = a * s_plane + (b // sh) * wph + (c // sw)
                ch0 = ((b % sh) * sw + (c % sw)) * c_in   # polyphase channel block
                gates_ref[...] += jnp.dot(
                    w_ref[t],
                    x_ref[ch0:ch0 + c_in, off:off + n_tot],
                    preferred_element_type=jnp.float32)
                t += 1

    # ---- Phase 2: batched EUP activations, re-laid out depth-major (off the serial
    #               path; static 128-aligned lane slices, static leading-axis stores).
    for dd in range(d_out):
        g = gates_ref[:, dd * s_plane:(dd + 1) * s_plane]
        z_ref[dd] = jnp.tanh(g[:c_out])
        f_ref[dd] = jax.nn.sigmoid(g[c_out:])

    # ---- Phase 3: fo-pool recurrence: 2 VPU ops + 1 lane-dense store per band. -----
    def step(i, h):
        dd = d_out - 1 - i if reverse else i          # `reverse` is static
        z = z_ref[dd]
        f = f_ref[dd]
        h = z + f * (h - z)                           # == f*h + (1-f)*z
        o_ref[dd] = h.astype(o_ref.dtype)
        return h

    lax.fori_loop(0, d_out, step, jnp.zeros((c_out, s_plane), jnp.float32),
                  unroll=d_out <= 8)


# ---------------------------------------------------------------------------
# Wrapper: pad / polyphase / flatten glue + pallas_call
# ---------------------------------------------------------------------------
def qrnn_conv3d_layer(x, w_taps, bias, *, k, s, p, reverse):
    """One QRNNConv3D layer.  x: [B, D, Cin, H, W] f32 -> [B, Dout, Cout, Ho, Wo] f32."""
    kd, kh, kw = k
    sd, sh, sw = s
    pd, ph, pw = p
    assert sd == 1, "depth stride must be 1 for the QRNN recurrence"
    B, D, Cin, H, W = x.shape
    T, Cout2, Cin_w = w_taps.shape
    assert T == kd * kh * kw and Cin_w == Cin
    Cout = Cout2 // 2

    Hp, Wp = H + 2 * ph, W + 2 * pw
    Dp = D + 2 * pd
    Dout = Dp - kd + 1
    Ho = (Hp - kh) // sh + 1
    Wo = (Wp - kw) // sw + 1
    Hpp, Wpp = _rup(Hp, sh), _rup(Wp, sw)            # pad up to the stride
    Hph, Wph = Hpp // sh, Wpp // sw                   # polyphase phase-plane size
    oh_max, ow_max = (kh - 1) // sh, (kw - 1) // sw
    # Every tap window must stay inside its (zero-padded) phase plane.
    assert oh_max + Ho <= Hph and ow_max + Wo <= Wph, "tap window escapes phase plane"

    Cp = sh * sw * Cin
    S = _rup(Hph * Wph, 128)                          # lane-aligned per-plane stride
    Ntot = Dout * S
    Lin = (Dp + 1) * S                                # +1 zero tail plane (tap overrun)

    # ---- layout prep (one fused XLA copy): spatial+depth zero pad, polyphase fold,
    #      channel-major transpose, per-plane flatten padded to S, bf16 cast.
    xp = jnp.pad(x, ((0, 0), (pd, pd), (0, 0),
                     (ph, ph + Hpp - Hp), (pw, pw + Wpp - Wp)))
    if sh == 1 and sw == 1:
        xp = jnp.transpose(xp, (0, 2, 1, 3, 4))                      # no polyphase fold
    else:
        xp = xp.reshape(B, Dp, Cin, Hph, sh, Wph, sw)
        xp = jnp.transpose(xp, (0, 4, 6, 2, 1, 3, 5))                # (B, r, t, Cin, Dp, Hph, Wph)
    xp = xp.reshape(B, Cp, Dp, Hph * Wph)
    xp = jnp.pad(xp, ((0, 0), (0, 0), (0, 0), (0, S - Hph * Wph)))
    xp = xp.reshape(B, Cp, Dp * S)
    xp = jnp.pad(xp, ((0, 0), (0, 0), (0, S))).astype(jnp.bfloat16)  # (B, Cp, Lin)

    w_b = w_taps.astype(jnp.bfloat16)
    b_col = bias.reshape(Cout2, 1).astype(jnp.float32)

    # ---- VMEM budget (review: explicit accounting + vmem_limit_bytes for v7x). ----
    in_blk = _rup(Cp, 8) * Lin * 2
    w_blk = T * _rup(Cout2, 8) * 128 * 2
    b_blk = _rup(Cout2, 8) * 128 * 4
    out_blk = Dout * _rup(Cout, 8) * S * 4
    scratch = _rup(Cout2, 8) * Ntot * 4 + 2 * Dout * _rup(Cout, 8) * S * 4
    vmem_need = 2 * (in_blk + w_blk + b_blk + out_blk) + scratch
    assert vmem_need < 48 * 2 ** 20, \
        "working set too large for a single block; add the H-tile grid axis (TODO)"
    vmem_limit = int(min(112 * 2 ** 20, vmem_need + (8 << 20)))

    cost = pl.CostEstimate(
        flops=int(2 * B * T * Cout2 * Cin * Ntot),
        transcendentals=int(B * Cout2 * Ntot),
        bytes_accessed=int(B * (Cp * Lin * 2 + Dout * Cout * S * 4)
                           + T * Cout2 * Cin * 2 + Cout2 * 4))

    kernel = functools.partial(
        _qrnn_conv3d_kernel, kd=kd, kh=kh, kw=kw, sh=sh, sw=sw,
        wph=Wph, s_plane=S, d_out=Dout, c_in=Cin, c_out=Cout, reverse=reverse)

    out = pl.pallas_call(
        kernel,
        out_shape=jax.ShapeDtypeStruct((B, Dout, Cout, S), jnp.float32),
        grid=(B,),
        in_specs=[
            pl.BlockSpec((None, Cp, Lin), lambda i: (i, 0, 0)),
            pl.BlockSpec((T, Cout2, Cin), lambda i: (0, 0, 0)),
            pl.BlockSpec((Cout2, 1), lambda i: (0, 0)),
        ],
        out_specs=pl.BlockSpec((None, Dout, Cout, S), lambda i: (i, 0, 0, 0)),
        scratch_shapes=[
            pltpu.VMEM((Cout2, Ntot), jnp.float32),      # gates (all bands)
            pltpu.VMEM((Dout, Cout, S), jnp.float32),    # z, depth-major
            pltpu.VMEM((Dout, Cout, S), jnp.float32),    # f, depth-major
        ],
        compiler_params=pltpu.CompilerParams(
            dimension_semantics=("parallel",),
            vmem_limit_bytes=vmem_limit),
        cost_estimate=cost,
    )(xp, w_b, b_col)

    # Un-flatten: real pixels live at lane q = i*Wph + j (i < Ho, j < Wo).
    out = out[..., :Ho * Wph].reshape(B, Dout, Cout, Ho, Wph)[..., :Wo]
    return out


# ---------------------------------------------------------------------------
# Pure-JAX reference (f32 math on bf16-rounded operands -> tight tolerance,
# and no bf16 dots outside Pallas, which crashed the runtime previously)
# ---------------------------------------------------------------------------
def _qrnn_conv3d_layer_ref(x, w, bias, *, k, s, p, reverse):
    kd, kh, kw = k
    _, sh, sw = s
    pd, ph, pw = p
    B, D, Cin, H, W = x.shape
    Cout2 = w.shape[-1]
    Cout = Cout2 // 2
    xq = x.astype(jnp.bfloat16).astype(jnp.float32)   # mirror the kernel's bf16 rounding
    wq = w.astype(jnp.bfloat16).astype(jnp.float32)
    xp = jnp.pad(xq, ((0, 0), (pd, pd), (0, 0), (ph, ph), (pw, pw)))
    Dp, Hp, Wp = D + 2 * pd, H + 2 * ph, W + 2 * pw
    Dout = Dp - kd + 1
    Ho = (Hp - kh) // sh + 1
    Wo = (Wp - kw) // sw + 1
    gates = jnp.zeros((B, Dout, Cout2, Ho, Wo), jnp.float32) \
        + bias.reshape(1, 1, Cout2, 1, 1).astype(jnp.float32)
    for a in range(kd):
        for b in range(kh):
            for c in range(kw):
                xsl = xp[:, a:a + Dout, :,
                         b:b + sh * (Ho - 1) + 1:sh,
                         c:c + sw * (Wo - 1) + 1:sw]
                gates = gates + jnp.einsum("bdihw,io->bdohw", xsl, wq[a, b, c])
    z = jnp.tanh(gates[:, :, :Cout])
    f = jax.nn.sigmoid(gates[:, :, Cout:])
    h = jnp.zeros((B, Cout, Ho, Wo), jnp.float32)
    outs = [None] * Dout
    order = range(Dout - 1, -1, -1) if reverse else range(Dout)
    for d in order:
        h = z[:, d] + f[:, d] * (h - z[:, d])
        outs[d] = h
    return jnp.stack(outs, axis=1)


# ---------------------------------------------------------------------------
# QRNN3DEncoder
# ---------------------------------------------------------------------------
class QRNN3DEncoderPallas:
    """Pallas port of QRNN3DEncoder."""

    def __init__(self, channels, num_half_layer, sample_idx, key,
                 is_2d=False, has_ad=True):
        self.enable_ad = has_ad
        self.layers = []
        for i in range(num_half_layer):
            if i not in sample_idx:
                k = (1, 3, 3) if is_2d else (3, 3, 3)
                s = (1, 1, 1)
                p = (0, 1, 1) if is_2d else (1, 1, 1)
                cin, cout = channels, channels
            else:
                k = (1, 3, 3) if is_2d else (3, 3, 3)
                s = (1, 2, 2)
                p = (0, 1, 1) if is_2d else (1, 1, 1)
                cin, cout = channels, 2 * channels
                channels *= 2
            key, kw_key, kb_key = jax.random.split(key, 3)
            kd, kh, kwd = k
            fan_in = cin * kd * kh * kwd
            w = jax.random.normal(kw_key, (kd, kh, kwd, cin, 2 * cout),
                                  jnp.float32) / jnp.sqrt(float(fan_in))
            b = 0.1 * jax.random.normal(kb_key, (2 * cout,), jnp.float32)
            # Pre-transposed weight for the kernel: (kd*kh*kw, 2*Cout, Cin); the tap
            # order (a, b, c) matches the kernel's static tap loop.
            w_taps = jnp.transpose(w, (0, 1, 2, 4, 3)).reshape(
                kd * kh * kwd, 2 * cout, cin)
            # TODO(synk): BasicConv3d's BatchNorm3d is omitted (identity under default
            # init in eval mode); a bias term is used instead.
            self.layers.append({"k": k, "s": s, "p": p, "w": w,
                                "w_taps": w_taps, "b": b})

    def _apply(self, layer_fn, x, xs, reverse):
        num_half_layer = len(self.layers)
        if not self.enable_ad:
            for i in range(num_half_layer - 1):
                x = layer_fn(x, self.layers[i], reverse=False)
                xs.append(x)
            return layer_fn(x, self.layers[-1], reverse=False)
        for i in range(num_half_layer - 1):
            x = layer_fn(x, self.layers[i], reverse=reverse)
            reverse = not reverse
            xs.append(x)
        x = layer_fn(x, self.layers[-1], reverse=reverse)
        reverse = not reverse
        return x, reverse

    def __call__(self, x, xs, reverse=False):
        fn = lambda x, L, reverse: qrnn_conv3d_layer(
            x, L["w_taps"], L["b"], k=L["k"], s=L["s"], p=L["p"], reverse=reverse)
        return self._apply(fn, x, xs, reverse)

    def reference(self, x, xs, reverse=False):
        fn = lambda x, L, reverse: _qrnn_conv3d_layer_ref(
            x, L["w"], L["b"], k=L["k"], s=L["s"], p=L["p"], reverse=reverse)
        return self._apply(fn, x, xs, reverse)


if __name__ == "__main__":
    key = jax.random.PRNGKey(0)
    kx, kparam = jax.random.split(key)

    # PyTorch NCDHW input: batch=2, channels=4, bands(D)=8, H=W=16
    B, C, D, H, W = 2, 4, 8, 16, 16
    x_ncdhw = jax.random.normal(kx, (B, C, D, H, W), jnp.float32)
    x = jnp.transpose(x_ncdhw, (0, 2, 1, 3, 4))   # NCDHW -> (B, D, C, H, W)

    enc = QRNN3DEncoderPallas(channels=C, num_half_layer=3, sample_idx=[1],
                              key=kparam, is_2d=False, has_ad=True)

    xs = []
    out, rev = enc(x, xs, reverse=False)
    out = jax.block_until_ready(out)

    # Sanity check against a pure-f32 JAX reference of the same math (same bf16-rounded
    # operands, f32 accumulation) so the tolerance can stay tight.
    xs_ref = []
    out_ref, rev_ref = enc.reference(x, xs_ref, reverse=False)
    out_ref = jax.block_until_ready(out_ref)

    assert rev == rev_ref == True
    assert out.shape == out_ref.shape == (B, D, 2 * C, H // 2, W // 2)
    assert len(xs) == len(xs_ref) == 2
    assert jnp.allclose(out, out_ref, rtol=2e-3, atol=2e-3), \
        float(jnp.max(jnp.abs(out - out_ref)))
    for a, b in zip(xs, xs_ref):
        assert a.shape == b.shape
        assert jnp.allclose(a, b, rtol=2e-3, atol=2e-3), \
            float(jnp.max(jnp.abs(a - b)))

    print("KERNEL_OK")
</pallas_src>

<mosaic_0001>
module attributes {stable_mosaic.version = 11 : i64} {
  func.func @_qrnn_conv3d_kernel(%arg0: i32, %arg1: memref<1x4x4224xbf16, #tpu.memory_space<vmem>>, %arg2: memref<27x8x4xbf16, #tpu.memory_space<vmem>>, %arg3: memref<8x1xf32, #tpu.memory_space<vmem>>, %arg4: memref<1x8x4x384xf32, #tpu.memory_space<vmem>>, %arg5: memref<8x3072xf32, #tpu.memory_space<vmem>>, %arg6: memref<8x4x384xf32, #tpu.memory_space<vmem>>, %arg7: memref<8x4x384xf32, #tpu.memory_space<vmem>>) attributes {dimension_semantics = [#tpu.dimension_semantics<parallel>], iteration_bounds = array<i64: 2>, scalar_prefetch = 0 : i64, scratch_operands = 3 : i64, tpu.core_type = #tpu.core_type<tc>, window_params = [{transform_indices = @transform_0, window_bounds = array<i64: 1, 4, 4224>}, {pipeline_mode = #tpu.pipeline_mode<synchronous>, transform_indices = @transform_1, window_bounds = array<i64: 27, 8, 4>}, {pipeline_mode = #tpu.pipeline_mode<synchronous>, transform_indices = @transform_2, window_bounds = array<i64: 8, 1>}, {transform_indices = @transform_3, window_bounds = array<i64: 1, 8, 4, 384>}]} {
    %c0 = arith.constant 0 : index
    %c0_0 = arith.constant 0 : index
    %0 = vector.load %arg3[%c0, %c0_0] : memref<8x1xf32, #tpu.memory_space<vmem>>, vector<8x1xf32>
    %1 = vector.shape_cast %0 : vector<8x1xf32> to vector<8x1xf32>
    %2 = vector.broadcast %1 : vector<8x1xf32> to vector<8x3072xf32>
    %c0_1 = arith.constant 0 : index
    %c0_2 = arith.constant 0 : index
    %3 = vector.load %arg5[%c0_1, %c0_2] : memref<8x3072xf32, #tpu.memory_space<vmem>>, vector<8x3072xf32>
    tpu.vector_store %arg5[%c0_1, %c0_2], %2 {strides = array<i32>} : memref<8x3072xf32, #tpu.memory_space<vmem>>, vector<8x3072xf32>,
    %c0_3 = arith.constant 0 : index
    %c0_4 = arith.constant 0 : index
    %4 = vector.load %arg5[%c0_3, %c0_4] : memref<8x3072xf32, #tpu.memory_space<vmem>>, vector<8x3072xf32>
    %c0_5 = arith.constant 0 : index
    %c0_6 = arith.constant 0 : index
    %c0_7 = arith.constant 0 : index
    %5 = vector.load %arg2[%c0_5, %c0_6, %c0_7] : memref<27x8x4xbf16, #tpu.memory_space<vmem>>, vector<1x8x4xbf16>
    %6 = vector.shape_cast %5 : vector<1x8x4xbf16> to vector<8x4xbf16>
    %c0_8 = arith.constant 0 : index
    %c0_9 = arith.constant 0 : index
    %c0_10 = arith.constant 0 : index
    %7 = vector.load %arg1[%c0_8, %c0_9, %c0_10] : memref<1x4x4224xbf16, #tpu.memory_space<vmem>>, vector<1x4x3072xbf16>
    %8 = vector.shape_cast %7 : vector<1x4x3072xbf16> to vector<4x3072xbf16>
    %cst = arith.constant dense<0.000000e+00> : vector<8x3072xf32>
    %9 = tpu.matmul %6, %8, %cst {dimension_numbers = #tpu.dot_dimension_numbers<[1], [0], [0], [1], [0, 0, 1, 1], [], []>} : vector<8x4xbf16>, vector<4x3072xbf16>, vector<8x3072xf32> -> vector<8x3072xf32>
    %10 = arith.addf %4, %9 : vector<8x3072xf32>
    %c0_11 = arith.constant 0 : index
    %c0_12 = arith.constant 0 : index
    %11 = vector.load %arg5[%c0_11, %c0_12] : memref<8x3072xf32, #tpu.memory_space<vmem>>, vector<8x3072xf32>
    tpu.vector_store %arg5[%c0_11, %c0_12], %10 {strides = array<i32>} : memref<8x3072xf32, #tpu.memory_space<vmem>>, vector<8x3072xf32>,
    %c0_13 = arith.constant 0 : index
    %c0_14 = arith.constant 0 : index
    %12 = vector.load %arg5[%c0_13, %c0_14] : memref<8x3072xf32, #tpu.memory_space<vmem>>, vector<8x3072xf32>
    %c1 = arith.constant 1 : index
    %c0_15 = arith.constant 0 : index
    %c0_16 = arith.constant 0 : index
    %13 = vector.load %arg2[%c1, %c0_15, %c0_16] : memref<27x8x4xbf16, #tpu.memory_space<vmem>>, vector<1x8x4xbf16>
    %14 = vector.shape_cast %13 : vector<1x8x4xbf16> to vector<8x4xbf16>
    %c0_17 = arith.constant 0 : index
    %c0_18 = arith.constant 0 : index
    %c1_19 = arith.constant 1 : index
    %15 = vector.load %arg1[%c0_17, %c0_18, %c1_19] : memref<1x4x4224xbf16, #tpu.memory_space<vmem>>, vector<1x4x3072xbf16>
    %16 = vector.shape_cast %15 : vector<1x4x3072xbf16> to vector<4x3072xbf16>
    %cst_20 = arith.constant dense<0.000000e+00> : vector<8x3072xf32>
    %17 = tpu.matmul %14, %16, %cst_20 {dimension_numbers = #tpu.dot_dimension_numbers<[1], [0], [0], [1], [0, 0, 1, 1], [], []>} : vector<8x4xbf16>, vector<4x3072xbf16>, vector<8x3072xf32> -> vector<8x3072xf32>
    %18 = arith.addf %12, %17 : vector<8x3072xf32>
    %c0_21 = arith.constant 0 : index
    %c0_22 = arith.constant 0 : index
    %19 = vector.load %arg5[%c0_21, %c0_22] : memref<8x3072xf32, #tpu.memory_space<vmem>>, vector<8x3072xf32>
    tpu.vector_store %arg5[%c0_21, %c0_22], %18 {strides = array<i32>} : memref<8x3072xf32, #tpu.memory_space<vmem>>, vector<8x3072xf32>,
    %c0_23 = arith.constant 0 : index
    %c0_24 = arith.constant 0 : index
    %20 = vector.load %arg5[%c0_23, %c0_24] : memref<8x3072xf32, #tpu.memory_space<vmem>>, vector<8x3072xf32>
    %c2 = arith.constant 2 : index
    %c0_25 = arith.constant 0 : index
    %c0_26 = arith.constant 0 : index
    %21 = vector.load %arg2[%c2, %c0_25, %c0_26] : memref<27x8x4xbf16, #tpu.memory_space<vmem>>, vector<1x8x4xbf16>
    %22 = vector.shape_cast %21 : vector<1x8x4xbf16> to vector<8x4xbf16>
    %c0_27 = arith.constant 0 : index
    %c0_28 = arith.constant 0 : index
    %c2_29 = arith.constant 2 : index
    %23 = vector.load %arg1[%c0_27, %c0_28, %c2_29] : memref<1x4x4224xbf16, #tpu.memory_space<vmem>>, vector<1x4x3072xbf16>
    %24 = vector.shape_cast %23 : vector<1x4x3072xbf16> to vector<4x3072xbf16>
    %cst_30 = arith.constant dense<0.000000e+00> : vector<8x3072xf32>
    %25 = tpu.matmul %22, %24, %cst_30 {dimension_numbers = #tpu.dot_dimension_numbers<[1], [0], [0], [1], [0, 0, 1, 1], [], []>} : vector<8x4xbf16>, vector<4x3072xbf16>, vector<8x3072xf32> -> vector<8x3072xf32>
    %26 = arith.addf %20, %25 : vector<8x3072xf32>
    %c0_31 = arith.constant 0 : index
    %c0_32 = arith.constant 0 : index
    %27 = vector.load %arg5[%c0_31, %c0_32] : memref<8x3072xf32, #tpu.memory_space<vmem>>, vector<8x3072xf32>
    tpu.vector_store %arg5[%c0_31, %c0_32], %26 {strides = array<i32>} : memref<8x3072xf32, #tpu.memory_space<vmem>>, vector<8x3072xf32>,
    %c0_33 = arith.constant 0 : index
    %c0_34 = arith.constant 0 : index
    %28 = vector.load %arg5[%c0_33, %c0_34] : memref<8x3072xf32, #tpu.memory_space<vmem>>, vector<8x3072xf32>
    %c3 = arith.constant 3 : index
    %c0_35 = arith.constant 0 : index
    %c0_36 = arith.constant 0 : index
    %29 = vector.load %arg2[%c3, %c0_35, %c0_36] : memref<27x8x4xbf16, #tpu.memory_space<vmem>>, vector<1x8x4xbf16>
    %30 = vector.shape_cast %29 : vector<1x8x4xbf16> to vector<8x4xbf16>
    %c0_37 = arith.constant 0 : index
    %c0_38 = arith.constant 0 : index
    %c18 = arith.constant 18 : index
    %31 = vector.load %arg1[%c0_37, %c0_38, %c18] : memref<1x4x4224xbf16, #tpu.memory_space<vmem>>, vector<1x4x3072xbf16>
    %32 = vector.shape_cast %31 : vector<1x4x3072xbf16> to vector<4x3072xbf16>
    %cst_39 = arith.constant dense<0.000000e+00> : vector<8x3072xf32>
    %33 = tpu.matmul %30, %32, %cst_39 {dimension_numbers = #tpu.dot_dimension_numbers<[1], [0], [0], [1], [0, 0, 1, 1], [], []>} : vector<8x4xbf16>, vector<4x3072xbf16>, vector<8x3072xf32> -> vector<8x3072xf32>
    %34 = arith.addf %28, %33 : vector<8x3072xf32>
    %c0_40 = arith.constant 0 : index
    %c0_41 = arith.constant 0 : index
    %35 = vector.load %arg5[%c0_40, %c0_41] : memref<8x3072xf32, #tpu.memory_space<vmem>>, vector<8x3072xf32>
    tpu.vector_store %arg5[%c0_40, %c0_41], %34 {strides = array<i32>} : memref<8x3072xf32, #tpu.memory_space<vmem>>, vector<8x3072xf32>,
    %c0_42 = arith.constant 0 : index
    %c0_43 = arith.constant 0 : index
    %36 = vector.load %arg5[%c0_42, %c0_43] : memref<8x3072xf32, #tpu.memory_space<vmem>>, vector<8x3072xf32>
    %c4 = arith.constant 4 : index
    %c0_44 = arith.constant 0 : index
    %c0_45 = arith.constant 0 : index
    %37 = vector.load %arg2[%c4, %c0_44, %c0_45] : memref<27x8x4xbf16, #tpu.memory_space<vmem>>, vector<1x8x4xbf16>
    %38 = vector.shape_cast %37 : vector<1x8x4xbf16> to vector<8x4xbf16>
    %c0_46 = arith.constant 0 : index
    %c0_47 = arith.constant 0 : index
    %c19 = arith.constant 19 : index
    %39 = vector.load %arg1[%c0_46, %c0_47, %c19] : memref<1x4x4224xbf16, #tpu.memory_space<vmem>>, vector<1x4x3072xbf16>
    %40 = vector.shape_cast %39 : vector<1x4x3072xbf16> to vector<4x3072xbf16>
    %cst_48 = arith.constant dense<0.000000e+00> : vector<8x3072xf32>
    %41 = tpu.matmul %38, %40, %cst_48 {dimension_numbers = #tpu.dot_dimension_numbers<[1], [0], [0], [1], [0, 0, 1, 1], [], []>} : vector<8x4xbf16>, vector<4x3072xbf16>, vector<8x3072xf32> -> vector<8x3072xf32>
    %42 = arith.addf %36, %41 : vector<8x3072xf32>
    %c0_49 = arith.constant 0 : index
    %c0_50 = arith.constant 0 : index
    %43 = vector.load %arg5[%c0_49, %c0_50] : memref<8x3072xf32, #tpu.memory_space<vmem>>, vector<8x3072xf32>
    tpu.vector_store %arg5[%c0_49, %c0_50], %42 {strides = array<i32>} : memref<8x3072xf32, #tpu.memory_space<vmem>>, vector<8x3072xf32>,
    %c0_51 = arith.constant 0 : index
    %c0_52 = arith.constant 0 : index
    %44 = vector.load %arg5[%c0_51, %c0_52] : memref<8x3072xf32, #tpu.memory_space<vmem>>, vector<8x3072xf32>
    %c5 = arith.constant 5 : index
    %c0_53 = arith.constant 0 : index
    %c0_54 = arith.constant 0 : index
    %45 = vector.load %arg2[%c5, %c0_53, %c0_54] : memref<27x8x4xbf16, #tpu.memory_space<vmem>>, vector<1x8x4xbf16>
    %46 = vector.shape_cast %45 : vector<1x8x4xbf16> to vector<8x4xbf16>
    %c0_55 = arith.constant 0 : index
    %c0_56 = arith.constant 0 : index
    %c20 = arith.constant 20 : index
    %47 = vector.load %arg1[%c0_55, %c0_56, %c20] : memref<1x4x4224xbf16, #tpu.memory_space<vmem>>, vector<1x4x3072xbf16>
    %48 = vector.shape_cast %47 : vector<1x4x3072xbf16> to vector<4x3072xbf16>
    %cst_57 = arith.constant dense<0.000000e+00> : vector<8x3072xf32>
    %49 = tpu.matmul %46, %48, %cst_57 {dimension_numbers = #tpu.dot_dimension_numbers<[1], [0], [0], [1], [0, 0, 1, 1], [], []>} : vector<8x4xbf16>, vector<4x3072xbf16>, vector<8x3072xf32> -> vector<8x3072xf32>
    %50 = arith.addf %44, %49 : vector<8x3072xf32>
    %c0_58 = arith.constant 0 : index
    %c0_59 = arith.constant 0 : index
    %51 = vector.load %arg5[%c0_58, %c0_59] : memref<8x3072xf32, #tpu.memory_space<vmem>>, vector<8x3072xf32>
    tpu.vector_store %arg5[%c0_58, %c0_59], %50 {strides = array<i32>} : memref<8x3072xf32, #tpu.memory_space<vmem>>, vector<8x3072xf32>,
    %c0_60 = arith.constant 0 : index
    %c0_61 = arith.constant 0 : index
    %52 = vector.load %arg5[%c0_60, %c0_61] : memref<8x3072xf32, #tpu.memory_space<vmem>>, vector<8x3072xf32>
    %c6 = arith.constant 6 : index
    %c0_62 = arith.constant 0 : index
    %c0_63 = arith.constant 0 : index
    %53 = vector.load %arg2[%c6, %c0_62, %c0_63] : memref<27x8x4xbf16, #tpu.memory_space<vmem>>, vector<1x8x4xbf16>
    %54 = vector.shape_cast %53 : vector<1x8x4xbf16> to vector<8x4xbf16>
    %c0_64 = arith.constant 0 : index
    %c0_65 = arith.constant 0 : index
    %c36 = arith.constant 36 : index
    %55 = vector.load %arg1[%c0_64, %c0_65, %c36] : memref<1x4x4224xbf16, #tpu.memory_space<vmem>>, vector<1x4x3072xbf16>
    %56 = vector.shape_cast %55 : vector<1x4x3072xbf16> to vector<4x3072xbf16>
    %cst_66 = arith.constant dense<0.000000e+00> : vector<8x3072xf32>
    %57 = tpu.matmul %54, %56, %cst_66 {dimension_numbers = #tpu.dot_dimension_numbers<[1], [0], [0], [1], [0, 0, 1, 1], [], []>} : vector<8x4xbf16>, vector<4x3072xbf16>, vector<8x3072xf32> -> vector<8x3072xf32>
    %58 = arith.addf %52, %57 : vector<8x3072xf32>
    %c0_67 = arith.constant 0 : index
    %c0_68 = arith.constant 0 : index
    %59 = vector.load %arg5[%c0_67, %c0_68] : memref<8x3072xf32, #tpu.memory_space<vmem>>, vector<8x3072xf32>
    tpu.vector_store %arg5[%c0_67, %c0_68], %58 {strides = array<i32>} : memref<8x3072xf32, #tpu.memory_space<vmem>>, vector<8x3072xf32>,
    %c0_69 = arith.constant 0 : index
    %c0_70 = arith.constant 0 : index
    %60 = vector.load %arg5[%c0_69, %c0_70] : memref<8x3072xf32, #tpu.memory_space<vmem>>, vector<8x3072xf32>
    %c7 = arith.constant 7 : index
    %c0_71 = arith.constant 0 : index
    %c0_72 = arith.constant 0 : index
    %61 = vector.load %arg2[%c7, %c0_71, %c0_72] : memref<27x8x4xbf16, #tpu.memory_space<vmem>>, vector<1x8x4xbf16>
    %62 = vector.shape_cast %61 : vector<1x8x4xbf16> to vector<8x4xbf16>
    %c0_73 = arith.constant 0 : index
    %c0_74 = arith.constant 0 : index
    %c37 = arith.constant 37 : index
    %63 = vector.load %arg1[%c0_73, %c0_74, %c37] : memref<1x4x4224xbf16, #tpu.memory_space<vmem>>, vector<1x4x3072xbf16>
    %64 = vector.shape_cast %63 : vector<1x4x3072xbf16> to vector<4x3072xbf16>
    %cst_75 = arith.constant dense<0.000000e+00> : vector<8x3072xf32>
    %65 = tpu.matmul %62, %64, %cst_75 {dimension_numbers = #tpu.dot_dimension_numbers<[1], [0], [0], [1], [0, 0, 1, 1], [], []>} : vector<8x4xbf16>, vector<4x3072xbf16>, vector<8x3072xf32> -> vector<8x3072xf32>
    %66 = arith.addf %60, %65 : vector<8x3072xf32>
    %c0_76 = arith.constant 0 : index
    %c0_77 = arith.constant 0 : index
    %67 = vector.load %arg5[%c0_76, %c0_77] : memref<8x3072xf32, #tpu.memory_space<vmem>>, vector<8x3072xf32>
    tpu.vector_store %arg5[%c0_76, %c0_77], %66 {strides = array<i32>} : memref<8x3072xf32, #tpu.memory_space<vmem>>, vector<8x3072xf32>,
    %c0_78 = arith.constant 0 : index
    %c0_79 = arith.constant 0 : index
    %68 = vector.load %arg5[%c0_78, %c0_79] : memref<8x3072xf32, #tpu.memory_space<vmem>>, vector<8x3072xf32>
    %c8 = arith.constant 8 : index
    %c0_80 = arith.constant 0 : index
    %c0_81 = arith.constant 0 : index
    %69 = vector.load %arg2[%c8, %c0_80, %c0_81] : memref<27x8x4xbf16, #tpu.memory_space<vmem>>, vector<1x8x4xbf16>
    %70 = vector.shape_cast %69 : vector<1x8x4xbf16> to vector<8x4xbf16>
    %c0_82 = arith.constant 0 : index
    %c0_83 = arith.constant 0 : index
    %c38 = arith.constant 38 : index
    %71 = vector.load %arg1[%c0_82, %c0_83, %c38] : memref<1x4x4224xbf16, #tpu.memory_space<vmem>>, vector<1x4x3072xbf16>
    %72 = vector.shape_cast %71 : vector<1x4x3072xbf16> to vector<4x3072xbf16>
    %cst_84 = arith.constant dense<0.000000e+00> : vector<8x3072xf32>
    %73 = tpu.matmul %70, %72, %cst_84 {dimension_numbers = #tpu.dot_dimension_numbers<[1], [0], [0], [1], [0, 0, 1, 1], [], []>} : vector<8x4xbf16>, vector<4x3072xbf16>, vector<8x3072xf32> -> vector<8x3072xf32>
    %74 = arith.addf %68, %73 : vector<8x3072xf32>
    %c0_85 = arith.constant 0 : index
    %c0_86 = arith.constant 0 : index
    %75 = vector.load %arg5[%c0_85, %c0_86] : memref<8x3072xf32, #tpu.memory_space<vmem>>, vector<8x3072xf32>
    tpu.vector_store %arg5[%c0_85, %c0_86], %74 {strides = array<i32>} : memref<8x3072xf32, #tpu.memory_space<vmem>>, vector<8x3072xf32>,
    %c0_87 = arith.constant 0 : index
    %c0_88 = arith.constant 0 : index
    %76 = vector.load %arg5[%c0_87, %c0_88] : memref<8x3072xf32, #tpu.memory_space<vmem>>, vector<8x3072xf32>
    %c9 = arith.constant 9 : index
    %c0_89 = arith.constant 0 : index
    %c0_90 = arith.constant 0 : index
    %77 = vector.load %arg2[%c9, %c0_89, %c0_90] : memref<27x8x4xbf16, #tpu.memory_space<vmem>>, vector<1x8x4xbf16>
    %78 = vector.shape_cast %77 : vector<1x8x4xbf16> to vector<8x4xbf16>
    %c0_91 = arith.constant 0 : index
    %c0_92 = arith.constant 0 : index
    %c384 = arith.constant 384 : index
    %79 = vector.load %arg1[%c0_91, %c0_92, %c384] : memref<1x4x4224xbf16, #tpu.memory_space<vmem>>, vector<1x4x3072xbf16>
    %80 = vector.shape_cast %79 : vector<1x4x3072xbf16> to vector<4x3072xbf16>
    %cst_93 = arith.constant dense<0.000000e+00> : vector<8x3072xf32>
    %81 = tpu.matmul %78, %80, %cst_93 {dimension_numbers = #tpu.dot_dimension_numbers<[1], [0], [0], [1], [0, 0, 1, 1], [], []>} : vector<8x4xbf16>, vector<4x3072xbf16>, vector<8x3072xf32> -> vector<8x3072xf32>
    %82 = arith.addf %76, %81 : vector<8x3072xf32>
    %c0_94 = arith.constant 0 : index
    %c0_95 = arith.constant 0 : index
    %83 = vector.load %arg5[%c0_94, %c0_95] : memref<8x3072xf32, #tpu.memory_space<vmem>>, vector<8x3072xf32>
    tpu.vector_store %arg5[%c0_94, %c0_95], %82 {strides = array<i32>} : memref<8x3072xf32, #tpu.memory_space<vmem>>, vector<8x3072xf32>,
    %c0_96 = arith.constant 0 : index
    %c0_97 = arith.constant 0 : index
    %84 = vector.load %arg5[%c0_96, %c0_97] : memref<8x3072xf32, #tpu.memory_space<vmem>>, vector<8x3072xf32>
    %c10 = arith.constant 10 : index
    %c0_98 = arith.constant 0 : index
    %c0_99 = arith.constant 0 : index
    %85 = vector.load %arg2[%c10, %c0_98, %c0_99] : memref<27x8x4xbf16, #tpu.memory_space<vmem>>, vector<1x8x4xbf16>
    %86 = vector.shape_cast %85 : vector<1x8x4xbf16> to vector<8x4xbf16>
    %c0_100 = arith.constant 0 : index
    %c0_101 = arith.constant 0 : index
    %c385 = arith.constant 385 : index
    %87 = vector.load %arg1[%c0_100, %c0_101, %c385] : memref<1x4x4224xbf16, #tpu.memory_space<vmem>>, vector<1x4x3072xbf16>
    %88 = vector.shape_cast %87 : vector<1x4x3072xbf16> to vector<4x3072xbf16>
    %cst_102 = arith.constant dense<0.000000e+00> : vector<8x3072xf32>
    %89 = tpu.matmul %86, %88, %cst_102 {dimension_numbers = #tpu.dot_dimension_numbers<[1], [0], [0], [1], [0, 0, 1, 1], [], []>} : vector<8x4xbf16>, vector<4x3072xbf16>, vector<8x3072xf32> -> vector<8x3072xf32>
    %90 = arith.addf %84, %89 : vector<8x3072xf32>
    %c0_103 = arith.constant 0 : index
    %c0_104 = arith.constant 0 : index
    %91 = vector.load %arg5[%c0_103, %c0_104] : memref<8x3072xf32, #tpu.memory_space<vmem>>, vector<8x3072xf32>
    tpu.vector_store %arg5[%c0_103, %c0_104], %90 {strides = array<i32>} : memref<8x3072xf32, #tpu.memory_space<vmem>>, vector<8x3072xf32>,
    %c0_105 = arith.constant 0 : index
    %c0_106 = arith.constant 0 : index
    %92 = vector.load %arg5[%c0_105, %c0_106] : memref<8x3072xf32, #tpu.memory_space<vmem>>, vector<8x3072xf32>
    %c11 = arith.constant 11 : index
    %c0_107 = arith.constant 0 : index
    %c0_108 = arith.constant 0 : index
    %93 = vector.load %arg2[%c11, %c0_107, %c0_108] : memref<27x8x4xbf16, #tpu.memory_space<vmem>>, vector<1x8x4xbf16>
    %94 = vector.shape_cast %93 : vector<1x8x4xbf16> to vector<8x4xbf16>
    %c0_109 = arith.constant 0 : index
    %c0_110 = arith.constant 0 : index
    %c386 = arith.constant 386 : index
    %95 = vector.load %arg1[%c0_109, %c0_110, %c386] : memref<1x4x4224xbf16, #tpu.memory_space<vmem>>, vector<1x4x3072xbf16>
    %96 = vector.shape_cast %95 : vector<1x4x3072xbf16> to vector<4x3072xbf16>
    %cst_111 = arith.constant dense<0.000000e+00> : vector<8x3072xf32>
    %97 = tpu.matmul %94, %96, %cst_111 {dimension_numbers = #tpu.dot_dimension_numbers<[1], [0], [0], [1], [0, 0, 1, 1], [], []>} : vector<8x4xbf16>, vector<4x3072xbf16>, vector<8x3072xf32> -> vector<8x3072xf32>
    %98 = arith.addf %92, %97 : vector<8x3072xf32>
    %c0_112 = arith.constant 0 : index
    %c0_113 = arith.constant 0 : index
    %99 = vector.load %arg5[%c0_112, %c0_113] : memref<8x3072xf32, #tpu.memory_space<vmem>>, vector<8x3072xf32>
    tpu.vector_store %arg5[%c0_112, %c0_113], %98 {strides = array<i32>} : memref<8x3072xf32, #tpu.memory_space<vmem>>, vector<8x3072xf32>,
    %c0_114 = arith.constant 0 : index
    %c0_115 = arith.constant 0 : index
    %100 = vector.load %arg5[%c0_114, %c0_115] : memref<8x3072xf32, #tpu.memory_space<vmem>>, vector<8x3072xf32>
    %c12 = arith.constant 12 : index
    %c0_116 = arith.constant 0 : index
    %c0_117 = arith.constant 0 : index
    %101 = vector.load %arg2[%c12, %c0_116, %c0_117] : memref<27x8x4xbf16, #tpu.memory_space<vmem>>, vector<1x8x4xbf16>
    %102 = vector.shape_cast %101 : vector<1x8x4xbf16> to vector<8x4xbf16>
    %c0_118 = arith.constant 0 : index
    %c0_119 = arith.constant 0 : index
    %c402 = arith.constant 402 : index
    %103 = vector.load %arg1[%c0_118, %c0_119, %c402] : memref<1x4x4224xbf16, #tpu.memory_space<vmem>>, vector<1x4x3072xbf16>
    %104 = vector.shape_cast %103 : vector<1x4x3072xbf16> to vector<4x3072xbf16>
    %cst_120 = arith.constant dense<0.000000e+00> : vector<8x3072xf32>
    %105 = tpu.matmul %102, %104, %cst_120 {dimension_numbers = #tpu.dot_dimension_numbers<[1], [0], [0], [1], [0, 0, 1, 1], [], []>} : vector<8x4xbf16>, vector<4x3072xbf16>, vector<8x3072xf32> -> vector<8x3072xf32>
    %106 = arith.addf %100, %105 : vector<8x3072xf32>
    %c0_121 = arith.constant 0 : index
    %c0_122 = arith.constant 0 : index
    %107 = vector.load %arg5[%c0_121, %c0_122] : memref<8x3072xf32, #tpu.memory_space<vmem>>, vector<8x3072xf32>
    tpu.vector_store %arg5[%c0_121, %c0_122], %106 {strides = array<i32>} : memref<8x3072xf32, #tpu.memory_space<vmem>>, vector<8x3072xf32>,
    %c0_123 = arith.constant 0 : index
    %c0_124 = arith.constant 0 : index
    %108 = vector.load %arg5[%c0_123, %c0_124] : memref<8x3072xf32, #tpu.memory_space<vmem>>, vector<8x3072xf32>
    %c13 = arith.constant 13 : index
    %c0_125 = arith.constant 0 : index
    %c0_126 = arith.constant 0 : index
    %109 = vector.load %arg2[%c13, %c0_125, %c0_126] : memref<27x8x4xbf16, #tpu.memory_space<vmem>>, vector<1x8x4xbf16>
    %110 = vector.shape_cast %109 : vector<1x8x4xbf16> to vector<8x4xbf16>
    %c0_127 = arith.constant 0 : index
    %c0_128 = arith.constant 0 : index
    %c403 = arith.constant 403 : index
    %111 = vector.load %arg1[%c0_127, %c0_128, %c403] : memref<1x4x4224xbf16, #tpu.memory_space<vmem>>, vector<1x4x3072xbf16>
    %112 = vector.shape_cast %111 : vector<1x4x3072xbf16> to vector<4x3072xbf16>
    %cst_129 = arith.constant dense<0.000000e+00> : vector<8x3072xf32>
    %113 = tpu.matmul %110, %112, %cst_129 {dimension_numbers = #tpu.dot_dimension_numbers<[1], [0], [0], [1], [0, 0, 1, 1], [], []>} : vector<8x4xbf16>, vector<4x3072xbf16>, vector<8x3072xf32> -> vector<8x3072xf32>
    %114 = arith.addf %108, %113 : vector<8x3072xf32>
    %c0_130 = arith.constant 0 : index
    %c0_131 = arith.constant 0 : index
    %115 = vector.load %arg5[%c0_130, %c0_131] : memref<8x3072xf32, #tpu.memory_space<vmem>>, vector<8x3072xf32>
    tpu.vector_store %arg5[%c0_130, %c0_131], %114 {strides = array<i32>} : memref<8x3072xf32, #tpu.memory_space<vmem>>, vector<8x3072xf32>,
    %c0_132 = arith.constant 0 : index
    %c0_133 = arith.constant 0 : index
    %116 = vector.load %arg5[%c0_132, %c0_133] : memref<8x3072xf32, #tpu.memory_space<vmem>>, vector<8x3072xf32>
    %c14 = arith.constant 14 : index
    %c0_134 = arith.constant 0 : index
    %c0_135 = arith.constant 0 : index
    %117 = vector.load %arg2[%c14, %c0_134, %c0_135] : memref<27x8x4xbf16, #tpu.memory_space<vmem>>, vector<1x8x4xbf16>
    %118 = vector.shape_cast %117 : vector<1x8x4xbf16> to vector<8x4xbf16>
    %c0_136 = arith.constant 0 : index
    %c0_137 = arith.constant 0 : index
    %c404 = arith.constant 404 : index
    %119 = vector.load %arg1[%c0_136, %c0_137, %c404] : memref<1x4x4224xbf16, #tpu.memory_space<vmem>>, vector<1x4x3072xbf16>
    %120 = vector.shape_cast %119 : vector<1x4x3072xbf16> to vector<4x3072xbf16>
    %cst_138 = arith.constant dense<0.000000e+00> : vector<8x3072xf32>
    %121 = tpu.matmul %118, %120, %cst_138 {dimension_numbers = #tpu.dot_dimension_numbers<[1], [0], [0], [1], [0, 0, 1, 1], [], []>} : vector<8x4xbf16>, vector<4x3072xbf16>, vector<8x3072xf32> -> vector<8x3072xf32>
    %122 = arith.addf %116, %121 : vector<8x3072xf32>
    %c0_139 = arith.constant 0 : index
    %c0_140 = arith.constant 0 : index
    %123 = vector.load %arg5[%c0_139, %c0_140] : memref<8x3072xf32, #tpu.memory_space<vmem>>, vector<8x3072xf32>
    tpu.vector_store %arg5[%c0_139, %c0_140], %122 {strides = array<i32>} : memref<8x3072xf32, #tpu.memory_space<vmem>>, vector<8x3072xf32>,
    %c0_141 = arith.constant 0 : index
    %c0_142 = arith.constant 0 : index
    %124 = vector.load %arg5[%c0_141, %c0_142] : memref<8x3072xf32, #tpu.memory_space<vmem>>, vector<8x3072xf32>
    %c15 = arith.constant 15 : index
    %c0_143 = arith.constant 0 : index
    %c0_144 = arith.constant 0 : index
    %125 = vector.load %arg2[%c15, %c0_143, %c0_144] : memref<27x8x4xbf16, #tpu.memory_space<vmem>>, vector<1x8x4xbf16>
    %126 = vector.shape_cast %125 : vector<1x8x4xbf16> to vector<8x4xbf16>
    %c0_145 = arith.constant 0 : index
    %c0_146 = arith.constant 0 : index
    %c420 = arith.constant 420 : index
    %127 = vector.load %arg1[%c0_145, %c0_146, %c420] : memref<1x4x4224xbf16, #tpu.memory_space<vmem>>, vector<1x4x3072xbf16>
    %128 = vector.shape_cast %127 : vector<1x4x3072xbf16> to vector<4x3072xbf16>
    %cst_147 = arith.constant dense<0.000000e+00> : vector<8x3072xf32>
    %129 = tpu.matmul %126, %128, %cst_147 {dimension_numbers = #tpu.dot_dimension_numbers<[1], [0], [0], [1], [0, 0, 1, 1], [], []>} : vector<8x4xbf16>, vector<4x3072xbf16>, vector<8x3072xf32> -> vector<8x3072xf32>
    %130 = arith.addf %124, %129 : vector<8x3072xf32>
    %c0_148 = arith.constant 0 : index
    %c0_149 = arith.constant 0 : index
    %131 = vector.load %arg5[%c0_148, %c0_149] : memref<8x3072xf32, #tpu.memory_space<vmem>>, vector<8x3072xf32>
    tpu.vector_store %arg5[%c0_148, %c0_149], %130 {strides = array<i32>} : memref<8x3072xf32, #tpu.memory_space<vmem>>, vector<8x3072xf32>,
    %c0_150 = arith.constant 0 : index
    %c0_151 = arith.constant 0 : index
    %132 = vector.load %arg5[%c0_150, %c0_151] : memref<8x3072xf32, #tpu.memory_space<vmem>>, vector<8x3072xf32>
    %c16 = arith.constant 16 : index
    %c0_152 = arith.constant 0 : index
    %c0_153 = arith.constant 0 : index
    %133 = vector.load %arg2[%c16, %c0_152, %c0_153] : memref<27x8x4xbf16, #tpu.memory_space<vmem>>, vector<1x8x4xbf16>
    %134 = vector.shape_cast %133 : vector<1x8x4xbf16> to vector<8x4xbf16>
    %c0_154 = arith.constant 0 : index
    %c0_155 = arith.constant 0 : index
    %c421 = arith.constant 421 : index
    %135 = vector.load %arg1[%c0_154, %c0_155, %c421] : memref<1x4x4224xbf16, #tpu.memory_space<vmem>>, vector<1x4x3072xbf16>
    %136 = vector.shape_cast %135 : vector<1x4x3072xbf16> to vector<4x3072xbf16>
    %cst_156 = arith.constant dense<0.000000e+00> : vector<8x3072xf32>
    %137 = tpu.matmul %134, %136, %cst_156 {dimension_numbers = #tpu.dot_dimension_numbers<[1], [0], [0], [1], [0, 0, 1, 1], [], []>} : vector<8x4xbf16>, vector<4x3072xbf16>, vector<8x3072xf32> -> vector<8x3072xf32>
    %138 = arith.addf %132, %137 : vector<8x3072xf32>
    %c0_157 = arith.constant 0 : index
    %c0_158 = arith.constant 0 : index
    %139 = vector.load %arg5[%c0_157, %c0_158] : memref<8x3072xf32, #tpu.memory_space<vmem>>, vector<8x3072xf32>
    tpu.vector_store %arg5[%c0_157, %c0_158], %138 {strides = array<i32>} : memref<8x3072xf32, #tpu.memory_space<vmem>>, vector<8x3072xf32>,
    %c0_159 = arith.constant 0 : index
    %c0_160 = arith.constant 0 : index
    %140 = vector.load %arg5[%c0_159, %c0_160] : memref<8x3072xf32, #tpu.memory_space<vmem>>, vector<8x3072xf32>
    %c17 = arith.constant 17 : index
    %c0_161 = arith.constant 0 : index
    %c0_162 = arith.constant 0 : index
    %141 = vector.load %arg2[%c17, %c0_161, %c0_162] : memref<27x8x4xbf16, #tpu.memory_space<vmem>>, vector<1x8x4xbf16>
    %142 = vector.shape_cast %141 : vector<1x8x4xbf16> to vector<8x4xbf16>
    %c0_163 = arith.constant 0 : index
    %c0_164 = arith.constant 0 : index
    %c422 = arith.constant 422 : index
    %143 = vector.load %arg1[%c0_163, %c0_164, %c422] : memref<1x4x4224xbf16, #tpu.memory_space<vmem>>, vector<1x4x3072xbf16>
    %144 = vector.shape_cast %143 : vector<1x4x3072xbf16> to vector<4x3072xbf16>
    %cst_165 = arith.constant dense<0.000000e+00> : vector<8x3072xf32>
    %145 = tpu.matmul %142, %144, %cst_165 {dimension_numbers = #tpu.dot_dimension_numbers<[1], [0], [0], [1], [0, 0, 1, 1], [], []>} : vector<8x4xbf16>, vector<4x3072xbf16>, vector<8x3072xf32> -> vector<8x3072xf32>
    %146 = arith.addf %140, %145 : vector<8x3072xf32>
    %c0_166 = arith.constant 0 : index
    %c0_167 = arith.constant 0 : index
    %147 = vector.load %arg5[%c0_166, %c0_167] : memref<8x3072xf32, #tpu.memory_space<vmem>>, vector<8x3072xf32>
    tpu.vector_store %arg5[%c0_166, %c0_167], %146 {strides = array<i32>} : memref<8x3072xf32, #tpu.memory_space<vmem>>, vector<8x3072xf32>,
    %c0_168 = arith.constant 0 : index
    %c0_169 = arith.constant 0 : index
    %148 = vector.load %arg5[%c0_168, %c0_169] : memref<8x3072xf32, #tpu.memory_space<vmem>>, vector<8x3072xf32>
    %c18_170 = arith.constant 18 : index
    %c0_171 = arith.constant 0 : index
    %c0_172 = arith.constant 0 : index
    %149 = vector.load %arg2[%c18_170, %c0_171, %c0_172] : memref<27x8x4xbf16, #tpu.memory_space<vmem>>, vector<1x8x4xbf16>
    %150 = vector.shape_cast %149 : vector<1x8x4xbf16> to vector<8x4xbf16>
    %c0_173 = arith.constant 0 : index
    %c0_174 = arith.constant 0 : index
    %c768 = arith.constant 768 : index
    %151 = vector.load %arg1[%c0_173, %c0_174, %c768] : memref<1x4x4224xbf16, #tpu.memory_space<vmem>>, vector<1x4x3072xbf16>
    %152 = vector.shape_cast %151 : vector<1x4x3072xbf16> to vector<4x3072xbf16>
    %cst_175 = arith.constant dense<0.000000e+00> : vector<8x3072xf32>
    %153 = tpu.matmul %150, %152, %cst_175 {dimension_numbers = #tpu.dot_dimension_numbers<[1], [0], [0], [1], [0, 0, 1, 1], [], []>} : vector<8x4xbf16>, vector<4x3072xbf16>, vector<8x3072xf32> -> vector<8x3072xf32>
    %154 = arith.addf %148, %153 : vector<8x3072xf32>
    %c0_176 = arith.constant 0 : index
    %c0_177 = arith.constant 0 : index
    %155 = vector.load %arg5[%c0_176, %c0_177] : memref<8x3072xf32, #tpu.memory_space<vmem>>, vector<8x3072xf32>
    tpu.vector_store %arg5[%c0_176, %c0_177], %154 {strides = array<i32>} : memref<8x3072xf32, #tpu.memory_space<vmem>>, vector<8x3072xf32>,
    %c0_178 = arith.constant 0 : index
    %c0_179 = arith.constant 0 : index
    %156 = vector.load %arg5[%c0_178, %c0_179] : memref<8x3072xf32, #tpu.memory_space<vmem>>, vector<8x3072xf32>
    %c19_180 = arith.constant 19 : index
    %c0_181 = arith.constant 0 : index
    %c0_182 = arith.constant 0 : index
    %157 = vector.load %arg2[%c19_180, %c0_181, %c0_182] : memref<27x8x4xbf16, #tpu.memory_space<vmem>>, vector<1x8x4xbf16>
    %158 = vector.shape_cast %157 : vector<1x8x4xbf16> to vector<8x4xbf16>
    %c0_183 = arith.constant 0 : index
    %c0_184 = arith.constant 0 : index
    %c769 = arith.constant 769 : index
    %159 = vector.load %arg1[%c0_183, %c0_184, %c769] : memref<1x4x4224xbf16, #tpu.memory_space<vmem>>, vector<1x4x3072xbf16>
    %160 = vector.shape_cast %159 : vector<1x4x3072xbf16> to vector<4x3072xbf16>
    %cst_185 = arith.constant dense<0.000000e+00> : vector<8x3072xf32>
    %161 = tpu.matmul %158, %160, %cst_185 {dimension_numbers = #tpu.dot_dimension_numbers<[1], [0], [0], [1], [0, 0, 1, 1], [], []>} : vector<8x4xbf16>, vector<4x3072xbf16>, vector<8x3072xf32> -> vector<8x3072xf32>
    %162 = arith.addf %156, %161 : vector<8x3072xf32>
    %c0_186 = arith.constant 0 : index
    %c0_187 = arith.constant 0 : index
    %163 = vector.load %arg5[%c0_186, %c0_187] : memref<8x3072xf32, #tpu.memory_space<vmem>>, vector<8x3072xf32>
    tpu.vector_store %arg5[%c0_186, %c0_187], %162 {strides = array<i32>} : memref<8x3072xf32, #tpu.memory_space<vmem>>, vector<8x3072xf32>,
    %c0_188 = arith.constant 0 : index
    %c0_189 = arith.constant 0 : index
    %164 = vector.load %arg5[%c0_188, %c0_189] : memref<8x3072xf32, #tpu.memory_space<vmem>>, vector<8x3072xf32>
    %c20_190 = arith.constant 20 : index
    %c0_191 = arith.constant 0 : index
    %c0_192 = arith.constant 0 : index
    %165 = vector.load %arg2[%c20_190, %c0_191, %c0_192] : memref<27x8x4xbf16, #tpu.memory_space<vmem>>, vector<1x8x4xbf16>
    %166 = vector.shape_cast %165 : vector<1x8x4xbf16> to vector<8x4xbf16>
    %c0_193 = arith.constant 0 : index
    %c0_194 = arith.constant 0 : index
    %c770 = arith.constant 770 : index
    %167 = vector.load %arg1[%c0_193, %c0_194, %c770] : memref<1x4x4224xbf16, #tpu.memory_space<vmem>>, vector<1x4x3072xbf16>
    %168 = vector.shape_cast %167 : vector<1x4x3072xbf16> to vector<4x3072xbf16>
    %cst_195 = arith.constant dense<0.000000e+00> : vector<8x3072xf32>
    %169 = tpu.matmul %166, %168, %cst_195 {dimension_numbers = #tpu.dot_dimension_numbers<[1], [0], [0], [1], [0, 0, 1, 1], [], []>} : vector<8x4xbf16>, vector<4x3072xbf16>, vector<8x3072xf32> -> vector<8x3072xf32>
    %170 = arith.addf %164, %169 : vector<8x3072xf32>
    %c0_196 = arith.constant 0 : index
    %c0_197 = arith.constant 0 : index
    %171 = vector.load %arg5[%c0_196, %c0_197] : memref<8x3072xf32, #tpu.memory_space<vmem>>, vector<8x3072xf32>
    tpu.vector_store %arg5[%c0_196, %c0_197], %170 {strides = array<i32>} : memref<8x3072xf32, #tpu.memory_space<vmem>>, vector<8x3072xf32>,
    %c0_198 = arith.constant 0 : index
    %c0_199 = arith.constant 0 : index
    %172 = vector.load %arg5[%c0_198, %c0_199] : memref<8x3072xf32, #tpu.memory_space<vmem>>, vector<8x3072xf32>
    %c21 = arith.constant 21 : index
    %c0_200 = arith.constant 0 : index
    %c0_201 = arith.constant 0 : index
    %173 = vector.load %arg2[%c21, %c0_200, %c0_201] : memref<27x8x4xbf16, #tpu.memory_space<vmem>>, vector<1x8x4xbf16>
    %174 = vector.shape_cast %173 : vector<1x8x4xbf16> to vector<8x4xbf16>
    %c0_202 = arith.constant 0 : index
    %c0_203 = arith.constant 0 : index
    %c786 = arith.constant 786 : index
    %175 = vector.load %arg1[%c0_202, %c0_203, %c786] : memref<1x4x4224xbf16, #tpu.memory_space<vmem>>, vector<1x4x3072xbf16>
    %176 = vector.shape_cast %175 : vector<1x4x3072xbf16> to vector<4x3072xbf16>
    %cst_204 = arith.constant dense<0.000000e+00> : vector<8x3072xf32>
    %177 = tpu.matmul %174, %176, %cst_204 {dimension_numbers = #tpu.dot_dimension_numbers<[1], [0], [0], [1], [0, 0, 1, 1], [], []>} : vector<8x4xbf16>, vector<4x3072xbf16>, vector<8x3072xf32> -> vector<8x3072xf32>
    %178 = arith.addf %172, %177 : vector<8x3072xf32>
    %c0_205 = arith.constant 0 : index
    %c0_206 = arith.constant 0 : index
    %179 = vector.load %arg5[%c0_205, %c0_206] : memref<8x3072xf32, #tpu.memory_space<vmem>>, vector<8x3072xf32>
    tpu.vector_store %arg5[%c0_205, %c0_206], %178 {strides = array<i32>} : memref<8x3072xf32, #tpu.memory_space<vmem>>, vector<8x3072xf32>,
    %c0_207 = arith.constant 0 : index
    %c0_208 = arith.constant 0 : index
    %180 = vector.load %arg5[%c0_207, %c0_208] : memref<8x3072xf32, #tpu.memory_space<vmem>>, vector<8x3072xf32>
    %c22 = arith.constant 22 : index
    %c0_209 = arith.constant 0 : index
    %c0_210 = arith.constant 0 : index
    %181 = vector.load %arg2[%c22, %c0_209, %c0_210] : memref<27x8x4xbf16, #tpu.memory_space<vmem>>, vector<1x8x4xbf16>
    %182 = vector.shape_cast %181 : vector<1x8x4xbf16> to vector<8x4xbf16>
    %c0_211 = arith.constant 0 : index
    %c0_212 = arith.constant 0 : index
    %c787 = arith.constant 787 : index
    %183 = vector.load %arg1[%c0_211, %c0_212, %c787] : memref<1x4x4224xbf16, #tpu.memory_space<vmem>>, vector<1x4x3072xbf16>
    %184 = vector.shape_cast %183 : vector<1x4x3072xbf16> to vector<4x3072xbf16>
    %cst_213 = arith.constant dense<0.000000e+00> : vector<8x3072xf32>
    %185 = tpu.matmul %182, %184, %cst_213 {dimension_numbers = #tpu.dot_dimension_numbers<[1], [0], [0], [1], [0, 0, 1, 1], [], []>} : vector<8x4xbf16>, vector<4x3072xbf16>, vector<8x3072xf32> -> vector<8x3072xf32>
    %186 = arith.addf %180, %185 : vector<8x3072xf32>
    %c0_214 = arith.constant 0 : index
    %c0_215 = arith.constant 0 : index
    %187 = vector.load %arg5[%c0_214, %c0_215] : memref<8x3072xf32, #tpu.memory_space<vmem>>, vector<8x3072xf32>
    tpu.vector_store %arg5[%c0_214, %c0_215], %186 {strides = array<i32>} : memref<8x3072xf32, #tpu.memory_space<vmem>>, vector<8x3072xf32>,
    %c0_216 = arith.constant 0 : index
    %c0_217 = arith.constant 0 : index
    %188 = vector.load %arg5[%c0_216, %c0_217] : memref<8x3072xf32, #tpu.memory_space<vmem>>, vector<8x3072xf32>
    %c23 = arith.constant 23 : index
    %c0_218 = arith.constant 0 : index
    %c0_219 = arith.constant 0 : index
    %189 = vector.load %arg2[%c23, %c0_218, %c0_219] : memref<27x8x4xbf16, #tpu.memory_space<vmem>>, vector<1x8x4xbf16>
    %190 = vector.shape_cast %189 : vector<1x8x4xbf16> to vector<8x4xbf16>
    %c0_220 = arith.constant 0 : index
    %c0_221 = arith.constant 0 : index
    %c788 = arith.constant 788 : index
    %191 = vector.load %arg1[%c0_220, %c0_221, %c788] : memref<1x4x4224xbf16, #tpu.memory_space<vmem>>, vector<1x4x3072xbf16>
    %192 = vector.shape_cast %191 : vector<1x4x3072xbf16> to vector<4x3072xbf16>
    %cst_222 = arith.constant dense<0.000000e+00> : vector<8x3072xf32>
    %193 = tpu.matmul %190, %192, %cst_222 {dimension_numbers = #tpu.dot_dimension_numbers<[1], [0], [0], [1], [0, 0, 1, 1], [], []>} : vector<8x4xbf16>, vector<4x3072xbf16>, vector<8x3072xf32> -> vector<8x3072xf32>
    %194 = arith.addf %188, %193 : vector<8x3072xf32>
    %c0_223 = arith.constant 0 : index
    %c0_224 = arith.constant 0 : index
    %195 = vector.load %arg5[%c0_223, %c0_224] : memref<8x3072xf32, #tpu.memory_space<vmem>>, vector<8x3072xf32>
    tpu.vector_store %arg5[%c0_223, %c0_224], %194 {strides = array<i32>} : memref<8x3072xf32, #tpu.memory_space<vmem>>, vector<8x3072xf32>,
    %c0_225 = arith.constant 0 : index
    %c0_226 = arith.constant 0 : index
    %196 = vector.load %arg5[%c0_225, %c0_226] : memref<8x3072xf32, #tpu.memory_space<vmem>>, vector<8x3072xf32>
    %c24 = arith.constant 24 : index
    %c0_227 = arith.constant 0 : index
    %c0_228 = arith.constant 0 : index
    %197 = vector.load %arg2[%c24, %c0_227, %c0_228] : memref<27x8x4xbf16, #tpu.memory_space<vmem>>, vector<1x8x4xbf16>
    %198 = vector.shape_cast %197 : vector<1x8x4xbf16> to vector<8x4xbf16>
    %c0_229 = arith.constant 0 : index
    %c0_230 = arith.constant 0 : index
    %c804 = arith.constant 804 : index
    %199 = vector.load %arg1[%c0_229, %c0_230, %c804] : memref<1x4x4224xbf16, #tpu.memory_space<vmem>>, vector<1x4x3072xbf16>
    %200 = vector.shape_cast %199 : vector<1x4x3072xbf16> to vector<4x3072xbf16>
    %cst_231 = arith.constant dense<0.000000e+00> : vector<8x3072xf32>
    %201 = tpu.matmul %198, %200, %cst_231 {dimension_numbers = #tpu.dot_dimension_numbers<[1], [0], [0], [1], [0, 0, 1, 1], [], []>} : vector<8x4xbf16>, vector<4x3072xbf16>, vector<8x3072xf32> -> vector<8x3072xf32>
    %202 = arith.addf %196, %201 : vector<8x3072xf32>
    %c0_232 = arith.constant 0 : index
    %c0_233 = arith.constant 0 : index
    %203 = vector.load %arg5[%c0_232, %c0_233] : memref<8x3072xf32, #tpu.memory_space<vmem>>, vector<8x3072xf32>
    tpu.vector_store %arg5[%c0_232, %c0_233], %202 {strides = array<i32>} : memref<8x3072xf32, #tpu.memory_space<vmem>>, vector<8x3072xf32>,
    %c0_234 = arith.constant 0 : index
    %c0_235 = arith.constant 0 : index
    %204 = vector.load %arg5[%c0_234, %c0_235] : memref<8x3072xf32, #tpu.memory_space<vmem>>, vector<8x3072xf32>
    %c25 = arith.constant 25 : index
    %c0_236 = arith.constant 0 : index
    %c0_237 = arith.constant 0 : index
    %205 = vector.load %arg2[%c25, %c0_236, %c0_237] : memref<27x8x4xbf16, #tpu.memory_space<vmem>>, vector<1x8x4xbf16>
    %206 = vector.shape_cast %205 : vector<1x8x4xbf16> to vector<8x4xbf16>
    %c0_238 = arith.constant 0 : index
    %c0_239 = arith.constant 0 : index
    %c805 = arith.constant 805 : index
    %207 = vector.load %arg1[%c0_238, %c0_239, %c805] : memref<1x4x4224xbf16, #tpu.memory_space<vmem>>, vector<1x4x3072xbf16>
    %208 = vector.shape_cast %207 : vector<1x4x3072xbf16> to vector<4x3072xbf16>
    %cst_240 = arith.constant dense<0.000000e+00> : vector<8x3072xf32>
    %209 = tpu.matmul %206, %208, %cst_240 {dimension_numbers = #tpu.dot_dimension_numbers<[1], [0], [0], [1], [0, 0, 1, 1], [], []>} : vector<8x4xbf16>, vector<4x3072xbf16>, vector<8x3072xf32> -> vector<8x3072xf32>
    %210 = arith.addf %204, %209 : vector<8x3072xf32>
    %c0_241 = arith.constant 0 : index
    %c0_242 = arith.constant 0 : index
    %211 = vector.load %arg5[%c0_241, %c0_242] : memref<8x3072xf32, #tpu.memory_space<vmem>>, vector<8x3072xf32>
    tpu.vector_store %arg5[%c0_241, %c0_242], %210 {strides = array<i32>} : memref<8x3072xf32, #tpu.memory_space<vmem>>, vector<8x3072xf32>,
    %c0_243 = arith.constant 0 : index
    %c0_244 = arith.constant 0 : index
    %212 = vector.load %arg5[%c0_243, %c0_244] : memref<8x3072xf32, #tpu.memory_space<vmem>>, vector<8x3072xf32>
    %c26 = arith.constant 26 : index
    %c0_245 = arith.constant 0 : index
    %c0_246 = arith.constant 0 : index
    %213 = vector.load %arg2[%c26, %c0_245, %c0_246] : memref<27x8x4xbf16, #tpu.memory_space<vmem>>, vector<1x8x4xbf16>
    %214 = vector.shape_cast %213 : vector<1x8x4xbf16> to vector<8x4xbf16>
    %c0_247 = arith.constant 0 : index
    %c0_248 = arith.constant 0 : index
    %c806 = arith.constant 806 : index
    %215 = vector.load %arg1[%c0_247, %c0_248, %c806] : memref<1x4x4224xbf16, #tpu.memory_space<vmem>>, vector<1x4x3072xbf16>
    %216 = vector.shape_cast %215 : vector<1x4x3072xbf16> to vector<4x3072xbf16>
    %cst_249 = arith.constant dense<0.000000e+00> : vector<8x3072xf32>
    %217 = tpu.matmul %214, %216, %cst_249 {dimension_numbers = #tpu.dot_dimension_numbers<[1], [0], [0], [1], [0, 0, 1, 1], [], []>} : vector<8x4xbf16>, vector<4x3072xbf16>, vector<8x3072xf32> -> vector<8x3072xf32>
    %218 = arith.addf %212, %217 : vector<8x3072xf32>
    %c0_250 = arith.constant 0 : index
    %c0_251 = arith.constant 0 : index
    %219 = vector.load %arg5[%c0_250, %c0_251] : memref<8x3072xf32, #tpu.memory_space<vmem>>, vector<8x3072xf32>
    tpu.vector_store %arg5[%c0_250, %c0_251], %218 {strides = array<i32>} : memref<8x3072xf32, #tpu.memory_space<vmem>>, vector<8x3072xf32>,
    %c0_252 = arith.constant 0 : index
    %c0_253 = arith.constant 0 : index
    %220 = vector.load %arg5[%c0_252, %c0_253] : memref<8x3072xf32, #tpu.memory_space<vmem>>, vector<8x384xf32>
    %221 = vector.extract_strided_slice %220 {offsets = [0, 0], sizes = [4, 384], strides = [1, 1]} : vector<8x384xf32> to vector<4x384xf32>
    %222 = math.tanh %221 : vector<4x384xf32>
    %c0_254 = arith.constant 0 : index
    %c0_255 = arith.constant 0 : index
    %c0_256 = arith.constant 0 : index
    %223 = vector.load %arg6[%c0_254, %c0_255, %c0_256] : memref<8x4x384xf32, #tpu.memory_space<vmem>>, vector<1x4x384xf32>
    %224 = vector.shape_cast %223 : vector<1x4x384xf32> to vector<4x384xf32>
    %225 = vector.shape_cast %222 : vector<4x384xf32> to vector<1x4x384xf32>
    tpu.vector_store %arg6[%c0_254, %c0_255, %c0_256], %225 {strides = array<i32>} : memref<8x4x384xf32, #tpu.memory_space<vmem>>, vector<1x4x384xf32>,
    %226 = vector.extract_strided_slice %220 {offsets = [4, 0], sizes = [4, 384], strides = [1, 1]} : vector<8x384xf32> to vector<4x384xf32>
    %227 = arith.negf %226 : vector<4x384xf32>
    %228 = math.exp %227 : vector<4x384xf32>
    %cst_257 = arith.constant 1.000000e+00 : f32
    %229 = vector.broadcast %cst_257 : f32 to vector<4x384xf32>
    %230 = arith.addf %229, %228 : vector<4x384xf32>
    %231 = arith.divf %229, %230 : vector<4x384xf32>
    %c0_258 = arith.constant 0 : index
    %c0_259 = arith.constant 0 : index
    %c0_260 = arith.constant 0 : index
    %232 = vector.load %arg7[%c0_258, %c0_259, %c0_260] : memref<8x4x384xf32, #tpu.memory_space<vmem>>, vector<1x4x384xf32>
    %233 = vector.shape_cast %232 : vector<1x4x384xf32> to vector<4x384xf32>
    %234 = vector.shape_cast %231 : vector<4x384xf32> to vector<1x4x384xf32>
    tpu.vector_store %arg7[%c0_258, %c0_259, %c0_260], %234 {strides = array<i32>} : memref<8x4x384xf32, #tpu.memory_space<vmem>>, vector<1x4x384xf32>,
    %c0_261 = arith.constant 0 : index
    %c384_262 = arith.constant 384 : index
    %235 = vector.load %arg5[%c0_261, %c384_262] : memref<8x3072xf32, #tpu.memory_space<vmem>>, vector<8x384xf32>
    %236 = vector.extract_strided_slice %235 {offsets = [0, 0], sizes = [4, 384], strides = [1, 1]} : vector<8x384xf32> to vector<4x384xf32>
    %237 = math.tanh %236 : vector<4x384xf32>
    %c1_263 = arith.constant 1 : index
    %c0_264 = arith.constant 0 : index
    %c0_265 = arith.constant 0 : index
    %238 = vector.load %arg6[%c1_263, %c0_264, %c0_265] : memref<8x4x384xf32, #tpu.memory_space<vmem>>, vector<1x4x384xf32>
    %239 = vector.shape_cast %238 : vector<1x4x384xf32> to vector<4x384xf32>
    %240 = vector.shape_cast %237 : vector<4x384xf32> to vector<1x4x384xf32>
    tpu.vector_store %arg6[%c1_263, %c0_264, %c0_265], %240 {strides = array<i32>} : memref<8x4x384xf32, #tpu.memory_space<vmem>>, vector<1x4x384xf32>,
    %241 = vector.extract_strided_slice %235 {offsets = [4, 0], sizes = [4, 384], strides = [1, 1]} : vector<8x384xf32> to vector<4x384xf32>
    %242 = arith.negf %241 : vector<4x384xf32>
    %243 = math.exp %242 : vector<4x384xf32>
    %cst_266 = arith.constant 1.000000e+00 : f32
    %244 = vector.broadcast %cst_266 : f32 to vector<4x384xf32>
    %245 = arith.addf %244, %243 : vector<4x384xf32>
    %246 = arith.divf %244, %245 : vector<4x384xf32>
    %c1_267 = arith.constant 1 : index
    %c0_268 = arith.constant 0 : index
    %c0_269 = arith.constant 0 : index
    %247 = vector.load %arg7[%c1_267, %c0_268, %c0_269] : memref<8x4x384xf32, #tpu.memory_space<vmem>>, vector<1x4x384xf32>
    %248 = vector.shape_cast %247 : vector<1x4x384xf32> to vector<4x384xf32>
    %249 = vector.shape_cast %246 : vector<4x384xf32> to vector<1x4x384xf32>
    tpu.vector_store %arg7[%c1_267, %c0_268, %c0_269], %249 {strides = array<i32>} : memref<8x4x384xf32, #tpu.memory_space<vmem>>, vector<1x4x384xf32>,
    %c0_270 = arith.constant 0 : index
    %c768_271 = arith.constant 768 : index
    %250 = vector.load %arg5[%c0_270, %c768_271] : memref<8x3072xf32, #tpu.memory_space<vmem>>, vector<8x384xf32>
    %251 = vector.extract_strided_slice %250 {offsets = [0, 0], sizes = [4, 384], strides = [1, 1]} : vector<8x384xf32> to vector<4x384xf32>
    %252 = math.tanh %251 : vector<4x384xf32>
    %c2_272 = arith.constant 2 : index
    %c0_273 = arith.constant 0 : index
    %c0_274 = arith.constant 0 : index
    %253 = vector.load %arg6[%c2_272, %c0_273, %c0_274] : memref<8x4x384xf32, #tpu.memory_space<vmem>>, vector<1x4x384xf32>
    %254 = vector.shape_cast %253 : vector<1x4x384xf32> to vector<4x384xf32>
    %255 = vector.shape_cast %252 : vector<4x384xf32> to vector<1x4x384xf32>
    tpu.vector_store %arg6[%c2_272, %c0_273, %c0_274], %255 {strides = array<i32>} : memref<8x4x384xf32, #tpu.memory_space<vmem>>, vector<1x4x384xf32>,
    %256 = vector.extract_strided_slice %250 {offsets = [4, 0], sizes = [4, 384], strides = [1, 1]} : vector<8x384xf32> to vector<4x384xf32>
    %257 = arith.negf %256 : vector<4x384xf32>
    %258 = math.exp %257 : vector<4x384xf32>
    %cst_275 = arith.constant 1.000000e+00 : f32
    %259 = vector.broadcast %cst_275 : f32 to vector<4x384xf32>
    %260 = arith.addf %259, %258 : vector<4x384xf32>
    %261 = arith.divf %259, %260 : vector<4x384xf32>
    %c2_276 = arith.constant 2 : index
    %c0_277 = arith.constant 0 : index
    %c0_278 = arith.constant 0 : index
    %262 = vector.load %arg7[%c2_276, %c0_277, %c0_278] : memref<8x4x384xf32, #tpu.memory_space<vmem>>, vector<1x4x384xf32>
    %263 = vector.shape_cast %262 : vector<1x4x384xf32> to vector<4x384xf32>
    %264 = vector.shape_cast %261 : vector<4x384xf32> to vector<1x4x384xf32>
    tpu.vector_store %arg7[%c2_276, %c0_277, %c0_278], %264 {strides = array<i32>} : memref<8x4x384xf32, #tpu.memory_space<vmem>>, vector<1x4x384xf32>,
    %c0_279 = arith.constant 0 : index
    %c1152 = arith.constant 1152 : index
    %265 = vector.load %arg5[%c0_279, %c1152] : memref<8x3072xf32, #tpu.memory_space<vmem>>, vector<8x384xf32>
    %266 = vector.extract_strided_slice %265 {offsets = [0, 0], sizes = [4, 384], strides = [1, 1]} : vector<8x384xf32> to vector<4x384xf32>
    %267 = math.tanh %266 : vector<4x384xf32>
    %c3_280 = arith.constant 3 : index
    %c0_281 = arith.constant 0 : index
    %c0_282 = arith.constant 0 : index
    %268 = vector.load %arg6[%c3_280, %c0_281, %c0_282] : memref<8x4x384xf32, #tpu.memory_space<vmem>>, vector<1x4x384xf32>
    %269 = vector.shape_cast %268 : vector<1x4x384xf32> to vector<4x384xf32>
    %270 = vector.shape_cast %267 : vector<4x384xf32> to vector<1x4x384xf32>
    tpu.vector_store %arg6[%c3_280, %c0_281, %c0_282], %270 {strides = array<i32>} : memref<8x4x384xf32, #tpu.memory_space<vmem>>, vector<1x4x384xf32>,
    %271 = vector.extract_strided_slice %265 {offsets = [4, 0], sizes = [4, 384], strides = [1, 1]} : vector<8x384xf32> to vector<4x384xf32>
    %272 = arith.negf %271 : vector<4x384xf32>
    %273 = math.exp %272 : vector<4x384xf32>
    %cst_283 = arith.constant 1.000000e+00 : f32
    %274 = vector.broadcast %cst_283 : f32 to vector<4x384xf32>
    %275 = arith.addf %274, %273 : vector<4x384xf32>
    %276 = arith.divf %274, %275 : vector<4x384xf32>
    %c3_284 = arith.constant 3 : index
    %c0_285 = arith.constant 0 : index
    %c0_286 = arith.constant 0 : index
    %277 = vector.load %arg7[%c3_284, %c0_285, %c0_286] : memref<8x4x384xf32, #tpu.memory_space<vmem>>, vector<1x4x384xf32>
    %278 = vector.shape_cast %277 : vector<1x4x384xf32> to vector<4x384xf32>
    %279 = vector.shape_cast %276 : vector<4x384xf32> to vector<1x4x384xf32>
    tpu.vector_store %arg7[%c3_284, %c0_285, %c0_286], %279 {strides = array<i32>} : memref<8x4x384xf32, #tpu.memory_space<vmem>>, vector<1x4x384xf32>,
    %c0_287 = arith.constant 0 : index
    %c1536 = arith.constant 1536 : index
    %280 = vector.load %arg5[%c0_287, %c1536] : memref<8x3072xf32, #tpu.memory_space<vmem>>, vector<8x384xf32>
    %281 = vector.extract_strided_slice %280 {offsets = [0, 0], sizes = [4, 384], strides = [1, 1]} : vector<8x384xf32> to vector<4x384xf32>
    %282 = math.tanh %281 : vector<4x384xf32>
    %c4_288 = arith.constant 4 : index
    %c0_289 = arith.constant 0 : index
    %c0_290 = arith.constant 0 : index
    %283 = vector.load %arg6[%c4_288, %c0_289, %c0_290] : memref<8x4x384xf32, #tpu.memory_space<vmem>>, vector<1x4x384xf32>
    %284 = vector.shape_cast %283 : vector<1x4x384xf32> to vector<4x384xf32>
    %285 = vector.shape_cast %282 : vector<4x384xf32> to vector<1x4x384xf32>
    tpu.vector_store %arg6[%c4_288, %c0_289, %c0_290], %285 {strides = array<i32>} : memref<8x4x384xf32, #tpu.memory_space<vmem>>, vector<1x4x384xf32>,
    %286 = vector.extract_strided_slice %280 {offsets = [4, 0], sizes = [4, 384], strides = [1, 1]} : vector<8x384xf32> to vector<4x384xf32>
    %287 = arith.negf %286 : vector<4x384xf32>
    %288 = math.exp %287 : vector<4x384xf32>
    %cst_291 = arith.constant 1.000000e+00 : f32
    %289 = vector.broadcast %cst_291 : f32 to vector<4x384xf32>
    %290 = arith.addf %289, %288 : vector<4x384xf32>
    %291 = arith.divf %289, %290 : vector<4x384xf32>
    %c4_292 = arith.constant 4 : index
    %c0_293 = arith.constant 0 : index
    %c0_294 = arith.constant 0 : index
    %292 = vector.load %arg7[%c4_292, %c0_293, %c0_294] : memref<8x4x384xf32, #tpu.memory_space<vmem>>, vector<1x4x384xf32>
    %293 = vector.shape_cast %292 : vector<1x4x384xf32> to vector<4x384xf32>
    %294 = vector.shape_cast %291 : vector<4x384xf32> to vector<1x4x384xf32>
    tpu.vector_store %arg7[%c4_292, %c0_293, %c0_294], %294 {strides = array<i32>} : memref<8x4x384xf32, #tpu.memory_space<vmem>>, vector<1x4x384xf32>,
    %c0_295 = arith.constant 0 : index
    %c1920 = arith.constant 1920 : index
    %295 = vector.load %arg5[%c0_295, %c1920] : memref<8x3072xf32, #tpu.memory_space<vmem>>, vector<8x384xf32>
    %296 = vector.extract_strided_slice %295 {offsets = [0, 0], sizes = [4, 384], strides = [1, 1]} : vector<8x384xf32> to vector<4x384xf32>
    %297 = math.tanh %296 : vector<4x384xf32>
    %c5_296 = arith.constant 5 : index
    %c0_297 = arith.constant 0 : index
    %c0_298 = arith.constant 0 : index
    %298 = vector.load %arg6[%c5_296, %c0_297, %c0_298] : memref<8x4x384xf32, #tpu.memory_space<vmem>>, vector<1x4x384xf32>
    %299 = vector.shape_cast %298 : vector<1x4x384xf32> to vector<4x384xf32>
    %300 = vector.shape_cast %297 : vector<4x384xf32> to vector<1x4x384xf32>
    tpu.vector_store %arg6[%c5_296, %c0_297, %c0_298], %300 {strides = array<i32>} : memref<8x4x384xf32, #tpu.memory_space<vmem>>, vector<1x4x384xf32>,
    %301 = vector.extract_strided_slice %295 {offsets = [4, 0], sizes = [4, 384], strides = [1, 1]} : vector<8x384xf32> to vector<4x384xf32>
    %302 = arith.negf %301 : vector<4x384xf32>
    %303 = math.exp %302 : vector<4x384xf32>
    %cst_299 = arith.constant 1.000000e+00 : f32
    %304 = vector.broadcast %cst_299 : f32 to vector<4x384xf32>
    %305 = arith.addf %304, %303 : vector<4x384xf32>
    %306 = arith.divf %304, %305 : vector<4x384xf32>
    %c5_300 = arith.constant 5 : index
    %c0_301 = arith.constant 0 : index
    %c0_302 = arith.constant 0 : index
    %307 = vector.load %arg7[%c5_300, %c0_301, %c0_302] : memref<8x4x384xf32, #tpu.memory_space<vmem>>, vector<1x4x384xf32>
    %308 = vector.shape_cast %307 : vector<1x4x384xf32> to vector<4x384xf32>
    %309 = vector.shape_cast %306 : vector<4x384xf32> to vector<1x4x384xf32>
    tpu.vector_store %arg7[%c5_300, %c0_301, %c0_302], %309 {strides = array<i32>} : memref<8x4x384xf32, #tpu.memory_space<vmem>>, vector<1x4x384xf32>,
    %c0_303 = arith.constant 0 : index
    %c2304 = arith.constant 2304 : index
    %310 = vector.load %arg5[%c0_303, %c2304] : memref<8x3072xf32, #tpu.memory_space<vmem>>, vector<8x384xf32>
    %311 = vector.extract_strided_slice %310 {offsets = [0, 0], sizes = [4, 384], strides = [1, 1]} : vector<8x384xf32> to vector<4x384xf32>
    %312 = math.tanh %311 : vector<4x384xf32>
    %c6_304 = arith.constant 6 : index
    %c0_305 = arith.constant 0 : index
    %c0_306 = arith.constant 0 : index
    %313 = vector.load %arg6[%c6_304, %c0_305, %c0_306] : memref<8x4x384xf32, #tpu.memory_space<vmem>>, vector<1x4x384xf32>
    %314 = vector.shape_cast %313 : vector<1x4x384xf32> to vector<4x384xf32>
    %315 = vector.shape_cast %312 : vector<4x384xf32> to vector<1x4x384xf32>
    tpu.vector_store %arg6[%c6_304, %c0_305, %c0_306], %315 {strides = array<i32>} : memref<8x4x384xf32, #tpu.memory_space<vmem>>, vector<1x4x384xf32>,
    %316 = vector.extract_strided_slice %310 {offsets = [4, 0], sizes = [4, 384], strides = [1, 1]} : vector<8x384xf32> to vector<4x384xf32>
    %317 = arith.negf %316 : vector<4x384xf32>
    %318 = math.exp %317 : vector<4x384xf32>
    %cst_307 = arith.constant 1.000000e+00 : f32
    %319 = vector.broadcast %cst_307 : f32 to vector<4x384xf32>
    %320 = arith.addf %319, %318 : vector<4x384xf32>
    %321 = arith.divf %319, %320 : vector<4x384xf32>
    %c6_308 = arith.constant 6 : index
    %c0_309 = arith.constant 0 : index
    %c0_310 = arith.constant 0 : index
    %322 = vector.load %arg7[%c6_308, %c0_309, %c0_310] : memref<8x4x384xf32, #tpu.memory_space<vmem>>, vector<1x4x384xf32>
    %323 = vector.shape_cast %322 : vector<1x4x384xf32> to vector<4x384xf32>
    %324 = vector.shape_cast %321 : vector<4x384xf32> to vector<1x4x384xf32>
    tpu.vector_store %arg7[%c6_308, %c0_309, %c0_310], %324 {strides = array<i32>} : memref<8x4x384xf32, #tpu.memory_space<vmem>>, vector<1x4x384xf32>,
    %c0_311 = arith.constant 0 : index
    %c2688 = arith.constant 2688 : index
    %325 = vector.load %arg5[%c0_311, %c2688] : memref<8x3072xf32, #tpu.memory_space<vmem>>, vector<8x384xf32>
    %326 = vector.extract_strided_slice %325 {offsets = [0, 0], sizes = [4, 384], strides = [1, 1]} : vector<8x384xf32> to vector<4x384xf32>
    %327 = math.tanh %326 : vector<4x384xf32>
    %c7_312 = arith.constant 7 : index
    %c0_313 = arith.constant 0 : index
    %c0_314 = arith.constant 0 : index
    %328 = vector.load %arg6[%c7_312, %c0_313, %c0_314] : memref<8x4x384xf32, #tpu.memory_space<vmem>>, vector<1x4x384xf32>
    %329 = vector.shape_cast %328 : vector<1x4x384xf32> to vector<4x384xf32>
    %330 = vector.shape_cast %327 : vector<4x384xf32> to vector<1x4x384xf32>
    tpu.vector_store %arg6[%c7_312, %c0_313, %c0_314], %330 {strides = array<i32>} : memref<8x4x384xf32, #tpu.memory_space<vmem>>, vector<1x4x384xf32>,
    %331 = vector.extract_strided_slice %325 {offsets = [4, 0], sizes = [4, 384], strides = [1, 1]} : vector<8x384xf32> to vector<4x384xf32>
    %332 = arith.negf %331 : vector<4x384xf32>
    %333 = math.exp %332 : vector<4x384xf32>
    %cst_315 = arith.constant 1.000000e+00 : f32
    %334 = vector.broadcast %cst_315 : f32 to vector<4x384xf32>
    %335 = arith.addf %334, %333 : vector<4x384xf32>
    %336 = arith.divf %334, %335 : vector<4x384xf32>
    %c7_316 = arith.constant 7 : index
    %c0_317 = arith.constant 0 : index
    %c0_318 = arith.constant 0 : index
    %337 = vector.load %arg7[%c7_316, %c0_317, %c0_318] : memref<8x4x384xf32, #tpu.memory_space<vmem>>, vector<1x4x384xf32>
    %338 = vector.shape_cast %337 : vector<1x4x384xf32> to vector<4x384xf32>
    %339 = vector.shape_cast %336 : vector<4x384xf32> to vector<1x4x384xf32>
    tpu.vector_store %arg7[%c7_316, %c0_317, %c0_318], %339 {strides = array<i32>} : memref<8x4x384xf32, #tpu.memory_space<vmem>>, vector<1x4x384xf32>,
    %cst_319 = arith.constant 0.000000e+00 : f32
    %340 = vector.broadcast %cst_319 : f32 to vector<4x384xf32>
    %c0_i32 = arith.constant 0 : i32
    %341 = arith.index_cast %c0_i32 : i32 to index
    %c0_320 = arith.constant 0 : index
    %c0_321 = arith.constant 0 : index
    %342 = vector.load %arg6[%341, %c0_320, %c0_321] : memref<8x4x384xf32, #tpu.memory_space<vmem>>, vector<1x4x384xf32>
    %343 = vector.shape_cast %342 : vector<1x4x384xf32> to vector<4x384xf32>
    %344 = arith.index_cast %c0_i32 : i32 to index
    %c0_322 = arith.constant 0 : index
    %c0_323 = arith.constant 0 : index
    %345 = vector.load %arg7[%344, %c0_322, %c0_323] : memref<8x4x384xf32, #tpu.memory_space<vmem>>, vector<1x4x384xf32>
    %346 = vector.shape_cast %345 : vector<1x4x384xf32> to vector<4x384xf32>
    %347 = arith.subf %340, %343 : vector<4x384xf32>
    %348 = arith.mulf %346, %347 : vector<4x384xf32>
    %349 = arith.addf %343, %348 : vector<4x384xf32>
    %c0_324 = arith.constant 0 : index
    %350 = arith.index_cast %c0_i32 : i32 to index
    %c0_325 = arith.constant 0 : index
    %c0_326 = arith.constant 0 : index
    %351 = vector.load %arg4[%c0_324, %350, %c0_325, %c0_326] : memref<1x8x4x384xf32, #tpu.memory_space<vmem>>, vector<1x1x4x384xf32>
    %352 = vector.shape_cast %351 : vector<1x1x4x384xf32> to vector<4x384xf32>
    %353 = vector.shape_cast %349 : vector<4x384xf32> to vector<1x1x4x384xf32>
    tpu.vector_store %arg4[%c0_324, %350, %c0_325, %c0_326], %353 {strides = array<i32>} : memref<1x8x4x384xf32, #tpu.memory_space<vmem>>, vector<1x1x4x384xf32>,
    %c1_i32 = arith.constant 1 : i32
    %354 = arith.index_cast %c1_i32 : i32 to index
    %c0_327 = arith.constant 0 : index
    %c0_328 = arith.constant 0 : index
    %355 = vector.load %arg6[%354, %c0_327, %c0_328] : memref<8x4x384xf32, #tpu.memory_space<vmem>>, vector<1x4x384xf32>
    %356 = vector.shape_cast %355 : vector<1x4x384xf32> to vector<4x384xf32>
    %357 = arith.index_cast %c1_i32 : i32 to index
    %c0_329 = arith.constant 0 : index
    %c0_330 = arith.constant 0 : index
    %358 = vector.load %arg7[%357, %c0_329, %c0_330] : memref<8x4x384xf32, #tpu.memory_space<vmem>>, vector<1x4x384xf32>
    %359 = vector.shape_cast %358 : vector<1x4x384xf32> to vector<4x384xf32>
    %360 = arith.subf %349, %356 : vector<4x384xf32>
    %361 = arith.mulf %359, %360 : vector<4x384xf32>
    %362 = arith.addf %356, %361 : vector<4x384xf32>
    %c0_331 = arith.constant 0 : index
    %363 = arith.index_cast %c1_i32 : i32 to index
    %c0_332 = arith.constant 0 : index
    %c0_333 = arith.constant 0 : index
    %364 = vector.load %arg4[%c0_331, %363, %c0_332, %c0_333] : memref<1x8x4x384xf32, #tpu.memory_space<vmem>>, vector<1x1x4x384xf32>
    %365 = vector.shape_cast %364 : vector<1x1x4x384xf32> to vector<4x384xf32>
    %366 = vector.shape_cast %362 : vector<4x384xf32> to vector<1x1x4x384xf32>
    tpu.vector_store %arg4[%c0_331, %363, %c0_332, %c0_333], %366 {strides = array<i32>} : memref<1x8x4x384xf32, #tpu.memory_space<vmem>>, vector<1x1x4x384xf32>,
    %c2_i32 = arith.constant 2 : i32
    %367 = arith.index_cast %c2_i32 : i32 to index
    %c0_334 = arith.constant 0 : index
    %c0_335 = arith.constant 0 : index
    %368 = vector.load %arg6[%367, %c0_334, %c0_335] : memref<8x4x384xf32, #tpu.memory_space<vmem>>, vector<1x4x384xf32>
    %369 = vector.shape_cast %368 : vector<1x4x384xf32> to vector<4x384xf32>
    %370 = arith.index_cast %c2_i32 : i32 to index
    %c0_336 = arith.constant 0 : index
    %c0_337 = arith.constant 0 : index
    %371 = vector.load %arg7[%370, %c0_336, %c0_337] : memref<8x4x384xf32, #tpu.memory_space<vmem>>, vector<1x4x384xf32>
    %372 = vector.shape_cast %371 : vector<1x4x384xf32> to vector<4x384xf32>
    %373 = arith.subf %362, %369 : vector<4x384xf32>
    %374 = arith.mulf %372, %373 : vector<4x384xf32>
    %375 = arith.addf %369, %374 : vector<4x384xf32>
    %c0_338 = arith.constant 0 : index
    %376 = arith.index_cast %c2_i32 : i32 to index
    %c0_339 = arith.constant 0 : index
    %c0_340 = arith.constant 0 : index
    %377 = vector.load %arg4[%c0_338, %376, %c0_339, %c0_340] : memref<1x8x4x384xf32, #tpu.memory_space<vmem>>, vector<1x1x4x384xf32>
    %378 = vector.shape_cast %377 : vector<1x1x4x384xf32> to vector<4x384xf32>
    %379 = vector.shape_cast %375 : vector<4x384xf32> to vector<1x1x4x384xf32>
    tpu.vector_store %arg4[%c0_338, %376, %c0_339, %c0_340], %379 {strides = array<i32>} : memref<1x8x4x384xf32, #tpu.memory_space<vmem>>, vector<1x1x4x384xf32>,
    %c3_i32 = arith.constant 3 : i32
    %380 = arith.index_cast %c3_i32 : i32 to index
    %c0_341 = arith.constant 0 : index
    %c0_342 = arith.constant 0 : index
    %381 = vector.load %arg6[%380, %c0_341, %c0_342] : memref<8x4x384xf32, #tpu.memory_space<vmem>>, vector<1x4x384xf32>
    %382 = vector.shape_cast %381 : vector<1x4x384xf32> to vector<4x384xf32>
    %383 = arith.index_cast %c3_i32 : i32 to index
    %c0_343 = arith.constant 0 : index
    %c0_344 = arith.constant 0 : index
    %384 = vector.load %arg7[%383, %c0_343, %c0_344] : memref<8x4x384xf32, #tpu.memory_space<vmem>>, vector<1x4x384xf32>
    %385 = vector.shape_cast %384 : vector<1x4x384xf32> to vector<4x384xf32>
    %386 = arith.subf %375, %382 : vector<4x384xf32>
    %387 = arith.mulf %385, %386 : vector<4x384xf32>
    %388 = arith.addf %382, %387 : vector<4x384xf32>
    %c0_345 = arith.constant 0 : index
    %389 = arith.index_cast %c3_i32 : i32 to index
    %c0_346 = arith.constant 0 : index
    %c0_347 = arith.constant 0 : index
    %390 = vector.load %arg4[%c0_345, %389, %c0_346, %c0_347] : memref<1x8x4x384xf32, #tpu.memory_space<vmem>>, vector<1x1x4x384xf32>
    %391 = vector.shape_cast %390 : vector<1x1x4x384xf32> to vector<4x384xf32>
    %392 = vector.shape_cast %388 : vector<4x384xf32> to vector<1x1x4x384xf32>
    tpu.vector_store %arg4[%c0_345, %389, %c0_346, %c0_347], %392 {strides = array<i32>} : memref<1x8x4x384xf32, #tpu.memory_space<vmem>>, vector<1x1x4x384xf32>,
    %c4_i32 = arith.constant 4 : i32
    %393 = arith.index_cast %c4_i32 : i32 to index
    %c0_348 = arith.constant 0 : index
    %c0_349 = arith.constant 0 : index
    %394 = vector.load %arg6[%393, %c0_348, %c0_349] : memref<8x4x384xf32, #tpu.memory_space<vmem>>, vector<1x4x384xf32>
    %395 = vector.shape_cast %394 : vector<1x4x384xf32> to vector<4x384xf32>
    %396 = arith.index_cast %c4_i32 : i32 to index
    %c0_350 = arith.constant 0 : index
    %c0_351 = arith.constant 0 : index
    %397 = vector.load %arg7[%396, %c0_350, %c0_351] : memref<8x4x384xf32, #tpu.memory_space<vmem>>, vector<1x4x384xf32>
    %398 = vector.shape_cast %397 : vector<1x4x384xf32> to vector<4x384xf32>
    %399 = arith.subf %388, %395 : vector<4x384xf32>
    %400 = arith.mulf %398, %399 : vector<4x384xf32>
    %401 = arith.addf %395, %400 : vector<4x384xf32>
    %c0_352 = arith.constant 0 : index
    %402 = arith.index_cast %c4_i32 : i32 to index
    %c0_353 = arith.constant 0 : index
    %c0_354 = arith.constant 0 : index
    %403 = vector.load %arg4[%c0_352, %402, %c0_353, %c0_354] : memref<1x8x4x384xf32, #tpu.memory_space<vmem>>, vector<1x1x4x384xf32>
    %404 = vector.shape_cast %403 : vector<1x1x4x384xf32> to vector<4x384xf32>
    %405 = vector.shape_cast %401 : vector<4x384xf32> to vector<1x1x4x384xf32>
    tpu.vector_store %arg4[%c0_352, %402, %c0_353, %c0_354], %405 {strides = array<i32>} : memref<1x8x4x384xf32, #tpu.memory_space<vmem>>, vector<1x1x4x384xf32>,
    %c5_i32 = arith.constant 5 : i32
    %406 = arith.index_cast %c5_i32 : i32 to index
    %c0_355 = arith.constant 0 : index
    %c0_356 = arith.constant 0 : index
    %407 = vector.load %arg6[%406, %c0_355, %c0_356] : memref<8x4x384xf32, #tpu.memory_space<vmem>>, vector<1x4x384xf32>
    %408 = vector.shape_cast %407 : vector<1x4x384xf32> to vector<4x384xf32>
    %409 = arith.index_cast %c5_i32 : i32 to index
    %c0_357 = arith.constant 0 : index
    %c0_358 = arith.constant 0 : index
    %410 = vector.load %arg7[%409, %c0_357, %c0_358] : memref<8x4x384xf32, #tpu.memory_space<vmem>>, vector<1x4x384xf32>
    %411 = vector.shape_cast %410 : vector<1x4x384xf32> to vector<4x384xf32>
    %412 = arith.subf %401, %408 : vector<4x384xf32>
    %413 = arith.mulf %411, %412 : vector<4x384xf32>
    %414 = arith.addf %408, %413 : vector<4x384xf32>
    %c0_359 = arith.constant 0 : index
    %415 = arith.index_cast %c5_i32 : i32 to index
    %c0_360 = arith.constant 0 : index
    %c0_361 = arith.constant 0 : index
    %416 = vector.load %arg4[%c0_359, %415, %c0_360, %c0_361] : memref<1x8x4x384xf32, #tpu.memory_space<vmem>>, vector<1x1x4x384xf32>
    %417 = vector.shape_cast %416 : vector<1x1x4x384xf32> to vector<4x384xf32>
    %418 = vector.shape_cast %414 : vector<4x384xf32> to vector<1x1x4x384xf32>
    tpu.vector_store %arg4[%c0_359, %415, %c0_360, %c0_361], %418 {strides = array<i32>} : memref<1x8x4x384xf32, #tpu.memory_space<vmem>>, vector<1x1x4x384xf32>,
    %c6_i32 = arith.constant 6 : i32
    %419 = arith.index_cast %c6_i32 : i32 to index
    %c0_362 = arith.constant 0 : index
    %c0_363 = arith.constant 0 : index
    %420 = vector.load %arg6[%419, %c0_362, %c0_363] : memref<8x4x384xf32, #tpu.memory_space<vmem>>, vector<1x4x384xf32>
    %421 = vector.shape_cast %420 : vector<1x4x384xf32> to vector<4x384xf32>
    %422 = arith.index_cast %c6_i32 : i32 to index
    %c0_364 = arith.constant 0 : index
    %c0_365 = arith.constant 0 : index
    %423 = vector.load %arg7[%422, %c0_364, %c0_365] : memref<8x4x384xf32, #tpu.memory_space<vmem>>, vector<1x4x384xf32>
    %424 = vector.shape_cast %423 : vector<1x4x384xf32> to vector<4x384xf32>
    %425 = arith.subf %414, %421 : vector<4x384xf32>
    %426 = arith.mulf %424, %425 : vector<4x384xf32>
    %427 = arith.addf %421, %426 : vector<4x384xf32>
    %c0_366 = arith.constant 0 : index
    %428 = arith.index_cast %c6_i32 : i32 to index
    %c0_367 = arith.constant 0 : index
    %c0_368 = arith.constant 0 : index
    %429 = vector.load %arg4[%c0_366, %428, %c0_367, %c0_368] : memref<1x8x4x384xf32, #tpu.memory_space<vmem>>, vector<1x1x4x384xf32>
    %430 = vector.shape_cast %429 : vector<1x1x4x384xf32> to vector<4x384xf32>
    %431 = vector.shape_cast %427 : vector<4x384xf32> to vector<1x1x4x384xf32>
    tpu.vector_store %arg4[%c0_366, %428, %c0_367, %c0_368], %431 {strides = array<i32>} : memref<1x8x4x384xf32, #tpu.memory_space<vmem>>, vector<1x1x4x384xf32>,
    %c7_i32 = arith.constant 7 : i32
    %432 = arith.index_cast %c7_i32 : i32 to index
    %c0_369 = arith.constant 0 : index
    %c0_370 = arith.constant 0 : index
    %433 = vector.load %arg6[%432, %c0_369, %c0_370] : memref<8x4x384xf32, #tpu.memory_space<vmem>>, vector<1x4x384xf32>
    %434 = vector.shape_cast %433 : vector<1x4x384xf32> to vector<4x384xf32>
    %435 = arith.index_cast %c7_i32 : i32 to index
    %c0_371 = arith.constant 0 : index
    %c0_372 = arith.constant 0 : index
    %436 = vector.load %arg7[%435, %c0_371, %c0_372] : memref<8x4x384xf32, #tpu.memory_space<vmem>>, vector<1x4x384xf32>
    %437 = vector.shape_cast %436 : vector<1x4x384xf32> to vector<4x384xf32>
    %438 = arith.subf %427, %434 : vector<4x384xf32>
    %439 = arith.mulf %437, %438 : vector<4x384xf32>
    %440 = arith.addf %434, %439 : vector<4x384xf32>
    %c0_373 = arith.constant 0 : index
    %441 = arith.index_cast %c7_i32 : i32 to index
    %c0_374 = arith.constant 0 : index
    %c0_375 = arith.constant 0 : index
    %442 = vector.load %arg4[%c0_373, %441, %c0_374, %c0_375] : memref<1x8x4x384xf32, #tpu.memory_space<vmem>>, vector<1x1x4x384xf32>
    %443 = vector.shape_cast %442 : vector<1x1x4x384xf32> to vector<4x384xf32>
    %444 = vector.shape_cast %440 : vector<4x384xf32> to vector<1x1x4x384xf32>
    tpu.vector_store %arg4[%c0_373, %441, %c0_374, %c0_375], %444 {strides = array<i32>} : memref<1x8x4x384xf32, #tpu.memory_space<vmem>>, vector<1x1x4x384xf32>,
    %c8_i32 = arith.constant 8 : i32
    return
  }
  func.func @transform_0(%arg0: i32) -> (i32, i32, i32) {
    %c0_i32 = arith.constant 0 : i32
    %c0_i32_0 = arith.constant 0 : i32
    %c0_i32_1 = arith.constant 0 : i32
    return %arg0, %c0_i32, %c0_i32_0 : i32, i32, i32
  }
  func.func @transform_1(%arg0: i32) -> (i32, i32, i32) {
    %c0_i32 = arith.constant 0 : i32
    %c0_i32_0 = arith.constant 0 : i32
    %c0_i32_1 = arith.constant 0 : i32
    %c0_i32_2 = arith.constant 0 : i32
    return %c0_i32, %c0_i32_0, %c0_i32_1 : i32, i32, i32
  }
  func.func @transform_2(%arg0: i32) -> (i32, i32) {
    %c0_i32 = arith.constant 0 : i32
    %c0_i32_0 = arith.constant 0 : i32
    %c0_i32_1 = arith.constant 0 : i32
    return %c0_i32, %c0_i32_0 : i32, i32
  }
  func.func @transform_3(%arg0: i32) -> (i32, i32, i32, i32) {
    %c0_i32 = arith.constant 0 : i32
    %c0_i32_0 = arith.constant 0 : i32
    %c0_i32_1 = arith.constant 0 : i32
    %c0_i32_2 = arith.constant 0 : i32
    return %arg0, %c0_i32, %c0_i32_0, %c0_i32_1 : i32, i32, i32, i32
  }
}

</mosaic_0001>

<bundles_post_ra>
// kernel: tpu_custom_call.1
= control target key start
LH: loop header
LB: loop body
LE: loop exit
PB: predicated region body
PF: predicated region fallthrough
CT: control target
= control target key end

     0   :  { %8 = vsyncpa [#allocation6], 0  ;;  %s31421_s0 = inlined_call_operand.vmem [shape: bf16[2,4,4224], index: 0, kind: input, shape index: {}]   ;;  %s31422_s1 = inlined_call_operand.vmem [shape: bf16[27,8,4], index: 1, kind: input, shape index: {}]   ;;  %s31423_s2 = inlined_call_operand.vmem [shape: f32[8,1], index: 2, kind: input, shape index: {}]   ;;  %s31424_s3 = inlined_call_operand.hbm [shape: f32[2,8,4,384], index: 3, kind: output, shape index: {}]  }
   0x1   :  { %10 = vsyncpa [#allocation6 + $0x1], 0  ;;  %s25457_s12 = smov 0   ;;  %s25459_s13 = smov 0  }
   0x2   :  { %s25461_s14 = smov 0   ;;  %s25463_s15 = smov 0  }
   0x3 LB: > { %s25478_s16 = sadd.s32 4294967295, %s25422_s15   ;;  %s23091_s17 = sadd.s32 4294967294, %s25422_s15   ;;  %s25422_s15 = sphi %s25463_s15, %s31467_s15   ;;  %s25418_s14 = sphi %s25461_s14, %s31466_s14   ;;  %s25414_s13 = sphi %s25459_s13, %s31465_s13   ;;  %s25410_s12 = sphi %s25457_s12, %s31464_s12  }
   0x4   : > { %s25482_s18 = sadd.s32 1, %s25422_s15   ;;  %s91_s19 = sadd.s32 1, %s25418_s14 }
   0x5   : > { %s88_s20 = ssub.s32 %s25422_s15, %s25482_s18  ;;  %p101_p0 = scmp.ne.s32.totalorder %s25418_s14, %s25414_s13 }
   0x6   : > { %p89_p1 = scmp.eq.s32.totalorder %s88_s20, 0  ;;  %p102_p2 = scmp.eq.s32.totalorder %s25478_s16, 1 }
   0x7   : > { %p107_p3 = scmp.ne.s32.totalorder %s25414_s13, %s25410_s12  ;;  %p108_p4 = scmp.eq.s32.totalorder %s23091_s17, 1 }
   0x8   : > { %s25493_s21 = scalar_select %p89_p1, %s25418_s14, %s91_s19  }
   0x9   : > { %p25495_p5 = por %p102_p2, %p101_p0  ;;  %p25499_p6 = por %p108_p4, %p107_p3 }
   0xa   : > { %p23094_p7 = scmp.ge.s32.totalorder %s25422_s15, 1  ;;  %p140_p8 = scmp.lt.s32.totalorder %s25422_s15, 3 }
   0xc   : > { %p141_p9 = pnand %p23094_p7, %p140_p8 }
   0xe   : > { %144 = sbr.rel (%p141_p9) target bundleno = 1702 (0x6a6), region = 32 }
  0x15   : > { %p164_p10 = scmp.lt.s32.totalorder %s25478_s16, 1  ;;  %v241_v0 = vlaneseq  ;;  %v25424_v1 = vmov 1983009808   ;;  %v31425_v3 = vmov 0   ;;  %s25426_s29 = smov 127   ;;  %vm343_vm0 = vcmask 1041408  }
  0x16   : > { %v239_v2 = vunpack.c.l.s4 %v25424_v1  ;;  %448 = vmatprep.mubr.bf16.mxu0 %v31425_v3  ;;  %489 = vmatprep.mubr.bf16.mxu1 %v31425_v3  ;;  %v25565_v23 = vld [vmem:[%s31422_s1] sm:$0xf]  ;;  %vm339_vm1 = vcmask 31744   ;;  %s25427_s5 = smov 126   ;;  %s25428_s6 = smov 110   ;;  %vm1155_vm2 = vcmask 1039360  }
  0x17   : > { %s165_s24 = scalar_select %p164_p10, %s25478_s16, 1  ;;  %v242_v4 = vshrl.u32 %v241_v0, 7  ;;  %25161 = vset.pattern.permute.xlu0 %v31425_v3  ;;  %vm1994_vm3 = vcmask 1031168   ;;  %vm2833_vm4 = vcmask 900096   ;;  %vm3672_vm5 = vcmask 891904  }
  0x18   : > { %v240_v5 = vunpack.c.0.s8 %v239_v2  ;;  %s25429_s9 = smov 109   ;;  %s25430_s17 = smov 108   ;;  %vm4511_vm6 = vcmask 883712   ;;  %vm5350_vm7 = vcmask 752640   ;;  %vm6189_vm8 = vcmask 744448  }
  0x19   : > { %s25108_s25 = smul.u32 66, %s165_s24  ;;  %s25431_s24 = smov 92   ;;  %vm7028_vm9 = vcmask 736256  }
  0x1a   : > { %v25510_v6 = vsub.s32 %v240_v5, %v242_v4  ;;  %s25432_s27 = smov 91   ;;  %s25433_s7 = smov 90  }
  0x1b   : > { %s25515_s28 = scalar_lea.vmem %s31421_s0, %s25108_s25  ;;  %s25109_s30 = smul.u32 1536, %s25478_s16 }
  0x1c   : > { %31441 = vst [vmem:[#allocation8_spill] sm:$0xff] %v25510_v6  ;;  %v982_v7 = vld [vmem:[%s25515_s28] sm:$0xff]  ;;  %v983_v8 = vld [vmem:[%s25515_s28 + $0x8] sm:$0xff]  ;;  %v984_v18 = vld [vmem:[%s25515_s28 + $0x10] sm:$0xff]  ;;  %s25434_s16 = smov [#allocation5]  }
  0x1d   : > { %v25520_v9 = vrot.slane %v982_v7, %v25510_v6  ;;  %v996_v10 = vcombine.high %v982_v7, %v982_v7  ;;  %v25523_v11 = vrot.slane %v983_v8, %v25510_v6  ;;  %v1013_v12 = vcombine.high %v983_v8, %v983_v8  ;;  %v985_v29 = vld [vmem:[%s25515_s28 + $0x18] sm:$0xff]  ;;  %v986_v37 = vld [vmem:[%s25515_s28 + $0x20] sm:$0xff]  ;;  %v987_v45 = vld [vmem:[%s25515_s28 + $0x28] sm:$0xff]  ;;  %s31373_s8 = scalar_lea.hbm %s31424_s3, %s25109_s30 }
  0x1e   : > { %v1030_v19 = vcombine.high %v984_v18, %v984_v18  ;;  %v25570_v24 = vrot.slane %v984_v18, %v25510_v6  ;;  %v1047_v31 = vcombine.high %v985_v29, %v985_v29  ;;  %v25611_v32 = vrot.slane %v985_v29, %v25510_v6  ;;  %v25737_v56 = vld.sshfl [vmem:[%s25515_s28 + $0x30] sm:$0x3 pattern:$0x76325410] }
  0x1f   : > { %1105 = vrot.lane.b32.xlu0 %v25520_v9, %s25426_s29  ;;  %v25528_v13 = vrot.slane %v996_v10, %v25510_v6  ;;  %v25532_v14 = vcombine.high %v25520_v9, %v25520_v9  ;;  %v25535_v15 = vrot.slane %v1013_v12, %v25510_v6  ;;  %v25545_v17 = vcombine.high %v25523_v11, %v25523_v11  ;;  %v25839_v10 = vld [vmem:[%s31422_s1 + $0x4] sm:$0xf] }
  0x20   : > { %v345_v20 = vsel %vm343_vm0, %v25520_v9, 0  ;;  %v357_v25 = vsel %vm343_vm0, %v25523_v11, 0  ;;  %v25577_v26 = vrot.slane %v1030_v19, %v25510_v6  ;;  %v25593_v28 = vcombine.high %v25570_v24, %v25570_v24 }
  0x21   : > { %1109 = vrot.lane.b32.xlu1 %v25528_v13, %s25426_s29  ;;  %v25541_v16 = vcombine.high %v25528_v13, %v25528_v13  ;;  %23096 = vmatprep.subr.msk.bf16.mxu0 %vm343_vm0, %v25532_v14  ;;  %v351_v21 = vsel %vm343_vm0, %v25528_v13, 0  ;;  %v25560_v22 = vcombine.high %v25535_v15, %v25535_v15  ;;  %v363_v27 = vsel %vm343_vm0, %v25535_v15, 0 }
  0x22   : > { %417 = vmatpush1.bf16.msra.mxu0 %v345_v20  ;;  %v25599_v30 = vcombine.high %v25577_v26, %v25577_v26  ;;  %v369_v33 = vsel %vm343_vm0, %v25570_v24, 0  ;;  %v25616_v34 = vrot.slane %v1047_v31, %v25510_v6  ;;  %v375_v35 = vsel %vm343_vm0, %v25577_v26, 0 }
  0x23   : > { %1113 = vrot.lane.b32.xlu0 %v25523_v11, %s25426_s29  ;;  %23098 = vmatprep.subr.msk.bf16.mxu1 %vm343_vm0, %v25541_v16  ;;  %v25630_v36 = vcombine.high %v25611_v32, %v25611_v32  ;;  %v1064_v39 = vcombine.high %v986_v37, %v986_v37  ;;  %v25648_v40 = vrot.slane %v986_v37, %v25510_v6  ;;  %v381_v41 = vsel %vm343_vm0, %v25611_v32, 0 }
  0x24   : > { %458 = vmatpush1.bf16.msra.mxu1 %v351_v21  ;;  %23100 = vmatprep.subr.msk.bf16.mxu0 %vm343_vm0, %v25545_v17  ;;  %v25636_v38 = vcombine.high %v25616_v34, %v25616_v34  ;;  %v387_v43 = vsel %vm343_vm0, %v25616_v34, 0  ;;  %v1081_v47 = vcombine.high %v987_v45, %v987_v45  ;;  %v25685_v48 = vrot.slane %v987_v45, %v25510_v6 }
  0x25   : > { %1115 = vrot.lane.b32.xlu1 %v25545_v17, %s25426_s29  ;;  %23102 = vmatprep.subr.msk.bf16.mxu1 %vm343_vm0, %v25560_v22  ;;  %v25653_v42 = vrot.slane %v1064_v39, %v25510_v6  ;;  %v25667_v44 = vcombine.high %v25648_v40, %v25648_v40  ;;  %v393_v49 = vsel %vm343_vm0, %v25648_v40, 0 }
  0x26   : > { %23097 = vmatmul.mubr.msk.bf16.vlgmr.msra.gmra.mrb[0].mxu0 %vm339_vm1, %v25565_v23  ;;  %v25690_v50 = vrot.slane %v1081_v47, %v25510_v6  ;;  %v25704_v52 = vcombine.high %v25685_v48, %v25685_v48  ;;  %v405_v54 = vsel %vm343_vm0, %v25685_v48, 0 }
  0x27   : > { %1107 = vrot.lane.b32.xlu0 %v25532_v14, %s25426_s29  ;;  %23099 = vmatmul.mubr.msk.bf16.vlgmr.msra.gmra.mrb[0].mxu1 %vm339_vm1, %v25565_v23  ;;  %v25673_v46 = vcombine.high %v25653_v42, %v25653_v42  ;;  %v399_v51 = vsel %vm343_vm0, %v25653_v42, 0 }
  0x28   : > { %499 = vmatpush1.bf16.msra.mxu0 %v357_v25  ;;  %530 = vmatprep.mubr.bf16.mxu0 %v31425_v3  ;;  %v25709_v53 = vcombine.high %v25690_v50, %v25690_v50  ;;  %v411_v55 = vsel %vm343_vm0, %v25690_v50, 0 }
  0x29   : > { %1111 = vrot.lane.b32.xlu1 %v25541_v16, %s25426_s29  ;;  %540 = vmatpush1.bf16.msra.mxu1 %v363_v27 }
  0x2a   : > { %571 = vmatprep.mubr.bf16.mxu1 %v31425_v3  ;;  %23104 = vmatprep.subr.msk.bf16.mxu0 %vm343_vm0, %v25593_v28 }
  0x2b   : > { %1117 = vrot.lane.b32.xlu0 %v25535_v15, %s25426_s29  ;;  %23106 = vmatprep.subr.msk.bf16.mxu1 %vm343_vm0, %v25599_v30 }
  0x2d   : > { %1119 = vrot.lane.b32.xlu1 %v25560_v22, %s25426_s29 }
  0x2e   : > { %23101 = vmatmul.mubr.msk.bf16.vlgmr.msra.gmra.mrb[4].mxu0 %vm339_vm1, %v25565_v23 }
  0x2f   : > { %1121 = vrot.lane.b32.xlu0 %v25570_v24, %s25426_s29  ;;  %23103 = vmatmul.mubr.msk.bf16.vlgmr.msra.gmra.mrb[4].mxu1 %vm339_vm1, %v25565_v23 }
  0x30   : > { %581 = vmatpush1.bf16.msra.mxu0 %v369_v33  ;;  %612 = vmatprep.mubr.bf16.mxu0 %v31425_v3 }
  0x31   : > { %1123 = vrot.lane.b32.xlu1 %v25593_v28, %s25426_s29  ;;  %622 = vmatpush1.bf16.msra.mxu1 %v375_v35 }
  0x32   : > { %653 = vmatprep.mubr.bf16.mxu1 %v31425_v3  ;;  %23108 = vmatprep.subr.msk.bf16.mxu0 %vm343_vm0, %v25630_v36 }
  0x33   : > { %1125 = vrot.lane.b32.xlu0 %v25577_v26, %s25426_s29  ;;  %23110 = vmatprep.subr.msk.bf16.mxu1 %vm343_vm0, %v25636_v38 }
  0x35   : > { %1127 = vrot.lane.b32.xlu1 %v25599_v30, %s25426_s29 }
  0x36   : > { %23105 = vmatmul.mubr.msk.bf16.vlgmr.msra.gmra.mrb[8].mxu0 %vm339_vm1, %v25565_v23 }
  0x37   : > { %1129 = vrot.lane.b32.xlu0 %v25611_v32, %s25426_s29  ;;  %23107 = vmatmul.mubr.msk.bf16.vlgmr.msra.gmra.mrb[8].mxu1 %vm339_vm1, %v25565_v23 }
  0x38   : > { %663 = vmatpush1.bf16.msra.mxu0 %v381_v41  ;;  %694 = vmatprep.mubr.bf16.mxu0 %v31425_v3 }
  0x39   : > { %1131 = vrot.lane.b32.xlu1 %v25630_v36, %s25426_s29  ;;  %704 = vmatpush1.bf16.msra.mxu1 %v387_v43 }
  0x3a   : > { %735 = vmatprep.mubr.bf16.mxu1 %v31425_v3  ;;  %23112 = vmatprep.subr.msk.bf16.mxu0 %vm343_vm0, %v25667_v44 }
  0x3b   : > { %1133 = vrot.lane.b32.xlu0 %v25616_v34, %s25426_s29  ;;  %23114 = vmatprep.subr.msk.bf16.mxu1 %vm343_vm0, %v25673_v46 }
  0x3d   : > { %1135 = vrot.lane.b32.xlu1 %v25636_v38, %s25426_s29 }
  0x3e   : > { %23109 = vmatmul.mubr.msk.bf16.vlgmr.msra.gmra.mrb[12].mxu0 %vm339_vm1, %v25565_v23 }
  0x3f   : > { %1137 = vrot.lane.b32.xlu0 %v25648_v40, %s25426_s29  ;;  %23111 = vmatmul.mubr.msk.bf16.vlgmr.msra.gmra.mrb[12].mxu1 %vm339_vm1, %v25565_v23 }
  0x40   : > { %745 = vmatpush1.bf16.msra.mxu0 %v393_v49  ;;  %776 = vmatprep.mubr.bf16.mxu0 %v31425_v3 }
  0x41   : > { %1139 = vrot.lane.b32.xlu1 %v25667_v44, %s25426_s29  ;;  %786 = vmatpush1.bf16.msra.mxu1 %v399_v51 }
  0x42   : > { %817 = vmatprep.mubr.bf16.mxu1 %v31425_v3  ;;  %23116 = vmatprep.subr.msk.bf16.mxu0 %vm343_vm0, %v25704_v52 }
  0x43   : > { %1141 = vrot.lane.b32.xlu0 %v25653_v42, %s25426_s29  ;;  %23118 = vmatprep.subr.msk.bf16.mxu1 %vm343_vm0, %v25709_v53 }
  0x45   : > { %1143 = vrot.lane.b32.xlu1 %v25673_v46, %s25426_s29 }
  0x46   : > { %23113 = vmatmul.mubr.msk.bf16.vlgmr.msra.gmra.mrb[16].mxu0 %vm339_vm1, %v25565_v23 }
  0x47   : > { %1145 = vrot.lane.b32.xlu0 %v25685_v48, %s25426_s29  ;;  %23115 = vmatmul.mubr.msk.bf16.vlgmr.msra.gmra.mrb[16].mxu1 %vm339_vm1, %v25565_v23 }
  0x48   : > { %827 = vmatpush1.bf16.msra.mxu0 %v405_v54  ;;  %858 = vmatprep.mubr.bf16.mxu0 %v31425_v3 }
  0x49   : > { %1147 = vrot.lane.b32.xlu1 %v25704_v52, %s25426_s29  ;;  %868 = vmatpush1.bf16.msra.mxu1 %v411_v55 }
  0x4a   : > { %899 = vmatprep.mubr.bf16.mxu1 %v31425_v3 }
  0x4b   : > { %1149 = vrot.lane.b32.xlu0 %v25690_v50, %s25426_s29 }
  0x4d   : > { %1151 = vrot.lane.b32.xlu1 %v25709_v53, %s25426_s29 }
  0x4e   : > { %23117 = vmatmul.mubr.msk.bf16.vlgmr.msra.gmra.mrb[20].mxu0 %vm339_vm1, %v25565_v23 }
  0x4f   : > { %1153 = vrot.lane.b32.xlu0 %v25737_v56, %s25426_s29  ;;  %23119 = vmatmul.mubr.msk.bf16.vlgmr.msra.gmra.mrb[20].mxu1 %vm339_vm1, %v25565_v23 }
  0x50   : > { %1287 = vmatprep.mubr.bf16.mxu0 %v31425_v3  ;;  %1328 = vmatprep.mubr.bf16.mxu1 %v31425_v3 }
  0x51   : > { %1944 = vrot.lane.b32.xlu1 %v25520_v9, %s25427_s5 }
  0x53   : > { %1946 = vrot.lane.b32.xlu0 %v25532_v14, %s25427_s5 }
  0x55   : > { %1948 = vrot.lane.b32.xlu1 %v25528_v13, %s25427_s5 }
  0x57   : > { %1950 = vrot.lane.b32.xlu0 %v25541_v16, %s25427_s5 }
  0x59   : > { %1952 = vrot.lane.b32.xlu1 %v25523_v11, %s25427_s5 }
  0x5b   : > { %1954 = vrot.lane.b32.xlu0 %v25545_v17, %s25427_s5 }
  0x5d   : > { %1956 = vrot.lane.b32.xlu1 %v25535_v15, %s25427_s5 }
  0x5f   : > { %1958 = vrot.lane.b32.xlu0 %v25560_v22, %s25427_s5 }
  0x61   : > { %1960 = vrot.lane.b32.xlu1 %v25570_v24, %s25427_s5 }
  0x63   : > { %1962 = vrot.lane.b32.xlu0 %v25593_v28, %s25427_s5 }
  0x65   : > { %1964 = vrot.lane.b32.xlu1 %v25577_v26, %s25427_s5 }
  0x67   : > { %1966 = vrot.lane.b32.xlu0 %v25599_v30, %s25427_s5 }
  0x69   : > { %1968 = vrot.lane.b32.xlu1 %v25611_v32, %s25427_s5 }
  0x6b   : > { %1970 = vrot.lane.b32.xlu0 %v25630_v36, %s25427_s5 }
  0x6d   : > { %1972 = vrot.lane.b32.xlu1 %v25616_v34, %s25427_s5 }
  0x6f   : > { %1974 = vrot.lane.b32.xlu0 %v25636_v38, %s25427_s5 }
  0x71   : > { %1976 = vrot.lane.b32.xlu1 %v25648_v40, %s25427_s5 }
  0x73   : > { %1978 = vrot.lane.b32.xlu0 %v25667_v44, %s25427_s5 }
  0x75   : > { %1980 = vrot.lane.b32.xlu1 %v25653_v42, %s25427_s5 }
  0x77   : > { %1982 = vrot.lane.b32.xlu0 %v25673_v46, %s25427_s5 }
  0x79   : > { %1984 = vrot.lane.b32.xlu1 %v25685_v48, %s25427_s5 }
  0x7b   : > { %1986 = vrot.lane.b32.xlu0 %v25704_v52, %s25427_s5 }
  0x7d   : > { %1988 = vrot.lane.b32.xlu1 %v25690_v50, %s25427_s5 }
  0x7f   : > { %1990 = vrot.lane.b32.xlu0 %v25709_v53, %s25427_s5 }
  0x81   : > { %1992 = vrot.lane.b32.xlu1 %v25737_v56, %s25427_s5 }
  0x83   : > { %2783 = vrot.lane.b32.xlu0 %v25520_v9, %s25428_s6 }
  0x85   : > { %2785 = vrot.lane.b32.xlu1 %v25532_v14, %s25428_s6 }
  0x87   : > { %2787 = vrot.lane.b32.xlu0 %v25528_v13, %s25428_s6 }
  0x89   : > { %2789 = vrot.lane.b32.xlu1 %v25541_v16, %s25428_s6 }
  0x8b   : > { %2791 = vrot.lane.b32.xlu0 %v25523_v11, %s25428_s6 }
  0x8d   : > { %2793 = vrot.lane.b32.xlu1 %v25545_v17, %s25428_s6 }
  0x8f   : > { %2795 = vrot.lane.b32.xlu0 %v25535_v15, %s25428_s6 }
  0x91   : > { %v1106_v57 = vpop.permute.xlu0 %1105  ;;  %2797 = vrot.lane.b32.xlu1 %v25560_v22, %s25428_s6 }
  0x93   : > { %2799 = vrot.lane.b32.xlu0 %v25570_v24, %s25428_s6  ;;  %v1110_v58 = vpop.permute.xlu1 %1109 }
  0x95   : > { %v1114_v59 = vpop.permute.xlu0 %1113  ;;  %2801 = vrot.lane.b32.xlu1 %v25593_v28, %s25428_s6 }
  0x97   : > { %2803 = vrot.lane.b32.xlu0 %v25577_v26, %s25428_s6  ;;  %v1116_v60 = vpop.permute.xlu1 %1115 }
  0x98   : > { %v1160_v5 = vsel %vm1155_vm2, %v1114_v59, %v1116_v60 }
  0x99   : > { %v1108_v61 = vpop.permute.xlu0 %1107  ;;  %2805 = vrot.lane.b32.xlu1 %v25599_v30, %s25428_s6  ;;  %v1196_v20 = vsel %vm343_vm0, %v1160_v5, 0 }
  0x9a   : > { %v1156_v62 = vsel %vm1155_vm2, %v1106_v57, %v1108_v61  ;;  %v1157_v63 = vsel %vm1155_vm2, %v1108_v61, %v1110_v58 }
  0x9b   : > { %2807 = vrot.lane.b32.xlu0 %v25611_v32, %s25428_s6  ;;  %v1112_v0 = vpop.permute.xlu1 %1111  ;;  %23122 = vmatprep.subr.msk.bf16.mxu0 %vm343_vm0, %v1157_v63  ;;  %v1184_v1 = vsel %vm343_vm0, %v1156_v62, 0 }
  0x9c   : > { %v1158_v2 = vsel %vm1155_vm2, %v1110_v58, %v1112_v0  ;;  %1256 = vmatpush1.bf16.msra.mxu0 %v1184_v1  ;;  %v1159_v4 = vsel %vm1155_vm2, %v1112_v0, %v1114_v59 }
  0x9d   : > { %v1118_v7 = vpop.permute.xlu0 %1117  ;;  %2809 = vrot.lane.b32.xlu1 %v25630_v36, %s25428_s6  ;;  %23124 = vmatprep.subr.msk.bf16.mxu1 %vm343_vm0, %v1159_v4  ;;  %v1190_v8 = vsel %vm343_vm0, %v1158_v2, 0 }
  0x9e   : > { %1297 = vmatpush1.bf16.msra.mxu1 %v1190_v8  ;;  %v1161_v12 = vsel %vm1155_vm2, %v1116_v60, %v1118_v7 }
  0x9f   : > { %2811 = vrot.lane.b32.xlu0 %v25616_v34, %s25428_s6  ;;  %v1120_v18 = vpop.permute.xlu1 %1119  ;;  %23126 = vmatprep.subr.msk.bf16.mxu0 %vm343_vm0, %v1161_v12 }
  0xa0   : > { %v1162_v19 = vsel %vm1155_vm2, %v1118_v7, %v1120_v18  ;;  %23123 = vmatmul.mubr.msk.bf16.vlgmr.msra.gmra.mrb[0].mxu0 %vm339_vm1, %v25839_v10 }
  0xa1   : > { %1338 = vmatpush1.bf16.msra.mxu0 %v1196_v20  ;;  %v1122_v21 = vpop.permute.xlu0 %1121  ;;  %2813 = vrot.lane.b32.xlu1 %v25636_v38, %s25428_s6  ;;  %v1202_v27 = vsel %vm343_vm0, %v1162_v19, 0 }
  0xa2   : > { %v1163_v23 = vsel %vm1155_vm2, %v1120_v18, %v1122_v21  ;;  %23125 = vmatmul.mubr.msk.bf16.vlgmr.msra.gmra.mrb[0].mxu1 %vm339_vm1, %v25839_v10  ;;  %1369 = vmatprep.mubr.bf16.mxu0 %v31425_v3 }
  0xa3   : > { %2815 = vrot.lane.b32.xlu0 %v25648_v40, %s25428_s6  ;;  %v1124_v25 = vpop.permute.xlu1 %1123  ;;  %23128 = vmatprep.subr.msk.bf16.mxu1 %vm343_vm0, %v1163_v23 }
  0xa4   : > { %1379 = vmatpush1.bf16.msra.mxu1 %v1202_v27  ;;  %1410 = vmatprep.mubr.bf16.mxu1 %v31425_v3  ;;  %v1164_v29 = vsel %vm1155_vm2, %v1122_v21, %v1124_v25 }
  0xa5   : > { %v1126_v31 = vpop.permute.xlu0 %1125  ;;  %2817 = vrot.lane.b32.xlu1 %v25667_v44, %s25428_s6  ;;  %v1208_v39 = vsel %vm343_vm0, %v1164_v29, 0 }
  0xa6   : > { %v1165_v33 = vsel %vm1155_vm2, %v1124_v25, %v1126_v31 }
  0xa7   : > { %2819 = vrot.lane.b32.xlu0 %v25653_v42, %s25428_s6  ;;  %v1128_v35 = vpop.permute.xlu1 %1127  ;;  %23130 = vmatprep.subr.msk.bf16.mxu0 %vm343_vm0, %v1165_v33 }
  0xa8   : > { %v1166_v37 = vsel %vm1155_vm2, %v1126_v31, %v1128_v35  ;;  %23127 = vmatmul.mubr.msk.bf16.vlgmr.msra.gmra.mrb[4].mxu0 %vm339_vm1, %v25839_v10 }
  0xa9   : > { %1420 = vmatpush1.bf16.msra.mxu0 %v1208_v39  ;;  %v1130_v41 = vpop.permute.xlu0 %1129  ;;  %2821 = vrot.lane.b32.xlu1 %v25673_v46, %s25428_s6  ;;  %v1214_v47 = vsel %vm343_vm0, %v1166_v37, 0 }
  0xaa   : > { %v1167_v43 = vsel %vm1155_vm2, %v1128_v35, %v1130_v41  ;;  %23129 = vmatmul.mubr.msk.bf16.vlgmr.msra.gmra.mrb[4].mxu1 %vm339_vm1, %v25839_v10  ;;  %1451 = vmatprep.mubr.bf16.mxu0 %v31425_v3 }
  0xab   : > { %2823 = vrot.lane.b32.xlu0 %v25685_v48, %s25428_s6  ;;  %v1132_v45 = vpop.permute.xlu1 %1131  ;;  %23132 = vmatprep.subr.msk.bf16.mxu1 %vm343_vm0, %v1167_v43 }
  0xac   : > { %1461 = vmatpush1.bf16.msra.mxu1 %v1214_v47  ;;  %1492 = vmatprep.mubr.bf16.mxu1 %v31425_v3  ;;  %v1168_v49 = vsel %vm1155_vm2, %v1130_v41, %v1132_v45 }
  0xad   : > { %v1134_v51 = vpop.permute.xlu0 %1133  ;;  %2825 = vrot.lane.b32.xlu1 %v25704_v52, %s25428_s6  ;;  %v1220_v58 = vsel %vm343_vm0, %v1168_v49, 0 }
  0xae   : > { %v1169_v54 = vsel %vm1155_vm2, %v1132_v45, %v1134_v51 }
  0xaf   : > { %2827 = vrot.lane.b32.xlu0 %v25690_v50, %s25428_s6  ;;  %v1136_v55 = vpop.permute.xlu1 %1135  ;;  %23134 = vmatprep.subr.msk.bf16.mxu0 %vm343_vm0, %v1169_v54 }
  0xb0   : > { %v1170_v57 = vsel %vm1155_vm2, %v1134_v51, %v1136_v55  ;;  %23131 = vmatmul.mubr.msk.bf16.vlgmr.msra.gmra.mrb[8].mxu0 %vm339_vm1, %v25839_v10 }
  0xb1   : > { %1502 = vmatpush1.bf16.msra.mxu0 %v1220_v58  ;;  %v1138_v59 = vpop.permute.xlu0 %1137  ;;  %2829 = vrot.lane.b32.xlu1 %v25709_v53, %s25428_s6  ;;  %v1226_v62 = vsel %vm343_vm0, %v1170_v57, 0 }
  0xb2   : > { %v1171_v60 = vsel %vm1155_vm2, %v1136_v55, %v1138_v59  ;;  %23133 = vmatmul.mubr.msk.bf16.vlgmr.msra.gmra.mrb[8].mxu1 %vm339_vm1, %v25839_v10  ;;  %1533 = vmatprep.mubr.bf16.mxu0 %v31425_v3 }
  0xb3   : > { %2831 = vrot.lane.b32.xlu0 %v25737_v56, %s25428_s6  ;;  %v1140_v61 = vpop.permute.xlu1 %1139  ;;  %23136 = vmatprep.subr.msk.bf16.mxu1 %vm343_vm0, %v1171_v60  ;;  %v4338_v60 = vld [vmem:[%s25515_s28] sm:$0xff] }
  0xb4   : > { %1543 = vmatpush1.bf16.msra.mxu1 %v1226_v62  ;;  %1574 = vmatprep.mubr.bf16.mxu1 %v31425_v3  ;;  %v1172_v63 = vsel %vm1155_vm2, %v1138_v59, %v1140_v61 }
  0xb5   : > { %v1142_v0 = vpop.permute.xlu0 %1141  ;;  %3622 = vrot.lane.b32.xlu1 %v25520_v9, %s25429_s9  ;;  %v1232_v5 = vsel %vm343_vm0, %v1172_v63, 0  ;;  %v26033_v63 = vrot.slane %v4338_v60, %v25510_v6 }
  0xb6   : > { %v1173_v1 = vsel %vm1155_vm2, %v1140_v61, %v1142_v0 }
  0xb7   : > { %3624 = vrot.lane.b32.xlu0 %v25532_v14, %s25429_s9  ;;  %v1144_v2 = vpop.permute.xlu1 %1143  ;;  %23138 = vmatprep.subr.msk.bf16.mxu0 %vm343_vm0, %v1173_v1 }
  0xb8   : > { %v1174_v4 = vsel %vm1155_vm2, %v1142_v0, %v1144_v2  ;;  %23135 = vmatmul.mubr.msk.bf16.vlgmr.msra.gmra.mrb[12].mxu0 %vm339_vm1, %v25839_v10  ;;  %v4352_v0 = vcombine.high %v4338_v60, %v4338_v60  ;;  %v4342_v60 = vld [vmem:[%s25515_s28 + $0x20] sm:$0xff] }
  0xb9   : > { %1584 = vmatpush1.bf16.msra.mxu0 %v1232_v5  ;;  %v1146_v7 = vpop.permute.xlu0 %1145  ;;  %3626 = vrot.lane.b32.xlu1 %v25528_v13, %s25429_s9  ;;  %v1238_v8 = vsel %vm343_vm0, %v1174_v4, 0  ;;  %v26049_v5 = vcombine.high %v26033_v63, %v26033_v63 }
  0xba   : > { %v1175_v9 = vsel %vm1155_vm2, %v1144_v2, %v1146_v7  ;;  %23137 = vmatmul.mubr.msk.bf16.vlgmr.msra.gmra.mrb[12].mxu1 %vm339_vm1, %v25839_v10  ;;  %1615 = vmatprep.mubr.bf16.mxu0 %v31425_v3 }
  0xbb   : > { %3628 = vrot.lane.b32.xlu0 %v25541_v16, %s25429_s9  ;;  %v1148_v14 = vpop.permute.xlu1 %1147  ;;  %23140 = vmatprep.subr.msk.bf16.mxu1 %vm343_vm0, %v1175_v9  ;;  %v4339_v9 = vld [vmem:[%s25515_s28 + $0x8] sm:$0xff] }
  0xbc   : > { %1625 = vmatpush1.bf16.msra.mxu1 %v1238_v8  ;;  %1656 = vmatprep.mubr.bf16.mxu1 %v31425_v3  ;;  %v1176_v13 = vsel %vm1155_vm2, %v1146_v7, %v1148_v14 }
  0xbd   : > { %v1150_v12 = vpop.permute.xlu0 %1149  ;;  %3630 = vrot.lane.b32.xlu1 %v25523_v11, %s25429_s9  ;;  %v1244_v20 = vsel %vm343_vm0, %v1176_v13, 0 }
  0xbe   : > { %v1177_v18 = vsel %vm1155_vm2, %v1148_v14, %v1150_v12 }
  0xbf   : > { %3632 = vrot.lane.b32.xlu0 %v25545_v17, %s25429_s9  ;;  %v1152_v16 = vpop.permute.xlu1 %1151  ;;  %23142 = vmatprep.subr.msk.bf16.mxu0 %vm343_vm0, %v1177_v18  ;;  %v26070_v18 = vrot.slane %v4339_v9, %v25510_v6 }
  0xc0   : > { %v1178_v19 = vsel %vm1155_vm2, %v1150_v12, %v1152_v16  ;;  %23139 = vmatmul.mubr.msk.bf16.vlgmr.msra.gmra.mrb[16].mxu0 %vm339_vm1, %v25839_v10 }
  0xc1   : > { %1666 = vmatpush1.bf16.msra.mxu0 %v1244_v20  ;;  %v1154_v21 = vpop.permute.xlu0 %1153  ;;  %3634 = vrot.lane.b32.xlu1 %v25535_v15, %s25429_s9  ;;  %v1250_v23 = vsel %vm343_vm0, %v1178_v19, 0 }
  0xc2   : > { %v1179_v11 = vsel %vm1155_vm2, %v1152_v16, %v1154_v21  ;;  %23141 = vmatmul.mubr.msk.bf16.vlgmr.msra.gmra.mrb[16].mxu1 %vm339_vm1, %v25839_v10  ;;  %1697 = vmatprep.mubr.bf16.mxu0 %v31425_v3  ;;  %v4369_v16 = vcombine.high %v4339_v9, %v4339_v9 }
  0xc3   : > { %3636 = vrot.lane.b32.xlu0 %v25560_v22, %s25429_s9  ;;  %v1945_v17 = vpop.permute.xlu1 %1944  ;;  %23144 = vmatprep.subr.msk.bf16.mxu1 %vm343_vm0, %v1179_v11 }
  0xc4   : > { %1707 = vmatpush1.bf16.msra.mxu1 %v1250_v23  ;;  %1738 = vmatprep.mubr.bf16.mxu1 %v31425_v3  ;;  %v26086_v23 = vcombine.high %v26070_v18, %v26070_v18 }
  0xc5   : > { %v1947_v15 = vpop.permute.xlu0 %1946  ;;  %3638 = vrot.lane.b32.xlu1 %v25570_v24, %s25429_s9 }
  0xc6   : > { %v1995_v25 = vsel %vm1994_vm3, %v1945_v17, %v1947_v15 }
  0xc7   : > { %3640 = vrot.lane.b32.xlu0 %v25593_v28, %s25429_s9  ;;  %v1949_v27 = vpop.permute.xlu1 %1948  ;;  %v2023_v31 = vsel %vm343_vm0, %v1995_v25, 0 }
  0xc8   : > { %v1996_v22 = vsel %vm1994_vm3, %v1947_v15, %v1949_v27  ;;  %23143 = vmatmul.mubr.msk.bf16.vlgmr.msra.gmra.mrb[20].mxu0 %vm339_vm1, %v25839_v10  ;;  %v26089_v15 = vrot.slane %v4369_v16, %v25510_v6 }
  0xc9   : > { %v1951_v29 = vpop.permute.xlu0 %1950  ;;  %3642 = vrot.lane.b32.xlu1 %v25577_v26, %s25429_s9  ;;  %23148 = vmatprep.subr.msk.bf16.mxu0 %vm343_vm0, %v1996_v22 }
  0xca   : > { %v1997_v24 = vsel %vm1994_vm3, %v1949_v27, %v1951_v29  ;;  %2095 = vmatpush1.bf16.msra.mxu0 %v2023_v31  ;;  %23145 = vmatmul.mubr.msk.bf16.vlgmr.msra.gmra.mrb[20].mxu1 %vm339_vm1, %v25839_v10  ;;  %v25975_v10 = vld [vmem:[%s31422_s1 + $0x8] sm:$0xf]  ;;  %v4340_v27 = vld [vmem:[%s25515_s28 + $0x10] sm:$0xff] }
  0xcb   : > { %3644 = vrot.lane.b32.xlu0 %v25599_v30, %s25429_s9  ;;  %v1953_v28 = vpop.permute.xlu1 %1952  ;;  %2126 = vmatprep.mubr.bf16.mxu0 %v31425_v3  ;;  %v2029_v35 = vsel %vm343_vm0, %v1997_v24, 0 }
  0xcc   : > { %v1998_v33 = vsel %vm1994_vm3, %v1951_v29, %v1953_v28  ;;  %2167 = vmatprep.mubr.bf16.mxu1 %v31425_v3 }
  0xcd   : > { %v1955_v26 = vpop.permute.xlu0 %1954  ;;  %3646 = vrot.lane.b32.xlu1 %v25611_v32, %s25429_s9  ;;  %23150 = vmatprep.subr.msk.bf16.mxu1 %vm343_vm0, %v1998_v33  ;;  %v26107_v33 = vrot.slane %v4340_v27, %v25510_v6 }
  0xce   : > { %v1999_v30 = vsel %vm1994_vm3, %v1953_v28, %v1955_v26  ;;  %2136 = vmatpush1.bf16.msra.mxu1 %v2029_v35  ;;  %v26104_v28 = vcombine.high %v26089_v15, %v26089_v15 }
  0xcf   : > { %3648 = vrot.lane.b32.xlu0 %v25630_v36, %s25429_s9  ;;  %v1957_v37 = vpop.permute.xlu1 %1956  ;;  %v2035_v41 = vsel %vm343_vm0, %v1999_v30, 0 }
  0xd0   : > { %v2000_v39 = vsel %vm1994_vm3, %v1955_v26, %v1957_v37  ;;  %23149 = vmatmul.mubr.msk.bf16.vlgmr.msra.gmra.mrb[0].mxu0 %vm339_vm1, %v25975_v10  ;;  %v4386_v26 = vcombine.high %v4340_v27, %v4340_v27 }
  0xd1   : > { %v1959_v32 = vpop.permute.xlu0 %1958  ;;  %3650 = vrot.lane.b32.xlu1 %v25616_v34, %s25429_s9  ;;  %23152 = vmatprep.subr.msk.bf16.mxu0 %vm343_vm0, %v2000_v39 }
  0xd2   : > { %v2001_v43 = vsel %vm1994_vm3, %v1957_v37, %v1959_v32  ;;  %2177 = vmatpush1.bf16.msra.mxu0 %v2035_v41  ;;  %23151 = vmatmul.mubr.msk.bf16.vlgmr.msra.gmra.mrb[0].mxu1 %vm339_vm1, %v25975_v10  ;;  %v26123_v41 = vcombine.high %v26107_v33, %v26107_v33 }
  0xd3   : > { %3652 = vrot.lane.b32.xlu0 %v25636_v38, %s25429_s9  ;;  %v1961_v36 = vpop.permute.xlu1 %1960  ;;  %2208 = vmatprep.mubr.bf16.mxu0 %v31425_v3  ;;  %v2041_v47 = vsel %vm343_vm0, %v2001_v43, 0  ;;  %v26126_v43 = vrot.slane %v4386_v26, %v25510_v6 }
  0xd4   : > { %v2002_v45 = vsel %vm1994_vm3, %v1959_v32, %v1961_v36  ;;  %2249 = vmatprep.mubr.bf16.mxu1 %v31425_v3 }
  0xd5   : > { %v1963_v34 = vpop.permute.xlu0 %1962  ;;  %3654 = vrot.lane.b32.xlu1 %v25648_v40, %s25429_s9  ;;  %23154 = vmatprep.subr.msk.bf16.mxu1 %vm343_vm0, %v2002_v45 }
  0xd6   : > { %v2003_v49 = vsel %vm1994_vm3, %v1961_v36, %v1963_v34  ;;  %2218 = vmatpush1.bf16.msra.mxu1 %v2041_v47  ;;  %v4341_v36 = vld [vmem:[%s25515_s28 + $0x18] sm:$0xff] }
  0xd7   : > { %3656 = vrot.lane.b32.xlu0 %v25667_v44, %s25429_s9  ;;  %v1965_v38 = vpop.permute.xlu1 %1964  ;;  %v2047_v40 = vsel %vm343_vm0, %v2003_v49, 0  ;;  %v26138_v49 = vcombine.high %v26126_v43, %v26126_v43 }
  0xd8   : > { %v2004_v51 = vsel %vm1994_vm3, %v1963_v34, %v1965_v38  ;;  %23153 = vmatmul.mubr.msk.bf16.vlgmr.msra.gmra.mrb[4].mxu0 %vm339_vm1, %v25975_v10 }
  0xd9   : > { %v1967_v54 = vpop.permute.xlu0 %1966  ;;  %3658 = vrot.lane.b32.xlu1 %v25653_v42, %s25429_s9  ;;  %23156 = vmatprep.subr.msk.bf16.mxu0 %vm343_vm0, %v2004_v51  ;;  %v4403_v51 = vcombine.high %v4341_v36, %v4341_v36 }
  0xda   : > { %v2005_v55 = vsel %vm1994_vm3, %v1965_v38, %v1967_v54  ;;  %2259 = vmatpush1.bf16.msra.mxu0 %v2047_v40  ;;  %23155 = vmatmul.mubr.msk.bf16.vlgmr.msra.gmra.mrb[4].mxu1 %vm339_vm1, %v25975_v10  ;;  %v26141_v38 = vrot.slane %v4341_v36, %v25510_v6 }
  0xdb   : > { %3660 = vrot.lane.b32.xlu0 %v25673_v46, %s25429_s9  ;;  %v1969_v44 = vpop.permute.xlu1 %1968  ;;  %2290 = vmatprep.mubr.bf16.mxu0 %v31425_v3  ;;  %v2053_v58 = vsel %vm343_vm0, %v2005_v55, 0 }
  0xdc   : > { %v2006_v57 = vsel %vm1994_vm3, %v1967_v54, %v1969_v44  ;;  %2331 = vmatprep.mubr.bf16.mxu1 %v31425_v3 }
  0xdd   : > { %v1971_v42 = vpop.permute.xlu0 %1970  ;;  %3662 = vrot.lane.b32.xlu1 %v25685_v48, %s25429_s9  ;;  %23158 = vmatprep.subr.msk.bf16.mxu1 %vm343_vm0, %v2006_v57 }
  0xde   : > { %v2007_v59 = vsel %vm1994_vm3, %v1969_v44, %v1971_v42  ;;  %2300 = vmatpush1.bf16.msra.mxu1 %v2053_v58  ;;  %v26165_v58 = vld [vmem:[%s31422_s1 + $0xc] sm:$0xf] }
  0xdf   : > { %3664 = vrot.lane.b32.xlu0 %v25704_v52, %s25429_s9  ;;  %v1973_v46 = vpop.permute.xlu1 %1972  ;;  %v2059_v48 = vsel %vm343_vm0, %v2007_v59, 0 }
  0xe0   : > { %v2008_v61 = vsel %vm1994_vm3, %v1971_v42, %v1973_v46  ;;  %23157 = vmatmul.mubr.msk.bf16.vlgmr.msra.gmra.mrb[8].mxu0 %vm339_vm1, %v25975_v10  ;;  %v26160_v42 = vrot.slane %v4403_v51, %v25510_v6 }
  0xe1   : > { %v1975_v62 = vpop.permute.xlu0 %1974  ;;  %3666 = vrot.lane.b32.xlu1 %v25690_v50, %s25429_s9  ;;  %23160 = vmatprep.subr.msk.bf16.mxu0 %vm343_vm0, %v2008_v61 }
  0xe2   : > { %v2009_v52 = vsel %vm1994_vm3, %v1973_v46, %v1975_v62  ;;  %2341 = vmatpush1.bf16.msra.mxu0 %v2059_v48  ;;  %23159 = vmatmul.mubr.msk.bf16.vlgmr.msra.gmra.mrb[8].mxu1 %vm339_vm1, %v25975_v10 }
  0xe3   : > { %3668 = vrot.lane.b32.xlu0 %v25709_v53, %s25429_s9  ;;  %v1977_v1 = vpop.permute.xlu1 %1976  ;;  %2372 = vmatprep.mubr.bf16.mxu0 %v31425_v3  ;;  %v2065_v4 = vsel %vm343_vm0, %v2009_v52, 0  ;;  %v26052_v53 = vrot.slane %v4352_v0, %v25510_v6  ;;  %v26180_v0 = vcombine.high %v26160_v42, %v26160_v42  ;;  %v26183_v52 = vrot.slane %v4342_v60, %v25510_v6 }
  0xe4   : > { %v2010_v50 = vsel %vm1994_vm3, %v1975_v62, %v1977_v1  ;;  %2413 = vmatprep.mubr.bf16.mxu1 %v31425_v3 }
  0xe5   : > { %v1979_v2 = vpop.permute.xlu0 %1978  ;;  %3670 = vrot.lane.b32.xlu1 %v25737_v56, %s25429_s9  ;;  %23162 = vmatprep.subr.msk.bf16.mxu1 %vm343_vm0, %v2010_v50  ;;  %v26067_v12 = vcombine.high %v26052_v53, %v26052_v53 }
  0xe6   : > { %v2011_v7 = vsel %vm1994_vm3, %v1977_v1, %v1979_v2  ;;  %2382 = vmatpush1.bf16.msra.mxu1 %v2065_v4  ;;  %v4420_v1 = vcombine.high %v4342_v60, %v4342_v60 }
  0xe7   : > { %4461 = vrot.lane.b32.xlu0 %v26033_v63, %s25430_s17  ;;  %v1981_v56 = vpop.permute.xlu1 %1980  ;;  %v2071_v13 = vsel %vm343_vm0, %v2011_v7, 0 }
  0xe8   : > { %v2012_v14 = vsel %vm1994_vm3, %v1979_v2, %v1981_v56  ;;  %23161 = vmatmul.mubr.msk.bf16.vlgmr.msra.gmra.mrb[12].mxu0 %vm339_vm1, %v25975_v10 }
  0xe9   : > { %v1983_v8 = vpop.permute.xlu0 %1982  ;;  %4463 = vrot.lane.b32.xlu1 %v26049_v5, %s25430_s17  ;;  %23164 = vmatprep.subr.msk.bf16.mxu0 %vm343_vm0, %v2012_v14  ;;  %v26201_v14 = vrot.slane %v4420_v1, %v25510_v6 }
  0xea   : > { %v2013_v19 = vsel %vm1994_vm3, %v1981_v56, %v1983_v8  ;;  %2423 = vmatpush1.bf16.msra.mxu0 %v2071_v13  ;;  %23163 = vmatmul.mubr.msk.bf16.vlgmr.msra.gmra.mrb[12].mxu1 %vm339_vm1, %v25975_v10  ;;  %v26198_v56 = vcombine.high %v26183_v52, %v26183_v52  ;;  %v4343_v13 = vld [vmem:[%s25515_s28 + $0x28] sm:$0xff] }
  0xeb   : > { %4465 = vrot.lane.b32.xlu0 %v26052_v53, %s25430_s17  ;;  %v1985_v20 = vpop.permute.xlu1 %1984  ;;  %2454 = vmatprep.mubr.bf16.mxu0 %v31425_v3  ;;  %v2077_v17 = vsel %vm343_vm0, %v2013_v19, 0 }
  0xec   : > { %v2014_v21 = vsel %vm1994_vm3, %v1983_v8, %v1985_v20  ;;  %2495 = vmatprep.mubr.bf16.mxu1 %v31425_v3 }
  0xed   : > { %v1987_v11 = vpop.permute.xlu0 %1986  ;;  %4467 = vrot.lane.b32.xlu1 %v26067_v12, %s25430_s17  ;;  %23166 = vmatprep.subr.msk.bf16.mxu1 %vm343_vm0, %v2014_v21 }
  0xee   : > { %v2015_v25 = vsel %vm1994_vm3, %v1985_v20, %v1987_v11  ;;  %2464 = vmatpush1.bf16.msra.mxu1 %v2077_v17  ;;  %v26220_v17 = vrot.slane %v4343_v13, %v25510_v6 }
  0xef   : > { %4469 = vrot.lane.b32.xlu0 %v26070_v18, %s25430_s17  ;;  %v1989_v22 = vpop.permute.xlu1 %1988  ;;  %v2083_v24 = vsel %vm343_vm0, %v2015_v25, 0  ;;  %v4437_v25 = vcombine.high %v4343_v13, %v4343_v13 }
  0xf0   : > { %v2016_v29 = vsel %vm1994_vm3, %v1987_v11, %v1989_v22  ;;  %23165 = vmatmul.mubr.msk.bf16.vlgmr.msra.gmra.mrb[16].mxu0 %vm339_vm1, %v25975_v10  ;;  %v26217_v11 = vcombine.high %v26201_v14, %v26201_v14  ;;  %v26235_v26 = vcombine.high %v26220_v17, %v26220_v17 }
  0xf1   : > { %v1991_v31 = vpop.permute.xlu0 %1990  ;;  %4471 = vrot.lane.b32.xlu1 %v26086_v23, %s25430_s17  ;;  %23168 = vmatprep.subr.msk.bf16.mxu0 %vm343_vm0, %v2016_v29 }
  0xf2   : > { %v2017_v35 = vsel %vm1994_vm3, %v1989_v22, %v1991_v31  ;;  %2505 = vmatpush1.bf16.msra.mxu0 %v2083_v24  ;;  %23167 = vmatmul.mubr.msk.bf16.vlgmr.msra.gmra.mrb[16].mxu1 %vm339_vm1, %v25975_v10 }
  0xf3   : > { %4473 = vrot.lane.b32.xlu0 %v26089_v15, %s25430_s17  ;;  %v1993_v30 = vpop.permute.xlu1 %1992  ;;  %2536 = vmatprep.mubr.bf16.mxu0 %v31425_v3  ;;  %v2089_v32 = vsel %vm343_vm0, %v2017_v35, 0  ;;  %v26238_v35 = vrot.slane %v4437_v25, %v25510_v6 }
  0xf4   : > { %v2018_v37 = vsel %vm1994_vm3, %v1991_v31, %v1993_v30  ;;  %2577 = vmatprep.mubr.bf16.mxu1 %v31425_v3 }
  0xf5   : > { %v2784_v39 = vpop.permute.xlu0 %2783  ;;  %4475 = vrot.lane.b32.xlu1 %v26104_v28, %s25430_s17  ;;  %23170 = vmatprep.subr.msk.bf16.mxu1 %vm343_vm0, %v2018_v37 }
  0xf6   : > { %2546 = vmatpush1.bf16.msra.mxu1 %v2089_v32 }
  0xf7   : > { %4477 = vrot.lane.b32.xlu0 %v26107_v33, %s25430_s17  ;;  %v2786_v45 = vpop.permute.xlu1 %2785 }
  0xf8   : > { %v2834_v34 = vsel %vm2833_vm4, %v2784_v39, %v2786_v45  ;;  %23169 = vmatmul.mubr.msk.bf16.vlgmr.msra.gmra.mrb[20].mxu0 %vm339_vm1, %v25975_v10 }
  0xf9   : > { %v2788_v47 = vpop.permute.xlu0 %2787  ;;  %4479 = vrot.lane.b32.xlu1 %v26123_v41, %s25430_s17  ;;  %2965 = vmatprep.mubr.bf16.mxu0 %v31425_v3  ;;  %v2862_v55 = vsel %vm343_vm0, %v2834_v34, 0 }
  0xfa   : > { %v2835_v54 = vsel %vm2833_vm4, %v2786_v45, %v2788_v47  ;;  %23171 = vmatmul.mubr.msk.bf16.vlgmr.msra.gmra.mrb[20].mxu1 %vm339_vm1, %v25975_v10  ;;  %v26157_v10 = vcombine.high %v26141_v38, %v26141_v38  ;;  %v26253_v45 = vcombine.high %v26238_v35, %v26238_v35 }
  0xfb   : > { %4481 = vrot.lane.b32.xlu0 %v26126_v43, %s25430_s17  ;;  %v2790_v40 = vpop.permute.xlu1 %2789  ;;  %23174 = vmatprep.subr.msk.bf16.mxu0 %vm343_vm0, %v2835_v54 }
  0xfc   : > { %v2836_v44 = vsel %vm2833_vm4, %v2788_v47, %v2790_v40  ;;  %2934 = vmatpush1.bf16.msra.mxu0 %v2862_v55  ;;  %3006 = vmatprep.mubr.bf16.mxu1 %v31425_v3 }
  0xfd   : > { %v2792_v57 = vpop.permute.xlu0 %2791  ;;  %4483 = vrot.lane.b32.xlu1 %v26138_v49, %s25430_s17  ;;  %v2868_v61 = vsel %vm343_vm0, %v2836_v44, 0 }
  0xfe   : > { %v2837_v59 = vsel %vm2833_vm4, %v2790_v40, %v2792_v57  ;;  %v26263_v40 = vld.sshfl [vmem:[%s25515_s28 + $0x30] sm:$0x3 pattern:$0x76325410] }
  0xff   : > { %4485 = vrot.lane.b32.xlu0 %v26141_v38, %s25430_s17  ;;  %v2794_v46 = vpop.permute.xlu1 %2793  ;;  %23176 = vmatprep.subr.msk.bf16.mxu1 %vm343_vm0, %v2837_v59 }
 0x100   : > { %v2838_v62 = vsel %vm2833_vm4, %v2792_v57, %v2794_v46  ;;  %2975 = vmatpush1.bf16.msra.mxu1 %v2868_v61  ;;  %23175 = vmatmul.mubr.msk.bf16.vlgmr.msra.gmra.mrb[0].mxu0 %vm339_vm1, %v26165_v58 }
 0x101   : > { %v2796_v48 = vpop.permute.xlu0 %2795  ;;  %4487 = vrot.lane.b32.xlu1 %v26157_v10, %s25430_s17  ;;  %3047 = vmatprep.mubr.bf16.mxu0 %v31425_v3  ;;  %v2874_v4 = vsel %vm343_vm0, %v2838_v62, 0 }
 0x102   : > { %v2839_v50 = vsel %vm2833_vm4, %v2794_v46, %v2796_v48 }
 0x103   : > { %4489 = vrot.lane.b32.xlu0 %v26160_v42, %s25430_s17  ;;  %v2798_v2 = vpop.permute.xlu1 %2797  ;;  %23178 = vmatprep.subr.msk.bf16.mxu0 %vm343_vm0, %v2839_v50 }
 0x104   : > { %v2840_v7 = vsel %vm2833_vm4, %v2796_v48, %v2798_v2  ;;  %3016 = vmatpush1.bf16.msra.mxu0 %v2874_v4  ;;  %23177 = vmatmul.mubr.msk.bf16.vlgmr.msra.gmra.mrb[0].mxu1 %vm339_vm1, %v26165_v58 }
 0x105   : > { %v2800_v9 = vpop.permute.xlu0 %2799  ;;  %4491 = vrot.lane.b32.xlu1 %v26180_v0, %s25430_s17  ;;  %3088 = vmatprep.mubr.bf16.mxu1 %v31425_v3  ;;  %v2880_v19 = vsel %vm343_vm0, %v2840_v7, 0 }
 0x106   : > { %v2841_v8 = vsel %vm2833_vm4, %v2798_v2, %v2800_v9 }
 0x107   : > { %4493 = vrot.lane.b32.xlu0 %v26183_v52, %s25430_s17  ;;  %v2802_v16 = vpop.permute.xlu1 %2801  ;;  %23180 = vmatprep.subr.msk.bf16.mxu1 %vm343_vm0, %v2841_v8 }
 0x108   : > { %v2842_v20 = vsel %vm2833_vm4, %v2800_v9, %v2802_v16  ;;  %3057 = vmatpush1.bf16.msra.mxu1 %v2880_v19  ;;  %23179 = vmatmul.mubr.msk.bf16.vlgmr.msra.gmra.mrb[4].mxu0 %vm339_vm1, %v26165_v58 }
 0x109   : > { %v2804_v21 = vpop.permute.xlu0 %2803  ;;  %4495 = vrot.lane.b32.xlu1 %v26198_v56, %s25430_s17  ;;  %3129 = vmatprep.mubr.bf16.mxu0 %v31425_v3  ;;  %v2886_v29 = vsel %vm343_vm0, %v2842_v20, 0 }
 0x10a   : > { %v2843_v27 = vsel %vm2833_vm4, %v2802_v16, %v2804_v21 }
 0x10b   : > { %4497 = vrot.lane.b32.xlu0 %v26201_v14, %s25430_s17  ;;  %v2806_v22 = vpop.permute.xlu1 %2805  ;;  %23182 = vmatprep.subr.msk.bf16.mxu0 %vm343_vm0, %v2843_v27 }
 0x10c   : > { %v2844_v31 = vsel %vm2833_vm4, %v2804_v21, %v2806_v22  ;;  %3098 = vmatpush1.bf16.msra.mxu0 %v2886_v29  ;;  %23181 = vmatmul.mubr.msk.bf16.vlgmr.msra.gmra.mrb[4].mxu1 %vm339_vm1, %v26165_v58 }
 0x10d   : > { %v2808_v24 = vpop.permute.xlu0 %2807  ;;  %4499 = vrot.lane.b32.xlu1 %v26217_v11, %s25430_s17  ;;  %3170 = vmatprep.mubr.bf16.mxu1 %v31425_v3  ;;  %v2892_v39 = vsel %vm343_vm0, %v2844_v31, 0 }
 0x10e   : > { %v2845_v30 = vsel %vm2833_vm4, %v2806_v22, %v2808_v24 }
 0x10f   : > { %4501 = vrot.lane.b32.xlu0 %v26220_v17, %s25430_s17  ;;  %v2810_v37 = vpop.permute.xlu1 %2809  ;;  %23184 = vmatprep.subr.msk.bf16.mxu1 %vm343_vm0, %v2845_v30 }
 0x110   : > { %v2846_v32 = vsel %vm2833_vm4, %v2808_v24, %v2810_v37  ;;  %3139 = vmatpush1.bf16.msra.mxu1 %v2892_v39  ;;  %23183 = vmatmul.mubr.msk.bf16.vlgmr.msra.gmra.mrb[8].mxu0 %vm339_vm1, %v26165_v58 }
 0x111   : > { %v2812_v36 = vpop.permute.xlu0 %2811  ;;  %4503 = vrot.lane.b32.xlu1 %v26235_v26, %s25430_s17  ;;  %3211 = vmatprep.mubr.bf16.mxu0 %v31425_v3  ;;  %v2898_v51 = vsel %vm343_vm0, %v2846_v32, 0 }
 0x112   : > { %v2847_v34 = vsel %vm2833_vm4, %v2810_v37, %v2812_v36 }
 0x113   : > { %4505 = vrot.lane.b32.xlu0 %v26238_v35, %s25430_s17  ;;  %v2814_v47 = vpop.permute.xlu1 %2813  ;;  %23186 = vmatprep.subr.msk.bf16.mxu0 %vm343_vm0, %v2847_v34 }
 0x114   : > { %v2848_v54 = vsel %vm2833_vm4, %v2812_v36, %v2814_v47  ;;  %3180 = vmatpush1.bf16.msra.mxu0 %v2898_v51  ;;  %23185 = vmatmul.mubr.msk.bf16.vlgmr.msra.gmra.mrb[8].mxu1 %vm339_vm1, %v26165_v58 }
 0x115   : > { %v2816_v55 = vpop.permute.xlu0 %2815  ;;  %4507 = vrot.lane.b32.xlu1 %v26253_v45, %s25430_s17  ;;  %3252 = vmatprep.mubr.bf16.mxu1 %v31425_v3  ;;  %v2904_v59 = vsel %vm343_vm0, %v2848_v54, 0 }
 0x116   : > { %v2849_v44 = vsel %vm2833_vm4, %v2814_v47, %v2816_v55 }
 0x117   : > { %4509 = vrot.lane.b32.xlu0 %v26263_v40, %s25430_s17  ;;  %v2818_v57 = vpop.permute.xlu1 %2817  ;;  %23188 = vmatprep.subr.msk.bf16.mxu1 %vm343_vm0, %v2849_v44 }
 0x118   : > { %v2850_v60 = vsel %vm2833_vm4, %v2816_v55, %v2818_v57  ;;  %3221 = vmatpush1.bf16.msra.mxu1 %v2904_v59  ;;  %23187 = vmatmul.mubr.msk.bf16.vlgmr.msra.gmra.mrb[12].mxu0 %vm339_vm1, %v26165_v58 }
 0x119   : > { %v2820_v46 = vpop.permute.xlu0 %2819  ;;  %5300 = vrot.lane.b32.xlu1 %v26033_v63, %s25431_s24  ;;  %3293 = vmatprep.mubr.bf16.mxu0 %v31425_v3  ;;  %v2910_v48 = vsel %vm343_vm0, %v2850_v60, 0 }
 0x11a   : > { %v2851_v61 = vsel %vm2833_vm4, %v2818_v57, %v2820_v46 }
 0x11b   : > { %5302 = vrot.lane.b32.xlu0 %v26049_v5, %s25431_s24  ;;  %v2822_v62 = vpop.permute.xlu1 %2821  ;;  %23190 = vmatprep.subr.msk.bf16.mxu0 %vm343_vm0, %v2851_v61 }
 0x11c   : > { %v2852_v1 = vsel %vm2833_vm4, %v2820_v46, %v2822_v62  ;;  %3262 = vmatpush1.bf16.msra.mxu0 %v2910_v48  ;;  %23189 = vmatmul.mubr.msk.bf16.vlgmr.msra.gmra.mrb[12].mxu1 %vm339_vm1, %v26165_v58 }
 0x11d   : > { %v2824_v50 = vpop.permute.xlu0 %2823  ;;  %5304 = vrot.lane.b32.xlu1 %v26052_v53, %s25431_s24  ;;  %3334 = vmatprep.mubr.bf16.mxu1 %v31425_v3  ;;  %v2916_v7 = vsel %vm343_vm0, %v2852_v1, 0 }
 0x11e   : > { %v2853_v2 = vsel %vm2833_vm4, %v2822_v62, %v2824_v50 }
 0x11f   : > { %5306 = vrot.lane.b32.xlu0 %v26067_v12, %s25431_s24  ;;  %v2826_v4 = vpop.permute.xlu1 %2825  ;;  %23192 = vmatprep.subr.msk.bf16.mxu1 %vm343_vm0, %v2853_v2 }
 0x120   : > { %v2854_v9 = vsel %vm2833_vm4, %v2824_v50, %v2826_v4  ;;  %3303 = vmatpush1.bf16.msra.mxu1 %v2916_v7  ;;  %23191 = vmatmul.mubr.msk.bf16.vlgmr.msra.gmra.mrb[16].mxu0 %vm339_vm1, %v26165_v58 }
 0x121   : > { %v2828_v8 = vpop.permute.xlu0 %2827  ;;  %5308 = vrot.lane.b32.xlu1 %v26070_v18, %s25431_s24  ;;  %3375 = vmatprep.mubr.bf16.mxu0 %v31425_v3  ;;  %v2922_v19 = vsel %vm343_vm0, %v2854_v9, 0 }
 0x122   : > { %v2855_v13 = vsel %vm2833_vm4, %v2826_v4, %v2828_v8 }
 0x123   : > { %5310 = vrot.lane.b32.xlu0 %v26086_v23, %s25431_s24  ;;  %v2830_v16 = vpop.permute.xlu1 %2829  ;;  %23194 = vmatprep.subr.msk.bf16.mxu0 %vm343_vm0, %v2855_v13 }
 0x124   : > { %v2856_v20 = vsel %vm2833_vm4, %v2828_v8, %v2830_v16  ;;  %3344 = vmatpush1.bf16.msra.mxu0 %v2922_v19  ;;  %23193 = vmatmul.mubr.msk.bf16.vlgmr.msra.gmra.mrb[16].mxu1 %vm339_vm1, %v26165_v58 }
 0x125   : > { %v2832_v21 = vpop.permute.xlu0 %2831  ;;  %5312 = vrot.lane.b32.xlu1 %v26089_v15, %s25431_s24  ;;  %3416 = vmatprep.mubr.bf16.mxu1 %v31425_v3  ;;  %v2928_v22 = vsel %vm343_vm0, %v2856_v20, 0 }
 0x126   : > { %v2857_v25 = vsel %vm2833_vm4, %v2830_v16, %v2832_v21 }
 0x127   : > { %5314 = vrot.lane.b32.xlu0 %v26104_v28, %s25431_s24  ;;  %v3623_v27 = vpop.permute.xlu1 %3622  ;;  %23196 = vmatprep.subr.msk.bf16.mxu1 %vm343_vm0, %v2857_v25 }
 0x128   : > { %3385 = vmatpush1.bf16.msra.mxu1 %v2928_v22  ;;  %23195 = vmatmul.mubr.msk.bf16.vlgmr.msra.gmra.mrb[20].mxu0 %vm339_vm1, %v26165_v58 }
 0x129   : > { %v3625_v29 = vpop.permute.xlu0 %3624  ;;  %5316 = vrot.lane.b32.xlu1 %v26107_v33, %s25431_s24  ;;  %3804 = vmatprep.mubr.bf16.mxu0 %v31425_v3 }
 0x12a   : > { %v3673_v31 = vsel %vm3672_vm5, %v3623_v27, %v3625_v29 }
 0x12b   : > { %5318 = vrot.lane.b32.xlu0 %v26123_v41, %s25431_s24  ;;  %v3627_v24 = vpop.permute.xlu1 %3626  ;;  %v3701_v39 = vsel %vm343_vm0, %v3673_v31, 0 }
 0x12c   : > { %v3674_v30 = vsel %vm3672_vm5, %v3625_v29, %v3627_v24  ;;  %23197 = vmatmul.mubr.msk.bf16.vlgmr.msra.gmra.mrb[20].mxu1 %vm339_vm1, %v26165_v58  ;;  %v26341_v58 = vld [vmem:[%s31422_s1 + $0x10] sm:$0xf] }
 0x12d   : > { %v3629_v37 = vpop.permute.xlu0 %3628  ;;  %5320 = vrot.lane.b32.xlu1 %v26126_v43, %s25431_s24  ;;  %23200 = vmatprep.subr.msk.bf16.mxu0 %vm343_vm0, %v3674_v30 }
 0x12e   : > { %v3675_v32 = vsel %vm3672_vm5, %v3627_v24, %v3629_v37  ;;  %3773 = vmatpush1.bf16.msra.mxu0 %v3701_v39  ;;  %3845 = vmatprep.mubr.bf16.mxu1 %v31425_v3 }
 0x12f   : > { %5322 = vrot.lane.b32.xlu0 %v26138_v49, %s25431_s24  ;;  %v3631_v36 = vpop.permute.xlu1 %3630  ;;  %v3707_v51 = vsel %vm343_vm0, %v3675_v32, 0 }
 0x130   : > { %v3676_v34 = vsel %vm3672_vm5, %v3629_v37, %v3631_v36 }
 0x131   : > { %v3633_v47 = vpop.permute.xlu0 %3632  ;;  %5324 = vrot.lane.b32.xlu1 %v26141_v38, %s25431_s24  ;;  %23202 = vmatprep.subr.msk.bf16.mxu1 %vm343_vm0, %v3676_v34 }
 0x132   : > { %v3677_v54 = vsel %vm3672_vm5, %v3631_v36, %v3633_v47  ;;  %3814 = vmatpush1.bf16.msra.mxu1 %v3707_v51  ;;  %23201 = vmatmul.mubr.msk.bf16.vlgmr.msra.gmra.mrb[0].mxu0 %vm339_vm1, %v26341_v58 }
 0x133   : > { %5326 = vrot.lane.b32.xlu0 %v26157_v10, %s25431_s24  ;;  %v3635_v55 = vpop.permute.xlu1 %3634  ;;  %3886 = vmatprep.mubr.bf16.mxu0 %v31425_v3  ;;  %v3713_v59 = vsel %vm343_vm0, %v3677_v54, 0 }
 0x134   : > { %v3678_v44 = vsel %vm3672_vm5, %v3633_v47, %v3635_v55 }
 0x135   : > { %v3637_v57 = vpop.permute.xlu0 %3636  ;;  %5328 = vrot.lane.b32.xlu1 %v26160_v42, %s25431_s24  ;;  %23204 = vmatprep.subr.msk.bf16.mxu0 %vm343_vm0, %v3678_v44 }
 0x136   : > { %v3679_v60 = vsel %vm3672_vm5, %v3635_v55, %v3637_v57  ;;  %3855 = vmatpush1.bf16.msra.mxu0 %v3713_v59  ;;  %23203 = vmatmul.mubr.msk.bf16.vlgmr.msra.gmra.mrb[0].mxu1 %vm339_vm1, %v26341_v58 }
 0x137   : > { %5330 = vrot.lane.b32.xlu0 %v26180_v0, %s25431_s24  ;;  %v3639_v46 = vpop.permute.xlu1 %3638  ;;  %3927 = vmatprep.mubr.bf16.mxu1 %v31425_v3  ;;  %v3719_v48 = vsel %vm343_vm0, %v3679_v60, 0 }
 0x138   : > { %v3680_v61 = vsel %vm3672_vm5, %v3637_v57, %v3639_v46 }
 0x139   : > { %v3641_v62 = vpop.permute.xlu0 %3640  ;;  %5332 = vrot.lane.b32.xlu1 %v26183_v52, %s25431_s24  ;;  %23206 = vmatprep.subr.msk.bf16.mxu1 %vm343_vm0, %v3680_v61 }
 0x13a   : > { %v3681_v1 = vsel %vm3672_vm5, %v3639_v46, %v3641_v62  ;;  %3896 = vmatpush1.bf16.msra.mxu1 %v3719_v48  ;;  %23205 = vmatmul.mubr.msk.bf16.vlgmr.msra.gmra.mrb[4].mxu0 %vm339_vm1, %v26341_v58 }
 0x13b   : > { %5334 = vrot.lane.b32.xlu0 %v26198_v56, %s25431_s24  ;;  %v3643_v50 = vpop.permute.xlu1 %3642  ;;  %3968 = vmatprep.mubr.bf16.mxu0 %v31425_v3  ;;  %v3725_v7 = vsel %vm343_vm0, %v3681_v1, 0 }
 0x13c   : > { %v3682_v2 = vsel %vm3672_vm5, %v3641_v62, %v3643_v50 }
 0x13d   : > { %v3645_v4 = vpop.permute.xlu0 %3644  ;;  %5336 = vrot.lane.b32.xlu1 %v26201_v14, %s25431_s24  ;;  %23208 = vmatprep.subr.msk.bf16.mxu0 %vm343_vm0, %v3682_v2 }
 0x13e   : > { %v3683_v9 = vsel %vm3672_vm5, %v3643_v50, %v3645_v4  ;;  %3937 = vmatpush1.bf16.msra.mxu0 %v3725_v7  ;;  %23207 = vmatmul.mubr.msk.bf16.vlgmr.msra.gmra.mrb[4].mxu1 %vm339_vm1, %v26341_v58 }
 0x13f   : > { %5338 = vrot.lane.b32.xlu0 %v26217_v11, %s25431_s24  ;;  %v3647_v8 = vpop.permute.xlu1 %3646  ;;  %4009 = vmatprep.mubr.bf16.mxu1 %v31425_v3  ;;  %v3731_v19 = vsel %vm343_vm0, %v3683_v9, 0 }
 0x140   : > { %v3684_v13 = vsel %vm3672_vm5, %v3645_v4, %v3647_v8 }
 0x141   : > { %v3649_v16 = vpop.permute.xlu0 %3648  ;;  %5340 = vrot.lane.b32.xlu1 %v26220_v17, %s25431_s24  ;;  %23210 = vmatprep.subr.msk.bf16.mxu1 %vm343_vm0, %v3684_v13 }
 0x142   : > { %v3685_v20 = vsel %vm3672_vm5, %v3647_v8, %v3649_v16  ;;  %3978 = vmatpush1.bf16.msra.mxu1 %v3731_v19  ;;  %23209 = vmatmul.mubr.msk.bf16.vlgmr.msra.gmra.mrb[8].mxu0 %vm339_vm1, %v26341_v58 }
 0x143   : > { %5342 = vrot.lane.b32.xlu0 %v26235_v26, %s25431_s24  ;;  %v3651_v21 = vpop.permute.xlu1 %3650  ;;  %4050 = vmatprep.mubr.bf16.mxu0 %v31425_v3  ;;  %v3737_v22 = vsel %vm343_vm0, %v3685_v20, 0 }
 0x144   : > { %v3686_v25 = vsel %vm3672_vm5, %v3649_v16, %v3651_v21 }
 0x145   : > { %v3653_v27 = vpop.permute.xlu0 %3652  ;;  %5344 = vrot.lane.b32.xlu1 %v26238_v35, %s25431_s24  ;;  %23212 = vmatprep.subr.msk.bf16.mxu0 %vm343_vm0, %v3686_v25 }
 0x146   : > { %v3687_v29 = vsel %vm3672_vm5, %v3651_v21, %v3653_v27  ;;  %4019 = vmatpush1.bf16.msra.mxu0 %v3737_v22  ;;  %23211 = vmatmul.mubr.msk.bf16.vlgmr.msra.gmra.mrb[8].mxu1 %vm339_vm1, %v26341_v58 }
 0x147   : > { %5346 = vrot.lane.b32.xlu0 %v26253_v45, %s25431_s24  ;;  %v3655_v31 = vpop.permute.xlu1 %3654  ;;  %4091 = vmatprep.mubr.bf16.mxu1 %v31425_v3  ;;  %v3743_v37 = vsel %vm343_vm0, %v3687_v29, 0 }
 0x148   : > { %v3688_v24 = vsel %vm3672_vm5, %v3653_v27, %v3655_v31 }
 0x149   : > { %v3657_v30 = vpop.permute.xlu0 %3656  ;;  %5348 = vrot.lane.b32.xlu1 %v26263_v40, %s25431_s24  ;;  %23214 = vmatprep.subr.msk.bf16.mxu1 %vm343_vm0, %v3688_v24  ;;  %v6855_v24 = vld [vmem:[%s25515_s28] sm:$0xff] }
 0x14a   : > { %v3689_v39 = vsel %vm3672_vm5, %v3655_v31, %v3657_v30  ;;  %4060 = vmatpush1.bf16.msra.mxu1 %v3743_v37  ;;  %23213 = vmatmul.mubr.msk.bf16.vlgmr.msra.gmra.mrb[12].mxu0 %vm339_vm1, %v26341_v58 }
 0x14b   : > { %6139 = vrot.lane.b32.xlu0 %v26033_v63, %s25432_s27  ;;  %v3659_v32 = vpop.permute.xlu1 %3658  ;;  %4132 = vmatprep.mubr.bf16.mxu0 %v31425_v3  ;;  %v3749_v47 = vsel %vm343_vm0, %v3689_v39, 0  ;;  %v6876_v39 = vrot.slane %v6855_v24, %v25510_v6 }
 0x14c   : > { %v3690_v36 = vsel %vm3672_vm5, %v3657_v30, %v3659_v32 }
 0x14d   : > { %v3661_v34 = vpop.permute.xlu0 %3660  ;;  %6141 = vrot.lane.b32.xlu1 %v26049_v5, %s25432_s27  ;;  %23216 = vmatprep.subr.msk.bf16.mxu0 %vm343_vm0, %v3690_v36 }
 0x14e   : > { %v3691_v51 = vsel %vm3672_vm5, %v3659_v32, %v3661_v34  ;;  %4101 = vmatpush1.bf16.msra.mxu0 %v3749_v47  ;;  %23215 = vmatmul.mubr.msk.bf16.vlgmr.msra.gmra.mrb[12].mxu1 %vm339_vm1, %v26341_v58  ;;  %v6869_v32 = vcombine.high %v6855_v24, %v6855_v24  ;;  %v6859_v24 = vld [vmem:[%s25515_s28 + $0x20] sm:$0xff] }
 0x14f   : > { %6143 = vrot.lane.b32.xlu0 %v26052_v53, %s25432_s27  ;;  %v3663_v63 = vpop.permute.xlu1 %3662  ;;  %4173 = vmatprep.mubr.bf16.mxu1 %v31425_v3  ;;  %v3755_v5 = vsel %vm343_vm0, %v3691_v51, 0  ;;  %v6884_v51 = vcombine.high %v6876_v39, %v6876_v39 }
 0x150   : > { %v3692_v54 = vsel %vm3672_vm5, %v3661_v34, %v3663_v63 }
 0x151   : > { %v3665_v55 = vpop.permute.xlu0 %3664  ;;  %6145 = vrot.lane.b32.xlu1 %v26067_v12, %s25432_s27  ;;  %23218 = vmatprep.subr.msk.bf16.mxu1 %vm343_vm0, %v3692_v54 }
 0x152   : > { %v3693_v44 = vsel %vm3672_vm5, %v3663_v63, %v3665_v55  ;;  %4142 = vmatpush1.bf16.msra.mxu1 %v3755_v5  ;;  %23217 = vmatmul.mubr.msk.bf16.vlgmr.msra.gmra.mrb[16].mxu0 %vm339_vm1, %v26341_v58  ;;  %v6883_v63 = vrot.slane %v6869_v32, %v25510_v6  ;;  %v6944_v32 = vrot.slane %v6859_v24, %v25510_v6 }
 0x153   : > { %6147 = vrot.lane.b32.xlu0 %v26070_v18, %s25432_s27  ;;  %v3667_v53 = vpop.permute.xlu1 %3666  ;;  %4214 = vmatprep.mubr.bf16.mxu0 %v31425_v3  ;;  %v3761_v12 = vsel %vm343_vm0, %v3693_v44, 0 }
 0x154   : > { %v3694_v57 = vsel %vm3672_vm5, %v3665_v55, %v3667_v53 }
 0x155   : > { %v3669_v59 = vpop.permute.xlu0 %3668  ;;  %6149 = vrot.lane.b32.xlu1 %v26086_v23, %s25432_s27  ;;  %23220 = vmatprep.subr.msk.bf16.mxu0 %vm343_vm0, %v3694_v57 }
 0x156   : > { %v3695_v60 = vsel %vm3672_vm5, %v3667_v53, %v3669_v59  ;;  %4183 = vmatpush1.bf16.msra.mxu0 %v3761_v12  ;;  %23219 = vmatmul.mubr.msk.bf16.vlgmr.msra.gmra.mrb[16].mxu1 %vm339_vm1, %v26341_v58  ;;  %v6885_v53 = vcombine.high %v6883_v63, %v6883_v63 }
 0x157   : > { %6151 = vrot.lane.b32.xlu0 %v26089_v15, %s25432_s27  ;;  %v3671_v18 = vpop.permute.xlu1 %3670  ;;  %4255 = vmatprep.mubr.bf16.mxu1 %v31425_v3  ;;  %v3767_v23 = vsel %vm343_vm0, %v3695_v60, 0 }
 0x158   : > { %v3696_v46 = vsel %vm3672_vm5, %v3669_v59, %v3671_v18 }
 0x159   : > { %v4462_v61 = vpop.permute.xlu0 %4461  ;;  %6153 = vrot.lane.b32.xlu1 %v26104_v28, %s25432_s27  ;;  %23222 = vmatprep.subr.msk.bf16.mxu1 %vm343_vm0, %v3696_v46 }
 0x15a   : > { %4224 = vmatpush1.bf16.msra.mxu1 %v3767_v23  ;;  %23221 = vmatmul.mubr.msk.bf16.vlgmr.msra.gmra.mrb[20].mxu0 %vm339_vm1, %v26341_v58 }
 0x15b   : > { %6155 = vrot.lane.b32.xlu0 %v26107_v33, %s25432_s27  ;;  %v4464_v15 = vpop.permute.xlu1 %4463  ;;  %4643 = vmatprep.mubr.bf16.mxu0 %v31425_v3 }
 0x15c   : > { %v4512_v62 = vsel %vm4511_vm6, %v4462_v61, %v4464_v15 }
 0x15d   : > { %v4466_v48 = vpop.permute.xlu0 %4465  ;;  %6157 = vrot.lane.b32.xlu1 %v26123_v41, %s25432_s27  ;;  %v4540_v33 = vsel %vm343_vm0, %v4512_v62, 0  ;;  %v26480_v41 = vld [vmem:[%s31422_s1 + $0x14] sm:$0xf] }
 0x15e   : > { %v4513_v28 = vsel %vm4511_vm6, %v4464_v15, %v4466_v48  ;;  %23223 = vmatmul.mubr.msk.bf16.vlgmr.msra.gmra.mrb[20].mxu1 %vm339_vm1, %v26341_v58 }
 0x15f   : > { %6159 = vrot.lane.b32.xlu0 %v26126_v43, %s25432_s27  ;;  %v4468_v1 = vpop.permute.xlu1 %4467  ;;  %23226 = vmatprep.subr.msk.bf16.mxu0 %vm343_vm0, %v4513_v28 }
 0x160   : > { %v4514_v50 = vsel %vm4511_vm6, %v4466_v48, %v4468_v1  ;;  %4612 = vmatpush1.bf16.msra.mxu0 %v4540_v33  ;;  %4684 = vmatprep.mubr.bf16.mxu1 %v31425_v3  ;;  %v6857_v48 = vld [vmem:[%s25515_s28 + $0x10] sm:$0xff] }
 0x161   : > { %v4470_v2 = vpop.permute.xlu0 %4469  ;;  %6161 = vrot.lane.b32.xlu1 %v26138_v49, %s25432_s27  ;;  %v4546_v4 = vsel %vm343_vm0, %v4514_v50, 0 }
 0x162   : > { %v4515_v43 = vsel %vm4511_vm6, %v4468_v1, %v4470_v2 }
 0x163   : > { %6163 = vrot.lane.b32.xlu0 %v26141_v38, %s25432_s27  ;;  %v4472_v58 = vpop.permute.xlu1 %4471  ;;  %23228 = vmatprep.subr.msk.bf16.mxu1 %vm343_vm0, %v4515_v43  ;;  %v6910_v43 = vrot.slane %v6857_v48, %v25510_v6 }
 0x164   : > { %v4516_v7 = vsel %vm4511_vm6, %v4470_v2, %v4472_v58  ;;  %4653 = vmatpush1.bf16.msra.mxu1 %v4546_v4  ;;  %23227 = vmatmul.mubr.msk.bf16.vlgmr.msra.gmra.mrb[0].mxu0 %vm339_vm1, %v26480_v41 }
 0x165   : > { %v4474_v49 = vpop.permute.xlu0 %4473  ;;  %6165 = vrot.lane.b32.xlu1 %v26157_v10, %s25432_s27  ;;  %4725 = vmatprep.mubr.bf16.mxu0 %v31425_v3  ;;  %v4552_v8 = vsel %vm343_vm0, %v4516_v7, 0 }
 0x166   : > { %v4517_v9 = vsel %vm4511_vm6, %v4472_v58, %v4474_v49  ;;  %v6903_v58 = vcombine.high %v6857_v48, %v6857_v48 }
 0x167   : > { %6167 = vrot.lane.b32.xlu0 %v26160_v42, %s25432_s27  ;;  %v4476_v38 = vpop.permute.xlu1 %4475  ;;  %23230 = vmatprep.subr.msk.bf16.mxu0 %vm343_vm0, %v4517_v9 }
 0x168   : > { %v4518_v13 = vsel %vm4511_vm6, %v4474_v49, %v4476_v38  ;;  %4694 = vmatpush1.bf16.msra.mxu0 %v4552_v8  ;;  %23229 = vmatmul.mubr.msk.bf16.vlgmr.msra.gmra.mrb[0].mxu1 %vm339_vm1, %v26480_v41  ;;  %v6918_v8 = vcombine.high %v6910_v43, %v6910_v43 }
 0x169   : > { %v4478_v16 = vpop.permute.xlu0 %4477  ;;  %6169 = vrot.lane.b32.xlu1 %v26180_v0, %s25432_s27  ;;  %4766 = vmatprep.mubr.bf16.mxu1 %v31425_v3  ;;  %v4558_v19 = vsel %vm343_vm0, %v4518_v13, 0  ;;  %v6917_v13 = vrot.slane %v6903_v58, %v25510_v6 }
 0x16a   : > { %v4519_v10 = vsel %vm4511_vm6, %v4476_v38, %v4478_v16 }
 0x16b   : > { %6171 = vrot.lane.b32.xlu0 %v26183_v52, %s25432_s27  ;;  %v4480_v42 = vpop.permute.xlu1 %4479  ;;  %23232 = vmatprep.subr.msk.bf16.mxu1 %vm343_vm0, %v4519_v10 }
 0x16c   : > { %v4520_v20 = vsel %vm4511_vm6, %v4478_v16, %v4480_v42  ;;  %4735 = vmatpush1.bf16.msra.mxu1 %v4558_v19  ;;  %23231 = vmatmul.mubr.msk.bf16.vlgmr.msra.gmra.mrb[4].mxu0 %vm339_vm1, %v26480_v41  ;;  %v6858_v16 = vld [vmem:[%s25515_s28 + $0x18] sm:$0xff] }
 0x16d   : > { %v4482_v21 = vpop.permute.xlu0 %4481  ;;  %6173 = vrot.lane.b32.xlu1 %v26198_v56, %s25432_s27  ;;  %4807 = vmatprep.mubr.bf16.mxu0 %v31425_v3  ;;  %v4564_v25 = vsel %vm343_vm0, %v4520_v20, 0  ;;  %v6919_v20 = vcombine.high %v6917_v13, %v6917_v13 }
 0x16e   : > { %v4521_v0 = vsel %vm4511_vm6, %v4480_v42, %v4482_v21 }
 0x16f   : > { %6175 = vrot.lane.b32.xlu0 %v26201_v14, %s25432_s27  ;;  %v4484_v52 = vpop.permute.xlu1 %4483  ;;  %23234 = vmatprep.subr.msk.bf16.mxu0 %vm343_vm0, %v4521_v0  ;;  %v6920_v0 = vcombine.high %v6858_v16, %v6858_v16 }
 0x170   : > { %v4522_v27 = vsel %vm4511_vm6, %v4482_v21, %v4484_v52  ;;  %4776 = vmatpush1.bf16.msra.mxu0 %v4564_v25  ;;  %23233 = vmatmul.mubr.msk.bf16.vlgmr.msra.gmra.mrb[4].mxu1 %vm339_vm1, %v26480_v41  ;;  %v6927_v21 = vrot.slane %v6858_v16, %v25510_v6 }
 0x171   : > { %v4486_v56 = vpop.permute.xlu0 %4485  ;;  %6177 = vrot.lane.b32.xlu1 %v26217_v11, %s25432_s27  ;;  %4848 = vmatprep.mubr.bf16.mxu1 %v31425_v3  ;;  %v4570_v29 = vsel %vm343_vm0, %v4522_v27, 0 }
 0x172   : > { %v4523_v14 = vsel %vm4511_vm6, %v4484_v52, %v4486_v56 }
 0x173   : > { %6179 = vrot.lane.b32.xlu0 %v26220_v17, %s25432_s27  ;;  %v4488_v22 = vpop.permute.xlu1 %4487  ;;  %23236 = vmatprep.subr.msk.bf16.mxu1 %vm343_vm0, %v4523_v14 }
 0x174   : > { %v4524_v31 = vsel %vm4511_vm6, %v4486_v56, %v4488_v22  ;;  %4817 = vmatpush1.bf16.msra.mxu1 %v4570_v29  ;;  %23235 = vmatmul.mubr.msk.bf16.vlgmr.msra.gmra.mrb[8].mxu0 %vm339_vm1, %v26480_v41  ;;  %v6934_v29 = vrot.slane %v6920_v0, %v25510_v6  ;;  %v8450_v0 = vld [vmem:[%s25515_s28 + $0xe] sm:$0xff] }
 0x175   : > { %v4490_v11 = vpop.permute.xlu0 %4489  ;;  %6181 = vrot.lane.b32.xlu1 %v26235_v26, %s25432_s27  ;;  %4889 = vmatprep.mubr.bf16.mxu0 %v31425_v3  ;;  %v4576_v37 = vsel %vm343_vm0, %v4524_v31, 0 }
 0x176   : > { %v4525_v17 = vsel %vm4511_vm6, %v4488_v22, %v4490_v11  ;;  %v6935_v22 = vcombine.high %v6927_v21, %v6927_v21 }
 0x177   : > { %6183 = vrot.lane.b32.xlu0 %v26238_v35, %s25432_s27  ;;  %v4492_v30 = vpop.permute.xlu1 %4491  ;;  %23238 = vmatprep.subr.msk.bf16.mxu0 %vm343_vm0, %v4525_v17 }
 0x178   : > { %v4526_v36 = vsel %vm4511_vm6, %v4490_v11, %v4492_v30  ;;  %4858 = vmatpush1.bf16.msra.mxu0 %v4576_v37  ;;  %23237 = vmatmul.mubr.msk.bf16.vlgmr.msra.gmra.mrb[8].mxu1 %vm339_vm1, %v26480_v41 }
 0x179   : > { %v4494_v26 = vpop.permute.xlu0 %4493  ;;  %6185 = vrot.lane.b32.xlu1 %v26253_v45, %s25432_s27  ;;  %4930 = vmatprep.mubr.bf16.mxu1 %v31425_v3  ;;  %v4582_v47 = vsel %vm343_vm0, %v4526_v36, 0  ;;  %v6856_v45 = vld [vmem:[%s25515_s28 + $0x8] sm:$0xff]  ;;  %v6937_v36 = vcombine.high %v6859_v24, %v6859_v24 }
 0x17a   : > { %v4527_v35 = vsel %vm4511_vm6, %v4492_v30, %v4494_v26  ;;  %v6893_v57 = vrot.slane %v6856_v45, %v25510_v6  ;;  %v6886_v59 = vcombine.high %v6856_v45, %v6856_v45 }
 0x17b   : > { %6187 = vrot.lane.b32.xlu0 %v26263_v40, %s25432_s27  ;;  %v4496_v34 = vpop.permute.xlu1 %4495  ;;  %23240 = vmatprep.subr.msk.bf16.mxu1 %vm343_vm0, %v4527_v35 }
 0x17c   : > { %v4528_v54 = vsel %vm4511_vm6, %v4494_v26, %v4496_v34  ;;  %4899 = vmatpush1.bf16.msra.mxu1 %v4582_v47  ;;  %23239 = vmatmul.mubr.msk.bf16.vlgmr.msra.gmra.mrb[12].mxu0 %vm339_vm1, %v26480_v41  ;;  %v6901_v23 = vcombine.high %v6893_v57, %v6893_v57  ;;  %v6900_v15 = vrot.slane %v6886_v59, %v25510_v6 }
 0x17d   : > { %v4498_v55 = vpop.permute.xlu0 %4497  ;;  %6978 = vrot.lane.b32.xlu1 %v6876_v39, %s25433_s7  ;;  %4971 = vmatprep.mubr.bf16.mxu0 %v31425_v3  ;;  %v4588_v44 = vsel %vm343_vm0, %v4528_v54, 0  ;;  %v6936_v39 = vcombine.high %v6934_v29, %v6934_v29  ;;  %v6951_v54 = vrot.slane %v6937_v36, %v25510_v6  ;;  %v8451_v36 = vld [vmem:[%s25515_s28 + $0x16] sm:$0xff] }
 0x17e   : > { %v4529_v40 = vsel %vm4511_vm6, %v4496_v34, %v4498_v55  ;;  %v6902_v2 = vcombine.high %v6900_v15, %v6900_v15 }
 0x17f   : > { %6980 = vrot.lane.b32.xlu0 %v6884_v51, %s25433_s7  ;;  %v4500_v5 = vpop.permute.xlu1 %4499  ;;  %23242 = vmatprep.subr.msk.bf16.mxu0 %vm343_vm0, %v4529_v40 }
 0x180   : > { %v4530_v12 = vsel %vm4511_vm6, %v4498_v55, %v4500_v5  ;;  %4940 = vmatpush1.bf16.msra.mxu0 %v4588_v44  ;;  %23241 = vmatmul.mubr.msk.bf16.vlgmr.msra.gmra.mrb[12].mxu1 %vm339_vm1, %v26480_v41  ;;  %v6860_v55 = vld [vmem:[%s25515_s28 + $0x28] sm:$0xff] }
 0x181   : > { %v4502_v60 = vpop.permute.xlu0 %4501  ;;  %6982 = vrot.lane.b32.xlu1 %v6883_v63, %s25433_s7  ;;  %5012 = vmatprep.mubr.bf16.mxu1 %v31425_v3  ;;  %v4594_v61 = vsel %vm343_vm0, %v4530_v12, 0  ;;  %v6952_v63 = vcombine.high %v6944_v32, %v6944_v32  ;;  %v6961_v59 = vrot.slane %v6860_v55, %v25510_v6  ;;  %v6954_v12 = vcombine.high %v6860_v55, %v6860_v55 }
 0x182   : > { %v4531_v18 = vsel %vm4511_vm6, %v4500_v5, %v4502_v60 }
 0x183   : > { %6984 = vrot.lane.b32.xlu0 %v6885_v53, %s25433_s7  ;;  %v4504_v46 = vpop.permute.xlu1 %4503  ;;  %23244 = vmatprep.subr.msk.bf16.mxu1 %vm343_vm0, %v4531_v18 }
 0x184   : > { %v4532_v62 = vsel %vm4511_vm6, %v4502_v60, %v4504_v46  ;;  %4981 = vmatpush1.bf16.msra.mxu1 %v4594_v61  ;;  %23243 = vmatmul.mubr.msk.bf16.vlgmr.msra.gmra.mrb[16].mxu0 %vm339_vm1, %v26480_v41 }
 0x185   : > { %v4506_v28 = vpop.permute.xlu0 %4505  ;;  %6986 = vrot.lane.b32.xlu1 %v6893_v57, %s25433_s7  ;;  %5053 = vmatprep.mubr.bf16.mxu0 %v31425_v3  ;;  %v4600_v50 = vsel %vm343_vm0, %v4532_v62, 0  ;;  %v6953_v57 = vcombine.high %v6951_v54, %v6951_v54  ;;  %v6968_v62 = vrot.slane %v6954_v12, %v25510_v6 }
 0x186   : > { %v4533_v1 = vsel %vm4511_vm6, %v4504_v46, %v4506_v28 }
 0x187   : > { %6988 = vrot.lane.b32.xlu0 %v6901_v23, %s25433_s7  ;;  %v4508_v33 = vpop.permute.xlu1 %4507  ;;  %23246 = vmatprep.subr.msk.bf16.mxu0 %vm343_vm0, %v4533_v1 }
 0x188   : > { %v4534_v4 = vsel %vm4511_vm6, %v4506_v28, %v4508_v33  ;;  %5022 = vmatpush1.bf16.msra.mxu0 %v4600_v50  ;;  %23245 = vmatmul.mubr.msk.bf16.vlgmr.msra.gmra.mrb[16].mxu1 %vm339_vm1, %v26480_v41  ;;  %v8449_v50 = vld [vmem:[%s25515_s28 + $0x6] sm:$0xff] }
 0x189   : > { %v4510_v7 = vpop.permute.xlu0 %4509  ;;  %6990 = vrot.lane.b32.xlu1 %v6900_v15, %s25433_s7  ;;  %5094 = vmatprep.mubr.bf16.mxu1 %v31425_v3  ;;  %v4606_v38 = vsel %vm343_vm0, %v4534_v4, 0  ;;  %v6969_v15 = vcombine.high %v6961_v59, %v6961_v59 }
 0x18a   : > { %v4535_v49 = vsel %vm4511_vm6, %v4508_v33, %v4510_v7 }
 0x18b   : > { %6992 = vrot.lane.b32.xlu0 %v6902_v2, %s25433_s7  ;;  %v5301_v9 = vpop.permute.xlu1 %5300  ;;  %23248 = vmatprep.subr.msk.bf16.mxu1 %vm343_vm0, %v4535_v49  ;;  %v26678_v49 = vrot.slane %v8449_v50, %v25510_v6 }
 0x18c   : > { %5063 = vmatpush1.bf16.msra.mxu1 %v4606_v38  ;;  %23247 = vmatmul.mubr.msk.bf16.vlgmr.msra.gmra.mrb[20].mxu0 %vm339_vm1, %v26480_v41 }
 0x18d   : > { %v5303_v10 = vpop.permute.xlu0 %5302  ;;  %6994 = vrot.lane.b32.xlu1 %v6910_v43, %s25433_s7  ;;  %5482 = vmatprep.mubr.bf16.mxu0 %v31425_v3  ;;  %v6970_v43 = vcombine.high %v6968_v62, %v6968_v62 }
 0x18e   : > { %v5351_v42 = vsel %vm5350_vm7, %v5301_v9, %v5303_v10  ;;  %v8463_v9 = vcombine.high %v8449_v50, %v8449_v50 }
 0x18f   : > { %6996 = vrot.lane.b32.xlu0 %v6918_v8, %s25433_s7  ;;  %v5305_v19 = vpop.permute.xlu1 %5304  ;;  %v5379_v27 = vsel %vm343_vm0, %v5351_v42, 0  ;;  %v23303_v8 = vld.sshfl [vmem:[%s25515_s28 + $0x30] sm:$0x3 pattern:$0x76325410] }
 0x190   : > { %v5352_v52 = vsel %vm5350_vm7, %v5303_v10, %v5305_v19  ;;  %23249 = vmatmul.mubr.msk.bf16.vlgmr.msra.gmra.mrb[20].mxu1 %vm339_vm1, %v26480_v41  ;;  %v26619_v41 = vld [vmem:[%s31422_s1 + $0x18] sm:$0xf] }
 0x191   : > { %v5307_v25 = vpop.permute.xlu0 %5306  ;;  %6998 = vrot.lane.b32.xlu1 %v6917_v13, %s25433_s7  ;;  %23252 = vmatprep.subr.msk.bf16.mxu0 %vm343_vm0, %v5352_v52 }
 0x192   : > { %v5353_v56 = vsel %vm5350_vm7, %v5305_v19, %v5307_v25  ;;  %5451 = vmatpush1.bf16.msra.mxu0 %v5379_v27  ;;  %5523 = vmatprep.mubr.bf16.mxu1 %v31425_v3  ;;  %v26692_v19 = vcombine.high %v26678_v49, %v26678_v49 }
 0x193   : > { %7000 = vrot.lane.b32.xlu0 %v6919_v20, %s25433_s7  ;;  %v5309_v14 = vpop.permute.xlu1 %5308  ;;  %v5385_v17 = vsel %vm343_vm0, %v5353_v56, 0  ;;  %v26695_v20 = vrot.slane %v8463_v9, %v25510_v6 }
 0x194   : > { %v5354_v31 = vsel %vm5350_vm7, %v5307_v25, %v5309_v14 }
 0x195   : > { %v5311_v11 = vpop.permute.xlu0 %5310  ;;  %7002 = vrot.lane.b32.xlu1 %v6927_v21, %s25433_s7  ;;  %23254 = vmatprep.subr.msk.bf16.mxu1 %vm343_vm0, %v5354_v31 }
 0x196   : > { %v5355_v30 = vsel %vm5350_vm7, %v5309_v14, %v5311_v11  ;;  %5492 = vmatpush1.bf16.msra.mxu1 %v5385_v17  ;;  %23253 = vmatmul.mubr.msk.bf16.vlgmr.msra.gmra.mrb[0].mxu0 %vm339_vm1, %v26619_v41  ;;  %v26711_v14 = vcombine.high %v26695_v20, %v26695_v20 }
 0x197   : > { %7004 = vrot.lane.b32.xlu0 %v6935_v22, %s25433_s7  ;;  %v5313_v37 = vpop.permute.xlu1 %5312  ;;  %5564 = vmatprep.mubr.bf16.mxu0 %v31425_v3  ;;  %v5391_v34 = vsel %vm343_vm0, %v5355_v30, 0  ;;  %v26714_v22 = vrot.slane %v8450_v0, %v25510_v6 }
 0x198   : > { %v5356_v26 = vsel %vm5350_vm7, %v5311_v11, %v5313_v37 }
 0x199   : > { %v5315_v35 = vpop.permute.xlu0 %5314  ;;  %7006 = vrot.lane.b32.xlu1 %v6934_v29, %s25433_s7  ;;  %23256 = vmatprep.subr.msk.bf16.mxu0 %vm343_vm0, %v5356_v26  ;;  %v8480_v29 = vcombine.high %v8450_v0, %v8450_v0 }
 0x19a   : > { %v5357_v47 = vsel %vm5350_vm7, %v5313_v37, %v5315_v35  ;;  %5533 = vmatpush1.bf16.msra.mxu0 %v5391_v34  ;;  %23255 = vmatmul.mubr.msk.bf16.vlgmr.msra.gmra.mrb[0].mxu1 %vm339_vm1, %v26619_v41  ;;  %v26729_v37 = vcombine.high %v26714_v22, %v26714_v22 }
 0x19b   : > { %7008 = vrot.lane.b32.xlu0 %v6936_v39, %s25433_s7  ;;  %v5317_v51 = vpop.permute.xlu1 %5316  ;;  %5605 = vmatprep.mubr.bf16.mxu1 %v31425_v3  ;;  %v5397_v5 = vsel %vm343_vm0, %v5357_v47, 0  ;;  %v26732_v39 = vrot.slane %v8480_v29, %v25510_v6 }
 0x19c   : > { %v5358_v45 = vsel %vm5350_vm7, %v5315_v35, %v5317_v51 }
 0x19d   : > { %v5319_v40 = vpop.permute.xlu0 %5318  ;;  %7010 = vrot.lane.b32.xlu1 %v6944_v32, %s25433_s7  ;;  %23258 = vmatprep.subr.msk.bf16.mxu1 %vm343_vm0, %v5358_v45 }
 0x19e   : > { %v5359_v44 = vsel %vm5350_vm7, %v5317_v51, %v5319_v40  ;;  %5574 = vmatpush1.bf16.msra.mxu1 %v5397_v5  ;;  %23257 = vmatmul.mubr.msk.bf16.vlgmr.msra.gmra.mrb[4].mxu0 %vm339_vm1, %v26619_v41  ;;  %v26748_v51 = vcombine.high %v26732_v39, %v26732_v39 }
 0x19f   : > { %7012 = vrot.lane.b32.xlu0 %v6952_v63, %s25433_s7  ;;  %v5321_v53 = vpop.permute.xlu1 %5320  ;;  %5646 = vmatprep.mubr.bf16.mxu0 %v31425_v3  ;;  %v5403_v46 = vsel %vm343_vm0, %v5359_v44, 0  ;;  %v26751_v63 = vrot.slane %v8451_v36, %v25510_v6 }
 0x1a0   : > { %v5360_v60 = vsel %vm5350_vm7, %v5319_v40, %v5321_v53 }
 0x1a1   : > { %v5323_v18 = vpop.permute.xlu0 %5322  ;;  %7014 = vrot.lane.b32.xlu1 %v6951_v54, %s25433_s7  ;;  %23260 = vmatprep.subr.msk.bf16.mxu0 %vm343_vm0, %v5360_v60  ;;  %v8497_v54 = vcombine.high %v8451_v36, %v8451_v36 }
 0x1a2   : > { %v5361_v61 = vsel %vm5350_vm7, %v5321_v53, %v5323_v18  ;;  %5615 = vmatpush1.bf16.msra.mxu0 %v5403_v46  ;;  %23259 = vmatmul.mubr.msk.bf16.vlgmr.msra.gmra.mrb[4].mxu1 %vm339_vm1, %v26619_v41  ;;  %v26766_v53 = vcombine.high %v26751_v63, %v26751_v63 }
 0x1a3   : > { %7016 = vrot.lane.b32.xlu0 %v6953_v57, %s25433_s7  ;;  %v5325_v23 = vpop.permute.xlu1 %5324  ;;  %5687 = vmatprep.mubr.bf16.mxu1 %v31425_v3  ;;  %v5409_v1 = vsel %vm343_vm0, %v5361_v61, 0  ;;  %v26769_v57 = vrot.slane %v8497_v54, %v25510_v6 }
 0x1a4   : > { %v5362_v48 = vsel %vm5350_vm7, %v5323_v18, %v5325_v23 }
 0x1a5   : > { %v5327_v28 = vpop.permute.xlu0 %5326  ;;  %7018 = vrot.lane.b32.xlu1 %v6961_v59, %s25433_s7  ;;  %23262 = vmatprep.subr.msk.bf16.mxu1 %vm343_vm0, %v5362_v48  ;;  %v8452_v59 = vld [vmem:[%s25515_s28 + $0x1e] sm:$0xff]  ;;  %v26782_v46 = vcombine.high %v26769_v57, %v26769_v57 }
 0x1a6   : > { %v5363_v33 = vsel %vm5350_vm7, %v5325_v23, %v5327_v28  ;;  %5656 = vmatpush1.bf16.msra.mxu1 %v5409_v1  ;;  %23261 = vmatmul.mubr.msk.bf16.vlgmr.msra.gmra.mrb[8].mxu0 %vm339_vm1, %v26619_v41  ;;  %v26785_v61 = vrot.slane %v8452_v59, %v25510_v6  ;;  %v8514_v23 = vcombine.high %v8452_v59, %v8452_v59  ;;  %v26797_v1 = vld [vmem:[%s31422_s1 + $0x1c] sm:$0xf] }
 0x1a7   : > { %7020 = vrot.lane.b32.xlu0 %v6969_v15, %s25433_s7  ;;  %v5329_v2 = vpop.permute.xlu1 %5328  ;;  %5728 = vmatprep.mubr.bf16.mxu0 %v31425_v3  ;;  %v5415_v7 = vsel %vm343_vm0, %v5363_v33, 0 }
 0x1a8   : > { %v5364_v58 = vsel %vm5350_vm7, %v5327_v28, %v5329_v2  ;;  %v26808_v50 = vrot.slane %v8514_v23, %v25510_v6 }
 0x1a9   : > { %v5331_v4 = vpop.permute.xlu0 %5330  ;;  %7022 = vrot.lane.b32.xlu1 %v6968_v62, %s25433_s7  ;;  %23264 = vmatprep.subr.msk.bf16.mxu0 %vm343_vm0, %v5364_v58 }
 0x1aa   : > { %v5365_v38 = vsel %vm5350_vm7, %v5329_v2, %v5331_v4  ;;  %5697 = vmatpush1.bf16.msra.mxu0 %v5415_v7  ;;  %23263 = vmatmul.mubr.msk.bf16.vlgmr.msra.gmra.mrb[8].mxu1 %vm339_vm1, %v26619_v41 }
 0x1ab   : > { %7024 = vrot.lane.b32.xlu0 %v6970_v43, %s25433_s7  ;;  %v5333_v13 = vpop.permute.xlu1 %5332  ;;  %5769 = vmatprep.mubr.bf16.mxu1 %v31425_v3  ;;  %v5421_v42 = vsel %vm343_vm0, %v5365_v38, 0  ;;  %v8453_v43 = vld [vmem:[%s25515_s28 + $0x26] sm:$0xff]  ;;  %v26824_v38 = vcombine.high %v26808_v50, %v26808_v50 }
 0x1ac   : > { %v5366_v16 = vsel %vm5350_vm7, %v5331_v4, %v5333_v13 }
 0x1ad   : > { %v5335_v10 = vpop.permute.xlu0 %5334  ;;  %7026 = vrot.lane.b32.xlu1 %v23303_v8, %s25433_s7  ;;  %23266 = vmatprep.subr.msk.bf16.mxu1 %vm343_vm0, %v5366_v16  ;;  %v26827_v8 = vrot.slane %v8453_v43, %v25510_v6 }
 0x1ae   : > { %v5367_v21 = vsel %vm5350_vm7, %v5333_v13, %v5335_v10  ;;  %5738 = vmatpush1.bf16.msra.mxu1 %v5421_v42  ;;  %23265 = vmatmul.mubr.msk.bf16.vlgmr.msra.gmra.mrb[12].mxu0 %vm339_vm1, %v26619_v41  ;;  %v8531_v13 = vcombine.high %v8453_v43, %v8453_v43 }
 0x1af   : > { %v5337_v52 = vpop.permute.xlu1 %5336  ;;  %5810 = vmatprep.mubr.bf16.mxu0 %v31425_v3  ;;  %8572 = vrot.lane.b32.xlu0 %v26678_v49, %s25426_s29  ;;  %v5427_v56 = vsel %vm343_vm0, %v5367_v21, 0 }
 0x1b0   : > { %v5368_v25 = vsel %vm5350_vm7, %v5335_v10, %v5337_v52 }
 0x1b1   : > { %v5339_v27 = vpop.permute.xlu0 %5338  ;;  %23268 = vmatprep.subr.msk.bf16.mxu0 %vm343_vm0, %v5368_v25  ;;  %8574 = vrot.lane.b32.xlu1 %v26692_v19, %s25426_s29  ;;  %v26845_v25 = vrot.slane %v8531_v13, %v25510_v6 }
 0x1b2   : > { %v5369_v31 = vsel %vm5350_vm7, %v5337_v52, %v5339_v27  ;;  %5779 = vmatpush1.bf16.msra.mxu0 %v5427_v56  ;;  %23267 = vmatmul.mubr.msk.bf16.vlgmr.msra.gmra.mrb[12].mxu1 %vm339_vm1, %v26619_v41  ;;  %v26842_v52 = vcombine.high %v26827_v8, %v26827_v8  ;;  %v8454_v56 = vld [vmem:[%s25515_s28 + $0x2e] sm:$0xff] }
 0x1b3   : > { %v5341_v24 = vpop.permute.xlu1 %5340  ;;  %5851 = vmatprep.mubr.bf16.mxu1 %v31425_v3  ;;  %8576 = vrot.lane.b32.xlu0 %v26695_v20, %s25426_s29  ;;  %v5433_v30 = vsel %vm343_vm0, %v5369_v31, 0 }
 0x1b4   : > { %v5370_v11 = vsel %vm5350_vm7, %v5339_v27, %v5341_v24 }
 0x1b5   : > { %v5343_v17 = vpop.permute.xlu0 %5342  ;;  %23270 = vmatprep.subr.msk.bf16.mxu1 %vm343_vm0, %v5370_v11  ;;  %8578 = vrot.lane.b32.xlu1 %v26711_v14, %s25426_s29 }
 0x1b6   : > { %v5371_v32 = vsel %vm5350_vm7, %v5341_v24, %v5343_v17  ;;  %5820 = vmatpush1.bf16.msra.mxu1 %v5433_v30  ;;  %23269 = vmatmul.mubr.msk.bf16.vlgmr.msra.gmra.mrb[16].mxu0 %vm339_vm1, %v26619_v41  ;;  %v26864_v30 = vrot.slane %v8454_v56, %v25510_v6 }
 0x1b7   : > { %v5345_v26 = vpop.permute.xlu1 %5344  ;;  %5892 = vmatprep.mubr.bf16.mxu0 %v31425_v3  ;;  %8580 = vrot.lane.b32.xlu0 %v26714_v22, %s25426_s29  ;;  %v5439_v47 = vsel %vm343_vm0, %v5371_v32, 0  ;;  %v8548_v32 = vcombine.high %v8454_v56, %v8454_v56 }
 0x1b8   : > { %v5372_v35 = vsel %vm5350_vm7, %v5343_v17, %v5345_v26  ;;  %v26861_v17 = vcombine.high %v26845_v25, %v26845_v25  ;;  %v26879_v54 = vcombine.high %v26864_v30, %v26864_v30 }
 0x1b9   : > { %v5347_v34 = vpop.permute.xlu0 %5346  ;;  %23272 = vmatprep.subr.msk.bf16.mxu0 %vm343_vm0, %v5372_v35  ;;  %8582 = vrot.lane.b32.xlu1 %v26729_v37, %s25426_s29 }
 0x1ba   : > { %v5373_v45 = vsel %vm5350_vm7, %v5345_v26, %v5347_v34  ;;  %5861 = vmatpush1.bf16.msra.mxu0 %v5439_v47  ;;  %23271 = vmatmul.mubr.msk.bf16.vlgmr.msra.gmra.mrb[16].mxu1 %vm339_vm1, %v26619_v41 }
 0x1bb   : > { %v5349_v55 = vpop.permute.xlu1 %5348  ;;  %5933 = vmatprep.mubr.bf16.mxu1 %v31425_v3  ;;  %8584 = vrot.lane.b32.xlu0 %v26732_v39, %s25426_s29  ;;  %v5445_v44 = vsel %vm343_vm0, %v5373_v45, 0  ;;  %v26882_v45 = vrot.slane %v8548_v32, %v25510_v6 }
 0x1bc   : > { %v5374_v40 = vsel %vm5350_vm7, %v5347_v34, %v5349_v55 }
 0x1bd   : > { %v6140_v5 = vpop.permute.xlu0 %6139  ;;  %23274 = vmatprep.subr.msk.bf16.mxu1 %vm343_vm0, %v5374_v40  ;;  %8586 = vrot.lane.b32.xlu1 %v26748_v51, %s25426_s29 }
 0x1be   : > { %5902 = vmatpush1.bf16.msra.mxu1 %v5445_v44  ;;  %23273 = vmatmul.mubr.msk.bf16.vlgmr.msra.gmra.mrb[20].mxu0 %vm339_vm1, %v26619_v41 }
 0x1bf   : > { %v6142_v12 = vpop.permute.xlu1 %6141  ;;  %6321 = vmatprep.mubr.bf16.mxu0 %v31425_v3  ;;  %8588 = vrot.lane.b32.xlu0 %v26751_v63, %s25426_s29 }
 0x1c0   : > { %v6190_v60 = vsel %vm6189_vm8, %v6140_v5, %v6142_v12 }
 0x1c1   : > { %v6144_v18 = vpop.permute.xlu0 %6143  ;;  %8590 = vrot.lane.b32.xlu1 %v26766_v53, %s25426_s29  ;;  %v6218_v48 = vsel %vm343_vm0, %v6190_v60, 0 }
 0x1c2   : > { %v6191_v15 = vsel %vm6189_vm8, %v6142_v12, %v6144_v18  ;;  %23275 = vmatmul.mubr.msk.bf16.vlgmr.msra.gmra.mrb[20].mxu1 %vm339_vm1, %v26619_v41  ;;  %v26805_v41 = vcombine.high %v26785_v61, %v26785_v61  ;;  %v26897_v12 = vcombine.high %v26882_v45, %v26882_v45 }
 0x1c3   : > { %v6146_v62 = vpop.permute.xlu1 %6145  ;;  %23278 = vmatprep.subr.msk.bf16.mxu0 %vm343_vm0, %v6191_v15  ;;  %6362 = vmatprep.mubr.bf16.mxu1 %v31425_v3 }
 0x1c4   : > { %v6192_v28 = vsel %vm6189_vm8, %v6144_v18, %v6146_v62  ;;  %6290 = vmatpush1.bf16.msra.mxu0 %v6218_v48  ;;  %8592 = vrot.lane.b32.xlu0 %v26769_v57, %s25426_s29 }
 0x1c5   : > { %v6148_v33 = vpop.permute.xlu0 %6147  ;;  %8594 = vrot.lane.b32.xlu1 %v26782_v46, %s25426_s29  ;;  %v6224_v4 = vsel %vm343_vm0, %v6192_v28, 0  ;;  %v26912_v28 = vld.sshfl [vmem:[%s25515_s28 + $0x36] sm:$0x3 pattern:$0x76325410] }
 0x1c6   : > { %v6193_v2 = vsel %vm6189_vm8, %v6146_v62, %v6148_v33 }
 0x1c7   : > { %v6150_v58 = vpop.permute.xlu1 %6149  ;;  %23280 = vmatprep.subr.msk.bf16.mxu1 %vm343_vm0, %v6193_v2  ;;  %23279 = vmatmul.mubr.msk.bf16.vlgmr.msra.gmra.mrb[0].mxu0 %vm339_vm1, %v26797_v1 }
 0x1c8   : > { %v6194_v7 = vsel %vm6189_vm8, %v6148_v33, %v6150_v58  ;;  %6331 = vmatpush1.bf16.msra.mxu1 %v6224_v4  ;;  %6403 = vmatprep.mubr.bf16.mxu0 %v31425_v3 }
 0x1c9   : > { %v6152_v9 = vpop.permute.xlu0 %6151  ;;  %8596 = vrot.lane.b32.xlu0 %v26785_v61, %s25426_s29  ;;  %8598 = vrot.lane.b32.xlu1 %v26805_v41, %s25426_s29  ;;  %v6230_v42 = vsel %vm343_vm0, %v6194_v7, 0 }
 0x1ca   : > { %v6195_v16 = vsel %vm6189_vm8, %v6150_v58, %v6152_v9 }
 0x1cb   : > { %v6154_v10 = vpop.permute.xlu1 %6153  ;;  %23282 = vmatprep.subr.msk.bf16.mxu0 %vm343_vm0, %v6195_v16  ;;  %23281 = vmatmul.mubr.msk.bf16.vlgmr.msra.gmra.mrb[0].mxu1 %vm339_vm1, %v26797_v1 }
 0x1cc   : > { %v6196_v21 = vsel %vm6189_vm8, %v6152_v9, %v6154_v10  ;;  %6372 = vmatpush1.bf16.msra.mxu0 %v6230_v42  ;;  %6444 = vmatprep.mubr.bf16.mxu1 %v31425_v3 }
 0x1cd   : > { %v6156_v0 = vpop.permute.xlu0 %6155  ;;  %8600 = vrot.lane.b32.xlu0 %v26808_v50, %s25426_s29  ;;  %8602 = vrot.lane.b32.xlu1 %v26824_v38, %s25426_s29  ;;  %v6236_v31 = vsel %vm343_vm0, %v6196_v21, 0 }
 0x1ce   : > { %v6197_v27 = vsel %vm6189_vm8, %v6154_v10, %v6156_v0 }
 0x1cf   : > { %v6158_v29 = vpop.permute.xlu1 %6157  ;;  %23284 = vmatprep.subr.msk.bf16.mxu1 %vm343_vm0, %v6197_v27  ;;  %23283 = vmatmul.mubr.msk.bf16.vlgmr.msra.gmra.mrb[4].mxu0 %vm339_vm1, %v26797_v1 }
 0x1d0   : > { %v6198_v24 = vsel %vm6189_vm8, %v6156_v0, %v6158_v29  ;;  %6413 = vmatpush1.bf16.msra.mxu1 %v6236_v31  ;;  %6485 = vmatprep.mubr.bf16.mxu0 %v31425_v3 }
 0x1d1   : > { %v6160_v11 = vpop.permute.xlu0 %6159  ;;  %8604 = vrot.lane.b32.xlu0 %v26827_v8, %s25426_s29  ;;  %8606 = vrot.lane.b32.xlu1 %v26842_v52, %s25426_s29  ;;  %v6242_v35 = vsel %vm343_vm0, %v6198_v24, 0 }
 0x1d2   : > { %v6199_v36 = vsel %vm6189_vm8, %v6158_v29, %v6160_v11 }
 0x1d3   : > { %v6162_v26 = vpop.permute.xlu1 %6161  ;;  %23286 = vmatprep.subr.msk.bf16.mxu0 %vm343_vm0, %v6199_v36  ;;  %23285 = vmatmul.mubr.msk.bf16.vlgmr.msra.gmra.mrb[4].mxu1 %vm339_vm1, %v26797_v1 }
 0x1d4   : > { %v6200_v34 = vsel %vm6189_vm8, %v6160_v11, %v6162_v26  ;;  %6454 = vmatpush1.bf16.msra.mxu0 %v6242_v35  ;;  %6526 = vmatprep.mubr.bf16.mxu1 %v31425_v3 }
 0x1d5   : > { %v6164_v47 = vpop.permute.xlu0 %6163  ;;  %8608 = vrot.lane.b32.xlu0 %v26845_v25, %s25426_s29  ;;  %8610 = vrot.lane.b32.xlu1 %v26861_v17, %s25426_s29  ;;  %v6248_v5 = vsel %vm343_vm0, %v6200_v34, 0 }
 0x1d6   : > { %v6201_v55 = vsel %vm6189_vm8, %v6162_v26, %v6164_v47 }
 0x1d7   : > { %v6166_v40 = vpop.permute.xlu1 %6165  ;;  %23288 = vmatprep.subr.msk.bf16.mxu1 %vm343_vm0, %v6201_v55  ;;  %23287 = vmatmul.mubr.msk.bf16.vlgmr.msra.gmra.mrb[8].mxu0 %vm339_vm1, %v26797_v1 }
 0x1d8   : > { %v6202_v44 = vsel %vm6189_vm8, %v6164_v47, %v6166_v40  ;;  %6495 = vmatpush1.bf16.msra.mxu1 %v6248_v5  ;;  %6567 = vmatprep.mubr.bf16.mxu0 %v31425_v3 }
 0x1d9   : > { %v6168_v59 = vpop.permute.xlu0 %6167  ;;  %8612 = vrot.lane.b32.xlu0 %v26864_v30, %s25426_s29  ;;  %8614 = vrot.lane.b32.xlu1 %v26879_v54, %s25426_s29  ;;  %v6254_v23 = vsel %vm343_vm0, %v6202_v44, 0 }
 0x1da   : > { %v6203_v60 = vsel %vm6189_vm8, %v6166_v40, %v6168_v59 }
 0x1db   : > { %v6170_v18 = vpop.permute.xlu1 %6169  ;;  %23290 = vmatprep.subr.msk.bf16.mxu0 %vm343_vm0, %v6203_v60  ;;  %23289 = vmatmul.mubr.msk.bf16.vlgmr.msra.gmra.mrb[8].mxu1 %vm339_vm1, %v26797_v1 }
 0x1dc   : > { %v6204_v15 = vsel %vm6189_vm8, %v6168_v59, %v6170_v18  ;;  %6536 = vmatpush1.bf16.msra.mxu0 %v6254_v23  ;;  %6608 = vmatprep.mubr.bf16.mxu1 %v31425_v3  ;;  %v26980_v59 = vld [vmem:[%s31422_s1 + $0x20] sm:$0xf] }
 0x1dd   : > { %v6172_v62 = vpop.permute.xlu0 %6171  ;;  %8616 = vrot.lane.b32.xlu0 %v26882_v45, %s25426_s29  ;;  %8618 = vrot.lane.b32.xlu1 %v26897_v12, %s25426_s29  ;;  %v6260_v2 = vsel %vm343_vm0, %v6204_v15, 0 }
 0x1de   : > { %v6205_v48 = vsel %vm6189_vm8, %v6170_v18, %v6172_v62 }
 0x1df   : > { %v6174_v33 = vpop.permute.xlu1 %6173  ;;  %23292 = vmatprep.subr.msk.bf16.mxu1 %vm343_vm0, %v6205_v48  ;;  %23291 = vmatmul.mubr.msk.bf16.vlgmr.msra.gmra.mrb[12].mxu0 %vm339_vm1, %v26797_v1 }
 0x1e0   : > { %v6206_v43 = vsel %vm6189_vm8, %v6172_v62, %v6174_v33  ;;  %6577 = vmatpush1.bf16.msra.mxu1 %v6260_v2  ;;  %6649 = vmatprep.mubr.bf16.mxu0 %v31425_v3 }
 0x1e1   : > { %v6176_v58 = vpop.permute.xlu0 %6175  ;;  %8620 = vrot.lane.b32.xlu0 %v26912_v28, %s25426_s29  ;;  %9410 = vrot.lane.b32.xlu1 %v26678_v49, %s25427_s5  ;;  %v6266_v9 = vsel %vm343_vm0, %v6206_v43, 0 }
 0x1e2   : > { %v6207_v4 = vsel %vm6189_vm8, %v6174_v33, %v6176_v58 }
 0x1e3   : > { %v6178_v7 = vpop.permute.xlu1 %6177  ;;  %23294 = vmatprep.subr.msk.bf16.mxu0 %vm343_vm0, %v6207_v4  ;;  %23293 = vmatmul.mubr.msk.bf16.vlgmr.msra.gmra.mrb[12].mxu1 %vm339_vm1, %v26797_v1 }
 0x1e4   : > { %v6208_v13 = vsel %vm6189_vm8, %v6176_v58, %v6178_v7  ;;  %6618 = vmatpush1.bf16.msra.mxu0 %v6266_v9  ;;  %6690 = vmatprep.mubr.bf16.mxu1 %v31425_v3 }
 0x1e5   : > { %v6180_v16 = vpop.permute.xlu0 %6179  ;;  %9412 = vrot.lane.b32.xlu0 %v26692_v19, %s25427_s5  ;;  %9414 = vrot.lane.b32.xlu1 %v26695_v20, %s25427_s5  ;;  %v6272_v21 = vsel %vm343_vm0, %v6208_v13, 0 }
 0x1e6   : > { %v6209_v10 = vsel %vm6189_vm8, %v6178_v7, %v6180_v16 }
 0x1e7   : > { %v6182_v42 = vpop.permute.xlu1 %6181  ;;  %23296 = vmatprep.subr.msk.bf16.mxu1 %vm343_vm0, %v6209_v10  ;;  %23295 = vmatmul.mubr.msk.bf16.vlgmr.msra.gmra.mrb[16].mxu0 %vm339_vm1, %v26797_v1 }
 0x1e8   : > { %v6210_v0 = vsel %vm6189_vm8, %v6180_v16, %v6182_v42  ;;  %6659 = vmatpush1.bf16.msra.mxu1 %v6272_v21  ;;  %6731 = vmatprep.mubr.bf16.mxu0 %v31425_v3 }
 0x1e9   : > { %v6184_v27 = vpop.permute.xlu0 %6183  ;;  %9416 = vrot.lane.b32.xlu0 %v26711_v14, %s25427_s5  ;;  %9418 = vrot.lane.b32.xlu1 %v26714_v22, %s25427_s5  ;;  %v6278_v31 = vsel %vm343_vm0, %v6210_v0, 0 }
 0x1ea   : > { %v6211_v56 = vsel %vm6189_vm8, %v6182_v42, %v6184_v27 }
 0x1eb   : > { %v6186_v29 = vpop.permute.xlu1 %6185  ;;  %23298 = vmatprep.subr.msk.bf16.mxu0 %vm343_vm0, %v6211_v56  ;;  %23297 = vmatmul.mubr.msk.bf16.vlgmr.msra.gmra.mrb[16].mxu1 %vm339_vm1, %v26797_v1 }
 0x1ec   : > { %v6212_v24 = vsel %vm6189_vm8, %v6184_v27, %v6186_v29  ;;  %6700 = vmatpush1.bf16.msra.mxu0 %v6278_v31  ;;  %6772 = vmatprep.mubr.bf16.mxu1 %v31425_v3 }
 0x1ed   : > { %v6188_v11 = vpop.permute.xlu0 %6187  ;;  %9420 = vrot.lane.b32.xlu0 %v26729_v37, %s25427_s5  ;;  %9422 = vrot.lane.b32.xlu1 %v26732_v39, %s25427_s5  ;;  %v6284_v26 = vsel %vm343_vm0, %v6212_v24, 0 }
 0x1ee   : > { %v6213_v32 = vsel %vm6189_vm8, %v6186_v29, %v6188_v11 }
 0x1ef   : > { %v6979_v36 = vpop.permute.xlu1 %6978  ;;  %23300 = vmatprep.subr.msk.bf16.mxu1 %vm343_vm0, %v6213_v32  ;;  %23299 = vmatmul.mubr.msk.bf16.vlgmr.msra.gmra.mrb[20].mxu0 %vm339_vm1, %v26797_v1 }
 0x1f0   : > { %6741 = vmatpush1.bf16.msra.mxu1 %v6284_v26  ;;  %7160 = vmatprep.mubr.bf16.mxu0 %v31425_v3 }
 0x1f1   : > { %v6981_v35 = vpop.permute.xlu0 %6980  ;;  %9424 = vrot.lane.b32.xlu0 %v26748_v51, %s25427_s5  ;;  %9426 = vrot.lane.b32.xlu1 %v26751_v63, %s25427_s5 }
 0x1f2   : > { %v7029_v34 = vsel %vm7028_vm9, %v6979_v36, %v6981_v35 }
 0x1f3   : > { %v6983_v47 = vpop.permute.xlu1 %6982  ;;  %23301 = vmatmul.mubr.msk.bf16.vlgmr.msra.gmra.mrb[20].mxu1 %vm339_vm1, %v26797_v1  ;;  %v7057_v5 = vsel %vm343_vm0, %v7029_v34, 0 }
 0x1f4   : > { %v7030_v55 = vsel %vm7028_vm9, %v6981_v35, %v6983_v47  ;;  %7201 = vmatprep.mubr.bf16.mxu1 %v31425_v3 }
 0x1f5   : > { %v6985_v40 = vpop.permute.xlu0 %6984  ;;  %23304 = vmatprep.subr.msk.bf16.mxu0 %vm343_vm0, %v7030_v55  ;;  %9428 = vrot.lane.b32.xlu0 %v26766_v53, %s25427_s5 }
 0x1f6   : > { %v7031_v44 = vsel %vm7028_vm9, %v6983_v47, %v6985_v40  ;;  %7129 = vmatpush1.bf16.msra.mxu0 %v7057_v5  ;;  %9430 = vrot.lane.b32.xlu1 %v26769_v57, %s25427_s5 }
 0x1f7   : > { %v6987_v1 = vpop.permute.xlu1 %6986  ;;  %v7063_v23 = vsel %vm343_vm0, %v7031_v44, 0 }
 0x1f8   : > { %v7032_v60 = vsel %vm7028_vm9, %v6985_v40, %v6987_v1 }
 0x1f9   : > { %v6989_v18 = vpop.permute.xlu0 %6988  ;;  %23305 = vmatmul.mubr.msk.bf16.vlgmr.msra.gmra.mrb[0].mxu0 %vm339_vm1, %v26980_v59  ;;  %23306 = vmatprep.subr.msk.bf16.mxu1 %vm343_vm0, %v7032_v60 }
 0x1fa   : > { %v7033_v15 = vsel %vm7028_vm9, %v6987_v1, %v6989_v18  ;;  %7170 = vmatpush1.bf16.msra.mxu1 %v7063_v23  ;;  %7242 = vmatprep.mubr.bf16.mxu0 %v31425_v3 }
 0x1fb   : > { %v6991_v62 = vpop.permute.xlu1 %6990  ;;  %9432 = vrot.lane.b32.xlu0 %v26782_v46, %s25427_s5  ;;  %9434 = vrot.lane.b32.xlu1 %v26785_v61, %s25427_s5  ;;  %v7069_v2 = vsel %vm343_vm0, %v7033_v15, 0 }
 0x1fc   : > { %v7034_v48 = vsel %vm7028_vm9, %v6989_v18, %v6991_v62 }
 0x1fd   : > { %v6993_v33 = vpop.permute.xlu0 %6992  ;;  %23307 = vmatmul.mubr.msk.bf16.vlgmr.msra.gmra.mrb[0].mxu1 %vm339_vm1, %v26980_v59  ;;  %23308 = vmatprep.subr.msk.bf16.mxu0 %vm343_vm0, %v7034_v48 }
 0x1fe   : > { %v7035_v43 = vsel %vm7028_vm9, %v6991_v62, %v6993_v33  ;;  %7211 = vmatpush1.bf16.msra.mxu0 %v7069_v2  ;;  %7283 = vmatprep.mubr.bf16.mxu1 %v31425_v3 }
 0x1ff   : > { %v6995_v58 = vpop.permute.xlu1 %6994  ;;  %9436 = vrot.lane.b32.xlu0 %v26805_v41, %s25427_s5  ;;  %9438 = vrot.lane.b32.xlu1 %v26808_v50, %s25427_s5  ;;  %v7075_v9 = vsel %vm343_vm0, %v7035_v43, 0 }
 0x200   : > { %v7036_v4 = vsel %vm7028_vm9, %v6993_v33, %v6995_v58 }
 0x201   : > { %v6997_v7 = vpop.permute.xlu0 %6996  ;;  %23309 = vmatmul.mubr.msk.bf16.vlgmr.msra.gmra.mrb[4].mxu0 %vm339_vm1, %v26980_v59  ;;  %23310 = vmatprep.subr.msk.bf16.mxu1 %vm343_vm0, %v7036_v4 }
 0x202   : > { %v7037_v13 = vsel %vm7028_vm9, %v6995_v58, %v6997_v7  ;;  %7252 = vmatpush1.bf16.msra.mxu1 %v7075_v9  ;;  %7324 = vmatprep.mubr.bf16.mxu0 %v31425_v3 }
 0x203   : > { %v6999_v16 = vpop.permute.xlu1 %6998  ;;  %9440 = vrot.lane.b32.xlu0 %v26824_v38, %s25427_s5  ;;  %9442 = vrot.lane.b32.xlu1 %v26827_v8, %s25427_s5  ;;  %v7081_v21 = vsel %vm343_vm0, %v7037_v13, 0 }
 0x204   : > { %v7038_v10 = vsel %vm7028_vm9, %v6997_v7, %v6999_v16 }
 0x205   : > { %v7001_v42 = vpop.permute.xlu0 %7000  ;;  %23311 = vmatmul.mubr.msk.bf16.vlgmr.msra.gmra.mrb[4].mxu1 %vm339_vm1, %v26980_v59  ;;  %23312 = vmatprep.subr.msk.bf16.mxu0 %vm343_vm0, %v7038_v10 }
 0x206   : > { %v7039_v0 = vsel %vm7028_vm9, %v6999_v16, %v7001_v42  ;;  %7293 = vmatpush1.bf16.msra.mxu0 %v7081_v21  ;;  %7365 = vmatprep.mubr.bf16.mxu1 %v31425_v3  ;;  %v7812_v16 = vsel %vm343_vm0, %v26678_v49, 0 }
 0x207   : > { %v7003_v27 = vpop.permute.xlu1 %7002  ;;  %9444 = vrot.lane.b32.xlu0 %v26842_v52, %s25427_s5  ;;  %9446 = vrot.lane.b32.xlu1 %v26845_v25, %s25427_s5  ;;  %v7087_v31 = vsel %vm343_vm0, %v7039_v0, 0 }
 0x208   : > { %v7040_v56 = vsel %vm7028_vm9, %v7001_v42, %v7003_v27 }
 0x209   : > { %v7005_v29 = vpop.permute.xlu0 %7004  ;;  %23313 = vmatmul.mubr.msk.bf16.vlgmr.msra.gmra.mrb[8].mxu0 %vm339_vm1, %v26980_v59  ;;  %23314 = vmatprep.subr.msk.bf16.mxu1 %vm343_vm0, %v7040_v56 }
 0x20a   : > { %v7041_v24 = vsel %vm7028_vm9, %v7003_v27, %v7005_v29  ;;  %7334 = vmatpush1.bf16.msra.mxu1 %v7087_v31  ;;  %7406 = vmatprep.mubr.bf16.mxu0 %v31425_v3 }
 0x20b   : > { %v7007_v11 = vpop.permute.xlu1 %7006  ;;  %9448 = vrot.lane.b32.xlu0 %v26861_v17, %s25427_s5  ;;  %9450 = vrot.lane.b32.xlu1 %v26864_v30, %s25427_s5  ;;  %v7093_v26 = vsel %vm343_vm0, %v7041_v24, 0 }
 0x20c   : > { %v7042_v32 = vsel %vm7028_vm9, %v7005_v29, %v7007_v11 }
 0x20d   : > { %v7009_v36 = vpop.permute.xlu0 %7008  ;;  %23315 = vmatmul.mubr.msk.bf16.vlgmr.msra.gmra.mrb[8].mxu1 %vm339_vm1, %v26980_v59  ;;  %23316 = vmatprep.subr.msk.bf16.mxu0 %vm343_vm0, %v7042_v32 }
 0x20e   : > { %v7043_v35 = vsel %vm7028_vm9, %v7007_v11, %v7009_v36  ;;  %7375 = vmatpush1.bf16.msra.mxu0 %v7093_v26  ;;  %7447 = vmatprep.mubr.bf16.mxu1 %v31425_v3 }
 0x20f   : > { %v7011_v34 = vpop.permute.xlu1 %7010  ;;  %9452 = vrot.lane.b32.xlu0 %v26879_v54, %s25427_s5  ;;  %9454 = vrot.lane.b32.xlu1 %v26882_v45, %s25427_s5  ;;  %v7099_v40 = vsel %vm343_vm0, %v7043_v35, 0 }
 0x210   : > { %v7044_v47 = vsel %vm7028_vm9, %v7009_v36, %v7011_v34 }
 0x211   : > { %v7013_v55 = vpop.permute.xlu0 %7012  ;;  %23317 = vmatmul.mubr.msk.bf16.vlgmr.msra.gmra.mrb[12].mxu0 %vm339_vm1, %v26980_v59  ;;  %23318 = vmatprep.subr.msk.bf16.mxu1 %vm343_vm0, %v7044_v47  ;;  %v7878_v47 = vsel %vm343_vm0, %v26882_v45, 0 }
 0x212   : > { %v7045_v5 = vsel %vm7028_vm9, %v7011_v34, %v7013_v55  ;;  %7416 = vmatpush1.bf16.msra.mxu1 %v7099_v40  ;;  %7488 = vmatprep.mubr.bf16.mxu0 %v31425_v3 }
 0x213   : > { %v7015_v44 = vpop.permute.xlu1 %7014  ;;  %9456 = vrot.lane.b32.xlu0 %v26897_v12, %s25427_s5  ;;  %9458 = vrot.lane.b32.xlu1 %v26912_v28, %s25427_s5  ;;  %v7105_v18 = vsel %vm343_vm0, %v7045_v5, 0 }
 0x214   : > { %v7046_v1 = vsel %vm7028_vm9, %v7013_v55, %v7015_v44 }
 0x215   : > { %v7017_v60 = vpop.permute.xlu0 %7016  ;;  %23319 = vmatmul.mubr.msk.bf16.vlgmr.msra.gmra.mrb[12].mxu1 %vm339_vm1, %v26980_v59  ;;  %23320 = vmatprep.subr.msk.bf16.mxu0 %vm343_vm0, %v7046_v1 }
 0x216   : > { %v7047_v23 = vsel %vm7028_vm9, %v7015_v44, %v7017_v60  ;;  %7457 = vmatpush1.bf16.msra.mxu0 %v7105_v18  ;;  %7529 = vmatprep.mubr.bf16.mxu1 %v31425_v3 }
 0x217   : > { %v7019_v15 = vpop.permute.xlu1 %7018  ;;  %10248 = vrot.lane.b32.xlu0 %v26678_v49, %s25428_s6  ;;  %10250 = vrot.lane.b32.xlu1 %v26692_v19, %s25428_s6  ;;  %v7111_v33 = vsel %vm343_vm0, %v7047_v23, 0  ;;  %v7818_v49 = vsel %vm343_vm0, %v26695_v20, 0 }
 0x218   : > { %v7048_v62 = vsel %vm7028_vm9, %v7017_v60, %v7019_v15 }
 0x219   : > { %v7021_v48 = vpop.permute.xlu0 %7020  ;;  %23321 = vmatmul.mubr.msk.bf16.vlgmr.msra.gmra.mrb[16].mxu0 %vm339_vm1, %v26980_v59  ;;  %23322 = vmatprep.subr.msk.bf16.mxu1 %vm343_vm0, %v7048_v62 }
 0x21a   : > { %v7049_v2 = vsel %vm7028_vm9, %v7019_v15, %v7021_v48  ;;  %7498 = vmatpush1.bf16.msra.mxu1 %v7111_v33  ;;  %7570 = vmatprep.mubr.bf16.mxu0 %v31425_v3 }
 0x21b   : > { %v7023_v43 = vpop.permute.xlu1 %7022  ;;  %10252 = vrot.lane.b32.xlu0 %v26695_v20, %s25428_s6  ;;  %10254 = vrot.lane.b32.xlu1 %v26711_v14, %s25428_s6  ;;  %v7117_v7 = vsel %vm343_vm0, %v7049_v2, 0  ;;  %v27125_v20 = vld [vmem:[%s31422_s1 + $0x24] sm:$0xf] }
 0x21c   : > { %v7050_v58 = vsel %vm7028_vm9, %v7021_v48, %v7023_v43 }
 0x21d   : > { %v7025_v4 = vpop.permute.xlu0 %7024  ;;  %23323 = vmatmul.mubr.msk.bf16.vlgmr.msra.gmra.mrb[16].mxu1 %vm339_vm1, %v26980_v59  ;;  %23324 = vmatprep.subr.msk.bf16.mxu0 %vm343_vm0, %v7050_v58 }
 0x21e   : > { %v7051_v9 = vsel %vm7028_vm9, %v7023_v43, %v7025_v4  ;;  %7539 = vmatpush1.bf16.msra.mxu0 %v7117_v7  ;;  %7611 = vmatprep.mubr.bf16.mxu1 %v31425_v3  ;;  %v10965_v43 = vld [vmem:[%s25515_s28 + $0x16] sm:$0xff] }
 0x21f   : > { %v7027_v13 = vpop.permute.xlu1 %7026  ;;  %23329 = vmatprep.subr.msk.bf16.mxu0 %vm343_vm0, %v26692_v19  ;;  %10256 = vrot.lane.b32.xlu0 %v26714_v22, %s25428_s6  ;;  %v7123_v42 = vsel %vm343_vm0, %v7051_v9, 0 }
 0x220   : > { %v7052_v10 = vsel %vm7028_vm9, %v7025_v4, %v7027_v13  ;;  %10258 = vrot.lane.b32.xlu1 %v26729_v37, %s25428_s6  ;;  %v27347_v13 = vrot.slane %v10965_v43, %v25510_v6 }
 0x221   : > { %23325 = vmatmul.mubr.msk.bf16.vlgmr.msra.gmra.mrb[20].mxu0 %vm339_vm1, %v26980_v59  ;;  %23326 = vmatprep.subr.msk.bf16.mxu1 %vm343_vm0, %v7052_v10  ;;  %v27103_v21 = vpop.permute.xlu0 %8572 }
 0x222   : > { %7580 = vmatpush1.bf16.msra.mxu1 %v7123_v42  ;;  %7884 = vmatpush1.bf16.msra.mxu0 %v7812_v16  ;;  %v11011_v16 = vcombine.high %v10965_v43, %v10965_v43 }
 0x223   : > { %7915 = vmatprep.mubr.bf16.mxu0 %v31425_v3  ;;  %23331 = vmatprep.subr.msk.bf16.mxu1 %vm343_vm0, %v26711_v14  ;;  %v27110_v19 = vpop.permute.xlu1 %8574  ;;  %v7824_v14 = vsel %vm343_vm0, %v26714_v22, 0  ;;  %v7830_v22 = vsel %vm343_vm0, %v26732_v39, 0 }
 0x224   : > { %23333 = vmatprep.subr.msk.bf16.mxu0 %vm343_vm0, %v26729_v37  ;;  %10260 = vrot.lane.b32.xlu0 %v26732_v39, %s25428_s6  ;;  %v7836_v39 = vsel %vm343_vm0, %v26751_v63, 0  ;;  %v8622_v1 = vsel %vm1155_vm2, %v27103_v21, %v27110_v19  ;;  %v27358_v21 = vld [vmem:[%s31422_s1 + $0x28] sm:$0xf] }
 0x225   : > { %23327 = vmatmul.mubr.msk.bf16.vlgmr.msra.gmra.mrb[20].mxu1 %vm339_vm1, %v26980_v59  ;;  %10262 = vrot.lane.b32.xlu1 %v26748_v51, %s25428_s6  ;;  %v27120_v0 = vpop.permute.xlu0 %8576  ;;  %v8650_v62 = vsel %vm343_vm0, %v8622_v1, 0 }
 0x226   : > { %7925 = vmatpush1.bf16.msra.mxu1 %v7818_v49  ;;  %7956 = vmatprep.mubr.bf16.mxu1 %v31425_v3 }
 0x227   : > { %23335 = vmatprep.subr.msk.bf16.mxu1 %vm343_vm0, %v26748_v51  ;;  %v27132_v37 = vpop.permute.xlu1 %8578 }
 0x228   : > { %10264 = vrot.lane.b32.xlu0 %v26751_v63, %s25428_s6  ;;  %v7842_v63 = vsel %vm343_vm0, %v26769_v57, 0  ;;  %v8624_v33 = vsel %vm1155_vm2, %v27120_v0, %v27132_v37 }
 0x229   : > { %23330 = vmatmul.mubr.msk.bf16.vlgmr.msra.gmra.mrb[0].mxu0 %vm339_vm1, %v27125_v20  ;;  %10266 = vrot.lane.b32.xlu1 %v26766_v53, %s25428_s6  ;;  %v27140_v59 = vpop.permute.xlu0 %8580  ;;  %v8656_v9 = vsel %vm343_vm0, %v8624_v33, 0 }
 0x22a   : > { %7966 = vmatpush1.bf16.msra.mxu0 %v7824_v14  ;;  %7997 = vmatprep.mubr.bf16.mxu0 %v31425_v3  ;;  %v8625_v60 = vsel %vm1155_vm2, %v27132_v37, %v27140_v59  ;;  %v27378_v14 = vrot.slane %v11011_v16, %v25510_v6 }
 0x22b   : > { %23337 = vmatprep.subr.msk.bf16.mxu0 %vm343_vm0, %v26766_v53  ;;  %v27147_v51 = vpop.permute.xlu1 %8582 }
 0x22c   : > { %10268 = vrot.lane.b32.xlu0 %v26769_v57, %s25428_s6  ;;  %v7848_v57 = vsel %vm343_vm0, %v26785_v61, 0  ;;  %v8626_v10 = vsel %vm1155_vm2, %v27140_v59, %v27147_v51 }
 0x22d   : > { %23332 = vmatmul.mubr.msk.bf16.vlgmr.msra.gmra.mrb[0].mxu1 %vm339_vm1, %v27125_v20  ;;  %10270 = vrot.lane.b32.xlu1 %v26782_v46, %s25428_s6  ;;  %v27155_v27 = vpop.permute.xlu0 %8584 }
 0x22e   : > { %8007 = vmatpush1.bf16.msra.mxu1 %v7830_v22  ;;  %8038 = vmatprep.mubr.bf16.mxu1 %v31425_v3  ;;  %v8627_v2 = vsel %vm1155_vm2, %v27147_v51, %v27155_v27  ;;  %v10966_v22 = vld [vmem:[%s25515_s28 + $0x1e] sm:$0xff] }
 0x22f   : > { %23339 = vmatprep.subr.msk.bf16.mxu1 %vm343_vm0, %v26782_v46  ;;  %v27162_v53 = vpop.permute.xlu1 %8586 }
 0x230   : > { %10272 = vrot.lane.b32.xlu0 %v26785_v61, %s25428_s6  ;;  %v7854_v61 = vsel %vm343_vm0, %v26808_v50, 0  ;;  %v8628_v37 = vsel %vm1155_vm2, %v27155_v27, %v27162_v53  ;;  %v27397_v27 = vcombine.high %v27378_v14, %v27378_v14 }
 0x231   : > { %23334 = vmatmul.mubr.msk.bf16.vlgmr.msra.gmra.mrb[4].mxu0 %vm339_vm1, %v27125_v20  ;;  %10274 = vrot.lane.b32.xlu1 %v26805_v41, %s25428_s6  ;;  %v27170_v56 = vpop.permute.xlu0 %8588 }
 0x232   : > { %8048 = vmatpush1.bf16.msra.mxu0 %v7836_v39  ;;  %8079 = vmatprep.mubr.bf16.mxu0 %v31425_v3  ;;  %v8629_v42 = vsel %vm1155_vm2, %v27162_v53, %v27170_v56  ;;  %v8668_v53 = vsel %vm343_vm0, %v8628_v37, 0 }
 0x233   : > { %23341 = vmatprep.subr.msk.bf16.mxu0 %vm343_vm0, %v26805_v41  ;;  %v27177_v46 = vpop.permute.xlu1 %8590 }
 0x234   : > { %10276 = vrot.lane.b32.xlu0 %v26808_v50, %s25428_s6  ;;  %v7860_v50 = vsel %vm343_vm0, %v26827_v8, 0 }
 0x235   : > { %23336 = vmatmul.mubr.msk.bf16.vlgmr.msra.gmra.mrb[4].mxu1 %vm339_vm1, %v27125_v20  ;;  %10278 = vrot.lane.b32.xlu1 %v26824_v38, %s25428_s6 }
 0x236   : > { %8089 = vmatpush1.bf16.msra.mxu1 %v7842_v63  ;;  %8120 = vmatprep.mubr.bf16.mxu1 %v31425_v3  ;;  %v27186_v29 = vpop.permute.xlu0 %8592  ;;  %v27405_v63 = vrot.slane %v10966_v22, %v25510_v6 }
 0x237   : > { %23343 = vmatprep.subr.msk.bf16.mxu1 %vm343_vm0, %v26824_v38  ;;  %v27192_v41 = vpop.permute.xlu1 %8594  ;;  %v8631_v59 = vsel %vm1155_vm2, %v27177_v46, %v27186_v29 }
 0x238   : > { %10280 = vrot.lane.b32.xlu0 %v26827_v8, %s25428_s6  ;;  %v10963_v8 = vld [vmem:[%s25515_s28 + $0x6] sm:$0xff] }
 0x239   : > { %23338 = vmatmul.mubr.msk.bf16.vlgmr.msra.gmra.mrb[8].mxu0 %vm339_vm1, %v27125_v20  ;;  %10282 = vrot.lane.b32.xlu1 %v26842_v52, %s25428_s6  ;;  %v27247_v36 = vrot.slane %v10963_v8, %v25510_v6 }
 0x23a   : > { %8130 = vmatpush1.bf16.msra.mxu0 %v7848_v57  ;;  %8161 = vmatprep.mubr.bf16.mxu0 %v31425_v3  ;;  %v11028_v57 = vcombine.high %v10966_v22, %v10966_v22 }
 0x23b   : > { %23345 = vmatprep.subr.msk.bf16.mxu0 %vm343_vm0, %v26842_v52  ;;  %v27205_v38 = vpop.permute.xlu0 %8596  ;;  %v27207_v31 = vpop.permute.xlu1 %8598  ;;  %v27262_v34 = vcombine.high %v27247_v36, %v27247_v36 }
 0x23c   : > { %10284 = vrot.lane.b32.xlu0 %v26845_v25, %s25428_s6 }
 0x23d   : > { %23340 = vmatmul.mubr.msk.bf16.vlgmr.msra.gmra.mrb[8].mxu1 %vm339_vm1, %v27125_v20  ;;  %10286 = vrot.lane.b32.xlu1 %v26861_v17, %s25428_s6 }
 0x23e   : > { %8171 = vmatpush1.bf16.msra.mxu1 %v7854_v61  ;;  %8202 = vmatprep.mubr.bf16.mxu1 %v31425_v3  ;;  %v8630_v61 = vsel %vm1155_vm2, %v27170_v56, %v27177_v46  ;;  %v27423_v56 = vcombine.high %v27405_v63, %v27405_v63 }
 0x23f   : > { %23347 = vmatprep.subr.msk.bf16.mxu1 %vm343_vm0, %v26861_v17  ;;  %v27220_v52 = vpop.permute.xlu0 %8600  ;;  %v27222_v24 = vpop.permute.xlu1 %8602  ;;  %v7866_v17 = vsel %vm343_vm0, %v26845_v25, 0  ;;  %v7872_v25 = vsel %vm343_vm0, %v26864_v30, 0  ;;  %v8674_v46 = vsel %vm343_vm0, %v8630_v61, 0 }
 0x240   : > { %10288 = vrot.lane.b32.xlu0 %v26864_v30, %s25428_s6  ;;  %v8636_v16 = vsel %vm1155_vm2, %v27220_v52, %v27222_v24 }
 0x241   : > { %23342 = vmatmul.mubr.msk.bf16.vlgmr.msra.gmra.mrb[12].mxu0 %vm339_vm1, %v27125_v20  ;;  %10290 = vrot.lane.b32.xlu1 %v26879_v54, %s25428_s6 }
 0x242   : > { %8212 = vmatpush1.bf16.msra.mxu0 %v7860_v50  ;;  %8243 = vmatprep.mubr.bf16.mxu0 %v31425_v3  ;;  %v8633_v50 = vsel %vm1155_vm2, %v27192_v41, %v27205_v38 }
 0x243   : > { %23349 = vmatprep.subr.msk.bf16.mxu0 %vm343_vm0, %v26879_v54  ;;  %v27236_v11 = vpop.permute.xlu0 %8604  ;;  %v27238_v32 = vpop.permute.xlu1 %8606  ;;  %v10977_v54 = vcombine.high %v10963_v8, %v10963_v8 }
 0x244   : > { %10292 = vrot.lane.b32.xlu0 %v26882_v45, %s25428_s6  ;;  %v8637_v33 = vsel %vm1155_vm2, %v27222_v24, %v27236_v11 }
 0x245   : > { %23344 = vmatmul.mubr.msk.bf16.vlgmr.msra.gmra.mrb[12].mxu1 %vm339_vm1, %v27125_v20  ;;  %10294 = vrot.lane.b32.xlu1 %v26897_v12, %s25428_s6  ;;  %v27269_v30 = vrot.slane %v10977_v54, %v25510_v6  ;;  %v27431_v54 = vrot.slane %v11028_v57, %v25510_v6 }
 0x246   : > { %8253 = vmatpush1.bf16.msra.mxu1 %v7866_v17  ;;  %8284 = vmatprep.mubr.bf16.mxu1 %v31425_v3 }
 0x247   : > { %23351 = vmatprep.subr.msk.bf16.mxu1 %vm343_vm0, %v26897_v12  ;;  %v27254_v26 = vpop.permute.xlu0 %8608  ;;  %v27256_v35 = vpop.permute.xlu1 %8610  ;;  %v8623_v12 = vsel %vm1155_vm2, %v27110_v19, %v27120_v0  ;;  %v27287_v5 = vcombine.high %v27269_v30, %v27269_v30  ;;  %v27370_v0 = vcombine.high %v27347_v13, %v27347_v13 }
 0x248   : > { %10296 = vrot.lane.b32.xlu0 %v26912_v28, %s25428_s6  ;;  %v10964_v28 = vld [vmem:[%s25515_s28 + $0xe] sm:$0xff] }
 0x249   : > { %23346 = vmatmul.mubr.msk.bf16.vlgmr.msra.gmra.mrb[16].mxu0 %vm339_vm1, %v27125_v20  ;;  %11086 = vrot.lane.b32.xlu1 %v27247_v36, %s25429_s9  ;;  %v27294_v44 = vrot.slane %v10964_v28, %v25510_v6  ;;  %v10994_v45 = vcombine.high %v10964_v28, %v10964_v28  ;;  %v10967_v28 = vld [vmem:[%s25515_s28 + $0x26] sm:$0xff] }
 0x24a   : > { %8294 = vmatpush1.bf16.msra.mxu0 %v7872_v25  ;;  %8325 = vmatprep.mubr.bf16.mxu0 %v31425_v3  ;;  %v8632_v25 = vsel %vm1155_vm2, %v27186_v29, %v27192_v41  ;;  %v27450_v29 = vcombine.high %v27431_v54, %v27431_v54  ;;  %v27458_v1 = vrot.slane %v10967_v28, %v25510_v6 }
 0x24b   : > { %23355 = vmatprep.subr.msk.bf16.mxu0 %vm343_vm0, %v8623_v12  ;;  %v27279_v55 = vpop.permute.xlu0 %8612  ;;  %v27281_v40 = vpop.permute.xlu1 %8614  ;;  %v27312_v15 = vcombine.high %v27294_v44, %v27294_v44  ;;  %v27320_v48 = vrot.slane %v10994_v45, %v25510_v6  ;;  %v8635_v12 = vsel %vm1155_vm2, %v27207_v31, %v27220_v52  ;;  %v8680_v41 = vsel %vm343_vm0, %v8632_v25, 0 }
 0x24c   : > { %11088 = vrot.lane.b32.xlu0 %v27262_v34, %s25429_s9  ;;  %v8692_v52 = vsel %vm343_vm0, %v8636_v16, 0  ;;  %v8641_v57 = vsel %vm1155_vm2, %v27256_v35, %v27279_v55  ;;  %v8640_v25 = vsel %vm1155_vm2, %v27254_v26, %v27256_v35 }
 0x24d   : > { %23348 = vmatmul.mubr.msk.bf16.vlgmr.msra.gmra.mrb[16].mxu1 %vm339_vm1, %v27125_v20  ;;  %11090 = vrot.lane.b32.xlu1 %v27269_v30, %s25429_s9  ;;  %v27339_v7 = vcombine.high %v27320_v48, %v27320_v48 }
 0x24e   : > { %8335 = vmatpush1.bf16.msra.mxu1 %v7878_v47  ;;  %8366 = vmatprep.mubr.bf16.mxu1 %v31425_v3 }
 0x24f   : > { %23357 = vmatprep.subr.msk.bf16.mxu1 %vm343_vm0, %v8625_v60  ;;  %v27304_v18 = vpop.permute.xlu0 %8616  ;;  %v27306_v23 = vpop.permute.xlu1 %8618  ;;  %v11045_v60 = vcombine.high %v10967_v28, %v10967_v28 }
 0x250   : > { %11092 = vrot.lane.b32.xlu0 %v27287_v5, %s25429_s9  ;;  %v8644_v16 = vsel %vm1155_vm2, %v27304_v18, %v27306_v23 }
 0x251   : > { %23350 = vmatmul.mubr.msk.bf16.vlgmr.msra.gmra.mrb[20].mxu0 %vm339_vm1, %v27125_v20  ;;  %11094 = vrot.lane.b32.xlu1 %v27294_v44, %s25429_s9 }
 0x252   : > { %8722 = vmatpush1.bf16.msra.mxu0 %v8650_v62  ;;  %8753 = vmatprep.mubr.bf16.mxu0 %v31425_v3  ;;  %v8634_v62 = vsel %vm1155_vm2, %v27205_v38, %v27207_v31  ;;  %v27476_v38 = vcombine.high %v27458_v1, %v27458_v1 }
 0x253   : > { %23359 = vmatprep.subr.msk.bf16.mxu0 %vm343_vm0, %v8627_v2  ;;  %v27331_v58 = vpop.permute.xlu0 %8620  ;;  %v27333_v4 = vpop.permute.xlu1 %9410  ;;  %v8686_v31 = vsel %vm343_vm0, %v8634_v62, 0 }
 0x254   : > { %11096 = vrot.lane.b32.xlu0 %v27312_v15, %s25429_s9  ;;  %v8645_v62 = vsel %vm1155_vm2, %v27306_v23, %v27331_v58 }
 0x255   : > { %23352 = vmatmul.mubr.msk.bf16.vlgmr.msra.gmra.mrb[20].mxu1 %vm339_vm1, %v27125_v20  ;;  %11098 = vrot.lane.b32.xlu1 %v27320_v48, %s25429_s9  ;;  %v8662_v20 = vsel %vm343_vm0, %v8626_v10, 0  ;;  %v8639_v10 = vsel %vm1155_vm2, %v27238_v32, %v27254_v26  ;;  %v8704_v26 = vsel %vm343_vm0, %v8640_v25, 0 }
 0x256   : > { %8763 = vmatpush1.bf16.msra.mxu1 %v8656_v9  ;;  %8794 = vmatprep.mubr.bf16.mxu1 %v31425_v3  ;;  %v27484_v9 = vrot.slane %v11045_v60, %v25510_v6  ;;  %v8642_v60 = vsel %vm1155_vm2, %v27279_v55, %v27281_v40 }
 0x257   : > { %23361 = vmatprep.subr.msk.bf16.mxu1 %vm343_vm0, %v8629_v42  ;;  %v27362_v49 = vpop.permute.xlu0 %9412  ;;  %v27364_v19 = vpop.permute.xlu1 %9414  ;;  %v10968_v42 = vld [vmem:[%s25515_s28 + $0x2e] sm:$0xff]  ;;  %v8710_v55 = vsel %vm343_vm0, %v8642_v60, 0 }
 0x258   : > { %11100 = vrot.lane.b32.xlu0 %v27339_v7, %s25429_s9  ;;  %v11062_v22 = vcombine.high %v10968_v42, %v10968_v42 }
 0x259   : > { %23356 = vmatmul.mubr.msk.bf16.vlgmr.msra.gmra.mrb[0].mxu0 %vm339_vm1, %v27358_v21  ;;  %11102 = vrot.lane.b32.xlu1 %v27347_v13, %s25429_s9 }
 0x25a   : > { %8804 = vmatpush1.bf16.msra.mxu0 %v8662_v20  ;;  %8835 = vmatprep.mubr.bf16.mxu0 %v31425_v3  ;;  %v27499_v20 = vcombine.high %v27484_v9, %v27484_v9 }
 0x25b   : > { %23363 = vmatprep.subr.msk.bf16.mxu0 %vm343_vm0, %v8631_v59  ;;  %v27389_v51 = vpop.permute.xlu0 %9416  ;;  %v27391_v39 = vpop.permute.xlu1 %9418  ;;  %v27511_v59 = vrot.slane %v10968_v42, %v25510_v6  ;;  %v8716_v42 = vsel %vm343_vm0, %v8644_v16, 0 }
 0x25c   : > { %11104 = vrot.lane.b32.xlu0 %v27370_v0, %s25429_s9 }
 0x25d   : > { %23358 = vmatmul.mubr.msk.bf16.vlgmr.msra.gmra.mrb[0].mxu1 %vm339_vm1, %v27358_v21  ;;  %11106 = vrot.lane.b32.xlu1 %v27378_v14, %s25429_s9  ;;  %v27525_v61 = vcombine.high %v27511_v59, %v27511_v59 }
 0x25e   : > { %8845 = vmatpush1.bf16.msra.mxu1 %v8668_v53  ;;  %8876 = vmatprep.mubr.bf16.mxu1 %v31425_v3  ;;  %v8638_v53 = vsel %vm1155_vm2, %v27236_v11, %v27238_v32 }
 0x25f   : > { %23365 = vmatprep.subr.msk.bf16.mxu1 %vm343_vm0, %v8633_v50  ;;  %v27415_v8 = vpop.permute.xlu0 %9420  ;;  %v27417_v17 = vpop.permute.xlu1 %9422  ;;  %v8698_v11 = vsel %vm343_vm0, %v8638_v53, 0 }
 0x260   : > { %11108 = vrot.lane.b32.xlu0 %v27397_v27, %s25429_s9 }
 0x261   : > { %23360 = vmatmul.mubr.msk.bf16.vlgmr.msra.gmra.mrb[4].mxu0 %vm339_vm1, %v27358_v21  ;;  %11110 = vrot.lane.b32.xlu1 %v27405_v63, %s25429_s9 }
 0x262   : > { %8886 = vmatpush1.bf16.msra.mxu0 %v8674_v46  ;;  %8917 = vmatprep.mubr.bf16.mxu0 %v31425_v3  ;;  %v27537_v46 = vrot.slane %v11062_v22, %v25510_v6  ;;  %v9465_v22 = vsel %vm1994_vm3, %v27415_v8, %v27417_v17 }
 0x263   : > { %23367 = vmatprep.subr.msk.bf16.mxu0 %vm343_vm0, %v8635_v12  ;;  %v27442_v47 = vpop.permute.xlu0 %9424  ;;  %v27444_v45 = vpop.permute.xlu1 %9426  ;;  %v8643_v12 = vsel %vm1155_vm2, %v27281_v40, %v27304_v18 }
 0x264   : > { %11112 = vrot.lane.b32.xlu0 %v27423_v56, %s25429_s9  ;;  %v27551_v28 = vcombine.high %v27537_v46, %v27537_v46 }
 0x265   : > { %23362 = vmatmul.mubr.msk.bf16.vlgmr.msra.gmra.mrb[4].mxu1 %vm339_vm1, %v27358_v21  ;;  %11114 = vrot.lane.b32.xlu1 %v27431_v54, %s25429_s9 }
 0x266   : > { %8927 = vmatpush1.bf16.msra.mxu1 %v8680_v41  ;;  %8958 = vmatprep.mubr.bf16.mxu1 %v31425_v3 }
 0x267   : > { %23369 = vmatprep.subr.msk.bf16.mxu1 %vm343_vm0, %v8637_v33  ;;  %v27468_v2 = vpop.permute.xlu0 %9428  ;;  %v27570_v33 = vld.sshfl [vmem:[%s25515_s28 + $0x36] sm:$0x3 pattern:$0x76325410] }
 0x268   : > { %11116 = vrot.lane.b32.xlu0 %v27450_v29, %s25429_s9  ;;  %v27472_v43 = vpop.permute.xlu1 %9430  ;;  %v9468_v16 = vsel %vm1994_vm3, %v27444_v45, %v27468_v2 }
 0x269   : > { %23364 = vmatmul.mubr.msk.bf16.vlgmr.msra.gmra.mrb[8].mxu0 %vm339_vm1, %v27358_v21  ;;  %11118 = vrot.lane.b32.xlu1 %v27458_v1, %s25429_s9 }
 0x26a   : > { %8968 = vmatpush1.bf16.msra.mxu0 %v8686_v31  ;;  %8999 = vmatprep.mubr.bf16.mxu0 %v31425_v3  ;;  %v9461_v31 = vsel %vm1994_vm3, %v27362_v49, %v27364_v19 }
 0x26b   : > { %23371 = vmatprep.subr.msk.bf16.mxu0 %vm343_vm0, %v8639_v10  ;;  %v9463_v10 = vsel %vm1994_vm3, %v27389_v51, %v27391_v39 }
 0x26c   : > { %11120 = vrot.lane.b32.xlu0 %v27476_v38, %s25429_s9 }
 0x26d   : > { %23366 = vmatmul.mubr.msk.bf16.vlgmr.msra.gmra.mrb[8].mxu1 %vm339_vm1, %v27358_v21  ;;  %11122 = vrot.lane.b32.xlu1 %v27484_v9, %s25429_s9  ;;  %v27506_v24 = vpop.permute.xlu0 %9432  ;;  %v27508_v37 = vpop.permute.xlu1 %9434 }
 0x26e   : > { %9009 = vmatpush1.bf16.msra.mxu1 %v8692_v52  ;;  %9040 = vmatprep.mubr.bf16.mxu1 %v31425_v3  ;;  %v9460_v52 = vsel %vm1994_vm3, %v27333_v4, %v27362_v49 }
 0x26f   : > { %23373 = vmatprep.subr.msk.bf16.mxu1 %vm343_vm0, %v8641_v57  ;;  %v9488_v53 = vsel %vm343_vm0, %v9460_v52, 0  ;;  %v9462_v57 = vsel %vm1994_vm3, %v27364_v19, %v27389_v51 }
 0x270   : > { %11124 = vrot.lane.b32.xlu0 %v27499_v20, %s25429_s9  ;;  %v9494_v25 = vsel %vm343_vm0, %v9462_v57, 0 }
 0x271   : > { %23368 = vmatmul.mubr.msk.bf16.vlgmr.msra.gmra.mrb[12].mxu0 %vm339_vm1, %v27358_v21  ;;  %11126 = vrot.lane.b32.xlu1 %v27511_v59, %s25429_s9  ;;  %v27532_v32 = vpop.permute.xlu0 %9436  ;;  %v27534_v50 = vpop.permute.xlu1 %9438 }
 0x272   : > { %9050 = vmatpush1.bf16.msra.mxu0 %v8698_v11  ;;  %9081 = vmatprep.mubr.bf16.mxu0 %v31425_v3  ;;  %v9467_v11 = vsel %vm1994_vm3, %v27442_v47, %v27444_v45 }
 0x273   : > { %23375 = vmatprep.subr.msk.bf16.mxu0 %vm343_vm0, %v8643_v12  ;;  %v9464_v12 = vsel %vm1994_vm3, %v27391_v39, %v27415_v8 }
 0x274   : > { %11128 = vrot.lane.b32.xlu0 %v27525_v61, %s25429_s9  ;;  %v9500_v39 = vsel %vm343_vm0, %v9464_v12, 0 }
 0x275   : > { %23370 = vmatmul.mubr.msk.bf16.vlgmr.msra.gmra.mrb[12].mxu1 %vm339_vm1, %v27358_v21  ;;  %11130 = vrot.lane.b32.xlu1 %v27537_v46, %s25429_s9  ;;  %v27558_v35 = vpop.permute.xlu0 %9440  ;;  %v27560_v41 = vpop.permute.xlu1 %9442 }
 0x276   : > { %9091 = vmatpush1.bf16.msra.mxu1 %v8704_v26  ;;  %9122 = vmatprep.mubr.bf16.mxu1 %v31425_v3  ;;  %v27650_v26 = vld [vmem:[%s31422_s1 + $0x2c] sm:$0xf] }
 0x277   : > { %23377 = vmatprep.subr.msk.bf16.mxu1 %vm343_vm0, %v8645_v62  ;;  %v9466_v62 = vsel %vm1994_vm3, %v27417_v17, %v27442_v47 }
 0x278   : > { %11132 = vrot.lane.b32.xlu0 %v27551_v28, %s25429_s9 }
 0x279   : > { %23372 = vmatmul.mubr.msk.bf16.vlgmr.msra.gmra.mrb[16].mxu0 %vm339_vm1, %v27358_v21  ;;  %11134 = vrot.lane.b32.xlu1 %v27570_v33, %s25429_s9  ;;  %v27583_v40 = vpop.permute.xlu0 %9444  ;;  %v27585_v58 = vpop.permute.xlu1 %9446 }
 0x27a   : > { %9132 = vmatpush1.bf16.msra.mxu0 %v8710_v55  ;;  %9163 = vmatprep.mubr.bf16.mxu0 %v31425_v3  ;;  %v9506_v55 = vsel %vm343_vm0, %v9466_v62, 0 }
 0x27b   : > { %23381 = vmatprep.subr.msk.bf16.mxu0 %vm343_vm0, %v9461_v31  ;;  %v9471_v31 = vsel %vm1994_vm3, %v27506_v24, %v27508_v37 }
 0x27c   : > { %11924 = vrot.lane.b32.xlu0 %v27247_v36, %s25430_s17 }
 0x27d   : > { %23374 = vmatmul.mubr.msk.bf16.vlgmr.msra.gmra.mrb[16].mxu1 %vm339_vm1, %v27358_v21  ;;  %11926 = vrot.lane.b32.xlu1 %v27262_v34, %s25430_s17  ;;  %v27602_v18 = vpop.permute.xlu0 %9448  ;;  %v27604_v23 = vpop.permute.xlu1 %9450 }
 0x27e   : > { %9173 = vmatpush1.bf16.msra.mxu1 %v8716_v42  ;;  %9204 = vmatprep.mubr.bf16.mxu1 %v31425_v3  ;;  %v9512_v42 = vsel %vm343_vm0, %v9468_v16, 0 }
 0x27f   : > { %23383 = vmatprep.subr.msk.bf16.mxu1 %vm343_vm0, %v9463_v10  ;;  %v9473_v10 = vsel %vm1994_vm3, %v27532_v32, %v27534_v50 }
 0x280   : > { %11928 = vrot.lane.b32.xlu0 %v27269_v30, %s25430_s17 }
 0x281   : > { %23376 = vmatmul.mubr.msk.bf16.vlgmr.msra.gmra.mrb[20].mxu0 %vm339_vm1, %v27358_v21  ;;  %11930 = vrot.lane.b32.xlu1 %v27287_v5, %s25430_s17  ;;  %v27621_v4 = vpop.permute.xlu0 %9452  ;;  %v27623_v49 = vpop.permute.xlu1 %9454 }
 0x282   : > { %9560 = vmatpush1.bf16.msra.mxu0 %v9488_v53  ;;  %9591 = vmatprep.mubr.bf16.mxu0 %v31425_v3 }
 0x283   : > { %23385 = vmatprep.subr.msk.bf16.mxu0 %vm343_vm0, %v9465_v22  ;;  %v9475_v22 = vsel %vm1994_vm3, %v27558_v35, %v27560_v41 }
 0x284   : > { %11932 = vrot.lane.b32.xlu0 %v27294_v44, %s25430_s17 }
 0x285   : > { %23378 = vmatmul.mubr.msk.bf16.vlgmr.msra.gmra.mrb[20].mxu1 %vm339_vm1, %v27358_v21  ;;  %11934 = vrot.lane.b32.xlu1 %v27312_v15, %s25430_s17  ;;  %v27640_v19 = vpop.permute.xlu0 %9456  ;;  %v27642_v51 = vpop.permute.xlu1 %9458  ;;  %v9469_v21 = vsel %vm1994_vm3, %v27468_v2, %v27472_v43  ;;  %v9470_v2 = vsel %vm1994_vm3, %v27472_v43, %v27506_v24  ;;  %v9472_v43 = vsel %vm1994_vm3, %v27508_v37, %v27532_v32 }
 0x286   : > { %9601 = vmatpush1.bf16.msra.mxu1 %v9494_v25  ;;  %9632 = vmatprep.mubr.bf16.mxu1 %v31425_v3  ;;  %v9518_v53 = vsel %vm343_vm0, %v9470_v2, 0  ;;  %v9524_v37 = vsel %vm343_vm0, %v9472_v43, 0  ;;  %v9474_v32 = vsel %vm1994_vm3, %v27534_v50, %v27558_v35  ;;  %v9476_v35 = vsel %vm1994_vm3, %v27560_v41, %v27583_v40 }
 0x287   : > { %23387 = vmatprep.subr.msk.bf16.mxu1 %vm343_vm0, %v9467_v11  ;;  %v9477_v11 = vsel %vm1994_vm3, %v27583_v40, %v27585_v58  ;;  %v9530_v50 = vsel %vm343_vm0, %v9474_v32, 0  ;;  %v9536_v41 = vsel %vm343_vm0, %v9476_v35, 0  ;;  %v9478_v40 = vsel %vm1994_vm3, %v27585_v58, %v27602_v18 }
 0x288   : > { %11936 = vrot.lane.b32.xlu0 %v27320_v48, %s25430_s17  ;;  %v9542_v58 = vsel %vm343_vm0, %v9478_v40, 0 }
 0x289   : > { %23382 = vmatmul.mubr.msk.bf16.vlgmr.msra.gmra.mrb[0].mxu0 %vm339_vm1, %v27650_v26  ;;  %11938 = vrot.lane.b32.xlu1 %v27339_v7, %s25430_s17  ;;  %v27664_v8 = vpop.permute.xlu0 %10248  ;;  %v27666_v60 = vpop.permute.xlu1 %10250 }
 0x28a   : > { %9642 = vmatpush1.bf16.msra.mxu0 %v9500_v39  ;;  %9673 = vmatprep.mubr.bf16.mxu0 %v31425_v3 }
 0x28b   : > { %23389 = vmatprep.subr.msk.bf16.mxu0 %vm343_vm0, %v9469_v21  ;;  %v9479_v21 = vsel %vm1994_vm3, %v27602_v18, %v27604_v23  ;;  %v9480_v18 = vsel %vm1994_vm3, %v27604_v23, %v27621_v4 }
 0x28c   : > { %11940 = vrot.lane.b32.xlu0 %v27347_v13, %s25430_s17  ;;  %v9548_v23 = vsel %vm343_vm0, %v9480_v18, 0 }
 0x28d   : > { %23384 = vmatmul.mubr.msk.bf16.vlgmr.msra.gmra.mrb[0].mxu1 %vm339_vm1, %v27650_v26  ;;  %11942 = vrot.lane.b32.xlu1 %v27370_v0, %s25430_s17  ;;  %v27683_v17 = vpop.permute.xlu0 %10252  ;;  %v27685_v47 = vpop.permute.xlu1 %10254 }
 0x28e   : > { %9683 = vmatpush1.bf16.msra.mxu1 %v9506_v55  ;;  %9714 = vmatprep.mubr.bf16.mxu1 %v31425_v3  ;;  %v10299_v2 = vsel %vm2833_vm4, %v27666_v60, %v27683_v17 }
 0x28f   : > { %23391 = vmatprep.subr.msk.bf16.mxu1 %vm343_vm0, %v9471_v31  ;;  %v9481_v31 = vsel %vm1994_vm3, %v27621_v4, %v27623_v49  ;;  %v9482_v4 = vsel %vm1994_vm3, %v27623_v49, %v27640_v19 }
 0x290   : > { %11944 = vrot.lane.b32.xlu0 %v27378_v14, %s25430_s17  ;;  %v9554_v49 = vsel %vm343_vm0, %v9482_v4, 0 }
 0x291   : > { %23386 = vmatmul.mubr.msk.bf16.vlgmr.msra.gmra.mrb[4].mxu0 %vm339_vm1, %v27650_v26  ;;  %11946 = vrot.lane.b32.xlu1 %v27397_v27, %s25430_s17  ;;  %v27702_v45 = vpop.permute.xlu0 %10256 }
 0x292   : > { %9724 = vmatpush1.bf16.msra.mxu0 %v9512_v42  ;;  %9755 = vmatprep.mubr.bf16.mxu0 %v31425_v3  ;;  %v27708_v52 = vpop.permute.xlu1 %10258  ;;  %v10301_v43 = vsel %vm2833_vm4, %v27685_v47, %v27702_v45 }
 0x293   : > { %23393 = vmatprep.subr.msk.bf16.mxu0 %vm343_vm0, %v9473_v10  ;;  %v9483_v10 = vsel %vm1994_vm3, %v27640_v19, %v27642_v51  ;;  %v10298_v19 = vsel %vm2833_vm4, %v27664_v8, %v27666_v60  ;;  %v10300_v8 = vsel %vm2833_vm4, %v27683_v17, %v27685_v47  ;;  %v10302_v17 = vsel %vm2833_vm4, %v27702_v45, %v27708_v52  ;;  %v27879_v47 = vld [vmem:[%s31422_s1 + $0x30] sm:$0xf] }
 0x294   : > { %11948 = vrot.lane.b32.xlu0 %v27405_v63, %s25430_s17  ;;  %v10338_v45 = vsel %vm343_vm0, %v10302_v17, 0 }
 0x295   : > { %23388 = vmatmul.mubr.msk.bf16.vlgmr.msra.gmra.mrb[4].mxu1 %vm339_vm1, %v27650_v26  ;;  %11950 = vrot.lane.b32.xlu1 %v27423_v56, %s25430_s17 }
 0x296   : > { %9765 = vmatpush1.bf16.msra.mxu1 %v9518_v53  ;;  %9796 = vmatprep.mubr.bf16.mxu1 %v31425_v3  ;;  %v27725_v24 = vpop.permute.xlu0 %10260 }
 0x297   : > { %23395 = vmatprep.subr.msk.bf16.mxu1 %vm343_vm0, %v9475_v22  ;;  %v27728_v57 = vpop.permute.xlu1 %10262  ;;  %v10303_v32 = vsel %vm2833_vm4, %v27708_v52, %v27725_v24 }
 0x298   : > { %11952 = vrot.lane.b32.xlu0 %v27431_v54, %s25430_s17  ;;  %v10304_v52 = vsel %vm2833_vm4, %v27725_v24, %v27728_v57 }
 0x299   : > { %23390 = vmatmul.mubr.msk.bf16.vlgmr.msra.gmra.mrb[8].mxu0 %vm339_vm1, %v27650_v26  ;;  %11954 = vrot.lane.b32.xlu1 %v27450_v29, %s25430_s17 }
 0x29a   : > { %9806 = vmatpush1.bf16.msra.mxu0 %v9524_v37  ;;  %9837 = vmatprep.mubr.bf16.mxu0 %v31425_v3  ;;  %v27744_v25 = vpop.permute.xlu0 %10264 }
 0x29b   : > { %23397 = vmatprep.subr.msk.bf16.mxu0 %vm343_vm0, %v9477_v11  ;;  %v27747_v12 = vpop.permute.xlu1 %10266 }
 0x29c   : > { %11956 = vrot.lane.b32.xlu0 %v27458_v1, %s25430_s17  ;;  %v10306_v24 = vsel %vm2833_vm4, %v27744_v25, %v27747_v12 }
 0x29d   : > { %23392 = vmatmul.mubr.msk.bf16.vlgmr.msra.gmra.mrb[8].mxu1 %vm339_vm1, %v27650_v26  ;;  %11958 = vrot.lane.b32.xlu1 %v27476_v38, %s25430_s17 }
 0x29e   : > { %9847 = vmatpush1.bf16.msra.mxu1 %v9530_v50  ;;  %9878 = vmatprep.mubr.bf16.mxu1 %v31425_v3  ;;  %v27763_v39 = vpop.permute.xlu0 %10268 }
 0x29f   : > { %23399 = vmatprep.subr.msk.bf16.mxu1 %vm343_vm0, %v9479_v21  ;;  %v27766_v62 = vpop.permute.xlu1 %10270  ;;  %v10305_v21 = vsel %vm2833_vm4, %v27728_v57, %v27744_v25 }
 0x2a0   : > { %11960 = vrot.lane.b32.xlu0 %v27484_v9, %s25430_s17  ;;  %v10308_v25 = vsel %vm2833_vm4, %v27763_v39, %v27766_v62 }
 0x2a1   : > { %23394 = vmatmul.mubr.msk.bf16.vlgmr.msra.gmra.mrb[12].mxu0 %vm339_vm1, %v27650_v26  ;;  %11962 = vrot.lane.b32.xlu1 %v27499_v20, %s25430_s17 }
 0x2a2   : > { %9888 = vmatpush1.bf16.msra.mxu0 %v9536_v41  ;;  %9919 = vmatprep.mubr.bf16.mxu0 %v31425_v3  ;;  %v27782_v55 = vpop.permute.xlu0 %10272 }
 0x2a3   : > { %23401 = vmatprep.subr.msk.bf16.mxu0 %vm343_vm0, %v9481_v31  ;;  %v27785_v16 = vpop.permute.xlu1 %10274  ;;  %v10309_v35 = vsel %vm2833_vm4, %v27766_v62, %v27782_v55 }
 0x2a4   : > { %11964 = vrot.lane.b32.xlu0 %v27511_v59, %s25430_s17 }
 0x2a5   : > { %23396 = vmatmul.mubr.msk.bf16.vlgmr.msra.gmra.mrb[12].mxu1 %vm339_vm1, %v27650_v26  ;;  %11966 = vrot.lane.b32.xlu1 %v27525_v61, %s25430_s17 }
 0x2a6   : > { %9929 = vmatpush1.bf16.msra.mxu1 %v9542_v58  ;;  %9960 = vmatprep.mubr.bf16.mxu1 %v31425_v3  ;;  %v27801_v42 = vpop.permute.xlu0 %10276 }
 0x2a7   : > { %23403 = vmatprep.subr.msk.bf16.mxu1 %vm343_vm0, %v9483_v10  ;;  %v27804_v51 = vpop.permute.xlu1 %10278  ;;  %v10311_v31 = vsel %vm2833_vm4, %v27785_v16, %v27801_v42 }
 0x2a8   : > { %11968 = vrot.lane.b32.xlu0 %v27537_v46, %s25430_s17 }
 0x2a9   : > { %23398 = vmatmul.mubr.msk.bf16.vlgmr.msra.gmra.mrb[16].mxu0 %vm339_vm1, %v27650_v26  ;;  %11970 = vrot.lane.b32.xlu1 %v27551_v28, %s25430_s17 }
 0x2aa   : > { %9970 = vmatpush1.bf16.msra.mxu0 %v9548_v23  ;;  %10001 = vmatprep.mubr.bf16.mxu0 %v31425_v3  ;;  %v27820_v22 = vpop.permute.xlu0 %10280 }
 0x2ab   : > { %23407 = vmatprep.subr.msk.bf16.mxu0 %vm343_vm0, %v10299_v2  ;;  %v27823_v53 = vpop.permute.xlu1 %10282  ;;  %v10313_v41 = vsel %vm2833_vm4, %v27804_v51, %v27820_v22 }
 0x2ac   : > { %11972 = vrot.lane.b32.xlu0 %v27570_v33, %s25430_s17  ;;  %v10314_v58 = vsel %vm2833_vm4, %v27820_v22, %v27823_v53 }
 0x2ad   : > { %23400 = vmatmul.mubr.msk.bf16.vlgmr.msra.gmra.mrb[16].mxu1 %vm339_vm1, %v27650_v26  ;;  %12762 = vrot.lane.b32.xlu1 %v27247_v36, %s25431_s24  ;;  %v10326_v36 = vsel %vm343_vm0, %v10298_v19, 0 }
 0x2ae   : > { %10011 = vmatpush1.bf16.msra.mxu1 %v9554_v49  ;;  %10042 = vmatprep.mubr.bf16.mxu1 %v31425_v3  ;;  %v27839_v11 = vpop.permute.xlu0 %10284 }
 0x2af   : > { %23409 = vmatprep.subr.msk.bf16.mxu1 %vm343_vm0, %v10301_v43  ;;  %v27842_v37 = vpop.permute.xlu1 %10286  ;;  %v10315_v40 = vsel %vm2833_vm4, %v27823_v53, %v27839_v11  ;;  %v13477_v53 = vld [vmem:[%s25515_s28 + $0x6] sm:$0xff] }
 0x2b0   : > { %12764 = vrot.lane.b32.xlu0 %v27262_v34, %s25431_s24  ;;  %v28051_v49 = vrot.slane %v13477_v53, %v25510_v6  ;;  %v13491_v19 = vcombine.high %v13477_v53, %v13477_v53 }
 0x2b1   : > { %23402 = vmatmul.mubr.msk.bf16.vlgmr.msra.gmra.mrb[20].mxu0 %vm339_vm1, %v27650_v26  ;;  %12766 = vrot.lane.b32.xlu1 %v27269_v30, %s25431_s24  ;;  %v10332_v30 = vsel %vm343_vm0, %v10300_v8, 0 }
 0x2b2   : > { %10398 = vmatpush1.bf16.msra.mxu0 %v10326_v36  ;;  %10429 = vmatprep.mubr.bf16.mxu0 %v31425_v3  ;;  %v27858_v60 = vpop.permute.xlu0 %10288  ;;  %v28074_v36 = vcombine.high %v28051_v49, %v28051_v49  ;;  %v28077_v8 = vrot.slane %v13491_v19, %v25510_v6 }
 0x2b3   : > { %23411 = vmatprep.subr.msk.bf16.mxu0 %vm343_vm0, %v10303_v32  ;;  %v27861_v34 = vpop.permute.xlu1 %10290  ;;  %v10317_v10 = vsel %vm2833_vm4, %v27842_v37, %v27858_v60 }
 0x2b4   : > { %12768 = vrot.lane.b32.xlu0 %v27287_v5, %s25431_s24  ;;  %v10318_v4 = vsel %vm2833_vm4, %v27858_v60, %v27861_v34  ;;  %v28101_v17 = vcombine.high %v28077_v8, %v28077_v8 }
 0x2b5   : > { %23404 = vmatmul.mubr.msk.bf16.vlgmr.msra.gmra.mrb[20].mxu1 %vm339_vm1, %v27650_v26  ;;  %12770 = vrot.lane.b32.xlu1 %v27294_v44, %s25431_s24  ;;  %v10307_v44 = vsel %vm2833_vm4, %v27747_v12, %v27763_v39  ;;  %v10310_v39 = vsel %vm2833_vm4, %v27782_v55, %v27785_v16  ;;  %v10312_v55 = vsel %vm2833_vm4, %v27801_v42, %v27804_v51 }
 0x2b6   : > { %10439 = vmatpush1.bf16.msra.mxu1 %v10332_v30  ;;  %10470 = vmatprep.mubr.bf16.mxu1 %v31425_v3  ;;  %v27882_v5 = vpop.permute.xlu0 %10292  ;;  %v10316_v51 = vsel %vm2833_vm4, %v27839_v11, %v27842_v37 }
 0x2b7   : > { %23413 = vmatprep.subr.msk.bf16.mxu1 %vm343_vm0, %v10305_v21  ;;  %v27885_v26 = vpop.permute.xlu1 %10294  ;;  %v10319_v42 = vsel %vm2833_vm4, %v27861_v34, %v27882_v5  ;;  %v13478_v34 = vld [vmem:[%s25515_s28 + $0xe] sm:$0xff] }
 0x2b8   : > { %12772 = vrot.lane.b32.xlu0 %v27312_v15, %s25431_s24  ;;  %v10320_v11 = vsel %vm2833_vm4, %v27882_v5, %v27885_v26  ;;  %v28104_v5 = vrot.slane %v13478_v34, %v25510_v6 }
 0x2b9   : > { %23408 = vmatmul.mubr.msk.bf16.vlgmr.msra.gmra.mrb[0].mxu0 %vm339_vm1, %v27879_v47  ;;  %12774 = vrot.lane.b32.xlu1 %v27320_v48, %s25431_s24  ;;  %v10344_v48 = vsel %vm343_vm0, %v10304_v52, 0  ;;  %v10392_v32 = vsel %vm343_vm0, %v10320_v11, 0  ;;  %v13481_v11 = vld [vmem:[%s25515_s28 + $0x26] sm:$0xff] }
 0x2ba   : > { %10480 = vmatpush1.bf16.msra.mxu0 %v10338_v45  ;;  %10511 = vmatprep.mubr.bf16.mxu0 %v31425_v3  ;;  %v27901_v50 = vpop.permute.xlu0 %10296 }
 0x2bb   : > { %23415 = vmatprep.subr.msk.bf16.mxu0 %vm343_vm0, %v10307_v44  ;;  %v27904_v15 = vpop.permute.xlu1 %11086  ;;  %v10321_v23 = vsel %vm2833_vm4, %v27885_v26, %v27901_v50  ;;  %v13508_v26 = vcombine.high %v13478_v34, %v13478_v34  ;;  %v13559_v34 = vcombine.high %v13481_v11, %v13481_v11 }
 0x2bc   : > { %12776 = vrot.lane.b32.xlu0 %v27339_v7, %s25431_s24 }
 0x2bd   : > { %23410 = vmatmul.mubr.msk.bf16.vlgmr.msra.gmra.mrb[0].mxu1 %vm339_vm1, %v27879_v47  ;;  %12778 = vrot.lane.b32.xlu1 %v27347_v13, %s25431_s24  ;;  %v10350_v13 = vsel %vm343_vm0, %v10306_v24, 0 }
 0x2be   : > { %10521 = vmatpush1.bf16.msra.mxu1 %v10344_v48  ;;  %10552 = vmatprep.mubr.bf16.mxu1 %v31425_v3  ;;  %v27920_v57 = vpop.permute.xlu0 %11088  ;;  %v28130_v48 = vrot.slane %v13508_v26, %v25510_v6 }
 0x2bf   : > { %23417 = vmatprep.subr.msk.bf16.mxu1 %vm343_vm0, %v10309_v35  ;;  %v27923_v7 = vpop.permute.xlu1 %11090  ;;  %v11136_v60 = vsel %vm3672_vm5, %v27904_v15, %v27920_v57  ;;  %v28127_v35 = vcombine.high %v28104_v5, %v28104_v5 }
 0x2c0   : > { %12780 = vrot.lane.b32.xlu0 %v27370_v0, %s25431_s24  ;;  %v11137_v43 = vsel %vm3672_vm5, %v27920_v57, %v27923_v7  ;;  %v11164_v30 = vsel %vm343_vm0, %v11136_v60, 0  ;;  %v28268_v60 = vrot.slane %v13481_v11, %v25510_v6 }
 0x2c1   : > { %23412 = vmatmul.mubr.msk.bf16.vlgmr.msra.gmra.mrb[4].mxu0 %vm339_vm1, %v27879_v47  ;;  %12782 = vrot.lane.b32.xlu1 %v27378_v14, %s25431_s24  ;;  %v10356_v14 = vsel %vm343_vm0, %v10308_v25, 0 }
 0x2c2   : > { %10562 = vmatpush1.bf16.msra.mxu0 %v10350_v13  ;;  %10593 = vmatprep.mubr.bf16.mxu0 %v31425_v3  ;;  %v27939_v12 = vpop.permute.xlu0 %11092 }
 0x2c3   : > { %23419 = vmatprep.subr.msk.bf16.mxu0 %vm343_vm0, %v10311_v31  ;;  %v27942_v0 = vpop.permute.xlu1 %11094  ;;  %v11138_v44 = vsel %vm3672_vm5, %v27923_v7, %v27939_v12  ;;  %v13479_v7 = vld [vmem:[%s25515_s28 + $0x16] sm:$0xff] }
 0x2c4   : > { %12784 = vrot.lane.b32.xlu0 %v27397_v27, %s25431_s24  ;;  %v11170_v15 = vsel %vm343_vm0, %v11138_v44, 0 }
 0x2c5   : > { %23414 = vmatmul.mubr.msk.bf16.vlgmr.msra.gmra.mrb[4].mxu1 %vm339_vm1, %v27879_v47  ;;  %12786 = vrot.lane.b32.xlu1 %v27405_v63, %s25431_s24  ;;  %v10362_v63 = vsel %vm343_vm0, %v10310_v39, 0 }
 0x2c6   : > { %10603 = vmatpush1.bf16.msra.mxu1 %v10356_v14  ;;  %10634 = vmatprep.mubr.bf16.mxu1 %v31425_v3  ;;  %v27958_v62 = vpop.permute.xlu0 %11096 }
 0x2c7   : > { %23421 = vmatprep.subr.msk.bf16.mxu1 %vm343_vm0, %v10313_v41  ;;  %v27961_v27 = vpop.permute.xlu1 %11098  ;;  %v11140_v24 = vsel %vm3672_vm5, %v27942_v0, %v27958_v62  ;;  %v13525_v41 = vcombine.high %v13479_v7, %v13479_v7 }
 0x2c8   : > { %12788 = vrot.lane.b32.xlu0 %v27423_v56, %s25431_s24  ;;  %v11141_v21 = vsel %vm3672_vm5, %v27958_v62, %v27961_v27  ;;  %v11176_v25 = vsel %vm343_vm0, %v11140_v24, 0 }
 0x2c9   : > { %23416 = vmatmul.mubr.msk.bf16.vlgmr.msra.gmra.mrb[8].mxu0 %vm339_vm1, %v27879_v47  ;;  %12790 = vrot.lane.b32.xlu1 %v27431_v54, %s25431_s24  ;;  %v10368_v54 = vsel %vm343_vm0, %v10312_v55, 0  ;;  %v28188_v55 = vrot.slane %v13525_v41, %v25510_v6 }
 0x2ca   : > { %10644 = vmatpush1.bf16.msra.mxu0 %v10362_v63  ;;  %10675 = vmatprep.mubr.bf16.mxu0 %v31425_v3  ;;  %v27977_v16 = vpop.permute.xlu0 %11100 }
 0x2cb   : > { %23423 = vmatprep.subr.msk.bf16.mxu0 %vm343_vm0, %v10315_v40  ;;  %v27980_v56 = vpop.permute.xlu1 %11102  ;;  %v11142_v14 = vsel %vm3672_vm5, %v27961_v27, %v27977_v16 }
 0x2cc   : > { %12792 = vrot.lane.b32.xlu0 %v27450_v29, %s25431_s24  ;;  %v11143_v50 = vsel %vm3672_vm5, %v27977_v16, %v27980_v56  ;;  %v11182_v27 = vsel %vm343_vm0, %v11142_v14, 0 }
 0x2cd   : > { %23418 = vmatmul.mubr.msk.bf16.vlgmr.msra.gmra.mrb[8].mxu1 %vm339_vm1, %v27879_v47  ;;  %12794 = vrot.lane.b32.xlu1 %v27458_v1, %s25431_s24  ;;  %v10374_v1 = vsel %vm343_vm0, %v10314_v58, 0 }
 0x2ce   : > { %10685 = vmatpush1.bf16.msra.mxu1 %v10368_v54  ;;  %10716 = vmatprep.mubr.bf16.mxu1 %v31425_v3  ;;  %v27996_v18 = vpop.permute.xlu0 %11104  ;;  %v13480_v54 = vld [vmem:[%s25515_s28 + $0x1e] sm:$0xff] }
 0x2cf   : > { %23425 = vmatprep.subr.msk.bf16.mxu1 %vm343_vm0, %v10317_v10  ;;  %v27999_v29 = vpop.permute.xlu1 %11106  ;;  %v11144_v16 = vsel %vm3672_vm5, %v27980_v56, %v27996_v18 }
 0x2d0   : > { %12796 = vrot.lane.b32.xlu0 %v27476_v38, %s25431_s24  ;;  %v11145_v13 = vsel %vm3672_vm5, %v27996_v18, %v27999_v29  ;;  %v11188_v56 = vsel %vm343_vm0, %v11144_v16, 0  ;;  %v28212_v18 = vcombine.high %v28188_v55, %v28188_v55 }
 0x2d1   : > { %23420 = vmatmul.mubr.msk.bf16.vlgmr.msra.gmra.mrb[12].mxu0 %vm339_vm1, %v27879_v47  ;;  %12798 = vrot.lane.b32.xlu1 %v27484_v9, %s25431_s24  ;;  %v10380_v9 = vsel %vm343_vm0, %v10316_v51, 0  ;;  %v13542_v51 = vcombine.high %v13480_v54, %v13480_v54 }
 0x2d2   : > { %10726 = vmatpush1.bf16.msra.mxu0 %v10374_v1  ;;  %10757 = vmatprep.mubr.bf16.mxu0 %v31425_v3  ;;  %v28015_v2 = vpop.permute.xlu0 %11108  ;;  %v28215_v1 = vrot.slane %v13480_v54, %v25510_v6 }
 0x2d3   : > { %23427 = vmatprep.subr.msk.bf16.mxu0 %vm343_vm0, %v10319_v42  ;;  %v28018_v38 = vpop.permute.xlu1 %11110 }
 0x2d4   : > { %12800 = vrot.lane.b32.xlu0 %v27499_v20, %s25431_s24  ;;  %v11147_v40 = vsel %vm3672_vm5, %v28015_v2, %v28018_v38 }
 0x2d5   : > { %23422 = vmatmul.mubr.msk.bf16.vlgmr.msra.gmra.mrb[12].mxu1 %vm339_vm1, %v27879_v47  ;;  %12802 = vrot.lane.b32.xlu1 %v27511_v59, %s25431_s24  ;;  %v10386_v59 = vsel %vm343_vm0, %v10318_v4, 0 }
 0x2d6   : > { %10767 = vmatpush1.bf16.msra.mxu1 %v10380_v9  ;;  %10798 = vmatprep.mubr.bf16.mxu1 %v31425_v3  ;;  %v28034_v22 = vpop.permute.xlu0 %11112 }
 0x2d7   : > { %23429 = vmatprep.subr.msk.bf16.mxu1 %vm343_vm0, %v10321_v23  ;;  %v28038_v20 = vpop.permute.xlu1 %11114  ;;  %v11146_v23 = vsel %vm3672_vm5, %v27999_v29, %v28015_v2  ;;  %v28238_v2 = vcombine.high %v28215_v1, %v28215_v1 }
 0x2d8   : > { %12804 = vrot.lane.b32.xlu0 %v27525_v61, %s25431_s24  ;;  %v11149_v42 = vsel %vm3672_vm5, %v28034_v22, %v28038_v20  ;;  %v11194_v29 = vsel %vm343_vm0, %v11146_v23, 0 }
 0x2d9   : > { %23424 = vmatmul.mubr.msk.bf16.vlgmr.msra.gmra.mrb[16].mxu0 %vm339_vm1, %v27879_v47  ;;  %12806 = vrot.lane.b32.xlu1 %v27537_v46, %s25431_s24  ;;  %v11139_v46 = vsel %vm3672_vm5, %v27939_v12, %v27942_v0  ;;  %v28159_v12 = vcombine.high %v28130_v48, %v28130_v48  ;;  %v28162_v0 = vrot.slane %v13479_v7, %v25510_v6  ;;  %v13482_v7 = vld [vmem:[%s25515_s28 + $0x2e] sm:$0xff] }
 0x2da   : > { %10808 = vmatpush1.bf16.msra.mxu0 %v10386_v59  ;;  %10839 = vmatprep.mubr.bf16.mxu0 %v31425_v3  ;;  %v28057_v61 = vpop.permute.xlu0 %11116  ;;  %v11148_v59 = vsel %vm3672_vm5, %v28018_v38, %v28034_v22  ;;  %v28321_v41 = vrot.slane %v13482_v7, %v25510_v6  ;;  %v13576_v14 = vcombine.high %v13482_v7, %v13482_v7 }
 0x2db   : > { %23433 = vmatprep.subr.msk.bf16.mxu0 %vm343_vm0, %v11137_v43  ;;  %v28060_v37 = vpop.permute.xlu1 %11118  ;;  %v28185_v63 = vcombine.high %v28162_v0, %v28162_v0  ;;  %v28241_v43 = vrot.slane %v13542_v51, %v25510_v6  ;;  %v11200_v38 = vsel %vm343_vm0, %v11148_v59, 0 }
 0x2dc   : > { %12808 = vrot.lane.b32.xlu0 %v27551_v28, %s25431_s24  ;;  %v11151_v53 = vsel %vm3672_vm5, %v28057_v61, %v28060_v37 }
 0x2dd   : > { %23426 = vmatmul.mubr.msk.bf16.vlgmr.msra.gmra.mrb[16].mxu1 %vm339_vm1, %v27879_v47  ;;  %12810 = vrot.lane.b32.xlu1 %v27570_v33, %s25431_s24  ;;  %v28265_v22 = vcombine.high %v28241_v43, %v28241_v43 }
 0x2de   : > { %10849 = vmatpush1.bf16.msra.mxu1 %v10392_v32  ;;  %10880 = vmatprep.mubr.bf16.mxu1 %v31425_v3  ;;  %v28083_v28 = vpop.permute.xlu0 %11120 }
 0x2df   : > { %23435 = vmatprep.subr.msk.bf16.mxu1 %vm343_vm0, %v11139_v46  ;;  %v28087_v33 = vpop.permute.xlu1 %11122 }
 0x2e0   : > { %13600 = vrot.lane.b32.xlu0 %v28051_v49, %s25432_s27  ;;  %v11153_v32 = vsel %vm3672_vm5, %v28083_v28, %v28087_v33 }
 0x2e1   : > { %23428 = vmatmul.mubr.msk.bf16.vlgmr.msra.gmra.mrb[20].mxu0 %vm339_vm1, %v27879_v47  ;;  %13602 = vrot.lane.b32.xlu1 %v28074_v36, %s25432_s27 }
 0x2e2   : > { %11236 = vmatpush1.bf16.msra.mxu0 %v11164_v30  ;;  %11267 = vmatprep.mubr.bf16.mxu0 %v31425_v3  ;;  %v28110_v45 = vpop.permute.xlu0 %11124 }
 0x2e3   : > { %23437 = vmatprep.subr.msk.bf16.mxu0 %vm343_vm0, %v11141_v21  ;;  %v28113_v52 = vpop.permute.xlu1 %11126  ;;  %v11150_v21 = vsel %vm3672_vm5, %v28038_v20, %v28057_v61  ;;  %v28291_v61 = vcombine.high %v28268_v60, %v28268_v60 }
 0x2e4   : > { %13604 = vrot.lane.b32.xlu0 %v28077_v8, %s25432_s27  ;;  %v11155_v44 = vsel %vm3672_vm5, %v28110_v45, %v28113_v52  ;;  %v11206_v20 = vsel %vm343_vm0, %v11150_v21, 0 }
 0x2e5   : > { %23430 = vmatmul.mubr.msk.bf16.vlgmr.msra.gmra.mrb[20].mxu1 %vm339_vm1, %v27879_v47  ;;  %13606 = vrot.lane.b32.xlu1 %v28101_v17, %s25432_s27  ;;  %v28138_v47 = vld [vmem:[%s31422_s1 + $0x34] sm:$0xf] }
 0x2e6   : > { %11277 = vmatpush1.bf16.msra.mxu1 %v11170_v15  ;;  %11308 = vmatprep.mubr.bf16.mxu1 %v31425_v3  ;;  %v28141_v57 = vpop.permute.xlu0 %11128  ;;  %v11152_v15 = vsel %vm3672_vm5, %v28060_v37, %v28083_v28 }
 0x2e7   : > { %23439 = vmatprep.subr.msk.bf16.mxu1 %vm343_vm0, %v11143_v50  ;;  %v28145_v31 = vpop.permute.xlu1 %11130  ;;  %v28294_v50 = vrot.slane %v13559_v34, %v25510_v6  ;;  %v11212_v37 = vsel %vm343_vm0, %v11152_v15, 0 }
 0x2e8   : > { %13608 = vrot.lane.b32.xlu0 %v28104_v5, %s25432_s27 }
 0x2e9   : > { %23434 = vmatmul.mubr.msk.bf16.vlgmr.msra.gmra.mrb[0].mxu0 %vm339_vm1, %v28138_v47  ;;  %13610 = vrot.lane.b32.xlu1 %v28127_v35, %s25432_s27  ;;  %v28318_v28 = vcombine.high %v28294_v50, %v28294_v50 }
 0x2ea   : > { %11318 = vmatpush1.bf16.msra.mxu0 %v11176_v25  ;;  %11349 = vmatprep.mubr.bf16.mxu0 %v31425_v3  ;;  %v28168_v39 = vpop.permute.xlu0 %11132  ;;  %v11157_v25 = vsel %vm3672_vm5, %v28141_v57, %v28145_v31 }
 0x2eb   : > { %23441 = vmatprep.subr.msk.bf16.mxu0 %vm343_vm0, %v11145_v13  ;;  %v28171_v62 = vpop.permute.xlu1 %11134 }
 0x2ec   : > { %13612 = vrot.lane.b32.xlu0 %v28130_v48, %s25432_s27  ;;  %v11159_v54 = vsel %vm3672_vm5, %v28168_v39, %v28171_v62  ;;  %v11156_v62 = vsel %vm3672_vm5, %v28113_v52, %v28141_v57 }
 0x2ed   : > { %23436 = vmatmul.mubr.msk.bf16.vlgmr.msra.gmra.mrb[0].mxu1 %vm339_vm1, %v28138_v47  ;;  %13614 = vrot.lane.b32.xlu1 %v28159_v12, %s25432_s27  ;;  %v11224_v52 = vsel %vm343_vm0, %v11156_v62, 0 }
 0x2ee   : > { %11359 = vmatpush1.bf16.msra.mxu1 %v11182_v27  ;;  %11390 = vmatprep.mubr.bf16.mxu1 %v31425_v3  ;;  %v28194_v10 = vpop.permute.xlu0 %11924 }
 0x2ef   : > { %23443 = vmatprep.subr.msk.bf16.mxu1 %vm343_vm0, %v11147_v40  ;;  %v28198_v58 = vpop.permute.xlu1 %11926  ;;  %v11154_v40 = vsel %vm3672_vm5, %v28087_v33, %v28110_v45  ;;  %v28344_v45 = vcombine.high %v28321_v41, %v28321_v41 }
 0x2f0   : > { %13616 = vrot.lane.b32.xlu0 %v28162_v0, %s25432_s27  ;;  %v11218_v33 = vsel %vm343_vm0, %v11154_v40, 0 }
 0x2f1   : > { %23438 = vmatmul.mubr.msk.bf16.vlgmr.msra.gmra.mrb[4].mxu0 %vm339_vm1, %v28138_v47  ;;  %13618 = vrot.lane.b32.xlu1 %v28185_v63, %s25432_s27 }
 0x2f2   : > { %11400 = vmatpush1.bf16.msra.mxu0 %v11188_v56  ;;  %11431 = vmatprep.mubr.bf16.mxu0 %v31425_v3  ;;  %v28221_v9 = vpop.permute.xlu0 %11928 }
 0x2f3   : > { %23445 = vmatprep.subr.msk.bf16.mxu0 %vm343_vm0, %v11149_v42  ;;  %v28224_v4 = vpop.permute.xlu1 %11930  ;;  %v28347_v42 = vrot.slane %v13576_v14, %v25510_v6  ;;  %v11975_v23 = vsel %vm4511_vm6, %v28198_v58, %v28221_v9 }
 0x2f4   : > { %13620 = vrot.lane.b32.xlu0 %v28188_v55, %s25432_s27 }
 0x2f5   : > { %23440 = vmatmul.mubr.msk.bf16.vlgmr.msra.gmra.mrb[4].mxu1 %vm339_vm1, %v28138_v47  ;;  %13622 = vrot.lane.b32.xlu1 %v28212_v18, %s25432_s27  ;;  %v28370_v57 = vcombine.high %v28347_v42, %v28347_v42 }
 0x2f6   : > { %11441 = vmatpush1.bf16.msra.mxu1 %v11194_v29  ;;  %11472 = vmatprep.mubr.bf16.mxu1 %v31425_v3  ;;  %v28247_v19 = vpop.permute.xlu0 %11932 }
 0x2f7   : > { %23447 = vmatprep.subr.msk.bf16.mxu1 %vm343_vm0, %v11151_v53  ;;  %v28251_v46 = vpop.permute.xlu1 %11934  ;;  %v11158_v53 = vsel %vm3672_vm5, %v28145_v31, %v28168_v39  ;;  %v11977_v11 = vsel %vm4511_vm6, %v28224_v4, %v28247_v19  ;;  %v28392_v39 = vld.sshfl [vmem:[%s25515_s28 + $0x36] sm:$0x3 pattern:$0x76325410] }
 0x2f8   : > { %13624 = vrot.lane.b32.xlu0 %v28215_v1, %s25432_s27  ;;  %v11230_v31 = vsel %vm343_vm0, %v11158_v53, 0 }
 0x2f9   : > { %23442 = vmatmul.mubr.msk.bf16.vlgmr.msra.gmra.mrb[8].mxu0 %vm339_vm1, %v28138_v47  ;;  %13626 = vrot.lane.b32.xlu1 %v28238_v2, %s25432_s27 }
 0x2fa   : > { %11482 = vmatpush1.bf16.msra.mxu0 %v11200_v38  ;;  %11513 = vmatprep.mubr.bf16.mxu0 %v31425_v3  ;;  %v28274_v30 = vpop.permute.xlu0 %11936 }
 0x2fb   : > { %23449 = vmatprep.subr.msk.bf16.mxu0 %vm343_vm0, %v11153_v32  ;;  %v28277_v26 = vpop.permute.xlu1 %11938  ;;  %v11974_v32 = vsel %vm4511_vm6, %v28194_v10, %v28198_v58  ;;  %v11979_v21 = vsel %vm4511_vm6, %v28251_v46, %v28274_v30  ;;  %v11976_v58 = vsel %vm4511_vm6, %v28221_v9, %v28224_v4  ;;  %v11978_v9 = vsel %vm4511_vm6, %v28247_v19, %v28251_v46  ;;  %v28438_v4 = vld [vmem:[%s31422_s1 + $0x38] sm:$0xf] }
 0x2fc   : > { %13628 = vrot.lane.b32.xlu0 %v28241_v43, %s25432_s27  ;;  %v12002_v10 = vsel %vm343_vm0, %v11974_v32, 0  ;;  %v12014_v19 = vsel %vm343_vm0, %v11978_v9, 0  ;;  %v11980_v46 = vsel %vm4511_vm6, %v28274_v30, %v28277_v26 }
 0x2fd   : > { %23444 = vmatmul.mubr.msk.bf16.vlgmr.msra.gmra.mrb[8].mxu1 %vm339_vm1, %v28138_v47  ;;  %13630 = vrot.lane.b32.xlu1 %v28265_v22, %s25432_s27 }
 0x2fe   : > { %11523 = vmatpush1.bf16.msra.mxu1 %v11206_v20  ;;  %11554 = vmatprep.mubr.bf16.mxu1 %v31425_v3  ;;  %v28300_v24 = vpop.permute.xlu0 %11940 }
 0x2ff   : > { %23451 = vmatprep.subr.msk.bf16.mxu1 %vm343_vm0, %v11155_v44  ;;  %v28304_v13 = vpop.permute.xlu1 %11942  ;;  %v11981_v15 = vsel %vm4511_vm6, %v28277_v26, %v28300_v24 }
 0x300   : > { %13632 = vrot.lane.b32.xlu0 %v28268_v60, %s25432_s27  ;;  %v11982_v30 = vsel %vm4511_vm6, %v28300_v24, %v28304_v13 }
 0x301   : > { %23446 = vmatmul.mubr.msk.bf16.vlgmr.msra.gmra.mrb[12].mxu0 %vm339_vm1, %v28138_v47  ;;  %13634 = vrot.lane.b32.xlu1 %v28291_v61, %s25432_s27 }
 0x302   : > { %11564 = vmatpush1.bf16.msra.mxu0 %v11212_v37  ;;  %11595 = vmatprep.mubr.bf16.mxu0 %v31425_v3  ;;  %v28327_v27 = vpop.permute.xlu0 %11944 }
 0x303   : > { %23453 = vmatprep.subr.msk.bf16.mxu0 %vm343_vm0, %v11157_v25  ;;  %v28330_v16 = vpop.permute.xlu1 %11946 }
 0x304   : > { %13636 = vrot.lane.b32.xlu0 %v28294_v50, %s25432_s27  ;;  %v11984_v24 = vsel %vm4511_vm6, %v28327_v27, %v28330_v16 }
 0x305   : > { %23448 = vmatmul.mubr.msk.bf16.vlgmr.msra.gmra.mrb[12].mxu1 %vm339_vm1, %v28138_v47  ;;  %13638 = vrot.lane.b32.xlu1 %v28318_v28, %s25432_s27 }
 0x306   : > { %11605 = vmatpush1.bf16.msra.mxu1 %v11218_v33  ;;  %11636 = vmatprep.mubr.bf16.mxu1 %v31425_v3  ;;  %v28353_v56 = vpop.permute.xlu0 %11948 }
 0x307   : > { %23455 = vmatprep.subr.msk.bf16.mxu1 %vm343_vm0, %v11159_v54  ;;  %v28356_v51 = vpop.permute.xlu1 %11950  ;;  %v11985_v25 = vsel %vm4511_vm6, %v28330_v16, %v28353_v56 }
 0x308   : > { %13640 = vrot.lane.b32.xlu0 %v28321_v41, %s25432_s27  ;;  %v11986_v40 = vsel %vm4511_vm6, %v28353_v56, %v28356_v51 }
 0x309   : > { %23450 = vmatmul.mubr.msk.bf16.vlgmr.msra.gmra.mrb[16].mxu0 %vm339_vm1, %v28138_v47  ;;  %13642 = vrot.lane.b32.xlu1 %v28344_v45, %s25432_s27 }
 0x30a   : > { %11646 = vmatpush1.bf16.msra.mxu0 %v11224_v52  ;;  %11677 = vmatprep.mubr.bf16.mxu0 %v31425_v3  ;;  %v28376_v29 = vpop.permute.xlu0 %11952 }
 0x30b   : > { %23459 = vmatprep.subr.msk.bf16.mxu0 %vm343_vm0, %v11975_v23  ;;  %v28379_v59 = vpop.permute.xlu1 %11954 }
 0x30c   : > { %13644 = vrot.lane.b32.xlu0 %v28347_v42, %s25432_s27  ;;  %v11988_v54 = vsel %vm4511_vm6, %v28376_v29, %v28379_v59 }
 0x30d   : > { %23452 = vmatmul.mubr.msk.bf16.vlgmr.msra.gmra.mrb[16].mxu1 %vm339_vm1, %v28138_v47  ;;  %13646 = vrot.lane.b32.xlu1 %v28370_v57, %s25432_s27 }
 0x30e   : > { %11687 = vmatpush1.bf16.msra.mxu1 %v11230_v31  ;;  %11718 = vmatprep.mubr.bf16.mxu1 %v31425_v3  ;;  %v28398_v38 = vpop.permute.xlu0 %11956 }
 0x30f   : > { %23461 = vmatprep.subr.msk.bf16.mxu1 %vm343_vm0, %v11977_v11  ;;  %v28401_v34 = vpop.permute.xlu1 %11958  ;;  %v11989_v14 = vsel %vm4511_vm6, %v28379_v59, %v28398_v38 }
 0x310   : > { %13648 = vrot.lane.b32.xlu0 %v28392_v39, %s25432_s27  ;;  %v11990_v56 = vsel %vm4511_vm6, %v28398_v38, %v28401_v34 }
 0x311   : > { %23454 = vmatmul.mubr.msk.bf16.vlgmr.msra.gmra.mrb[20].mxu0 %vm339_vm1, %v28138_v47  ;;  %14438 = vrot.lane.b32.xlu1 %v28051_v49, %s25433_s7  ;;  %v12008_v49 = vsel %vm343_vm0, %v11976_v58, 0 }
 0x312   : > { %12074 = vmatpush1.bf16.msra.mxu0 %v12002_v10  ;;  %12105 = vmatprep.mubr.bf16.mxu0 %v31425_v3  ;;  %v28417_v44 = vpop.permute.xlu0 %11960 }
 0x313   : > { %23463 = vmatprep.subr.msk.bf16.mxu0 %vm343_vm0, %v11979_v21  ;;  %v28420_v20 = vpop.permute.xlu1 %11962  ;;  %v11991_v16 = vsel %vm4511_vm6, %v28401_v34, %v28417_v44  ;;  %v15908_v34 = vld [vmem:[%s25515_s28 + $0xc] sm:$0xff] }
 0x314   : > { %14440 = vrot.lane.b32.xlu0 %v28074_v36, %s25433_s7  ;;  %v11992_v52 = vsel %vm4511_vm6, %v28417_v44, %v28420_v20  ;;  %v28626_v10 = vrot.slane %v15908_v34, %v25510_v6  ;;  %v15922_v58 = vcombine.high %v15908_v34, %v15908_v34 }
 0x315   : > { %23456 = vmatmul.mubr.msk.bf16.vlgmr.msra.gmra.mrb[20].mxu1 %vm339_vm1, %v28138_v47  ;;  %14442 = vrot.lane.b32.xlu1 %v28077_v8, %s25433_s7  ;;  %v11983_v8 = vsel %vm4511_vm6, %v28304_v13, %v28327_v27 }
 0x316   : > { %12115 = vmatpush1.bf16.msra.mxu1 %v12008_v49  ;;  %12146 = vmatprep.mubr.bf16.mxu1 %v31425_v3  ;;  %v28441_v36 = vpop.permute.xlu0 %11964  ;;  %v28649_v49 = vcombine.high %v28626_v10, %v28626_v10  ;;  %v28652_v9 = vrot.slane %v15922_v58, %v25510_v6 }
 0x317   : > { %23465 = vmatprep.subr.msk.bf16.mxu1 %vm343_vm0, %v11981_v15  ;;  %v28444_v47 = vpop.permute.xlu1 %11966  ;;  %v11993_v62 = vsel %vm4511_vm6, %v28420_v20, %v28441_v36 }
 0x318   : > { %14444 = vrot.lane.b32.xlu0 %v28101_v17, %s25433_s7  ;;  %v11994_v59 = vsel %vm4511_vm6, %v28441_v36, %v28444_v47 }
 0x319   : > { %23460 = vmatmul.mubr.msk.bf16.vlgmr.msra.gmra.mrb[0].mxu0 %vm339_vm1, %v28438_v4  ;;  %14446 = vrot.lane.b32.xlu1 %v28104_v5, %s25433_s7  ;;  %v12020_v5 = vsel %vm343_vm0, %v11980_v46, 0  ;;  %v28676_v46 = vcombine.high %v28652_v9, %v28652_v9 }
 0x31a   : > { %12156 = vmatpush1.bf16.msra.mxu0 %v12014_v19  ;;  %12187 = vmatprep.mubr.bf16.mxu0 %v31425_v3  ;;  %v28460_v7 = vpop.permute.xlu0 %11968 }
 0x31b   : > { %23467 = vmatprep.subr.msk.bf16.mxu0 %vm343_vm0, %v11983_v8  ;;  %v28463_v17 = vpop.permute.xlu1 %11970  ;;  %v11995_v23 = vsel %vm4511_vm6, %v28444_v47, %v28460_v7  ;;  %v15909_v47 = vld [vmem:[%s25515_s28 + $0x14] sm:$0xff] }
 0x31c   : > { %14448 = vrot.lane.b32.xlu0 %v28127_v35, %s25433_s7  ;;  %v11987_v35 = vsel %vm4511_vm6, %v28356_v51, %v28376_v29  ;;  %v11996_v32 = vsel %vm4511_vm6, %v28460_v7, %v28463_v17  ;;  %v28679_v7 = vrot.slane %v15909_v47, %v25510_v6 }
 0x31d   : > { %23462 = vmatmul.mubr.msk.bf16.vlgmr.msra.gmra.mrb[0].mxu1 %vm339_vm1, %v28438_v4  ;;  %14450 = vrot.lane.b32.xlu1 %v28130_v48, %s25433_s7  ;;  %v12026_v48 = vsel %vm343_vm0, %v11982_v30, 0 }
 0x31e   : > { %12197 = vmatpush1.bf16.msra.mxu1 %v12020_v5  ;;  %12228 = vmatprep.mubr.bf16.mxu1 %v31425_v3  ;;  %v11973_v26 = vpop.permute.xlu0 %11972 }
 0x31f   : > { %23469 = vmatprep.subr.msk.bf16.mxu1 %vm343_vm0, %v11985_v25  ;;  %v28480_v37 = vpop.permute.xlu1 %12762  ;;  %v11997_v29 = vsel %vm4511_vm6, %v28463_v17, %v11973_v26  ;;  %v15939_v17 = vcombine.high %v15909_v47, %v15909_v47 }
 0x320   : > { %14452 = vrot.lane.b32.xlu0 %v28159_v12, %s25433_s7 }
 0x321   : > { %23464 = vmatmul.mubr.msk.bf16.vlgmr.msra.gmra.mrb[4].mxu0 %vm339_vm1, %v28438_v4  ;;  %14454 = vrot.lane.b32.xlu1 %v28162_v0, %s25433_s7  ;;  %v12032_v0 = vsel %vm343_vm0, %v11984_v24, 0 }
 0x322   : > { %12238 = vmatpush1.bf16.msra.mxu0 %v12026_v48  ;;  %12269 = vmatprep.mubr.bf16.mxu0 %v31425_v3  ;;  %v28496_v13 = vpop.permute.xlu0 %12764  ;;  %v28710_v48 = vrot.slane %v15939_v17, %v25510_v6 }
 0x323   : > { %23471 = vmatprep.subr.msk.bf16.mxu0 %vm343_vm0, %v11987_v35  ;;  %v28499_v12 = vpop.permute.xlu1 %12766  ;;  %v12812_v44 = vsel %vm5350_vm7, %v28480_v37, %v28496_v13  ;;  %v28707_v35 = vcombine.high %v28679_v7, %v28679_v7 }
 0x324   : > { %14456 = vrot.lane.b32.xlu0 %v28185_v63, %s25433_s7  ;;  %v12813_v31 = vsel %vm5350_vm7, %v28496_v13, %v28499_v12  ;;  %v12840_v15 = vsel %vm343_vm0, %v12812_v44, 0 }
 0x325   : > { %23466 = vmatmul.mubr.msk.bf16.vlgmr.msra.gmra.mrb[4].mxu1 %vm339_vm1, %v28438_v4  ;;  %14458 = vrot.lane.b32.xlu1 %v28188_v55, %s25433_s7  ;;  %v12038_v55 = vsel %vm343_vm0, %v11986_v40, 0 }
 0x326   : > { %12279 = vmatpush1.bf16.msra.mxu1 %v12032_v0  ;;  %12310 = vmatprep.mubr.bf16.mxu1 %v31425_v3  ;;  %v28515_v27 = vpop.permute.xlu0 %12768 }
 0x327   : > { %23473 = vmatprep.subr.msk.bf16.mxu1 %vm343_vm0, %v11989_v14  ;;  %v28518_v63 = vpop.permute.xlu1 %12770  ;;  %v12814_v36 = vsel %vm5350_vm7, %v28499_v12, %v28515_v27  ;;  %v15910_v12 = vld [vmem:[%s25515_s28 + $0x1c] sm:$0xff] }
 0x328   : > { %14460 = vrot.lane.b32.xlu0 %v28212_v18, %s25433_s7  ;;  %v12815_v21 = vsel %vm5350_vm7, %v28515_v27, %v28518_v63  ;;  %v12846_v19 = vsel %vm343_vm0, %v12814_v36, 0  ;;  %v28734_v27 = vcombine.high %v28710_v48, %v28710_v48 }
 0x329   : > { %23468 = vmatmul.mubr.msk.bf16.vlgmr.msra.gmra.mrb[8].mxu0 %vm339_vm1, %v28438_v4  ;;  %14462 = vrot.lane.b32.xlu1 %v28215_v1, %s25433_s7  ;;  %v12044_v1 = vsel %vm343_vm0, %v11988_v54, 0 }
 0x32a   : > { %12320 = vmatpush1.bf16.msra.mxu0 %v12038_v55  ;;  %12351 = vmatprep.mubr.bf16.mxu0 %v31425_v3  ;;  %v28534_v33 = vpop.permute.xlu0 %12772 }
 0x32b   : > { %23475 = vmatprep.subr.msk.bf16.mxu0 %vm343_vm0, %v11991_v16  ;;  %v28537_v18 = vpop.permute.xlu1 %12774  ;;  %v12816_v25 = vsel %vm5350_vm7, %v28518_v63, %v28534_v33  ;;  %v28737_v63 = vrot.slane %v15910_v12, %v25510_v6  ;;  %v15956_v16 = vcombine.high %v15910_v12, %v15910_v12 }
 0x32c   : > { %14464 = vrot.lane.b32.xlu0 %v28238_v2, %s25433_s7  ;;  %v12852_v37 = vsel %vm343_vm0, %v12816_v25, 0 }
 0x32d   : > { %23470 = vmatmul.mubr.msk.bf16.vlgmr.msra.gmra.mrb[8].mxu1 %vm339_vm1, %v28438_v4  ;;  %14466 = vrot.lane.b32.xlu1 %v28241_v43, %s25433_s7  ;;  %v12050_v43 = vsel %vm343_vm0, %v11990_v56, 0  ;;  %v28763_v56 = vrot.slane %v15956_v16, %v25510_v6 }
 0x32e   : > { %12361 = vmatpush1.bf16.msra.mxu1 %v12044_v1  ;;  %12392 = vmatprep.mubr.bf16.mxu1 %v31425_v3  ;;  %v28553_v51 = vpop.permute.xlu0 %12776  ;;  %v28760_v1 = vcombine.high %v28737_v63, %v28737_v63 }
 0x32f   : > { %23477 = vmatprep.subr.msk.bf16.mxu1 %vm343_vm0, %v11993_v62  ;;  %v28556_v2 = vpop.permute.xlu1 %12778  ;;  %v12818_v24 = vsel %vm5350_vm7, %v28537_v18, %v28553_v51 }
 0x330   : > { %14468 = vrot.lane.b32.xlu0 %v28265_v22, %s25433_s7  ;;  %v12819_v8 = vsel %vm5350_vm7, %v28553_v51, %v28556_v2  ;;  %v12858_v40 = vsel %vm343_vm0, %v12818_v24, 0 }
 0x331   : > { %23472 = vmatmul.mubr.msk.bf16.vlgmr.msra.gmra.mrb[12].mxu0 %vm339_vm1, %v28438_v4  ;;  %14470 = vrot.lane.b32.xlu1 %v28268_v60, %s25433_s7  ;;  %v12056_v60 = vsel %vm343_vm0, %v11992_v52, 0 }
 0x332   : > { %12402 = vmatpush1.bf16.msra.mxu0 %v12050_v43  ;;  %12433 = vmatprep.mubr.bf16.mxu0 %v31425_v3  ;;  %v28572_v53 = vpop.permute.xlu0 %12780 }
 0x333   : > { %23479 = vmatprep.subr.msk.bf16.mxu0 %vm343_vm0, %v11995_v23  ;;  %v28575_v22 = vpop.permute.xlu1 %12782  ;;  %v12820_v55 = vsel %vm5350_vm7, %v28556_v2, %v28572_v53  ;;  %v15911_v23 = vld [vmem:[%s25515_s28 + $0x24] sm:$0xff] }
 0x334   : > { %14472 = vrot.lane.b32.xlu0 %v28291_v61, %s25433_s7  ;;  %v12821_v26 = vsel %vm5350_vm7, %v28572_v53, %v28575_v22  ;;  %v12864_v62 = vsel %vm343_vm0, %v12820_v55, 0 }
 0x335   : > { %23474 = vmatmul.mubr.msk.bf16.vlgmr.msra.gmra.mrb[12].mxu1 %vm339_vm1, %v28438_v4  ;;  %14474 = vrot.lane.b32.xlu1 %v28294_v50, %s25433_s7  ;;  %v12062_v50 = vsel %vm343_vm0, %v11994_v59, 0 }
 0x336   : > { %12443 = vmatpush1.bf16.msra.mxu1 %v12056_v60  ;;  %12474 = vmatprep.mubr.bf16.mxu1 %v31425_v3  ;;  %v28590_v11 = vpop.permute.xlu0 %12784  ;;  %v15973_v60 = vcombine.high %v15911_v23, %v15911_v23 }
 0x337   : > { %23481 = vmatprep.subr.msk.bf16.mxu1 %vm343_vm0, %v11997_v29  ;;  %v28593_v61 = vpop.permute.xlu1 %12786  ;;  %v12822_v51 = vsel %vm5350_vm7, %v28575_v22, %v28590_v11  ;;  %v28787_v22 = vcombine.high %v28763_v56, %v28763_v56  ;;  %v28790_v29 = vrot.slane %v15911_v23, %v25510_v6 }
 0x338   : > { %14476 = vrot.lane.b32.xlu0 %v28318_v28, %s25433_s7  ;;  %v12823_v0 = vsel %vm5350_vm7, %v28590_v11, %v28593_v61  ;;  %v12870_v53 = vsel %vm343_vm0, %v12822_v51, 0 }
 0x339   : > { %23476 = vmatmul.mubr.msk.bf16.vlgmr.msra.gmra.mrb[16].mxu0 %vm339_vm1, %v28438_v4  ;;  %14478 = vrot.lane.b32.xlu1 %v28321_v41, %s25433_s7  ;;  %v12068_v41 = vsel %vm343_vm0, %v11996_v32, 0  ;;  %v28813_v32 = vcombine.high %v28790_v29, %v28790_v29 }
 0x33a   : > { %12484 = vmatpush1.bf16.msra.mxu0 %v12062_v50  ;;  %12515 = vmatprep.mubr.bf16.mxu0 %v31425_v3  ;;  %v28609_v38 = vpop.permute.xlu0 %12788 }
 0x33b   : > { %23485 = vmatprep.subr.msk.bf16.mxu0 %vm343_vm0, %v12813_v31  ;;  %v28613_v28 = vpop.permute.xlu1 %12790  ;;  %v12824_v59 = vsel %vm5350_vm7, %v28593_v61, %v28609_v38 }
 0x33c   : > { %14480 = vrot.lane.b32.xlu0 %v28344_v45, %s25433_s7  ;;  %v12876_v61 = vsel %vm343_vm0, %v12824_v59, 0 }
 0x33d   : > { %23478 = vmatmul.mubr.msk.bf16.vlgmr.msra.gmra.mrb[16].mxu1 %vm339_vm1, %v28438_v4  ;;  %14482 = vrot.lane.b32.xlu1 %v28347_v42, %s25433_s7  ;;  %v12817_v42 = vsel %vm5350_vm7, %v28534_v33, %v28537_v18  ;;  %v12825_v18 = vsel %vm5350_vm7, %v28609_v38, %v28613_v28  ;;  %v28816_v38 = vrot.slane %v15973_v60, %v25510_v6 }
 0x33e   : > { %12525 = vmatpush1.bf16.msra.mxu1 %v12068_v41  ;;  %12556 = vmatprep.mubr.bf16.mxu1 %v31425_v3  ;;  %v28632_v45 = vpop.permute.xlu0 %12792  ;;  %v15912_v41 = vld [vmem:[%s25515_s28 + $0x2c] sm:$0xff] }
 0x33f   : > { %23487 = vmatprep.subr.msk.bf16.mxu1 %vm343_vm0, %v12815_v21  ;;  %v28635_v20 = vpop.permute.xlu1 %12794  ;;  %v12826_v34 = vsel %vm5350_vm7, %v28613_v28, %v28632_v45 }
 0x340   : > { %14484 = vrot.lane.b32.xlu0 %v28370_v57, %s25433_s7  ;;  %v12827_v52 = vsel %vm5350_vm7, %v28632_v45, %v28635_v20  ;;  %v12882_v28 = vsel %vm343_vm0, %v12826_v34, 0  ;;  %v28840_v45 = vcombine.high %v28816_v38, %v28816_v38  ;;  %v28970_v34 = vld.sshfl [vmem:[%s25515_s28 + $0x3c] sm:$0x3 pattern:$0x76325410] }
 0x341   : > { %23480 = vmatmul.mubr.msk.bf16.vlgmr.msra.gmra.mrb[20].mxu0 %vm339_vm1, %v28438_v4  ;;  %14486 = vrot.lane.b32.xlu1 %v28392_v39, %s25433_s7 }
 0x342   : > { %12912 = vmatpush1.bf16.msra.mxu0 %v12840_v15  ;;  %12943 = vmatprep.mubr.bf16.mxu0 %v31425_v3  ;;  %v28658_v57 = vpop.permute.xlu0 %12796  ;;  %v15990_v15 = vcombine.high %v15912_v41, %v15912_v41 }
 0x343   : > { %23489 = vmatprep.subr.msk.bf16.mxu0 %vm343_vm0, %v12817_v42  ;;  %v28662_v39 = vpop.permute.xlu1 %12798  ;;  %v28843_v42 = vrot.slane %v15912_v41, %v25510_v6  ;;  %v12828_v36 = vsel %vm5350_vm7, %v28635_v20, %v28658_v57 }
 0x344   : > { %16031 = vrot.lane.b32.xlu0 %v28626_v10, %s25426_s29  ;;  %v12829_v50 = vsel %vm5350_vm7, %v28658_v57, %v28662_v39  ;;  %v12888_v20 = vsel %vm343_vm0, %v12828_v36, 0  ;;  %v28869_v17 = vrot.slane %v15990_v15, %v25510_v6  ;;  %v28994_v15 = vld [vmem:[%s31422_s1 + $0x40] sm:$0xf] }
 0x345   : > { %23482 = vmatmul.mubr.msk.bf16.vlgmr.msra.gmra.mrb[20].mxu1 %vm339_vm1, %v28438_v4  ;;  %16033 = vrot.lane.b32.xlu1 %v28649_v49, %s25426_s29  ;;  %v28687_v4 = vld [vmem:[%s31422_s1 + $0x3c] sm:$0xf]  ;;  %v28866_v57 = vcombine.high %v28843_v42, %v28843_v42 }
 0x346   : > { %12953 = vmatpush1.bf16.msra.mxu1 %v12846_v19  ;;  %12984 = vmatprep.mubr.bf16.mxu1 %v31425_v3  ;;  %v28690_v5 = vpop.permute.xlu0 %12800 }
 0x347   : > { %23491 = vmatprep.subr.msk.bf16.mxu1 %vm343_vm0, %v12819_v8  ;;  %v28693_v30 = vpop.permute.xlu1 %12802  ;;  %v12830_v25 = vsel %vm5350_vm7, %v28662_v39, %v28690_v5 }
 0x348   : > { %16035 = vrot.lane.b32.xlu0 %v28652_v9, %s25426_s29  ;;  %v12831_v44 = vsel %vm5350_vm7, %v28690_v5, %v28693_v30  ;;  %v12894_v39 = vsel %vm343_vm0, %v12830_v25, 0  ;;  %v28893_v5 = vcombine.high %v28869_v17, %v28869_v17 }
 0x349   : > { %23486 = vmatmul.mubr.msk.bf16.vlgmr.msra.gmra.mrb[0].mxu0 %vm339_vm1, %v28687_v4  ;;  %16037 = vrot.lane.b32.xlu1 %v28676_v46, %s25426_s29 }
 0x34a   : > { %12994 = vmatpush1.bf16.msra.mxu0 %v12852_v37  ;;  %13025 = vmatprep.mubr.bf16.mxu0 %v31425_v3  ;;  %v28716_v13 = vpop.permute.xlu0 %12804  ;;  %v15913_v37 = vld [vmem:[%s25515_s28 + $0x34] sm:$0xff] }
 0x34b   : > { %23493 = vmatprep.subr.msk.bf16.mxu0 %vm343_vm0, %v12821_v26  ;;  %v28720_v14 = vpop.permute.xlu1 %12806  ;;  %v12832_v16 = vsel %vm5350_vm7, %v28693_v30, %v28716_v13 }
 0x34c   : > { %16039 = vrot.lane.b32.xlu0 %v28679_v7, %s25426_s29  ;;  %v12833_v19 = vsel %vm5350_vm7, %v28716_v13, %v28720_v14  ;;  %v12900_v30 = vsel %vm343_vm0, %v12832_v16, 0 }
 0x34d   : > { %23488 = vmatmul.mubr.msk.bf16.vlgmr.msra.gmra.mrb[0].mxu1 %vm339_vm1, %v28687_v4  ;;  %16041 = vrot.lane.b32.xlu1 %v28707_v35, %s25426_s29 }
 0x34e   : > { %13035 = vmatpush1.bf16.msra.mxu1 %v12858_v40  ;;  %13066 = vmatprep.mubr.bf16.mxu1 %v31425_v3  ;;  %v28743_v54 = vpop.permute.xlu0 %12808  ;;  %v16007_v40 = vcombine.high %v15913_v37, %v15913_v37 }
 0x34f   : > { %23495 = vmatprep.subr.msk.bf16.mxu1 %vm343_vm0, %v12823_v0  ;;  %v28746_v33 = vpop.permute.xlu1 %12810  ;;  %v28896_v0 = vrot.slane %v15913_v37, %v25510_v6  ;;  %v12834_v51 = vsel %vm5350_vm7, %v28720_v14, %v28743_v54 }
 0x350   : > { %16043 = vrot.lane.b32.xlu0 %v28710_v48, %s25426_s29  ;;  %v12835_v12 = vsel %vm5350_vm7, %v28743_v54, %v28746_v33  ;;  %v12906_v14 = vsel %vm343_vm0, %v12834_v51, 0 }
 0x351   : > { %23490 = vmatmul.mubr.msk.bf16.vlgmr.msra.gmra.mrb[4].mxu0 %vm339_vm1, %v28687_v4  ;;  %16045 = vrot.lane.b32.xlu1 %v28734_v27, %s25426_s29  ;;  %v28919_v13 = vcombine.high %v28896_v0, %v28896_v0 }
 0x352   : > { %13076 = vmatpush1.bf16.msra.mxu0 %v12864_v62  ;;  %13107 = vmatprep.mubr.bf16.mxu0 %v31425_v3  ;;  %v28769_v2 = vpop.permute.xlu0 %13600  ;;  %v28922_v62 = vrot.slane %v16007_v40, %v25510_v6 }
 0x353   : > { %23497 = vmatprep.subr.msk.bf16.mxu0 %vm343_vm0, %v12825_v18  ;;  %v28773_v43 = vpop.permute.xlu1 %13602 }
 0x354   : > { %16047 = vrot.lane.b32.xlu0 %v28737_v63, %s25426_s29  ;;  %v28948_v54 = vcombine.high %v28922_v62, %v28922_v62 }
 0x355   : > { %23492 = vmatmul.mubr.msk.bf16.vlgmr.msra.gmra.mrb[4].mxu1 %vm339_vm1, %v28687_v4  ;;  %16049 = vrot.lane.b32.xlu1 %v28760_v1, %s25426_s29 }
 0x356   : > { %13117 = vmatpush1.bf16.msra.mxu1 %v12870_v53  ;;  %13148 = vmatprep.mubr.bf16.mxu1 %v31425_v3  ;;  %v28796_v11 = vpop.permute.xlu0 %13604  ;;  %v13650_v53 = vsel %vm6189_vm8, %v28769_v2, %v28773_v43 }
 0x357   : > { %23499 = vmatprep.subr.msk.bf16.mxu1 %vm343_vm0, %v12827_v52  ;;  %v28799_v31 = vpop.permute.xlu1 %13606  ;;  %v13651_v18 = vsel %vm6189_vm8, %v28773_v43, %v28796_v11  ;;  %v13678_v43 = vsel %vm343_vm0, %v13650_v53, 0 }
 0x358   : > { %16051 = vrot.lane.b32.xlu0 %v28763_v56, %s25426_s29 }
 0x359   : > { %23494 = vmatmul.mubr.msk.bf16.vlgmr.msra.gmra.mrb[8].mxu0 %vm339_vm1, %v28687_v4  ;;  %16053 = vrot.lane.b32.xlu1 %v28787_v22, %s25426_s29 }
 0x35a   : > { %13158 = vmatpush1.bf16.msra.mxu0 %v12876_v61  ;;  %13189 = vmatprep.mubr.bf16.mxu0 %v31425_v3  ;;  %v28822_v21 = vpop.permute.xlu0 %13608 }
 0x35b   : > { %23501 = vmatprep.subr.msk.bf16.mxu0 %vm343_vm0, %v12829_v50  ;;  %v28826_v58 = vpop.permute.xlu1 %13610  ;;  %v13653_v60 = vsel %vm6189_vm8, %v28799_v31, %v28822_v21  ;;  %v13652_v50 = vsel %vm6189_vm8, %v28796_v11, %v28799_v31 }
 0x35c   : > { %16055 = vrot.lane.b32.xlu0 %v28790_v29, %s25426_s29  ;;  %v13684_v11 = vsel %vm343_vm0, %v13652_v50, 0 }
 0x35d   : > { %23496 = vmatmul.mubr.msk.bf16.vlgmr.msra.gmra.mrb[8].mxu1 %vm339_vm1, %v28687_v4  ;;  %16057 = vrot.lane.b32.xlu1 %v28813_v32, %s25426_s29 }
 0x35e   : > { %13199 = vmatpush1.bf16.msra.mxu1 %v12882_v28  ;;  %13230 = vmatprep.mubr.bf16.mxu1 %v31425_v3  ;;  %v28849_v47 = vpop.permute.xlu0 %13612 }
 0x35f   : > { %23503 = vmatprep.subr.msk.bf16.mxu1 %vm343_vm0, %v12831_v44  ;;  %v28852_v8 = vpop.permute.xlu1 %13614  ;;  %v13655_v61 = vsel %vm6189_vm8, %v28826_v58, %v28849_v47  ;;  %v13654_v44 = vsel %vm6189_vm8, %v28822_v21, %v28826_v58 }
 0x360   : > { %16059 = vrot.lane.b32.xlu0 %v28816_v38, %s25426_s29  ;;  %v13690_v58 = vsel %vm343_vm0, %v13654_v44, 0 }
 0x361   : > { %23498 = vmatmul.mubr.msk.bf16.vlgmr.msra.gmra.mrb[12].mxu0 %vm339_vm1, %v28687_v4  ;;  %16061 = vrot.lane.b32.xlu1 %v28840_v45, %s25426_s29 }
 0x362   : > { %13240 = vmatpush1.bf16.msra.mxu0 %v12888_v20  ;;  %13271 = vmatprep.mubr.bf16.mxu0 %v31425_v3  ;;  %v28875_v26 = vpop.permute.xlu0 %13616 }
 0x363   : > { %23505 = vmatprep.subr.msk.bf16.mxu0 %vm343_vm0, %v12833_v19  ;;  %v28879_v24 = vpop.permute.xlu1 %13618  ;;  %v13657_v28 = vsel %vm6189_vm8, %v28852_v8, %v28875_v26 }
 0x364   : > { %16063 = vrot.lane.b32.xlu0 %v28843_v42, %s25426_s29  ;;  %v13658_v25 = vsel %vm6189_vm8, %v28875_v26, %v28879_v24 }
 0x365   : > { %23500 = vmatmul.mubr.msk.bf16.vlgmr.msra.gmra.mrb[12].mxu1 %vm339_vm1, %v28687_v4  ;;  %16065 = vrot.lane.b32.xlu1 %v28866_v57, %s25426_s29  ;;  %v13702_v26 = vsel %vm343_vm0, %v13658_v25, 0 }
 0x366   : > { %13281 = vmatpush1.bf16.msra.mxu1 %v12894_v39  ;;  %13312 = vmatprep.mubr.bf16.mxu1 %v31425_v3  ;;  %v28902_v55 = vpop.permute.xlu0 %13620 }
 0x367   : > { %23507 = vmatprep.subr.msk.bf16.mxu1 %vm343_vm0, %v12835_v12  ;;  %v28905_v33 = vpop.permute.xlu1 %13622  ;;  %v13659_v19 = vsel %vm6189_vm8, %v28879_v24, %v28902_v55 }
 0x368   : > { %16067 = vrot.lane.b32.xlu0 %v28869_v17, %s25426_s29  ;;  %v13660_v39 = vsel %vm6189_vm8, %v28902_v55, %v28905_v33 }
 0x369   : > { %23502 = vmatmul.mubr.msk.bf16.vlgmr.msra.gmra.mrb[16].mxu0 %vm339_vm1, %v28687_v4  ;;  %16069 = vrot.lane.b32.xlu1 %v28893_v5, %s25426_s29 }
 0x36a   : > { %13322 = vmatpush1.bf16.msra.mxu0 %v12900_v30  ;;  %13353 = vmatprep.mubr.bf16.mxu0 %v31425_v3  ;;  %v28928_v23 = vpop.permute.xlu0 %13624 }
 0x36b   : > { %23511 = vmatprep.subr.msk.bf16.mxu0 %vm343_vm0, %v13651_v18  ;;  %v28931_v52 = vpop.permute.xlu1 %13626  ;;  %v13661_v37 = vsel %vm6189_vm8, %v28905_v33, %v28928_v23  ;;  %v13708_v18 = vsel %vm343_vm0, %v13660_v39, 0 }
 0x36c   : > { %16071 = vrot.lane.b32.xlu0 %v28896_v0, %s25426_s29  ;;  %v13662_v33 = vsel %vm6189_vm8, %v28928_v23, %v28931_v52 }
 0x36d   : > { %23504 = vmatmul.mubr.msk.bf16.vlgmr.msra.gmra.mrb[16].mxu1 %vm339_vm1, %v28687_v4  ;;  %16073 = vrot.lane.b32.xlu1 %v28919_v13, %s25426_s29  ;;  %v13714_v53 = vsel %vm343_vm0, %v13662_v33, 0 }
 0x36e   : > { %13363 = vmatpush1.bf16.msra.mxu1 %v12906_v14  ;;  %13394 = vmatprep.mubr.bf16.mxu1 %v31425_v3  ;;  %v28951_v2 = vpop.permute.xlu0 %13628 }
 0x36f   : > { %23513 = vmatprep.subr.msk.bf16.mxu1 %vm343_vm0, %v13653_v60  ;;  %v28955_v59 = vpop.permute.xlu1 %13630  ;;  %v13663_v40 = vsel %vm6189_vm8, %v28931_v52, %v28951_v2 }
 0x370   : > { %16075 = vrot.lane.b32.xlu0 %v28922_v62, %s25426_s29  ;;  %v13664_v52 = vsel %vm6189_vm8, %v28951_v2, %v28955_v59 }
 0x371   : > { %23506 = vmatmul.mubr.msk.bf16.vlgmr.msra.gmra.mrb[20].mxu0 %vm339_vm1, %v28687_v4  ;;  %16077 = vrot.lane.b32.xlu1 %v28948_v54, %s25426_s29 }
 0x372   : > { %13750 = vmatpush1.bf16.msra.mxu0 %v13678_v43  ;;  %13781 = vmatprep.mubr.bf16.mxu0 %v31425_v3  ;;  %v28973_v41 = vpop.permute.xlu0 %13632  ;;  %v13720_v43 = vsel %vm343_vm0, %v13664_v52, 0 }
 0x373   : > { %23515 = vmatprep.subr.msk.bf16.mxu0 %vm343_vm0, %v13655_v61  ;;  %v28977_v31 = vpop.permute.xlu1 %13634  ;;  %v13665_v30 = vsel %vm6189_vm8, %v28955_v59, %v28973_v41 }
 0x374   : > { %16079 = vrot.lane.b32.xlu0 %v28970_v34, %s25426_s29  ;;  %v13666_v59 = vsel %vm6189_vm8, %v28973_v41, %v28977_v31 }
 0x375   : > { %23508 = vmatmul.mubr.msk.bf16.vlgmr.msra.gmra.mrb[20].mxu1 %vm339_vm1, %v28687_v4  ;;  %16869 = vrot.lane.b32.xlu1 %v28626_v10, %s25427_s5  ;;  %v13656_v4 = vsel %vm6189_vm8, %v28849_v47, %v28852_v8 }
 0x376   : > { %13791 = vmatpush1.bf16.msra.mxu1 %v13684_v11  ;;  %13822 = vmatprep.mubr.bf16.mxu1 %v31425_v3  ;;  %v28997_v21 = vpop.permute.xlu0 %13636  ;;  %v13696_v47 = vsel %vm343_vm0, %v13656_v4, 0  ;;  %v13726_v11 = vsel %vm343_vm0, %v13666_v59, 0 }
 0x377   : > { %23517 = vmatprep.subr.msk.bf16.mxu1 %vm343_vm0, %v13657_v28  ;;  %v29001_v36 = vpop.permute.xlu1 %13638  ;;  %v13667_v60 = vsel %vm6189_vm8, %v28977_v31, %v28997_v21 }
 0x378   : > { %16871 = vrot.lane.b32.xlu0 %v28649_v49, %s25427_s5  ;;  %v13668_v31 = vsel %vm6189_vm8, %v28997_v21, %v29001_v36 }
 0x379   : > { %23512 = vmatmul.mubr.msk.bf16.vlgmr.msra.gmra.mrb[0].mxu0 %vm339_vm1, %v28994_v15  ;;  %16873 = vrot.lane.b32.xlu1 %v28652_v9, %s25427_s5 }
 0x37a   : > { %13832 = vmatpush1.bf16.msra.mxu0 %v13690_v58  ;;  %13863 = vmatprep.mubr.bf16.mxu0 %v31425_v3  ;;  %v29016_v20 = vpop.permute.xlu0 %13640  ;;  %v13732_v58 = vsel %vm343_vm0, %v13668_v31, 0 }
 0x37b   : > { %23519 = vmatprep.subr.msk.bf16.mxu0 %vm343_vm0, %v13659_v19  ;;  %v29020_v8 = vpop.permute.xlu1 %13642  ;;  %v13669_v50 = vsel %vm6189_vm8, %v29001_v36, %v29016_v20 }
 0x37c   : > { %16875 = vrot.lane.b32.xlu0 %v28676_v46, %s25427_s5  ;;  %v13670_v36 = vsel %vm6189_vm8, %v29016_v20, %v29020_v8 }
 0x37d   : > { %23514 = vmatmul.mubr.msk.bf16.vlgmr.msra.gmra.mrb[0].mxu1 %vm339_vm1, %v28994_v15  ;;  %16877 = vrot.lane.b32.xlu1 %v28679_v7, %s25427_s5 }
 0x37e   : > { %13873 = vmatpush1.bf16.msra.mxu1 %v13696_v47  ;;  %13904 = vmatprep.mubr.bf16.mxu1 %v31425_v3  ;;  %v29035_v12 = vpop.permute.xlu0 %13644  ;;  %v13738_v47 = vsel %vm343_vm0, %v13670_v36, 0 }
 0x37f   : > { %23521 = vmatprep.subr.msk.bf16.mxu1 %vm343_vm0, %v13661_v37  ;;  %v29039_v24 = vpop.permute.xlu1 %13646  ;;  %v13671_v44 = vsel %vm6189_vm8, %v29020_v8, %v29035_v12 }
 0x380   : > { %16879 = vrot.lane.b32.xlu0 %v28707_v35, %s25427_s5  ;;  %v13672_v8 = vsel %vm6189_vm8, %v29035_v12, %v29039_v24 }
 0x381   : > { %23516 = vmatmul.mubr.msk.bf16.vlgmr.msra.gmra.mrb[4].mxu0 %vm339_vm1, %v28994_v15  ;;  %16881 = vrot.lane.b32.xlu1 %v28710_v48, %s25427_s5 }
 0x382   : > { %13914 = vmatpush1.bf16.msra.mxu0 %v13702_v26  ;;  %13945 = vmatprep.mubr.bf16.mxu0 %v31425_v3  ;;  %v13649_v16 = vpop.permute.xlu0 %13648  ;;  %v13744_v26 = vsel %vm343_vm0, %v13672_v8, 0 }
 0x383   : > { %23523 = vmatprep.subr.msk.bf16.mxu0 %vm343_vm0, %v13663_v40  ;;  %v29056_v55 = vpop.permute.xlu1 %14438  ;;  %v13673_v4 = vsel %vm6189_vm8, %v29039_v24, %v13649_v16 }
 0x384   : > { %16883 = vrot.lane.b32.xlu0 %v28734_v27, %s25427_s5 }
 0x385   : > { %23518 = vmatmul.mubr.msk.bf16.vlgmr.msra.gmra.mrb[4].mxu1 %vm339_vm1, %v28994_v15  ;;  %16885 = vrot.lane.b32.xlu1 %v28737_v63, %s25427_s5 }
 0x386   : > { %13955 = vmatpush1.bf16.msra.mxu1 %v13708_v18  ;;  %13986 = vmatprep.mubr.bf16.mxu1 %v31425_v3  ;;  %v14441_v51 = vpop.permute.xlu0 %14440 }
 0x387   : > { %23525 = vmatprep.subr.msk.bf16.mxu1 %vm343_vm0, %v13665_v30  ;;  %v29073_v23 = vpop.permute.xlu1 %14442  ;;  %v14488_v24 = vsel %vm7028_vm9, %v29056_v55, %v14441_v51 }
 0x388   : > { %16887 = vrot.lane.b32.xlu0 %v28760_v1, %s25427_s5  ;;  %v14489_v25 = vsel %vm7028_vm9, %v14441_v51, %v29073_v23  ;;  %v14516_v16 = vsel %vm343_vm0, %v14488_v24, 0 }
 0x389   : > { %23520 = vmatmul.mubr.msk.bf16.vlgmr.msra.gmra.mrb[8].mxu0 %vm339_vm1, %v28994_v15  ;;  %16889 = vrot.lane.b32.xlu1 %v28763_v56, %s25427_s5 }
 0x38a   : > { %13996 = vmatpush1.bf16.msra.mxu0 %v13714_v53  ;;  %14027 = vmatprep.mubr.bf16.mxu0 %v31425_v3  ;;  %v14445_v14 = vpop.permute.xlu0 %14444 }
 0x38b   : > { %23527 = vmatprep.subr.msk.bf16.mxu0 %vm343_vm0, %v13667_v60  ;;  %v29090_v2 = vpop.permute.xlu1 %14446  ;;  %v14490_v55 = vsel %vm7028_vm9, %v29073_v23, %v14445_v14  ;;  %v29201_v60 = vld [vmem:[%s31422_s1 + $0x44] sm:$0xf] }
 0x38c   : > { %16891 = vrot.lane.b32.xlu0 %v28787_v22, %s25427_s5  ;;  %v14491_v39 = vsel %vm7028_vm9, %v14445_v14, %v29090_v2  ;;  %v14522_v51 = vsel %vm343_vm0, %v14490_v55, 0 }
 0x38d   : > { %23522 = vmatmul.mubr.msk.bf16.vlgmr.msra.gmra.mrb[8].mxu1 %vm339_vm1, %v28994_v15  ;;  %16893 = vrot.lane.b32.xlu1 %v28790_v29, %s25427_s5 }
 0x38e   : > { %14037 = vmatpush1.bf16.msra.mxu1 %v13720_v43  ;;  %14068 = vmatprep.mubr.bf16.mxu1 %v31425_v3  ;;  %v14449_v61 = vpop.permute.xlu0 %14448 }
 0x38f   : > { %23529 = vmatprep.subr.msk.bf16.mxu1 %vm343_vm0, %v13669_v50  ;;  %v29107_v41 = vpop.permute.xlu1 %14450  ;;  %v14492_v23 = vsel %vm7028_vm9, %v29090_v2, %v14449_v61 }
 0x390   : > { %16895 = vrot.lane.b32.xlu0 %v28813_v32, %s25427_s5  ;;  %v14493_v33 = vsel %vm7028_vm9, %v14449_v61, %v29107_v41  ;;  %v14528_v43 = vsel %vm343_vm0, %v14492_v23, 0 }
 0x391   : > { %23524 = vmatmul.mubr.msk.bf16.vlgmr.msra.gmra.mrb[12].mxu0 %vm339_vm1, %v28994_v15  ;;  %16897 = vrot.lane.b32.xlu1 %v28816_v38, %s25427_s5 }
 0x392   : > { %14078 = vmatpush1.bf16.msra.mxu0 %v13726_v11  ;;  %14109 = vmatprep.mubr.bf16.mxu0 %v31425_v3  ;;  %v14453_v28 = vpop.permute.xlu0 %14452 }
 0x393   : > { %23531 = vmatprep.subr.msk.bf16.mxu0 %vm343_vm0, %v13671_v44  ;;  %v29124_v21 = vpop.permute.xlu1 %14454 }
 0x394   : > { %16899 = vrot.lane.b32.xlu0 %v28840_v45, %s25427_s5  ;;  %v14495_v52 = vsel %vm7028_vm9, %v14453_v28, %v29124_v21 }
 0x395   : > { %23526 = vmatmul.mubr.msk.bf16.vlgmr.msra.gmra.mrb[12].mxu1 %vm339_vm1, %v28994_v15  ;;  %16901 = vrot.lane.b32.xlu1 %v28843_v42, %s25427_s5 }
 0x396   : > { %14119 = vmatpush1.bf16.msra.mxu1 %v13732_v58  ;;  %14150 = vmatprep.mubr.bf16.mxu1 %v31425_v3  ;;  %v14457_v19 = vpop.permute.xlu0 %14456 }
 0x397   : > { %23533 = vmatprep.subr.msk.bf16.mxu1 %vm343_vm0, %v13673_v4  ;;  %v29140_v20 = vpop.permute.xlu1 %14458 }
 0x398   : > { %16903 = vrot.lane.b32.xlu0 %v28866_v57, %s25427_s5  ;;  %v14497_v59 = vsel %vm7028_vm9, %v14457_v19, %v29140_v20 }
 0x399   : > { %23528 = vmatmul.mubr.msk.bf16.vlgmr.msra.gmra.mrb[16].mxu0 %vm339_vm1, %v28994_v15  ;;  %16905 = vrot.lane.b32.xlu1 %v28869_v17, %s25427_s5 }
 0x39a   : > { %14160 = vmatpush1.bf16.msra.mxu0 %v13738_v47  ;;  %14191 = vmatprep.mubr.bf16.mxu0 %v31425_v3  ;;  %v14461_v37 = vpop.permute.xlu0 %14460 }
 0x39b   : > { %23537 = vmatprep.subr.msk.bf16.mxu0 %vm343_vm0, %v14489_v25  ;;  %v29156_v12 = vpop.permute.xlu1 %14462 }
 0x39c   : > { %16907 = vrot.lane.b32.xlu0 %v28893_v5, %s25427_s5  ;;  %v14499_v31 = vsel %vm7028_vm9, %v14461_v37, %v29156_v12 }
 0x39d   : > { %23530 = vmatmul.mubr.msk.bf16.vlgmr.msra.gmra.mrb[16].mxu1 %vm339_vm1, %v28994_v15  ;;  %16909 = vrot.lane.b32.xlu1 %v28896_v0, %s25427_s5 }
 0x39e   : > { %14201 = vmatpush1.bf16.msra.mxu1 %v13744_v26  ;;  %14232 = vmatprep.mubr.bf16.mxu1 %v31425_v3  ;;  %v14465_v40 = vpop.permute.xlu0 %14464 }
 0x39f   : > { %23539 = vmatprep.subr.msk.bf16.mxu1 %vm343_vm0, %v14491_v39  ;;  %v29171_v18 = vpop.permute.xlu1 %14466 }
 0x3a0   : > { %16911 = vrot.lane.b32.xlu0 %v28919_v13, %s25427_s5  ;;  %v14501_v36 = vsel %vm7028_vm9, %v14465_v40, %v29171_v18 }
 0x3a1   : > { %23532 = vmatmul.mubr.msk.bf16.vlgmr.msra.gmra.mrb[20].mxu0 %vm339_vm1, %v28994_v15  ;;  %16913 = vrot.lane.b32.xlu1 %v28922_v62, %s25427_s5 }
 0x3a2   : > { %14588 = vmatpush1.bf16.msra.mxu0 %v14516_v16  ;;  %14619 = vmatprep.mubr.bf16.mxu0 %v31425_v3  ;;  %v14469_v30 = vpop.permute.xlu0 %14468 }
 0x3a3   : > { %23541 = vmatprep.subr.msk.bf16.mxu0 %vm343_vm0, %v14493_v33  ;;  %v29186_v53 = vpop.permute.xlu1 %14470 }
 0x3a4   : > { %16915 = vrot.lane.b32.xlu0 %v28948_v54, %s25427_s5  ;;  %v14503_v8 = vsel %vm7028_vm9, %v14469_v30, %v29186_v53 }
 0x3a5   : > { %23534 = vmatmul.mubr.msk.bf16.vlgmr.msra.gmra.mrb[20].mxu1 %vm339_vm1, %v28994_v15  ;;  %16917 = vrot.lane.b32.xlu1 %v28970_v34, %s25427_s5  ;;  %v14494_v15 = vsel %vm7028_vm9, %v29107_v41, %v14453_v28  ;;  %v14496_v41 = vsel %vm7028_vm9, %v29124_v21, %v14457_v19  ;;  %v14498_v21 = vsel %vm7028_vm9, %v29140_v20, %v14461_v37 }
 0x3a6   : > { %14629 = vmatpush1.bf16.msra.mxu1 %v14522_v51  ;;  %14660 = vmatprep.mubr.bf16.mxu1 %v31425_v3  ;;  %v14473_v14 = vpop.permute.xlu0 %14472  ;;  %v14534_v61 = vsel %vm343_vm0, %v14494_v15, 0  ;;  %v14540_v28 = vsel %vm343_vm0, %v14496_v41, 0  ;;  %v14546_v19 = vsel %vm343_vm0, %v14498_v21, 0  ;;  %v14500_v20 = vsel %vm7028_vm9, %v29156_v12, %v14465_v40 }
 0x3a7   : > { %23543 = vmatprep.subr.msk.bf16.mxu1 %vm343_vm0, %v14495_v52  ;;  %v29206_v2 = vpop.permute.xlu1 %14474  ;;  %v14552_v37 = vsel %vm343_vm0, %v14500_v20, 0  ;;  %v14502_v12 = vsel %vm7028_vm9, %v29171_v18, %v14469_v30  ;;  %v14504_v18 = vsel %vm7028_vm9, %v29186_v53, %v14473_v14 }
 0x3a8   : > { %17707 = vrot.lane.b32.xlu0 %v28626_v10, %s25428_s6  ;;  %v14505_v24 = vsel %vm7028_vm9, %v14473_v14, %v29206_v2  ;;  %v14558_v40 = vsel %vm343_vm0, %v14502_v12, 0  ;;  %v14564_v30 = vsel %vm343_vm0, %v14504_v18, 0 }
 0x3a9   : > { %23538 = vmatmul.mubr.msk.bf16.vlgmr.msra.gmra.mrb[0].mxu0 %vm339_vm1, %v29201_v60  ;;  %17709 = vrot.lane.b32.xlu1 %v28649_v49, %s25428_s6 }
 0x3aa   : > { %14670 = vmatpush1.bf16.msra.mxu0 %v14528_v43  ;;  %14701 = vmatprep.mubr.bf16.mxu0 %v31425_v3  ;;  %v14477_v50 = vpop.permute.xlu0 %14476 }
 0x3ab   : > { %23545 = vmatprep.subr.msk.bf16.mxu0 %vm343_vm0, %v14497_v59  ;;  %v29221_v11 = vpop.permute.xlu1 %14478  ;;  %v14506_v53 = vsel %vm7028_vm9, %v29206_v2, %v14477_v50 }
 0x3ac   : > { %17711 = vrot.lane.b32.xlu0 %v28652_v9, %s25428_s6  ;;  %v14507_v55 = vsel %vm7028_vm9, %v14477_v50, %v29221_v11  ;;  %v14570_v14 = vsel %vm343_vm0, %v14506_v53, 0  ;;  %v15301_v53 = vsel %vm343_vm0, %v28763_v56, 0 }
 0x3ad   : > { %23540 = vmatmul.mubr.msk.bf16.vlgmr.msra.gmra.mrb[0].mxu1 %vm339_vm1, %v29201_v60  ;;  %17713 = vrot.lane.b32.xlu1 %v28676_v46, %s25428_s6 }
 0x3ae   : > { %14711 = vmatpush1.bf16.msra.mxu1 %v14534_v61  ;;  %14742 = vmatprep.mubr.bf16.mxu1 %v31425_v3  ;;  %v14481_v44 = vpop.permute.xlu0 %14480 }
 0x3af   : > { %23547 = vmatprep.subr.msk.bf16.mxu1 %vm343_vm0, %v14499_v31  ;;  %v29236_v58 = vpop.permute.xlu1 %14482  ;;  %v14508_v2 = vsel %vm7028_vm9, %v29221_v11, %v14481_v44 }
 0x3b0   : > { %17715 = vrot.lane.b32.xlu0 %v28679_v7, %s25428_s6  ;;  %v14509_v23 = vsel %vm7028_vm9, %v14481_v44, %v29236_v58  ;;  %v14576_v50 = vsel %vm343_vm0, %v14508_v2, 0 }
 0x3b1   : > { %23542 = vmatmul.mubr.msk.bf16.vlgmr.msra.gmra.mrb[4].mxu0 %vm339_vm1, %v29201_v60  ;;  %17717 = vrot.lane.b32.xlu1 %v28707_v35, %s25428_s6 }
 0x3b2   : > { %14752 = vmatpush1.bf16.msra.mxu0 %v14540_v28  ;;  %14783 = vmatprep.mubr.bf16.mxu0 %v31425_v3  ;;  %v14485_v4 = vpop.permute.xlu0 %14484 }
 0x3b3   : > { %23549 = vmatprep.subr.msk.bf16.mxu0 %vm343_vm0, %v14501_v36  ;;  %v14487_v47 = vpop.permute.xlu1 %14486  ;;  %v14510_v11 = vsel %vm7028_vm9, %v29236_v58, %v14485_v4 }
 0x3b4   : > { %17719 = vrot.lane.b32.xlu0 %v28710_v48, %s25428_s6  ;;  %v14511_v15 = vsel %vm7028_vm9, %v14485_v4, %v14487_v47  ;;  %v14582_v31 = vsel %vm343_vm0, %v14510_v11, 0 }
 0x3b5   : > { %23544 = vmatmul.mubr.msk.bf16.vlgmr.msra.gmra.mrb[4].mxu1 %vm339_vm1, %v29201_v60  ;;  %17721 = vrot.lane.b32.xlu1 %v28734_v27, %s25428_s6 }
 0x3b6   : > { %14793 = vmatpush1.bf16.msra.mxu1 %v14546_v19  ;;  %14824 = vmatprep.mubr.bf16.mxu1 %v31425_v3  ;;  %v29262_v25 = vpop.permute.xlu0 %16031 }
 0x3b7   : > { %23551 = vmatprep.subr.msk.bf16.mxu1 %vm343_vm0, %v14503_v8  ;;  %v29266_v26 = vpop.permute.xlu1 %16033  ;;  %v18423_v8 = vld [vmem:[%s25515_s28 + $0x14] sm:$0xff] }
 0x3b8   : > { %17723 = vrot.lane.b32.xlu0 %v28737_v63, %s25428_s6 }
 0x3b9   : > { %23546 = vmatmul.mubr.msk.bf16.vlgmr.msra.gmra.mrb[8].mxu0 %vm339_vm1, %v29201_v60  ;;  %17725 = vrot.lane.b32.xlu1 %v28760_v1, %s25428_s6 }
 0x3ba   : > { %14834 = vmatpush1.bf16.msra.mxu0 %v14552_v37  ;;  %14865 = vmatprep.mubr.bf16.mxu0 %v31425_v3  ;;  %v29279_v39 = vpop.permute.xlu0 %16035 }
 0x3bb   : > { %23553 = vmatprep.subr.msk.bf16.mxu0 %vm343_vm0, %v14505_v24  ;;  %v29283_v16 = vpop.permute.xlu1 %16037 }
 0x3bc   : > { %17727 = vrot.lane.b32.xlu0 %v28763_v56, %s25428_s6 }
 0x3bd   : > { %23548 = vmatmul.mubr.msk.bf16.vlgmr.msra.gmra.mrb[8].mxu1 %vm339_vm1, %v29201_v60  ;;  %17729 = vrot.lane.b32.xlu1 %v28787_v22, %s25428_s6 }
 0x3be   : > { %14875 = vmatpush1.bf16.msra.mxu1 %v14558_v40  ;;  %14906 = vmatprep.mubr.bf16.mxu1 %v31425_v3  ;;  %v29296_v33 = vpop.permute.xlu0 %16039  ;;  %v15295_v40 = vsel %vm343_vm0, %v28737_v63, 0 }
 0x3bf   : > { %23555 = vmatprep.subr.msk.bf16.mxu1 %vm343_vm0, %v14507_v55  ;;  %v29300_v51 = vpop.permute.xlu1 %16041 }
 0x3c0   : > { %17731 = vrot.lane.b32.xlu0 %v28790_v29, %s25428_s6 }
 0x3c1   : > { %23550 = vmatmul.mubr.msk.bf16.vlgmr.msra.gmra.mrb[12].mxu0 %vm339_vm1, %v29201_v60  ;;  %17733 = vrot.lane.b32.xlu1 %v28813_v32, %s25428_s6 }
 0x3c2   : > { %14916 = vmatpush1.bf16.msra.mxu0 %v14564_v30  ;;  %14947 = vmatprep.mubr.bf16.mxu0 %v31425_v3  ;;  %v29313_v52 = vpop.permute.xlu0 %16043  ;;  %v18424_v30 = vld [vmem:[%s25515_s28 + $0x1c] sm:$0xff] }
 0x3c3   : > { %23557 = vmatprep.subr.msk.bf16.mxu0 %vm343_vm0, %v14509_v23  ;;  %v29317_v43 = vpop.permute.xlu1 %16045  ;;  %v29484_v56 = vrot.slane %v18424_v30, %v25510_v6 }
 0x3c4   : > { %17735 = vrot.lane.b32.xlu0 %v28816_v38, %s25428_s6 }
 0x3c5   : > { %23552 = vmatmul.mubr.msk.bf16.vlgmr.msra.gmra.mrb[12].mxu1 %vm339_vm1, %v29201_v60  ;;  %17737 = vrot.lane.b32.xlu1 %v28840_v45, %s25428_s6  ;;  %v29499_v11 = vcombine.high %v29484_v56, %v29484_v56 }
 0x3c6   : > { %14957 = vmatpush1.bf16.msra.mxu1 %v14570_v14  ;;  %14988 = vmatprep.mubr.bf16.mxu1 %v31425_v3  ;;  %v29329_v59 = vpop.permute.xlu0 %16047 }
 0x3c7   : > { %23559 = vmatprep.subr.msk.bf16.mxu1 %vm343_vm0, %v14511_v15  ;;  %v29333_v61 = vpop.permute.xlu1 %16049  ;;  %v15307_v15 = vsel %vm343_vm0, %v28790_v29, 0 }
 0x3c8   : > { %17739 = vrot.lane.b32.xlu0 %v28843_v42, %s25428_s6 }
 0x3c9   : > { %23554 = vmatmul.mubr.msk.bf16.vlgmr.msra.gmra.mrb[16].mxu0 %vm339_vm1, %v29201_v60  ;;  %17741 = vrot.lane.b32.xlu1 %v28866_v57, %s25428_s6 }
 0x3ca   : > { %14998 = vmatpush1.bf16.msra.mxu0 %v14576_v50  ;;  %15029 = vmatprep.mubr.bf16.mxu0 %v31425_v3  ;;  %v29344_v41 = vpop.permute.xlu0 %16051 }
 0x3cb   : > { %23562 = vmatprep.subr.msk.bf16.mxu0 %vm343_vm0, %v28649_v49  ;;  %v29349_v44 = vpop.permute.xlu1 %16053  ;;  %v15271_v49 = vsel %vm343_vm0, %v28626_v10, 0  ;;  %v18422_v10 = vld [vmem:[%s25515_s28 + $0xc] sm:$0xff] }
 0x3cc   : > { %17743 = vrot.lane.b32.xlu0 %v28869_v17, %s25428_s6  ;;  %v29389_v4 = vrot.slane %v18422_v10, %v25510_v6  ;;  %v18436_v19 = vcombine.high %v18422_v10, %v18422_v10 }
 0x3cd   : > { %23556 = vmatmul.mubr.msk.bf16.vlgmr.msra.gmra.mrb[16].mxu1 %vm339_vm1, %v29201_v60  ;;  %17745 = vrot.lane.b32.xlu1 %v28893_v5, %s25428_s6 }
 0x3ce   : > { %15039 = vmatpush1.bf16.msra.mxu1 %v14582_v31  ;;  %15070 = vmatprep.mubr.bf16.mxu1 %v31425_v3  ;;  %v29358_v28 = vpop.permute.xlu0 %16055  ;;  %v29409_v20 = vcombine.high %v29389_v4, %v29389_v4  ;;  %v18425_v31 = vld [vmem:[%s25515_s28 + $0x24] sm:$0xff] }
 0x3cf   : > { %23564 = vmatprep.subr.msk.bf16.mxu1 %vm343_vm0, %v28676_v46  ;;  %v29364_v58 = vpop.permute.xlu1 %16057  ;;  %v15277_v46 = vsel %vm343_vm0, %v28652_v9, 0  ;;  %v29394_v9 = vld [vmem:[%s31422_s1 + $0x48] sm:$0xf] }
 0x3d0   : > { %17747 = vrot.lane.b32.xlu0 %v28896_v0, %s25428_s6 }
 0x3d1   : > { %23558 = vmatmul.mubr.msk.bf16.vlgmr.msra.gmra.mrb[20].mxu0 %vm339_vm1, %v29201_v60  ;;  %17749 = vrot.lane.b32.xlu1 %v28919_v13, %s25428_s6 }
 0x3d2   : > { %15343 = vmatpush1.bf16.msra.mxu0 %v15271_v49  ;;  %15374 = vmatprep.mubr.bf16.mxu0 %v31425_v3  ;;  %v29373_v21 = vpop.permute.xlu0 %16059  ;;  %v15313_v49 = vsel %vm343_vm0, %v28816_v38, 0  ;;  %v29529_v38 = vrot.slane %v18425_v31, %v25510_v6 }
 0x3d3   : > { %23566 = vmatprep.subr.msk.bf16.mxu0 %vm343_vm0, %v28707_v35  ;;  %v29380_v36 = vpop.permute.xlu1 %16061 }
 0x3d4   : > { %17751 = vrot.lane.b32.xlu0 %v28922_v62, %s25428_s6 }
 0x3d5   : > { %23560 = vmatmul.mubr.msk.bf16.vlgmr.msra.gmra.mrb[20].mxu1 %vm339_vm1, %v29201_v60  ;;  %17753 = vrot.lane.b32.xlu1 %v28948_v54, %s25428_s6  ;;  %v15283_v60 = vsel %vm343_vm0, %v28679_v7, 0  ;;  %v29416_v7 = vrot.slane %v18436_v19, %v25510_v6 }
 0x3d6   : > { %15384 = vmatpush1.bf16.msra.mxu1 %v15277_v46  ;;  %15415 = vmatprep.mubr.bf16.mxu1 %v31425_v3  ;;  %v29397_v35 = vpop.permute.xlu0 %16063 }
 0x3d7   : > { %23568 = vmatprep.subr.msk.bf16.mxu1 %vm343_vm0, %v28734_v27  ;;  %v29403_v47 = vpop.permute.xlu1 %16065  ;;  %v29432_v12 = vcombine.high %v29416_v7, %v29416_v7 }
 0x3d8   : > { %17755 = vrot.lane.b32.xlu0 %v28970_v34, %s25428_s6  ;;  %v15289_v34 = vsel %vm343_vm0, %v28710_v48, 0  ;;  %v29439_v48 = vrot.slane %v18423_v8, %v25510_v6  ;;  %s161_s6 = sand.u32 1, %s25414_s13  }
 0x3d9   : > { %23563 = vmatmul.mubr.msk.bf16.vlgmr.msra.gmra.mrb[0].mxu0 %vm339_vm1, %v29394_v9  ;;  %18545 = vrot.lane.b32.xlu1 %v29389_v4, %s25429_s9  ;;  %s31304_s26 = smul.u32 96, %s161_s6 }
 0x3da   : > { %15425 = vmatpush1.bf16.msra.mxu0 %v15283_v60  ;;  %15456 = vmatprep.mubr.bf16.mxu0 %v31425_v3  ;;  %v29419_v27 = vpop.permute.xlu0 %16067  ;;  %v29454_v55 = vcombine.high %v29439_v48, %v29439_v48  ;;  %v15319_v60 = vsel %vm343_vm0, %v28843_v42, 0 }
 0x3db   : > { %23570 = vmatprep.subr.msk.bf16.mxu0 %vm343_vm0, %v28760_v1  ;;  %v29426_v37 = vpop.permute.xlu1 %16069  ;;  %v18453_v1 = vcombine.high %v18423_v8, %v18423_v8 }
 0x3dc   : > { %18547 = vrot.lane.b32.xlu0 %v29409_v20, %s25429_s9 }
 0x3dd   : > { %23565 = vmatmul.mubr.msk.bf16.vlgmr.msra.gmra.mrb[0].mxu1 %vm339_vm1, %v29394_v9  ;;  %18549 = vrot.lane.b32.xlu1 %v29416_v7, %s25429_s9  ;;  %v29461_v63 = vrot.slane %v18453_v1, %v25510_v6  ;;  %v18426_v1 = vld [vmem:[%s25515_s28 + $0x2c] sm:$0xff] }
 0x3de   : > { %15466 = vmatpush1.bf16.msra.mxu1 %v15289_v34  ;;  %15497 = vmatprep.mubr.bf16.mxu1 %v31425_v3  ;;  %v29442_v24 = vpop.permute.xlu0 %16071  ;;  %v29544_v34 = vcombine.high %v29529_v38, %v29529_v38 }
 0x3df   : > { %23572 = vmatprep.subr.msk.bf16.mxu1 %vm343_vm0, %v28787_v22  ;;  %v29448_v18 = vpop.permute.xlu1 %16073  ;;  %v29477_v14 = vcombine.high %v29461_v63, %v29461_v63 }
 0x3e0   : > { %18551 = vrot.lane.b32.xlu0 %v29432_v12, %s25429_s9 }
 0x3e1   : > { %23567 = vmatmul.mubr.msk.bf16.vlgmr.msra.gmra.mrb[4].mxu0 %vm339_vm1, %v29394_v9  ;;  %18553 = vrot.lane.b32.xlu1 %v29439_v48, %s25429_s9 }
 0x3e2   : > { %15507 = vmatpush1.bf16.msra.mxu0 %v15295_v40  ;;  %15538 = vmatprep.mubr.bf16.mxu0 %v31425_v3  ;;  %v29464_v22 = vpop.permute.xlu0 %16075  ;;  %v15325_v40 = vsel %vm343_vm0, %v28869_v17, 0 }
 0x3e3   : > { %23574 = vmatprep.subr.msk.bf16.mxu0 %vm343_vm0, %v28813_v32  ;;  %v29471_v23 = vpop.permute.xlu1 %16077  ;;  %v18470_v32 = vcombine.high %v18424_v30, %v18424_v30 }
 0x3e4   : > { %18555 = vrot.lane.b32.xlu0 %v29454_v55, %s25429_s9 }
 0x3e5   : > { %23569 = vmatmul.mubr.msk.bf16.vlgmr.msra.gmra.mrb[4].mxu1 %vm339_vm1, %v29394_v9  ;;  %18557 = vrot.lane.b32.xlu1 %v29461_v63, %s25429_s9  ;;  %v29506_v29 = vrot.slane %v18470_v32, %v25510_v6  ;;  %v18504_v32 = vcombine.high %v18426_v1, %v18426_v1 }
 0x3e6   : > { %15548 = vmatpush1.bf16.msra.mxu1 %v15301_v53  ;;  %15579 = vmatprep.mubr.bf16.mxu1 %v31425_v3  ;;  %v29487_v2 = vpop.permute.xlu0 %16079 }
 0x3e7   : > { %23576 = vmatprep.subr.msk.bf16.mxu1 %vm343_vm0, %v28840_v45  ;;  %v29493_v50 = vpop.permute.xlu1 %16869  ;;  %v29522_v46 = vcombine.high %v29506_v29, %v29506_v29 }
 0x3e8   : > { %18559 = vrot.lane.b32.xlu0 %v29477_v14, %s25429_s9 }
 0x3e9   : > { %23571 = vmatmul.mubr.msk.bf16.vlgmr.msra.gmra.mrb[8].mxu0 %vm339_vm1, %v29394_v9  ;;  %18561 = vrot.lane.b32.xlu1 %v29484_v56, %s25429_s9 }
 0x3ea   : > { %15589 = vmatpush1.bf16.msra.mxu0 %v15307_v15  ;;  %15620 = vmatprep.mubr.bf16.mxu0 %v31425_v3  ;;  %v29509_v45 = vpop.permute.xlu0 %16871  ;;  %v15331_v15 = vsel %vm343_vm0, %v28896_v0, 0  ;;  %v29596_v0 = vrot.slane %v18504_v32, %v25510_v6 }
 0x3eb   : > { %23578 = vmatprep.subr.msk.bf16.mxu0 %vm343_vm0, %v28866_v57  ;;  %v29516_v10 = vpop.permute.xlu1 %16873  ;;  %v18487_v57 = vcombine.high %v18425_v31, %v18425_v31 }
 0x3ec   : > { %18563 = vrot.lane.b32.xlu0 %v29499_v11, %s25429_s9  ;;  %v29614_v32 = vcombine.high %v29596_v0, %v29596_v0 }
 0x3ed   : > { %23573 = vmatmul.mubr.msk.bf16.vlgmr.msra.gmra.mrb[8].mxu1 %vm339_vm1, %v29394_v9  ;;  %18565 = vrot.lane.b32.xlu1 %v29506_v29, %s25429_s9  ;;  %v29551_v42 = vrot.slane %v18487_v57, %v25510_v6 }
 0x3ee   : > { %15630 = vmatpush1.bf16.msra.mxu1 %v15313_v49  ;;  %15661 = vmatprep.mubr.bf16.mxu1 %v31425_v3  ;;  %v29532_v19 = vpop.permute.xlu0 %16875 }
 0x3ef   : > { %23580 = vmatprep.subr.msk.bf16.mxu1 %vm343_vm0, %v28893_v5  ;;  %v29538_v8 = vpop.permute.xlu1 %16877  ;;  %v29567_v53 = vcombine.high %v29551_v42, %v29551_v42 }
 0x3f0   : > { %18567 = vrot.lane.b32.xlu0 %v29522_v46, %s25429_s9 }
 0x3f1   : > { %23575 = vmatmul.mubr.msk.bf16.vlgmr.msra.gmra.mrb[12].mxu0 %vm339_vm1, %v29394_v9  ;;  %18569 = vrot.lane.b32.xlu1 %v29529_v38, %s25429_s9 }
 0x3f2   : > { %15671 = vmatpush1.bf16.msra.mxu0 %v15319_v60  ;;  %15702 = vmatprep.mubr.bf16.mxu0 %v31425_v3  ;;  %v29554_v5 = vpop.permute.xlu0 %16879  ;;  %v18427_v60 = vld [vmem:[%s25515_s28 + $0x34] sm:$0xff] }
 0x3f3   : > { %23582 = vmatprep.subr.msk.bf16.mxu0 %vm343_vm0, %v28919_v13  ;;  %v29561_v30 = vpop.permute.xlu1 %16881  ;;  %v29574_v13 = vrot.slane %v18426_v1, %v25510_v6  ;;  %v15337_v1 = vsel %vm343_vm0, %v28922_v62, 0  ;;  %v16081_v62 = vsel %vm1155_vm2, %v29262_v25, %v29266_v26 }
 0x3f4   : > { %18571 = vrot.lane.b32.xlu0 %v29544_v34, %s25429_s9  ;;  %v16109_v25 = vsel %vm343_vm0, %v16081_v62, 0 }
 0x3f5   : > { %23577 = vmatmul.mubr.msk.bf16.vlgmr.msra.gmra.mrb[12].mxu1 %vm339_vm1, %v29394_v9  ;;  %18573 = vrot.lane.b32.xlu1 %v29551_v42, %s25429_s9  ;;  %v29589_v49 = vcombine.high %v29574_v13, %v29574_v13 }
 0x3f6   : > { %15712 = vmatpush1.bf16.msra.mxu1 %v15325_v40  ;;  %15743 = vmatprep.mubr.bf16.mxu1 %v31425_v3  ;;  %v29577_v17 = vpop.permute.xlu0 %16883 }
 0x3f7   : > { %31442 = vst [vmem:[#allocation9_spill] sm:$0xff] %v29577_v17  ;;  %23584 = vmatprep.subr.msk.bf16.mxu1 %vm343_vm0, %v28948_v54  ;;  %v29583_v31 = vpop.permute.xlu1 %16885  ;;  %v16082_v54 = vsel %vm1155_vm2, %v29266_v26, %v29279_v39 }
 0x3f8   : > { %18575 = vrot.lane.b32.xlu0 %v29567_v53, %s25429_s9 }
 0x3f9   : > { %23579 = vmatmul.mubr.msk.bf16.vlgmr.msra.gmra.mrb[16].mxu0 %vm339_vm1, %v29394_v9  ;;  %18577 = vrot.lane.b32.xlu1 %v29574_v13, %s25429_s9 }
 0x3fa   : > { %15753 = vmatpush1.bf16.msra.mxu0 %v15331_v15  ;;  %15784 = vmatprep.mubr.bf16.mxu0 %v31425_v3  ;;  %v29602_v57 = vpop.permute.xlu0 %16887  ;;  %v29621_v15 = vrot.slane %v18427_v60, %v25510_v6  ;;  %v16084_v3 = vsel %vm1155_vm2, %v29283_v16, %v29296_v33 }
 0x3fb   : > { %31443 = vst [vmem:[#allocation10_spill] sm:$0xff] %v29602_v57  ;;  %23588 = vmatprep.subr.msk.bf16.mxu0 %vm343_vm0, %v16082_v54  ;;  %v29608_v40 = vpop.permute.xlu1 %16889  ;;  %v18521_v54 = vcombine.high %v18427_v60, %v18427_v60  ;;  %v31445_v57 = vmov 0  }
 0x3fc   : > { %31444 = vst [vmem:[#allocation11_spill] sm:$0xff] %v29608_v40  ;;  %18579 = vrot.lane.b32.xlu0 %v29589_v49, %s25429_s9  ;;  %v29639_v60 = vcombine.high %v29621_v15, %v29621_v15 }
 0x3fd   : > { %23581 = vmatmul.mubr.msk.bf16.vlgmr.msra.gmra.mrb[16].mxu1 %vm339_vm1, %v29394_v9  ;;  %18581 = vrot.lane.b32.xlu1 %v29596_v0, %s25429_s9  ;;  %v29647_v26 = vrot.slane %v18521_v54, %v25510_v6  ;;  %v16085_v54 = vsel %vm1155_vm2, %v29296_v33, %v29300_v51 }
 0x3fe   : > { %15794 = vmatpush1.bf16.msra.mxu1 %v15337_v1  ;;  %15825 = vmatprep.mubr.bf16.mxu1 %v31445_v57  ;;  %v29630_v40 = vpop.permute.xlu0 %16891  ;;  %v16086_v1 = vsel %vm1155_vm2, %v29300_v51, %v29313_v52  ;;  %v16121_v33 = vsel %vm343_vm0, %v16085_v54, 0  ;;  %v16087_v51 = vsel %vm1155_vm2, %v29313_v52, %v29317_v43  ;;  %v16092_v54 = vsel %vm1155_vm2, %v29349_v44, %v29358_v28 }
 0x3ff   : > { %31446 = vst [vmem:[#allocation12_spill] sm:$0xff] %v29630_v40  ;;  %23590 = vmatprep.subr.msk.bf16.mxu1 %vm343_vm0, %v16084_v3  ;;  %v29633_v17 = vpop.permute.xlu1 %16893  ;;  %v16083_v3 = vsel %vm1155_vm2, %v29279_v39, %v29283_v16  ;;  %v29665_v39 = vcombine.high %v29647_v26, %v29647_v26  ;;  %v16127_v52 = vsel %vm343_vm0, %v16087_v51, 0  ;;  %v16094_v51 = vsel %vm1155_vm2, %v29364_v58, %v29373_v21 }
 0x400   : > { %18583 = vrot.lane.b32.xlu0 %v29614_v32, %s25429_s9  ;;  %v16115_v16 = vsel %vm343_vm0, %v16083_v3, 0  ;;  %v29687_v3 = vld.sshfl [vmem:[%s25515_s28 + $0x3c] sm:$0x3 pattern:$0x76325410] }
 0x401   : > { %23583 = vmatmul.mubr.msk.bf16.vlgmr.msra.gmra.mrb[20].mxu0 %vm339_vm1, %v29394_v9  ;;  %18585 = vrot.lane.b32.xlu1 %v29621_v15, %s25429_s9 }
 0x402   : > { %16181 = vmatpush1.bf16.msra.mxu0 %v16109_v25  ;;  %16212 = vmatprep.mubr.bf16.mxu0 %v31445_v57  ;;  %v29656_v40 = vpop.permute.xlu0 %16895  ;;  %v16088_v25 = vsel %vm1155_vm2, %v29317_v43, %v29329_v59  ;;  %v16089_v43 = vsel %vm1155_vm2, %v29329_v59, %v29333_v61 }
 0x403   : > { %23592 = vmatprep.subr.msk.bf16.mxu0 %vm343_vm0, %v16086_v1  ;;  %v29659_v62 = vpop.permute.xlu1 %16897  ;;  %v29681_v1 = vld [vmem:[%s31422_s1 + $0x4c] sm:$0xf]  ;;  %v16133_v59 = vsel %vm343_vm0, %v16089_v43, 0  ;;  %v16096_v43 = vsel %vm1155_vm2, %v29380_v36, %v29397_v35 }
 0x404   : > { %18587 = vrot.lane.b32.xlu0 %v29639_v60, %s25429_s9 }
 0x405   : > { %23585 = vmatmul.mubr.msk.bf16.vlgmr.msra.gmra.mrb[20].mxu1 %vm339_vm1, %v29394_v9  ;;  %18589 = vrot.lane.b32.xlu1 %v29647_v26, %s25429_s9 }
 0x406   : > { %16222 = vmatpush1.bf16.msra.mxu1 %v16115_v16  ;;  %16253 = vmatprep.mubr.bf16.mxu1 %v31445_v57  ;;  %v29684_v9 = vpop.permute.xlu0 %16899  ;;  %v16090_v16 = vsel %vm1155_vm2, %v29333_v61, %v29344_v41  ;;  %v16091_v61 = vsel %vm1155_vm2, %v29344_v41, %v29349_v44  ;;  %v16093_v44 = vsel %vm1155_vm2, %v29358_v28, %v29364_v58 }
 0x407   : > { %31447 = vst [vmem:[#allocation13_spill] sm:$0xff] %v29684_v9  ;;  %23594 = vmatprep.subr.msk.bf16.mxu1 %vm343_vm0, %v16088_v25  ;;  %v29690_v6 = vpop.permute.xlu1 %16901  ;;  %v16139_v41 = vsel %vm343_vm0, %v16091_v61, 0  ;;  %v16145_v28 = vsel %vm343_vm0, %v16093_v44, 0  ;;  %v16095_v58 = vsel %vm1155_vm2, %v29373_v21, %v29380_v36  ;;  %v16098_v61 = vsel %vm1155_vm2, %v29403_v47, %v29419_v27 }
 0x408   : > { %18591 = vrot.lane.b32.xlu0 %v29665_v39, %s25429_s9  ;;  %v16151_v21 = vsel %vm343_vm0, %v16095_v58, 0  ;;  %v16097_v36 = vsel %vm1155_vm2, %v29397_v35, %v29403_v47  ;;  %v16100_v44 = vsel %vm1155_vm2, %v29426_v37, %v29442_v24  ;;  %v16099_v47 = vsel %vm1155_vm2, %v29419_v27, %v29426_v37 }
 0x409   : > { %23589 = vmatmul.mubr.msk.bf16.vlgmr.msra.gmra.mrb[0].mxu0 %vm339_vm1, %v29681_v1  ;;  %18593 = vrot.lane.b32.xlu1 %v29687_v3, %s25429_s9  ;;  %v16157_v35 = vsel %vm343_vm0, %v16097_v36, 0  ;;  %v16102_v58 = vsel %vm1155_vm2, %v29448_v18, %v29464_v22  ;;  %v16163_v27 = vsel %vm343_vm0, %v16099_v47, 0  ;;  %v16101_v37 = vsel %vm1155_vm2, %v29442_v24, %v29448_v18  ;;  %s31311_s9 = scalar_lea.vmem [#allocation5], %s31304_s26 }
 0x40a   : > { %16263 = vmatpush1.bf16.msra.mxu0 %v16121_v33  ;;  %16294 = vmatprep.mubr.bf16.mxu0 %v31445_v57  ;;  %v29706_v25 = vpop.permute.xlu0 %16903  ;;  %v16104_v36 = vsel %vm1155_vm2, %v29471_v23, %v29487_v2  ;;  %v16920_v47 = vsel %vm1994_vm3, %v29509_v45, %v29516_v10  ;;  %v16169_v24 = vsel %vm343_vm0, %v16101_v37, 0  ;;  %v16103_v18 = vsel %vm1155_vm2, %v29464_v22, %v29471_v23 }
 0x40b   : > { %23596 = vmatprep.subr.msk.bf16.mxu0 %vm343_vm0, %v16090_v16  ;;  %v29709_v9 = vpop.permute.xlu1 %16905  ;;  %v16922_v37 = vsel %vm1994_vm3, %v29532_v19, %v29538_v8  ;;  %v16175_v22 = vsel %vm343_vm0, %v16103_v18, 0  ;;  %v16919_v23 = vsel %vm1994_vm3, %v29493_v50, %v29509_v45  ;;  %v16921_v45 = vsel %vm1994_vm3, %v29516_v10, %v29532_v19 }
 0x40c   : > { %19383 = vrot.lane.b32.xlu0 %v29389_v4, %s25430_s17  ;;  %v16947_v50 = vsel %vm343_vm0, %v16919_v23, 0  ;;  %v16953_v10 = vsel %vm343_vm0, %v16921_v45, 0  ;;  %v16923_v19 = vsel %vm1994_vm3, %v29538_v8, %v29554_v5  ;;  %v31452_v45 = vld [vmem:[#allocation11_spill] sm:$0xff] }
 0x40d   : > { %23591 = vmatmul.mubr.msk.bf16.vlgmr.msra.gmra.mrb[0].mxu1 %vm339_vm1, %v29681_v1  ;;  %19385 = vrot.lane.b32.xlu1 %v29409_v20, %s25430_s17  ;;  %v16959_v8 = vsel %vm343_vm0, %v16923_v19, 0 }
 0x40e   : > { %16304 = vmatpush1.bf16.msra.mxu1 %v16127_v52  ;;  %16335 = vmatprep.mubr.bf16.mxu1 %v31445_v57  ;;  %v29725_v33 = vpop.permute.xlu0 %16907 }
 0x40f   : > { %23598 = vmatprep.subr.msk.bf16.mxu1 %vm343_vm0, %v16092_v54  ;;  %v29728_v16 = vpop.permute.xlu1 %16909 }
 0x410   : > { %19387 = vrot.lane.b32.xlu0 %v29416_v7, %s25430_s17 }
 0x411   : > { %23593 = vmatmul.mubr.msk.bf16.vlgmr.msra.gmra.mrb[4].mxu0 %vm339_vm1, %v29681_v1  ;;  %19389 = vrot.lane.b32.xlu1 %v29432_v12, %s25430_s17 }
 0x412   : > { %16345 = vmatpush1.bf16.msra.mxu0 %v16133_v59  ;;  %16376 = vmatprep.mubr.bf16.mxu0 %v31445_v57  ;;  %v29744_v52 = vpop.permute.xlu0 %16911 }
 0x413   : > { %23600 = vmatprep.subr.msk.bf16.mxu0 %vm343_vm0, %v16094_v51  ;;  %v29747_v54 = vpop.permute.xlu1 %16913 }
 0x414   : > { %19391 = vrot.lane.b32.xlu0 %v29439_v48, %s25430_s17 }
 0x415   : > { %23595 = vmatmul.mubr.msk.bf16.vlgmr.msra.gmra.mrb[4].mxu1 %vm339_vm1, %v29681_v1  ;;  %19393 = vrot.lane.b32.xlu1 %v29454_v55, %s25430_s17 }
 0x416   : > { %16386 = vmatpush1.bf16.msra.mxu1 %v16139_v41  ;;  %16417 = vmatprep.mubr.bf16.mxu1 %v31445_v57  ;;  %v29763_v59 = vpop.permute.xlu0 %16915 }
 0x417   : > { %23602 = vmatprep.subr.msk.bf16.mxu1 %vm343_vm0, %v16096_v43  ;;  %v29766_v51 = vpop.permute.xlu1 %16917 }
 0x418   : > { %19395 = vrot.lane.b32.xlu0 %v29461_v63, %s25430_s17 }
 0x419   : > { %23597 = vmatmul.mubr.msk.bf16.vlgmr.msra.gmra.mrb[8].mxu0 %vm339_vm1, %v29681_v1  ;;  %19397 = vrot.lane.b32.xlu1 %v29477_v14, %s25430_s17 }
 0x41a   : > { %16427 = vmatpush1.bf16.msra.mxu0 %v16145_v28  ;;  %16458 = vmatprep.mubr.bf16.mxu0 %v31445_v57  ;;  %v29782_v41 = vpop.permute.xlu0 %17707 }
 0x41b   : > { %23604 = vmatprep.subr.msk.bf16.mxu0 %vm343_vm0, %v16098_v61  ;;  %v29785_v43 = vpop.permute.xlu1 %17709 }
 0x41c   : > { %19399 = vrot.lane.b32.xlu0 %v29484_v56, %s25430_s17 }
 0x41d   : > { %23599 = vmatmul.mubr.msk.bf16.vlgmr.msra.gmra.mrb[8].mxu1 %vm339_vm1, %v29681_v1  ;;  %19401 = vrot.lane.b32.xlu1 %v29499_v11, %s25430_s17 }
 0x41e   : > { %16468 = vmatpush1.bf16.msra.mxu1 %v16151_v21  ;;  %16499 = vmatprep.mubr.bf16.mxu1 %v31445_v57  ;;  %v29801_v28 = vpop.permute.xlu0 %17711 }
 0x41f   : > { %23606 = vmatprep.subr.msk.bf16.mxu1 %vm343_vm0, %v16100_v44  ;;  %v29804_v61 = vpop.permute.xlu1 %17713 }
 0x420   : > { %19403 = vrot.lane.b32.xlu0 %v29506_v29, %s25430_s17 }
 0x421   : > { %23601 = vmatmul.mubr.msk.bf16.vlgmr.msra.gmra.mrb[12].mxu0 %vm339_vm1, %v29681_v1  ;;  %19405 = vrot.lane.b32.xlu1 %v29522_v46, %s25430_s17 }
 0x422   : > { %16509 = vmatpush1.bf16.msra.mxu0 %v16157_v35  ;;  %16540 = vmatprep.mubr.bf16.mxu0 %v31445_v57  ;;  %v29820_v21 = vpop.permute.xlu0 %17715 }
 0x423   : > { %23608 = vmatprep.subr.msk.bf16.mxu0 %vm343_vm0, %v16102_v58  ;;  %v29823_v44 = vpop.permute.xlu1 %17717 }
 0x424   : > { %19407 = vrot.lane.b32.xlu0 %v29529_v38, %s25430_s17 }
 0x425   : > { %23603 = vmatmul.mubr.msk.bf16.vlgmr.msra.gmra.mrb[12].mxu1 %vm339_vm1, %v29681_v1  ;;  %19409 = vrot.lane.b32.xlu1 %v29544_v34, %s25430_s17 }
 0x426   : > { %16550 = vmatpush1.bf16.msra.mxu1 %v16163_v27  ;;  %16581 = vmatprep.mubr.bf16.mxu1 %v31445_v57  ;;  %v29839_v35 = vpop.permute.xlu0 %17719 }
 0x427   : > { %23610 = vmatprep.subr.msk.bf16.mxu1 %vm343_vm0, %v16104_v36  ;;  %v29842_v58 = vpop.permute.xlu1 %17721 }
 0x428   : > { %19411 = vrot.lane.b32.xlu0 %v29551_v42, %s25430_s17 }
 0x429   : > { %23605 = vmatmul.mubr.msk.bf16.vlgmr.msra.gmra.mrb[16].mxu0 %vm339_vm1, %v29681_v1  ;;  %19413 = vrot.lane.b32.xlu1 %v29567_v53, %s25430_s17 }
 0x42a   : > { %16591 = vmatpush1.bf16.msra.mxu0 %v16169_v24  ;;  %16622 = vmatprep.mubr.bf16.mxu0 %v31445_v57  ;;  %v29858_v2 = vpop.permute.xlu0 %17723  ;;  %v16924_v24 = vsel %vm1994_vm3, %v29554_v5, %v29561_v30 }
 0x42b   : > { %23614 = vmatprep.subr.msk.bf16.mxu0 %vm343_vm0, %v16920_v47  ;;  %v29861_v27 = vpop.permute.xlu1 %17725 }
 0x42c   : > { %19415 = vrot.lane.b32.xlu0 %v29574_v13, %s25430_s17 }
 0x42d   : > { %23607 = vmatmul.mubr.msk.bf16.vlgmr.msra.gmra.mrb[16].mxu1 %vm339_vm1, %v29681_v1  ;;  %19417 = vrot.lane.b32.xlu1 %v29589_v49, %s25430_s17 }
 0x42e   : > { %16632 = vmatpush1.bf16.msra.mxu1 %v16175_v22  ;;  %16663 = vmatprep.mubr.bf16.mxu1 %v31445_v57  ;;  %v29877_v36 = vpop.permute.xlu0 %17727  ;;  %v31450_v22 = vld [vmem:[#allocation9_spill] sm:$0xff] }
 0x42f   : > { %23616 = vmatprep.subr.msk.bf16.mxu1 %vm343_vm0, %v16922_v37  ;;  %v29880_v47 = vpop.permute.xlu1 %17729  ;;  %v16926_v23 = vsel %vm1994_vm3, %v31450_v22, %v29583_v31  ;;  %v16925_v5 = vsel %vm1994_vm3, %v29561_v30, %v31450_v22 }
 0x430   : > { %31448 = vst [vmem:[#allocation14_spill] sm:$0xff] %v29880_v47  ;;  %19419 = vrot.lane.b32.xlu0 %v29596_v0, %s25430_s17  ;;  %v16965_v30 = vsel %vm343_vm0, %v16925_v5, 0  ;;  %v16932_v5 = vsel %vm1994_vm3, %v29656_v40, %v29659_v62 }
 0x431   : > { %23609 = vmatmul.mubr.msk.bf16.vlgmr.msra.gmra.mrb[20].mxu0 %vm339_vm1, %v29681_v1  ;;  %19421 = vrot.lane.b32.xlu1 %v29614_v32, %s25430_s17 }
 0x432   : > { %17019 = vmatpush1.bf16.msra.mxu0 %v16947_v50  ;;  %17050 = vmatprep.mubr.bf16.mxu0 %v31445_v57  ;;  %v29896_v18 = vpop.permute.xlu0 %17731 }
 0x433   : > { %23618 = vmatprep.subr.msk.bf16.mxu0 %vm343_vm0, %v16924_v24  ;;  %v29899_v37 = vpop.permute.xlu1 %17733  ;;  %v29917_v24 = vld [vmem:[%s31422_s1 + $0x50] sm:$0xf] }
 0x434   : > { %31449 = vst [vmem:[#allocation15_spill] sm:$0xff] %v29899_v37  ;;  %19423 = vrot.lane.b32.xlu0 %v29621_v15, %s25430_s17  ;;  %v31453_v37 = vld [vmem:[#allocation10_spill] sm:$0xff] }
 0x435   : > { %23611 = vmatmul.mubr.msk.bf16.vlgmr.msra.gmra.mrb[20].mxu1 %vm339_vm1, %v29681_v1  ;;  %19425 = vrot.lane.b32.xlu1 %v29639_v60, %s25430_s17  ;;  %v16928_v47 = vsel %vm1994_vm3, %v31453_v37, %v31452_v45 }
 0x436   : > { %17060 = vmatpush1.bf16.msra.mxu1 %v16953_v10  ;;  %17091 = vmatprep.mubr.bf16.mxu1 %v31445_v57  ;;  %v29920_v50 = vpop.permute.xlu0 %17735 }
 0x437   : > { %23620 = vmatprep.subr.msk.bf16.mxu1 %vm343_vm0, %v16926_v23  ;;  %v29923_v1 = vpop.permute.xlu1 %17737 }
 0x438   : > { %31451 = vst [vmem:[#allocation9_spill] sm:$0xff] %v29923_v1  ;;  %19427 = vrot.lane.b32.xlu0 %v29647_v26, %s25430_s17  ;;  %v31454_v1 = vld [vmem:[#allocation12_spill] sm:$0xff] }
 0x439   : > { %23615 = vmatmul.mubr.msk.bf16.vlgmr.msra.gmra.mrb[0].mxu0 %vm339_vm1, %v29917_v24  ;;  %19429 = vrot.lane.b32.xlu1 %v29665_v39, %s25430_s17  ;;  %v16930_v19 = vsel %vm1994_vm3, %v31454_v1, %v29633_v17 }
 0x43a   : > { %17101 = vmatpush1.bf16.msra.mxu0 %v16959_v8  ;;  %17132 = vmatprep.mubr.bf16.mxu0 %v31445_v57  ;;  %v29939_v23 = vpop.permute.xlu0 %17739 }
 0x43b   : > { %23622 = vmatprep.subr.msk.bf16.mxu0 %vm343_vm0, %v16928_v47  ;;  %v29942_v10 = vpop.permute.xlu1 %17741  ;;  %v16927_v47 = vsel %vm1994_vm3, %v29583_v31, %v31453_v37  ;;  %v16929_v31 = vsel %vm1994_vm3, %v31452_v45, %v31454_v1  ;;  %v16931_v1 = vsel %vm1994_vm3, %v29633_v17, %v29656_v40 }
 0x43c   : > { %19431 = vrot.lane.b32.xlu0 %v29687_v3, %s25430_s17  ;;  %s23029_s17 = sshll.u32 %s31311_s9, 4  ;;  %s31375_s17 = int_to_ptr.vmem [resolvable:$true] %s23029_s17 }
 0x43d   : > { %23617 = vmatmul.mubr.msk.bf16.vlgmr.msra.gmra.mrb[0].mxu1 %vm339_vm1, %v29917_v24  ;;  %20221 = vrot.lane.b32.xlu1 %v29389_v4, %s25431_s24  ;;  %v16971_v4 = vsel %vm343_vm0, %v16927_v47, 0  ;;  %v16936_v47 = vsel %vm1994_vm3, %v29706_v25, %v29709_v9 }
 0x43e   : > { %17142 = vmatpush1.bf16.msra.mxu1 %v16965_v30  ;;  %17173 = vmatprep.mubr.bf16.mxu1 %v31445_v57  ;;  %v29958_v22 = vpop.permute.xlu0 %17743 }
 0x43f   : > { %23624 = vmatprep.subr.msk.bf16.mxu1 %vm343_vm0, %v16930_v19  ;;  %v29961_v8 = vpop.permute.xlu1 %17745  ;;  %v31455_v19 = vld [vmem:[#allocation13_spill] sm:$0xff] }
 0x440   : > { %20223 = vrot.lane.b32.xlu0 %v29409_v20, %s25431_s24  ;;  %v16934_v30 = vsel %vm1994_vm3, %v31455_v19, %v29690_v6  ;;  %v16933_v17 = vsel %vm1994_vm3, %v29659_v62, %v31455_v19  ;;  %v16935_v62 = vsel %vm1994_vm3, %v29690_v6, %v29706_v25  ;;  %v16942_v19 = vsel %vm1994_vm3, %v29763_v59, %v29766_v51 }
 0x441   : > { %23619 = vmatmul.mubr.msk.bf16.vlgmr.msra.gmra.mrb[4].mxu0 %vm339_vm1, %v29917_v24  ;;  %20225 = vrot.lane.b32.xlu1 %v29416_v7, %s25431_s24  ;;  %v16977_v7 = vsel %vm343_vm0, %v16929_v31, 0  ;;  %v16940_v31 = vsel %vm1994_vm3, %v29744_v52, %v29747_v54  ;;  %v16995_v6 = vsel %vm343_vm0, %v16935_v62, 0  ;;  %v17758_v51 = vsel %vm2833_vm4, %v29785_v43, %v29801_v28 }
 0x442   : > { %17183 = vmatpush1.bf16.msra.mxu0 %v16971_v4  ;;  %17214 = vmatprep.mubr.bf16.mxu0 %v31445_v57  ;;  %v29977_v37 = vpop.permute.xlu0 %17747 }
 0x443   : > { %23626 = vmatprep.subr.msk.bf16.mxu0 %vm343_vm0, %v16932_v5  ;;  %v29980_v20 = vpop.permute.xlu1 %17749  ;;  %v16938_v5 = vsel %vm1994_vm3, %v29725_v33, %v29728_v16 }
 0x444   : > { %20227 = vrot.lane.b32.xlu0 %v29432_v12, %s25431_s24 }
 0x445   : > { %23621 = vmatmul.mubr.msk.bf16.vlgmr.msra.gmra.mrb[4].mxu1 %vm339_vm1, %v29917_v24  ;;  %20229 = vrot.lane.b32.xlu1 %v29439_v48, %s25431_s24  ;;  %v16983_v48 = vsel %vm343_vm0, %v16931_v1, 0  ;;  %v17764_v1 = vsel %vm2833_vm4, %v29842_v58, %v29858_v2 }
 0x446   : > { %17224 = vmatpush1.bf16.msra.mxu1 %v16977_v7  ;;  %17255 = vmatprep.mubr.bf16.mxu1 %v31445_v57  ;;  %v29996_v45 = vpop.permute.xlu0 %17751  ;;  %v17762_v7 = vsel %vm2833_vm4, %v29823_v44, %v29839_v35 }
 0x447   : > { %23628 = vmatprep.subr.msk.bf16.mxu1 %vm343_vm0, %v16934_v30  ;;  %v29999_v12 = vpop.permute.xlu1 %17753  ;;  %v17760_v30 = vsel %vm2833_vm4, %v29804_v61, %v29820_v21 }
 0x448   : > { %20231 = vrot.lane.b32.xlu0 %v29454_v55, %s25431_s24 }
 0x449   : > { %23623 = vmatmul.mubr.msk.bf16.vlgmr.msra.gmra.mrb[8].mxu0 %vm339_vm1, %v29917_v24  ;;  %20233 = vrot.lane.b32.xlu1 %v29461_v63, %s25431_s24  ;;  %v16989_v63 = vsel %vm343_vm0, %v16933_v17, 0 }
 0x44a   : > { %17265 = vmatpush1.bf16.msra.mxu0 %v16983_v48  ;;  %17296 = vmatprep.mubr.bf16.mxu0 %v31445_v57  ;;  %v30015_v40 = vpop.permute.xlu0 %17755 }
 0x44b   : > { %23630 = vmatprep.subr.msk.bf16.mxu0 %vm343_vm0, %v16936_v47  ;;  %v30018_v55 = vpop.permute.xlu1 %18545 }
 0x44c   : > { %20235 = vrot.lane.b32.xlu0 %v29477_v14, %s25431_s24 }
 0x44d   : > { %23625 = vmatmul.mubr.msk.bf16.vlgmr.msra.gmra.mrb[8].mxu1 %vm339_vm1, %v29917_v24  ;;  %20237 = vrot.lane.b32.xlu1 %v29484_v56, %s25431_s24  ;;  %v16937_v56 = vsel %vm1994_vm3, %v29709_v9, %v29725_v33  ;;  %v16939_v9 = vsel %vm1994_vm3, %v29728_v16, %v29744_v52  ;;  %v16941_v16 = vsel %vm1994_vm3, %v29747_v54, %v29763_v59 }
 0x44e   : > { %17306 = vmatpush1.bf16.msra.mxu1 %v16989_v63  ;;  %17337 = vmatprep.mubr.bf16.mxu1 %v31445_v57  ;;  %v30034_v4 = vpop.permute.xlu0 %18547  ;;  %v17757_v54 = vsel %vm2833_vm4, %v29782_v41, %v29785_v43  ;;  %v17759_v41 = vsel %vm2833_vm4, %v29801_v28, %v29804_v61  ;;  %v17761_v28 = vsel %vm2833_vm4, %v29820_v21, %v29823_v44  ;;  %v30150_v61 = vld [vmem:[%s31422_s1 + $0x54] sm:$0xf]  ;;  %v31456_v44 = vld [vmem:[#allocation8_spill] sm:$0xff] }
 0x44f   : > { %23632 = vmatprep.subr.msk.bf16.mxu1 %vm343_vm0, %v16938_v5  ;;  %v30037_v14 = vpop.permute.xlu1 %18549  ;;  %v17797_v21 = vsel %vm343_vm0, %v17761_v28, 0  ;;  %v17763_v5 = vsel %vm2833_vm4, %v29839_v35, %v29842_v58 }
 0x450   : > { %20239 = vrot.lane.b32.xlu0 %v29499_v11, %s25431_s24  ;;  %v17803_v35 = vsel %vm343_vm0, %v17763_v5, 0 }
 0x451   : > { %23627 = vmatmul.mubr.msk.bf16.vlgmr.msra.gmra.mrb[12].mxu0 %vm339_vm1, %v29917_v24  ;;  %20241 = vrot.lane.b32.xlu1 %v29506_v29, %s25431_s24  ;;  %v17001_v29 = vsel %vm343_vm0, %v16937_v56, 0  ;;  %v20937_v56 = vld [vmem:[%s25515_s28 + $0x14] sm:$0xff] }
 0x452   : > { %17347 = vmatpush1.bf16.msra.mxu0 %v16995_v6  ;;  %17378 = vmatprep.mubr.bf16.mxu0 %v31445_v57  ;;  %v30053_v25 = vpop.permute.xlu0 %18551  ;;  %v17765_v6 = vsel %vm2833_vm4, %v29858_v2, %v29861_v27 }
 0x453   : > { %23634 = vmatprep.subr.msk.bf16.mxu0 %vm343_vm0, %v16940_v31  ;;  %v30056_v11 = vpop.permute.xlu1 %18553  ;;  %v17809_v2 = vsel %vm343_vm0, %v17765_v6, 0 }
 0x454   : > { %20243 = vrot.lane.b32.xlu0 %v29522_v46, %s25431_s24 }
 0x455   : > { %23629 = vmatmul.mubr.msk.bf16.vlgmr.msra.gmra.mrb[12].mxu1 %vm339_vm1, %v29917_v24  ;;  %20245 = vrot.lane.b32.xlu1 %v29529_v38, %s25431_s24  ;;  %v17007_v38 = vsel %vm343_vm0, %v16939_v9, 0  ;;  %v30223_v9 = vrot.slane %v20937_v56, %v31456_v44 }
 0x456   : > { %17388 = vmatpush1.bf16.msra.mxu1 %v17001_v29  ;;  %17419 = vmatprep.mubr.bf16.mxu1 %v31445_v57  ;;  %v30072_v33 = vpop.permute.xlu0 %18555 }
 0x457   : > { %23636 = vmatprep.subr.msk.bf16.mxu1 %vm343_vm0, %v16942_v19  ;;  %v30075_v46 = vpop.permute.xlu1 %18557  ;;  %v31458_v19 = vld [vmem:[#allocation15_spill] sm:$0xff] }
 0x458   : > { %20247 = vrot.lane.b32.xlu0 %v29544_v34, %s25431_s24  ;;  %v17770_v29 = vsel %vm2833_vm4, %v31458_v19, %v29920_v50 }
 0x459   : > { %23631 = vmatmul.mubr.msk.bf16.vlgmr.msra.gmra.mrb[16].mxu0 %vm339_vm1, %v29917_v24  ;;  %20249 = vrot.lane.b32.xlu1 %v29551_v42, %s25431_s24  ;;  %v17013_v42 = vsel %vm343_vm0, %v16941_v16, 0 }
 0x45a   : > { %17429 = vmatpush1.bf16.msra.mxu0 %v17007_v38  ;;  %17460 = vmatprep.mubr.bf16.mxu0 %v31445_v57  ;;  %v30091_v52 = vpop.permute.xlu0 %18559 }
 0x45b   : > { %23640 = vmatprep.subr.msk.bf16.mxu0 %vm343_vm0, %v17758_v51  ;;  %v30094_v34 = vpop.permute.xlu1 %18561  ;;  %v20967_v51 = vcombine.high %v20937_v56, %v20937_v56 }
 0x45c   : > { %20251 = vrot.lane.b32.xlu0 %v29567_v53, %s25431_s24 }
 0x45d   : > { %23633 = vmatmul.mubr.msk.bf16.vlgmr.msra.gmra.mrb[16].mxu1 %vm339_vm1, %v29917_v24  ;;  %20253 = vrot.lane.b32.xlu1 %v29574_v13, %s25431_s24  ;;  %v17785_v13 = vsel %vm343_vm0, %v17757_v54, 0 }
 0x45e   : > { %17470 = vmatpush1.bf16.msra.mxu1 %v17013_v42  ;;  %17501 = vmatprep.mubr.bf16.mxu1 %v31445_v57  ;;  %v30110_v59 = vpop.permute.xlu0 %18563  ;;  %v31459_v42 = vld [vmem:[#allocation9_spill] sm:$0xff] }
 0x45f   : > { %23642 = vmatprep.subr.msk.bf16.mxu1 %vm343_vm0, %v17760_v30  ;;  %v30113_v53 = vpop.permute.xlu1 %18565  ;;  %v17772_v54 = vsel %vm2833_vm4, %v31459_v42, %v29939_v23  ;;  %v17771_v5 = vsel %vm2833_vm4, %v29920_v50, %v31459_v42 }
 0x460   : > { %20255 = vrot.lane.b32.xlu0 %v29589_v49, %s25431_s24  ;;  %v17827_v50 = vsel %vm343_vm0, %v17771_v5, 0  ;;  %v20940_v5 = vld [vmem:[%s25515_s28 + $0x2c] sm:$0xff] }
 0x461   : > { %23635 = vmatmul.mubr.msk.bf16.vlgmr.msra.gmra.mrb[20].mxu0 %vm339_vm1, %v29917_v24  ;;  %20257 = vrot.lane.b32.xlu1 %v29596_v0, %s25431_s24  ;;  %v17791_v0 = vsel %vm343_vm0, %v17759_v41, 0  ;;  %v17769_v41 = vsel %vm2833_vm4, %v29896_v18, %v31458_v19  ;;  %v17773_v19 = vsel %vm2833_vm4, %v29939_v23, %v29942_v10 }
 0x462   : > { %17857 = vmatpush1.bf16.msra.mxu0 %v17785_v13  ;;  %17888 = vmatprep.mubr.bf16.mxu0 %v31445_v57  ;;  %v30129_v43 = vpop.permute.xlu0 %18567  ;;  %v30249_v13 = vrot.slane %v20967_v51, %v31456_v44  ;;  %v17833_v23 = vsel %vm343_vm0, %v17773_v19, 0  ;;  %v30382_v19 = vrot.slane %v20940_v5, %v31456_v44 }
 0x463   : > { %23644 = vmatprep.subr.msk.bf16.mxu0 %vm343_vm0, %v17762_v7  ;;  %v30132_v49 = vpop.permute.xlu1 %18569  ;;  %v30246_v7 = vcombine.high %v30223_v9, %v30223_v9 }
 0x464   : > { %20259 = vrot.lane.b32.xlu0 %v29614_v32, %s25431_s24 }
 0x465   : > { %23637 = vmatmul.mubr.msk.bf16.vlgmr.msra.gmra.mrb[20].mxu1 %vm339_vm1, %v29917_v24  ;;  %20261 = vrot.lane.b32.xlu1 %v29621_v15, %s25431_s24  ;;  %v20936_v24 = vld [vmem:[%s25515_s28 + $0xc] sm:$0xff]  ;;  %v17766_v15 = vsel %vm2833_vm4, %v29861_v27, %v29877_v36 }
 0x466   : > { %17898 = vmatpush1.bf16.msra.mxu1 %v17791_v0  ;;  %17929 = vmatprep.mubr.bf16.mxu1 %v31445_v57  ;;  %v30153_v32 = vpop.permute.xlu0 %18571  ;;  %v30170_v48 = vrot.slane %v20936_v24, %v31456_v44  ;;  %v20950_v17 = vcombine.high %v20936_v24, %v20936_v24  ;;  %v20938_v0 = vld [vmem:[%s25515_s28 + $0x1c] sm:$0xff]  ;;  %v17774_v24 = vsel %vm2833_vm4, %v29942_v10, %v29958_v22 }
 0x467   : > { %23646 = vmatprep.subr.msk.bf16.mxu1 %vm343_vm0, %v17764_v1  ;;  %v30157_v47 = vpop.permute.xlu1 %18573 }
 0x468   : > { %20263 = vrot.lane.b32.xlu0 %v29639_v60, %s25431_s24  ;;  %v30193_v58 = vcombine.high %v30170_v48, %v30170_v48  ;;  %v30196_v31 = vrot.slane %v20950_v17, %v31456_v44  ;;  %v20984_v17 = vcombine.high %v20938_v0, %v20938_v0 }
 0x469   : > { %23641 = vmatmul.mubr.msk.bf16.vlgmr.msra.gmra.mrb[0].mxu0 %vm339_vm1, %v30150_v61  ;;  %20265 = vrot.lane.b32.xlu1 %v29647_v26, %s25431_s24  ;;  %v31457_v26 = vld [vmem:[#allocation14_spill] sm:$0xff] }
 0x46a   : > { %17939 = vmatpush1.bf16.msra.mxu0 %v17797_v21  ;;  %17970 = vmatprep.mubr.bf16.mxu0 %v31445_v57  ;;  %v30176_v60 = vpop.permute.xlu0 %18575  ;;  %v17768_v62 = vsel %vm2833_vm4, %v31457_v26, %v29896_v18  ;;  %v30220_v27 = vcombine.high %v30196_v31, %v30196_v31  ;;  %v17767_v38 = vsel %vm2833_vm4, %v29877_v36, %v31457_v26  ;;  %v17821_v18 = vsel %vm343_vm0, %v17769_v41, 0 }
 0x46b   : > { %23648 = vmatprep.subr.msk.bf16.mxu0 %vm343_vm0, %v17766_v15  ;;  %v30179_v63 = vpop.permute.xlu1 %18577  ;;  %v17815_v36 = vsel %vm343_vm0, %v17767_v38, 0  ;;  %v30273_v15 = vcombine.high %v30249_v13, %v30249_v13  ;;  %v30276_v21 = vrot.slane %v20938_v0, %v31456_v44  ;;  %v30302_v56 = vrot.slane %v20984_v17, %v31456_v44 }
 0x46c   : > { %20267 = vrot.lane.b32.xlu0 %v29665_v39, %s25431_s24  ;;  %v17778_v38 = vsel %vm2833_vm4, %v29980_v20, %v29996_v45 }
 0x46d   : > { %23643 = vmatmul.mubr.msk.bf16.vlgmr.msra.gmra.mrb[0].mxu1 %vm339_vm1, %v30150_v61  ;;  %20269 = vrot.lane.b32.xlu1 %v29687_v3, %s25431_s24  ;;  %v30299_v6 = vcombine.high %v30276_v21, %v30276_v21  ;;  %v30326_v10 = vcombine.high %v30302_v56, %v30302_v56 }
 0x46e   : > { %17980 = vmatpush1.bf16.msra.mxu1 %v17803_v35  ;;  %18011 = vmatprep.mubr.bf16.mxu1 %v31445_v57  ;;  %v30202_v39 = vpop.permute.xlu0 %18579  ;;  %v17776_v35 = vsel %vm2833_vm4, %v29961_v8, %v29977_v37 }
 0x46f   : > { %23650 = vmatprep.subr.msk.bf16.mxu1 %vm343_vm0, %v17768_v62  ;;  %v30206_v3 = vpop.permute.xlu1 %18581 }
 0x470   : > { %21059 = vrot.lane.b32.xlu0 %v30170_v48, %s25432_s27 }
 0x471   : > { %23645 = vmatmul.mubr.msk.bf16.vlgmr.msra.gmra.mrb[4].mxu0 %vm339_vm1, %v30150_v61  ;;  %21061 = vrot.lane.b32.xlu1 %v30193_v58, %s25432_s27 }
 0x472   : > { %18021 = vmatpush1.bf16.msra.mxu0 %v17809_v2  ;;  %18052 = vmatprep.mubr.bf16.mxu0 %v31445_v57  ;;  %v30229_v16 = vpop.permute.xlu0 %18583  ;;  %v20939_v2 = vld [vmem:[%s25515_s28 + $0x24] sm:$0xff] }
 0x473   : > { %23652 = vmatprep.subr.msk.bf16.mxu0 %vm343_vm0, %v17770_v29  ;;  %v30232_v30 = vpop.permute.xlu1 %18585  ;;  %v30329_v42 = vrot.slane %v20939_v2, %v31456_v44 }
 0x474   : > { %21063 = vrot.lane.b32.xlu0 %v30196_v31, %s25432_s27 }
 0x475   : > { %23647 = vmatmul.mubr.msk.bf16.vlgmr.msra.gmra.mrb[4].mxu1 %vm339_vm1, %v30150_v61  ;;  %21065 = vrot.lane.b32.xlu1 %v30220_v27, %s25432_s27 }
 0x476   : > { %18062 = vmatpush1.bf16.msra.mxu1 %v17815_v36  ;;  %18093 = vmatprep.mubr.bf16.mxu1 %v31445_v57  ;;  %v30255_v1 = vpop.permute.xlu0 %18587  ;;  %v17775_v36 = vsel %vm2833_vm4, %v29958_v22, %v29961_v8  ;;  %v30352_v8 = vcombine.high %v30329_v42, %v30329_v42 }
 0x477   : > { %23654 = vmatprep.subr.msk.bf16.mxu1 %vm343_vm0, %v17772_v54  ;;  %v30259_v28 = vpop.permute.xlu1 %18589  ;;  %v21001_v54 = vcombine.high %v20939_v2, %v20939_v2  ;;  %v17839_v22 = vsel %vm343_vm0, %v17775_v36, 0  ;;  %v21018_v2 = vcombine.high %v20940_v5, %v20940_v5  ;;  %v18598_v36 = vsel %vm3672_vm5, %v30053_v25, %v30056_v11  ;;  %v20941_v5 = vld [vmem:[%s25515_s28 + $0x34] sm:$0xff] }
 0x478   : > { %21067 = vrot.lane.b32.xlu0 %v30223_v9, %s25432_s27 }
 0x479   : > { %23649 = vmatmul.mubr.msk.bf16.vlgmr.msra.gmra.mrb[8].mxu0 %vm339_vm1, %v30150_v61  ;;  %21069 = vrot.lane.b32.xlu1 %v30246_v7, %s25432_s27 }
 0x47a   : > { %18103 = vmatpush1.bf16.msra.mxu0 %v17821_v18  ;;  %18134 = vmatprep.mubr.bf16.mxu0 %v31445_v57  ;;  %v30282_v26 = vpop.permute.xlu0 %18591  ;;  %v30355_v18 = vrot.slane %v21001_v54, %v31456_v44 }
 0x47b   : > { %23656 = vmatprep.subr.msk.bf16.mxu0 %vm343_vm0, %v17774_v24  ;;  %v30285_v62 = vpop.permute.xlu1 %18593  ;;  %v17780_v24 = vsel %vm2833_vm4, %v29999_v12, %v30015_v40  ;;  %v17777_v40 = vsel %vm2833_vm4, %v29977_v37, %v29980_v20 }
 0x47c   : > { %21071 = vrot.lane.b32.xlu0 %v30249_v13, %s25432_s27  ;;  %v17845_v37 = vsel %vm343_vm0, %v17777_v40, 0  ;;  %v30379_v20 = vcombine.high %v30355_v18, %v30355_v18 }
 0x47d   : > { %23651 = vmatmul.mubr.msk.bf16.vlgmr.msra.gmra.mrb[8].mxu1 %vm339_vm1, %v30150_v61  ;;  %21073 = vrot.lane.b32.xlu1 %v30273_v15, %s25432_s27 }
 0x47e   : > { %18144 = vmatpush1.bf16.msra.mxu1 %v17827_v50  ;;  %18175 = vmatprep.mubr.bf16.mxu1 %v31445_v57  ;;  %v30308_v29 = vpop.permute.xlu0 %19383  ;;  %v18596_v50 = vsel %vm3672_vm5, %v30034_v4, %v30037_v14 }
 0x47f   : > { %23658 = vmatprep.subr.msk.bf16.mxu1 %vm343_vm0, %v17776_v35  ;;  %v30312_v51 = vpop.permute.xlu1 %19385 }
 0x480   : > { %21075 = vrot.lane.b32.xlu0 %v30276_v21, %s25432_s27 }
 0x481   : > { %23653 = vmatmul.mubr.msk.bf16.vlgmr.msra.gmra.mrb[12].mxu0 %vm339_vm1, %v30150_v61  ;;  %21077 = vrot.lane.b32.xlu1 %v30299_v6, %s25432_s27 }
 0x482   : > { %18185 = vmatpush1.bf16.msra.mxu0 %v17833_v23  ;;  %18216 = vmatprep.mubr.bf16.mxu0 %v31445_v57  ;;  %v30335_v41 = vpop.permute.xlu0 %19387 }
 0x483   : > { %23660 = vmatprep.subr.msk.bf16.mxu0 %vm343_vm0, %v17778_v38  ;;  %v30338_v0 = vpop.permute.xlu1 %19389  ;;  %v17779_v38 = vsel %vm2833_vm4, %v29996_v45, %v29999_v12  ;;  %v30405_v12 = vcombine.high %v30382_v19, %v30382_v19 }
 0x484   : > { %21079 = vrot.lane.b32.xlu0 %v30302_v56, %s25432_s27  ;;  %v17851_v45 = vsel %vm343_vm0, %v17779_v38, 0  ;;  %v21035_v38 = vcombine.high %v20941_v5, %v20941_v5 }
 0x485   : > { %23655 = vmatmul.mubr.msk.bf16.vlgmr.msra.gmra.mrb[12].mxu1 %vm339_vm1, %v30150_v61  ;;  %21081 = vrot.lane.b32.xlu1 %v30326_v10, %s25432_s27 }
 0x486   : > { %18226 = vmatpush1.bf16.msra.mxu1 %v17839_v22  ;;  %18257 = vmatprep.mubr.bf16.mxu1 %v31445_v57  ;;  %v30361_v17 = vpop.permute.xlu0 %19391  ;;  %v18595_v22 = vsel %vm3672_vm5, %v30018_v55, %v30034_v4 }
 0x487   : > { %23662 = vmatprep.subr.msk.bf16.mxu1 %vm343_vm0, %v17780_v24  ;;  %v30365_v35 = vpop.permute.xlu1 %19393  ;;  %v30408_v24 = vrot.slane %v21018_v2, %v31456_v44  ;;  %v18623_v55 = vsel %vm343_vm0, %v18595_v22, 0  ;;  %v30435_v2 = vrot.slane %v20941_v5, %v31456_v44  ;;  %v30461_v5 = vrot.slane %v21035_v38, %v31456_v44 }
 0x488   : > { %21083 = vrot.lane.b32.xlu0 %v30329_v42, %s25432_s27  ;;  %v18604_v44 = vsel %vm3672_vm5, %v30110_v59, %v30113_v53 }
 0x489   : > { %23657 = vmatmul.mubr.msk.bf16.vlgmr.msra.gmra.mrb[16].mxu0 %vm339_vm1, %v30150_v61  ;;  %21085 = vrot.lane.b32.xlu1 %v30352_v8, %s25432_s27  ;;  %v30432_v4 = vcombine.high %v30408_v24, %v30408_v24 }
 0x48a   : > { %18267 = vmatpush1.bf16.msra.mxu0 %v17845_v37  ;;  %18298 = vmatprep.mubr.bf16.mxu0 %v31445_v57  ;;  %v30388_v23 = vpop.permute.xlu0 %19395  ;;  %v18600_v37 = vsel %vm3672_vm5, %v30072_v33, %v30075_v46 }
 0x48b   : > { %23666 = vmatprep.subr.msk.bf16.mxu0 %vm343_vm0, %v18596_v50  ;;  %v30391_v54 = vpop.permute.xlu1 %19397 }
 0x48c   : > { %21087 = vrot.lane.b32.xlu0 %v30355_v18, %s25432_s27 }
 0x48d   : > { %23659 = vmatmul.mubr.msk.bf16.vlgmr.msra.gmra.mrb[16].mxu1 %vm339_vm1, %v30150_v61  ;;  %21089 = vrot.lane.b32.xlu1 %v30379_v20, %s25432_s27 }
 0x48e   : > { %18308 = vmatpush1.bf16.msra.mxu1 %v17851_v45  ;;  %18339 = vmatprep.mubr.bf16.mxu1 %v31445_v57  ;;  %v30414_v40 = vpop.permute.xlu0 %19399 }
 0x48f   : > { %23668 = vmatprep.subr.msk.bf16.mxu1 %vm343_vm0, %v18598_v36  ;;  %v30418_v50 = vpop.permute.xlu1 %19401  ;;  %v18597_v36 = vsel %vm3672_vm5, %v30037_v14, %v30053_v25  ;;  %v30458_v25 = vcombine.high %v30435_v2, %v30435_v2 }
 0x490   : > { %31460 = vst [vmem:[#allocation11_spill] sm:$0xff] %v30418_v50  ;;  %21091 = vrot.lane.b32.xlu0 %v30382_v19, %s25432_s27  ;;  %v18602_v50 = vsel %vm3672_vm5, %v30091_v52, %v30094_v34  ;;  %v18629_v14 = vsel %vm343_vm0, %v18597_v36, 0 }
 0x491   : > { %23661 = vmatmul.mubr.msk.bf16.vlgmr.msra.gmra.mrb[20].mxu0 %vm339_vm1, %v30150_v61  ;;  %21093 = vrot.lane.b32.xlu1 %v30405_v12, %s25432_s27 }
 0x492   : > { %18695 = vmatpush1.bf16.msra.mxu0 %v18623_v55  ;;  %18726 = vmatprep.mubr.bf16.mxu0 %v31445_v57  ;;  %v30441_v45 = vpop.permute.xlu0 %19403 }
 0x493   : > { %23670 = vmatprep.subr.msk.bf16.mxu0 %vm343_vm0, %v18600_v37  ;;  %v30444_v22 = vpop.permute.xlu1 %19405  ;;  %v18599_v37 = vsel %vm3672_vm5, %v30056_v11, %v30072_v33  ;;  %v30489_v33 = vcombine.high %v30461_v5, %v30461_v5 }
 0x494   : > { %21095 = vrot.lane.b32.xlu0 %v30408_v24, %s25432_s27  ;;  %v18635_v11 = vsel %vm343_vm0, %v18599_v37, 0  ;;  %v18606_v37 = vsel %vm3672_vm5, %v30129_v43, %v30132_v49 }
 0x495   : > { %23663 = vmatmul.mubr.msk.bf16.vlgmr.msra.gmra.mrb[20].mxu1 %vm339_vm1, %v30150_v61  ;;  %21097 = vrot.lane.b32.xlu1 %v30432_v4, %s25432_s27  ;;  %v30469_v61 = vld [vmem:[%s31422_s1 + $0x58] sm:$0xf] }
 0x496   : > { %18736 = vmatpush1.bf16.msra.mxu1 %v18629_v14  ;;  %18767 = vmatprep.mubr.bf16.mxu1 %v31445_v57  ;;  %v30472_v55 = vpop.permute.xlu0 %19407 }
 0x497   : > { %23672 = vmatprep.subr.msk.bf16.mxu1 %vm343_vm0, %v18602_v50  ;;  %v30475_v36 = vpop.permute.xlu1 %19409  ;;  %v18601_v50 = vsel %vm3672_vm5, %v30075_v46, %v30091_v52  ;;  %v30511_v52 = vld.sshfl [vmem:[%s25515_s28 + $0x3c] sm:$0x3 pattern:$0x76325410]  ;;  %s31380_s28 = scalar_lea.sflag [#allocation6], %s161_s6 }
 0x498   : > { %21099 = vrot.lane.b32.xlu0 %v30435_v2, %s25432_s27  ;;  %v18641_v46 = vsel %vm343_vm0, %v18601_v50, 0  ;;  %v18608_v50 = vsel %vm3672_vm5, %v30153_v32, %v30157_v47 }
 0x499   : > { %23667 = vmatmul.mubr.msk.bf16.vlgmr.msra.gmra.mrb[0].mxu0 %vm339_vm1, %v30469_v61  ;;  %21101 = vrot.lane.b32.xlu1 %v30458_v25, %s25432_s27 }
 0x49a   : > { %18777 = vmatpush1.bf16.msra.mxu0 %v18635_v11  ;;  %18808 = vmatprep.mubr.bf16.mxu0 %v31445_v57  ;;  %v30495_v38 = vpop.permute.xlu0 %19411 }
 0x49b   : > { %23674 = vmatprep.subr.msk.bf16.mxu0 %vm343_vm0, %v18604_v44  ;;  %v30498_v14 = vpop.permute.xlu1 %19413  ;;  %v18603_v44 = vsel %vm3672_vm5, %v30094_v34, %v30110_v59  ;;  %v18605_v59 = vsel %vm3672_vm5, %v30113_v53, %v30129_v43  ;;  %v18607_v43 = vsel %vm3672_vm5, %v30132_v49, %v30153_v32  ;;  %v18609_v32 = vsel %vm3672_vm5, %v30157_v47, %v30176_v60 }
 0x49c   : > { %31461 = vst [vmem:[#allocation10_spill] sm:$0xff] %v30498_v14  ;;  %21103 = vrot.lane.b32.xlu0 %v30461_v5, %s25432_s27  ;;  %v18647_v34 = vsel %vm343_vm0, %v18603_v44, 0  ;;  %v18610_v44 = vsel %vm3672_vm5, %v30176_v60, %v30179_v63  ;;  %v18653_v53 = vsel %vm343_vm0, %v18605_v59, 0  ;;  %v18659_v49 = vsel %vm343_vm0, %v18607_v43, 0 }
 0x49d   : > { %23669 = vmatmul.mubr.msk.bf16.vlgmr.msra.gmra.mrb[0].mxu1 %vm339_vm1, %v30469_v61  ;;  %21105 = vrot.lane.b32.xlu1 %v30489_v33, %s25432_s27  ;;  %v18665_v47 = vsel %vm343_vm0, %v18609_v32, 0  ;;  %v18611_v60 = vsel %vm3672_vm5, %v30179_v63, %v30202_v39  ;;  %v18616_v59 = vsel %vm3672_vm5, %v30255_v1, %v30259_v28  ;;  %v19438_v43 = vsel %vm4511_vm6, %v30365_v35, %v30388_v23 }
 0x49e   : > { %18818 = vmatpush1.bf16.msra.mxu1 %v18641_v46  ;;  %18849 = vmatprep.mubr.bf16.mxu1 %v31445_v57  ;;  %v30517_v11 = vpop.permute.xlu0 %19415  ;;  %v18671_v63 = vsel %vm343_vm0, %v18611_v60, 0 }
 0x49f   : > { %23676 = vmatprep.subr.msk.bf16.mxu1 %vm343_vm0, %v18606_v37  ;;  %v30520_v14 = vpop.permute.xlu1 %19417 }
 0x4a0   : > { %21107 = vrot.lane.b32.xlu0 %v30511_v52, %s25432_s27  ;;  %s25360_s27 = scalar_lea.vmem %s31375_s17, 1536 }
 0x4a1   : > { %23671 = vmatmul.mubr.msk.bf16.vlgmr.msra.gmra.mrb[4].mxu0 %vm339_vm1, %v30469_v61  ;;  %21897 = vrot.lane.b32.xlu1 %v30170_v48, %s25433_s7  ;;  %p25361_p11 = scmp.ne.s32.totalorder %s31375_s17, %s25360_s27 }
 0x4a2   : > { %18859 = vmatpush1.bf16.msra.mxu0 %v18647_v34  ;;  %18890 = vmatprep.mubr.bf16.mxu0 %v31445_v57  ;;  %v30536_v37 = vpop.permute.xlu0 %19419  ;;  %v18614_v34 = vsel %vm3672_vm5, %v30229_v16, %v30232_v30 }
 0x4a3   : > { %23678 = vmatprep.subr.msk.bf16.mxu0 %vm343_vm0, %v18608_v50  ;;  %v30539_v46 = vpop.permute.xlu1 %19421  ;;  %v18612_v50 = vsel %vm3672_vm5, %v30202_v39, %v30206_v3  ;;  %v18613_v39 = vsel %vm3672_vm5, %v30206_v3, %v30229_v16  ;;  %v18615_v16 = vsel %vm3672_vm5, %v30232_v30, %v30255_v1  ;;  %v18617_v1 = vsel %vm3672_vm5, %v30259_v28, %v30282_v26  ;;  %p25362_p12 = pnand %p25361_p11, %p25495_p5 }
 0x4a4   : > { %21899 = vrot.lane.b32.xlu0 %v30193_v58, %s25433_s7  ;;  %v18677_v3 = vsel %vm343_vm0, %v18613_v39, 0  ;;  %v18683_v30 = vsel %vm343_vm0, %v18615_v16, 0  ;;  %v18689_v28 = vsel %vm343_vm0, %v18617_v1, 0 }
 0x4a5   : > { %23673 = vmatmul.mubr.msk.bf16.vlgmr.msra.gmra.mrb[4].mxu1 %vm339_vm1, %v30469_v61  ;;  %21901 = vrot.lane.b32.xlu1 %v30196_v31, %s25433_s7  ;;  %p25363_p13 = pneg %p25362_p12 }
 0x4a6   : > { %18900 = vmatpush1.bf16.msra.mxu1 %v18653_v53  ;;  %18931 = vmatprep.mubr.bf16.mxu1 %v31445_v57  ;;  %v30555_v48 = vpop.permute.xlu0 %19423  ;;  %v19436_v53 = vsel %vm4511_vm6, %v30338_v0, %v30361_v17 }
 0x4a7   : > { %23680 = vmatprep.subr.msk.bf16.mxu1 %vm343_vm0, %v18610_v44  ;;  %v30558_v58 = vpop.permute.xlu1 %19425  ;;  %v18618_v44 = vsel %vm3672_vm5, %v30282_v26, %v30285_v62  ;;  %v19433_v26 = vsel %vm4511_vm6, %v30308_v29, %v30312_v51 }
 0x4a8   : > { %21903 = vrot.lane.b32.xlu0 %v30220_v27, %s25433_s7  ;;  %v19461_v29 = vsel %vm343_vm0, %v19433_v26, 0 }
 0x4a9   : > { %23675 = vmatmul.mubr.msk.bf16.vlgmr.msra.gmra.mrb[8].mxu0 %vm339_vm1, %v30469_v61  ;;  %21905 = vrot.lane.b32.xlu1 %v30223_v9, %s25433_s7 }
 0x4aa   : > { %18941 = vmatpush1.bf16.msra.mxu0 %v18659_v49  ;;  %18972 = vmatprep.mubr.bf16.mxu0 %v31445_v57  ;;  %v30574_v31 = vpop.permute.xlu0 %19427 }
 0x4ab   : > { %23682 = vmatprep.subr.msk.bf16.mxu0 %vm343_vm0, %v18612_v50  ;;  %v30577_v27 = vpop.permute.xlu1 %19429  ;;  %v19440_v50 = vsel %vm4511_vm6, %v30391_v54, %v30414_v40 }
 0x4ac   : > { %21907 = vrot.lane.b32.xlu0 %v30246_v7, %s25433_s7 }
 0x4ad   : > { %23677 = vmatmul.mubr.msk.bf16.vlgmr.msra.gmra.mrb[8].mxu1 %vm339_vm1, %v30469_v61  ;;  %21909 = vrot.lane.b32.xlu1 %v30249_v13, %s25433_s7 }
 0x4ae   : > { %18982 = vmatpush1.bf16.msra.mxu1 %v18665_v47  ;;  %19013 = vmatprep.mubr.bf16.mxu1 %v31445_v57  ;;  %v30593_v9 = vpop.permute.xlu0 %19431  ;;  %v19446_v47 = vsel %vm4511_vm6, %v30475_v36, %v30495_v38 }
 0x4af   : > { %23684 = vmatprep.subr.msk.bf16.mxu1 %vm343_vm0, %v18614_v34  ;;  %v30596_v7 = vpop.permute.xlu1 %20221  ;;  %v19444_v34 = vsel %vm4511_vm6, %v30444_v22, %v30472_v55 }
 0x4b0   : > { %21911 = vrot.lane.b32.xlu0 %v30273_v15, %s25433_s7 }
 0x4b1   : > { %23679 = vmatmul.mubr.msk.bf16.vlgmr.msra.gmra.mrb[12].mxu0 %vm339_vm1, %v30469_v61  ;;  %21913 = vrot.lane.b32.xlu1 %v30276_v21, %s25433_s7 }
 0x4b2   : > { %19023 = vmatpush1.bf16.msra.mxu0 %v18671_v63  ;;  %19054 = vmatprep.mubr.bf16.mxu0 %v31445_v57  ;;  %v30612_v13 = vpop.permute.xlu0 %20223 }
 0x4b3   : > { %23686 = vmatprep.subr.msk.bf16.mxu0 %vm343_vm0, %v18616_v59  ;;  %v30615_v15 = vpop.permute.xlu1 %20225  ;;  %v31463_v59 = vld [vmem:[#allocation10_spill] sm:$0xff] }
 0x4b4   : > { %21915 = vrot.lane.b32.xlu0 %v30299_v6, %s25433_s7  ;;  %v19434_v6 = vsel %vm4511_vm6, %v30312_v51, %v30335_v41  ;;  %v19435_v51 = vsel %vm4511_vm6, %v30335_v41, %v30338_v0  ;;  %v19437_v41 = vsel %vm4511_vm6, %v30361_v17, %v30365_v35  ;;  %v30709_v0 = vld [vmem:[%s31422_s1 + $0x5c] sm:$0xf]  ;;  %v19439_v35 = vsel %vm4511_vm6, %v30388_v23, %v30391_v54 }
 0x4b5   : > { %23681 = vmatmul.mubr.msk.bf16.vlgmr.msra.gmra.mrb[12].mxu1 %vm339_vm1, %v30469_v61  ;;  %21917 = vrot.lane.b32.xlu1 %v30302_v56, %s25433_s7  ;;  %v19473_v17 = vsel %vm343_vm0, %v19437_v41, 0  ;;  %v19448_v63 = vsel %vm4511_vm6, %v31463_v59, %v30517_v11 }
 0x4b6   : > { %19064 = vmatpush1.bf16.msra.mxu1 %v18677_v3  ;;  %19095 = vmatprep.mubr.bf16.mxu1 %v31445_v57  ;;  %v30631_v21 = vpop.permute.xlu0 %20227 }
 0x4b7   : > { %23688 = vmatprep.subr.msk.bf16.mxu1 %vm343_vm0, %v18618_v44  ;;  %v30634_v62 = vpop.permute.xlu1 %20229  ;;  %v19450_v44 = vsel %vm4511_vm6, %v30520_v14, %v30536_v37 }
 0x4b8   : > { %21919 = vrot.lane.b32.xlu0 %v30326_v10, %s25433_s7 }
 0x4b9   : > { %23683 = vmatmul.mubr.msk.bf16.vlgmr.msra.gmra.mrb[16].mxu0 %vm339_vm1, %v30469_v61  ;;  %21921 = vrot.lane.b32.xlu1 %v30329_v42, %s25433_s7 }
 0x4ba   : > { %19105 = vmatpush1.bf16.msra.mxu0 %v18683_v30  ;;  %19136 = vmatprep.mubr.bf16.mxu0 %v31445_v57  ;;  %v30650_v56 = vpop.permute.xlu0 %20231 }
 0x4bb   : > { %23692 = vmatprep.subr.msk.bf16.mxu0 %vm343_vm0, %v19434_v6  ;;  %v30653_v10 = vpop.permute.xlu1 %20233  ;;  %v19452_v6 = vsel %vm4511_vm6, %v30539_v46, %v30555_v48 }
 0x4bc   : > { %21923 = vrot.lane.b32.xlu0 %v30352_v8, %s25433_s7 }
 0x4bd   : > { %23685 = vmatmul.mubr.msk.bf16.vlgmr.msra.gmra.mrb[16].mxu1 %vm339_vm1, %v30469_v61  ;;  %21925 = vrot.lane.b32.xlu1 %v30355_v18, %s25433_s7 }
 0x4be   : > { %19146 = vmatpush1.bf16.msra.mxu1 %v18689_v28  ;;  %19177 = vmatprep.mubr.bf16.mxu1 %v31445_v57  ;;  %v30669_v42 = vpop.permute.xlu0 %20235  ;;  %v19454_v28 = vsel %vm4511_vm6, %v30558_v58, %v30574_v31 }
 0x4bf   : > { %23694 = vmatprep.subr.msk.bf16.mxu1 %vm343_vm0, %v19436_v53  ;;  %v30672_v8 = vpop.permute.xlu1 %20237 }
 0x4c0   : > { %21927 = vrot.lane.b32.xlu0 %v30379_v20, %s25433_s7 }
 0x4c1   : > { %23687 = vmatmul.mubr.msk.bf16.vlgmr.msra.gmra.mrb[20].mxu0 %vm339_vm1, %v30469_v61  ;;  %21929 = vrot.lane.b32.xlu1 %v30382_v19, %s25433_s7  ;;  %v19467_v19 = vsel %vm343_vm0, %v19435_v51, 0 }
 0x4c2   : > { %19533 = vmatpush1.bf16.msra.mxu0 %v19461_v29  ;;  %19564 = vmatprep.mubr.bf16.mxu0 %v31445_v57  ;;  %v30688_v18 = vpop.permute.xlu0 %20239  ;;  %v19456_v29 = vsel %vm4511_vm6, %v30577_v27, %v30593_v9  ;;  %v20272_v9 = vsel %vm5350_vm7, %v30612_v13, %v30615_v15 }
 0x4c3   : > { %23696 = vmatprep.subr.msk.bf16.mxu0 %vm343_vm0, %v19438_v43  ;;  %v30691_v20 = vpop.permute.xlu1 %20241 }
 0x4c4   : > { %21931 = vrot.lane.b32.xlu0 %v30405_v12, %s25433_s7 }
 0x4c5   : > { %23689 = vmatmul.mubr.msk.bf16.vlgmr.msra.gmra.mrb[20].mxu1 %vm339_vm1, %v30469_v61  ;;  %21933 = vrot.lane.b32.xlu1 %v30408_v24, %s25433_s7  ;;  %v31462_v24 = vld [vmem:[#allocation11_spill] sm:$0xff] }
 0x4c6   : > { %19574 = vmatpush1.bf16.msra.mxu1 %v19467_v19  ;;  %19605 = vmatprep.mubr.bf16.mxu1 %v31445_v57  ;;  %v30712_v12 = vpop.permute.xlu0 %20243  ;;  %v19442_v49 = vsel %vm4511_vm6, %v31462_v24, %v30441_v45  ;;  %v19441_v23 = vsel %vm4511_vm6, %v30414_v40, %v31462_v24  ;;  %v19443_v40 = vsel %vm4511_vm6, %v30441_v45, %v30444_v22 }
 0x4c7   : > { %23698 = vmatprep.subr.msk.bf16.mxu1 %vm343_vm0, %v19440_v50  ;;  %v30715_v61 = vpop.permute.xlu1 %20245  ;;  %v19491_v39 = vsel %vm343_vm0, %v19443_v40, 0  ;;  %v19445_v45 = vsel %vm4511_vm6, %v30472_v55, %v30475_v36  ;;  %v19447_v55 = vsel %vm4511_vm6, %v30495_v38, %v31463_v59  ;;  %v19449_v38 = vsel %vm4511_vm6, %v30517_v11, %v30520_v14 }
 0x4c8   : > { %21935 = vrot.lane.b32.xlu0 %v30432_v4, %s25433_s7  ;;  %v19497_v3 = vsel %vm343_vm0, %v19445_v45, 0  ;;  %v19503_v30 = vsel %vm343_vm0, %v19447_v55, 0  ;;  %v19509_v26 = vsel %vm343_vm0, %v19449_v38, 0  ;;  %v19451_v14 = vsel %vm4511_vm6, %v30536_v37, %v30539_v46 }
 0x4c9   : > { %23693 = vmatmul.mubr.msk.bf16.vlgmr.msra.gmra.mrb[0].mxu0 %vm339_vm1, %v30709_v0  ;;  %21937 = vrot.lane.b32.xlu1 %v30435_v2, %s25433_s7  ;;  %v19479_v2 = vsel %vm343_vm0, %v19439_v35, 0  ;;  %v19515_v51 = vsel %vm343_vm0, %v19451_v14, 0  ;;  %v19453_v37 = vsel %vm4511_vm6, %v30555_v48, %v30558_v58  ;;  %v19455_v48 = vsel %vm4511_vm6, %v30574_v31, %v30577_v27 }
 0x4ca   : > { %19615 = vmatpush1.bf16.msra.mxu0 %v19473_v17  ;;  %19646 = vmatprep.mubr.bf16.mxu0 %v31445_v57  ;;  %v30731_v32 = vpop.permute.xlu0 %20247  ;;  %v19521_v19 = vsel %vm343_vm0, %v19453_v37, 0  ;;  %v20274_v58 = vsel %vm5350_vm7, %v30631_v21, %v30634_v62  ;;  %v19527_v41 = vsel %vm343_vm0, %v19455_v48, 0  ;;  %v20271_v31 = vsel %vm5350_vm7, %v30596_v7, %v30612_v13 }
 0x4cb   : > { %23700 = vmatprep.subr.msk.bf16.mxu0 %vm343_vm0, %v19442_v49  ;;  %v30734_v4 = vpop.permute.xlu1 %20249  ;;  %v20276_v27 = vsel %vm5350_vm7, %v30650_v56, %v30653_v10  ;;  %v20299_v17 = vsel %vm343_vm0, %v20271_v31, 0  ;;  %v20273_v35 = vsel %vm5350_vm7, %v30615_v15, %v30631_v21  ;;  %v20275_v15 = vsel %vm5350_vm7, %v30634_v62, %v30650_v56  ;;  %v30902_v21 = vld [vmem:[%s31422_s1 + $0x60] sm:$0xf] }
 0x4cc   : > { %21939 = vrot.lane.b32.xlu0 %v30458_v25, %s25433_s7  ;;  %v20279_v59 = vsel %vm5350_vm7, %v30672_v8, %v30688_v18 }
 0x4cd   : > { %23695 = vmatmul.mubr.msk.bf16.vlgmr.msra.gmra.mrb[0].mxu1 %vm339_vm1, %v30709_v0  ;;  %21941 = vrot.lane.b32.xlu1 %v30461_v5, %s25433_s7  ;;  %v19485_v5 = vsel %vm343_vm0, %v19441_v23, 0  ;;  %v20280_v23 = vsel %vm5350_vm7, %v30688_v18, %v30691_v20 }
 0x4ce   : > { %19656 = vmatpush1.bf16.msra.mxu1 %v19479_v2  ;;  %19687 = vmatprep.mubr.bf16.mxu1 %v31445_v57  ;;  %v30750_v54 = vpop.permute.xlu0 %20251  ;;  %v20305_v2 = vsel %vm343_vm0, %v20273_v35, 0 }
 0x4cf   : > { %23702 = vmatprep.subr.msk.bf16.mxu1 %vm343_vm0, %v19444_v34  ;;  %v30753_v25 = vpop.permute.xlu1 %20253  ;;  %v20278_v34 = vsel %vm5350_vm7, %v30669_v42, %v30672_v8  ;;  %v20281_v8 = vsel %vm5350_vm7, %v30691_v20, %v30712_v12  ;;  %v170_v20 = vld [vmem:[%s31423_s2] sm:$0xff] }
 0x4d0   : > { %21943 = vrot.lane.b32.xlu0 %v30489_v33, %s25433_s7  ;;  %v20286_v18 = vsel %vm5350_vm7, %v30750_v54, %v30753_v25  ;;  %v20329_v45 = vsel %vm343_vm0, %v20281_v8, 0 }
 0x4d1   : > { %23697 = vmatmul.mubr.msk.bf16.vlgmr.msra.gmra.mrb[4].mxu0 %vm339_vm1, %v30709_v0  ;;  %21945 = vrot.lane.b32.xlu1 %v30511_v52, %s25433_s7  ;;  %s25364_s7 = sshll.u32 %s25434_s16, 4  ;;  %s25365_s7 = int_to_ptr.vmem [resolvable:$false] %s25364_s7 }
 0x4d2   : > { %19697 = vmatpush1.bf16.msra.mxu0 %v19485_v5  ;;  %19728 = vmatprep.mubr.bf16.mxu0 %v31445_v57  ;;  %v30769_v60 = vpop.permute.xlu0 %20255  ;;  %v20282_v5 = vsel %vm5350_vm7, %v30712_v12, %v30715_v61  ;;  %v20283_v12 = vsel %vm5350_vm7, %v30715_v61, %v30731_v32  ;;  %s25366_s10 = scalar_lea.vmem %s25365_s7, 3072  ;;  %p25367_p0 = scmp.lt.s32.totalorder %s31375_s17, %s25365_s7 }
 0x4d3   : > { %23704 = vmatprep.subr.msk.bf16.mxu0 %vm343_vm0, %v19446_v47  ;;  %v30772_v33 = vpop.permute.xlu1 %20257  ;;  %v20277_v47 = vsel %vm5350_vm7, %v30653_v10, %v30669_v42  ;;  %p25368_p1 = scmp.lt.s32.totalorder %s25366_s10, %s25360_s27 }
 0x4d4   : > { %v20317_v40 = vsel %vm343_vm0, %v20277_v47, 0  ;;  %173 = vperm.xlu0 %25161, %v170_v20   ;;  %v20288_v55 = vsel %vm5350_vm7, %v30769_v60, %v30772_v33 }
 0x4d5   : > { %23699 = vmatmul.mubr.msk.bf16.vlgmr.msra.gmra.mrb[4].mxu1 %vm339_vm1, %v30709_v0  ;;  %p25369_p2 = por %p25368_p1, %p25367_p0 }
 0x4d6   : > { %19738 = vmatpush1.bf16.msra.mxu1 %v19491_v39  ;;  %19769 = vmatprep.mubr.bf16.mxu1 %v31445_v57  ;;  %v30784_v22 = vpop.permute.xlu0 %20259  ;;  %v20323_v39 = vsel %vm343_vm0, %v20279_v59, 0 }
 0x4d7   : > { %23706 = vmatprep.subr.msk.bf16.mxu1 %vm343_vm0, %v19448_v63  ;;  %v30787_v52 = vpop.permute.xlu1 %20261  ;;  %v20284_v63 = vsel %vm5350_vm7, %v30731_v32, %v30734_v4  ;;  %p25370_p3 = pnand %p25369_p2, %p25363_p13 }
 0x4d8   : > { %v20290_v38 = vsel %vm5350_vm7, %v30784_v22, %v30787_v52 }
 0x4d9   : > { %23701 = vmatmul.mubr.msk.bf16.vlgmr.msra.gmra.mrb[8].mxu0 %vm339_vm1, %v30709_v0 }
 0x4da   : > { %19779 = vmatpush1.bf16.msra.mxu0 %v19497_v3  ;;  %19810 = vmatprep.mubr.bf16.mxu0 %v31445_v57  ;;  %v30799_v36 = vpop.permute.xlu0 %20263 }
 0x4db   : > { %23708 = vmatprep.subr.msk.bf16.mxu0 %vm343_vm0, %v19450_v44  ;;  %v30802_v16 = vpop.permute.xlu1 %20265  ;;  %v20291_v37 = vsel %vm5350_vm7, %v30787_v52, %v30799_v36 }
 0x4dd   : > { %23703 = vmatmul.mubr.msk.bf16.vlgmr.msra.gmra.mrb[8].mxu1 %vm339_vm1, %v30709_v0 }
 0x4de   : > { %19820 = vmatpush1.bf16.msra.mxu1 %v19503_v30  ;;  %19851 = vmatprep.mubr.bf16.mxu1 %v31445_v57  ;;  %v30814_v1 = vpop.permute.xlu0 %20267  ;;  %v20285_v30 = vsel %vm5350_vm7, %v30734_v4, %v30750_v54  ;;  %v20287_v4 = vsel %vm5350_vm7, %v30753_v25, %v30769_v60  ;;  %v20292_v54 = vsel %vm5350_vm7, %v30799_v36, %v30802_v16 }
 0x4df   : > { %23710 = vmatprep.subr.msk.bf16.mxu1 %vm343_vm0, %v19452_v6  ;;  %v30817_v53 = vpop.permute.xlu1 %20269  ;;  %v20335_v6 = vsel %vm343_vm0, %v20283_v12, 0  ;;  %v20289_v25 = vsel %vm5350_vm7, %v30772_v33, %v30784_v22  ;;  %v20293_v52 = vsel %vm5350_vm7, %v30802_v16, %v30814_v1 }
 0x4e0   : > { %v20294_v60 = vsel %vm5350_vm7, %v30814_v1, %v30817_v53  ;;  %v20365_v48 = vsel %vm343_vm0, %v20293_v52, 0 }
 0x4e1   : > { %23705 = vmatmul.mubr.msk.bf16.vlgmr.msra.gmra.mrb[12].mxu0 %vm339_vm1, %v30709_v0 }
 0x4e2   : > { %19861 = vmatpush1.bf16.msra.mxu0 %v19509_v26  ;;  %19892 = vmatprep.mubr.bf16.mxu0 %v31445_v57  ;;  %v30829_v11 = vpop.permute.xlu0 %21059  ;;  %v20347_v26 = vsel %vm343_vm0, %v20287_v4, 0 }
 0x4e3   : > { %23712 = vmatprep.subr.msk.bf16.mxu0 %vm343_vm0, %v19454_v28  ;;  %v30832_v43 = vpop.permute.xlu1 %21061  ;;  %v20341_v28 = vsel %vm343_vm0, %v20285_v30, 0 }
 0x4e4   : > { %v21109_v36 = vsel %vm6189_vm8, %v30829_v11, %v30832_v43 }
 0x4e5   : > { %23707 = vmatmul.mubr.msk.bf16.vlgmr.msra.gmra.mrb[12].mxu1 %vm339_vm1, %v30709_v0  ;;  %v21137_v1 = vsel %vm343_vm0, %v21109_v36, 0 }
 0x4e6   : > { %19902 = vmatpush1.bf16.msra.mxu1 %v19515_v51  ;;  %19933 = vmatprep.mubr.bf16.mxu1 %v31445_v57  ;;  %v30845_v46 = vpop.permute.xlu0 %21063  ;;  %v20353_v51 = vsel %vm343_vm0, %v20289_v25, 0 }
 0x4e7   : > { %23714 = vmatprep.subr.msk.bf16.mxu1 %vm343_vm0, %v19456_v29  ;;  %v30847_v50 = vpop.permute.xlu1 %21065  ;;  %v21110_v53 = vsel %vm6189_vm8, %v30832_v43, %v30845_v46 }
 0x4e8   : > { %v21111_v11 = vsel %vm6189_vm8, %v30845_v46, %v30847_v50 }
 0x4e9   : > { %23709 = vmatmul.mubr.msk.bf16.vlgmr.msra.gmra.mrb[16].mxu0 %vm339_vm1, %v30709_v0 }
 0x4ea   : > { %19943 = vmatpush1.bf16.msra.mxu0 %v19521_v19  ;;  %19974 = vmatprep.mubr.bf16.mxu0 %v31445_v57  ;;  %v30866_v24 = vpop.permute.xlu0 %21067 }
 0x4eb   : > { %23718 = vmatprep.subr.msk.bf16.mxu0 %vm343_vm0, %v20272_v9  ;;  %v30868_v49 = vpop.permute.xlu1 %21069  ;;  %v20359_v9 = vsel %vm343_vm0, %v20291_v37, 0  ;;  %v21112_v19 = vsel %vm6189_vm8, %v30847_v50, %v30866_v24 }
 0x4ec   : > { %v21113_v46 = vsel %vm6189_vm8, %v30866_v24, %v30868_v49 }
 0x4ed   : > { %23711 = vmatmul.mubr.msk.bf16.vlgmr.msra.gmra.mrb[16].mxu1 %vm339_vm1, %v30709_v0  ;;  %v21149_v35 = vsel %vm343_vm0, %v21113_v46, 0 }
 0x4ee   : > { %19984 = vmatpush1.bf16.msra.mxu1 %v19527_v41  ;;  %20015 = vmatprep.mubr.bf16.mxu1 %v31445_v57  ;;  %v30886_v7 = vpop.permute.xlu0 %21071  ;;  %v21143_v41 = vsel %vm343_vm0, %v21111_v11, 0 }
 0x4ef   : > { %23720 = vmatprep.subr.msk.bf16.mxu1 %vm343_vm0, %v20274_v58  ;;  %v30888_v13 = vpop.permute.xlu1 %21073  ;;  %v21114_v43 = vsel %vm6189_vm8, %v30868_v49, %v30886_v7 }
 0x4f0   : > { %v21115_v24 = vsel %vm6189_vm8, %v30886_v7, %v30888_v13 }
 0x4f1   : > { %23713 = vmatmul.mubr.msk.bf16.vlgmr.msra.gmra.mrb[20].mxu0 %vm339_vm1, %v30709_v0 }
 0x4f2   : > { %20371 = vmatpush1.bf16.msra.mxu0 %v20299_v17  ;;  %20402 = vmatprep.mubr.bf16.mxu0 %v31445_v57  ;;  %v30912_v62 = vpop.permute.xlu0 %21075  ;;  %v31074_v17 = vld [vmem:[%s31422_s1 + $0x64] sm:$0xf] }
 0x4f3   : > { %23722 = vmatprep.subr.msk.bf16.mxu0 %vm343_vm0, %v20276_v27  ;;  %v30914_v56 = vpop.permute.xlu1 %21077  ;;  %v21116_v50 = vsel %vm6189_vm8, %v30888_v13, %v30912_v62 }
 0x4f4   : > { %v21117_v7 = vsel %vm6189_vm8, %v30912_v62, %v30914_v56 }
 0x4f5   : > { %23715 = vmatmul.mubr.msk.bf16.vlgmr.msra.gmra.mrb[20].mxu1 %vm339_vm1, %v30709_v0  ;;  %v20311_v0 = vsel %vm343_vm0, %v20275_v15, 0  ;;  %v21155_v15 = vsel %vm343_vm0, %v21115_v24, 0 }
 0x4f6   : > { %20412 = vmatpush1.bf16.msra.mxu1 %v20305_v2  ;;  %20443 = vmatprep.mubr.bf16.mxu1 %v31445_v57  ;;  %v30932_v10 = vpop.permute.xlu0 %21079 }
 0x4f7   : > { %23724 = vmatprep.subr.msk.bf16.mxu1 %vm343_vm0, %v20278_v34  ;;  %v30934_v42 = vpop.permute.xlu1 %21081  ;;  %v21118_v49 = vsel %vm6189_vm8, %v30914_v56, %v30932_v10 }
 0x4f8   : > { %v21119_v62 = vsel %vm6189_vm8, %v30932_v10, %v30934_v42 }
 0x4f9   : > { %23719 = vmatmul.mubr.msk.bf16.vlgmr.msra.gmra.mrb[0].mxu0 %vm339_vm1, %v30902_v21  ;;  %v21167_v47 = vsel %vm343_vm0, %v21119_v62, 0 }
 0x4fa   : > { %20453 = vmatpush1.bf16.msra.mxu0 %v20311_v0  ;;  %20484 = vmatprep.mubr.bf16.mxu0 %v31445_v57  ;;  %v30953_v44 = vpop.permute.xlu0 %21083 }
 0x4fb   : > { %23726 = vmatprep.subr.msk.bf16.mxu0 %vm343_vm0, %v20280_v23  ;;  %v30955_v3 = vpop.permute.xlu1 %21085  ;;  %v21120_v13 = vsel %vm6189_vm8, %v30934_v42, %v30953_v44 }
 0x4fd   : > { %23721 = vmatmul.mubr.msk.bf16.vlgmr.msra.gmra.mrb[0].mxu1 %vm339_vm1, %v30902_v21 }
 0x4fe   : > { %20494 = vmatpush1.bf16.msra.mxu1 %v20317_v40  ;;  %20525 = vmatprep.mubr.bf16.mxu1 %v31445_v57  ;;  %v30976_v61 = vpop.permute.xlu0 %21087 }
 0x4ff   : > { %23728 = vmatprep.subr.msk.bf16.mxu1 %vm343_vm0, %v20282_v5  ;;  %v30978_v32 = vpop.permute.xlu1 %21089  ;;  %v21122_v56 = vsel %vm6189_vm8, %v30955_v3, %v30976_v61  ;;  %v21121_v5 = vsel %vm6189_vm8, %v30953_v44, %v30955_v3 }
 0x500   : > { %v21173_v42 = vsel %vm343_vm0, %v21121_v5, 0 }
 0x501   : > { %23723 = vmatmul.mubr.msk.bf16.vlgmr.msra.gmra.mrb[4].mxu0 %vm339_vm1, %v30902_v21 }
 0x502   : > { %20535 = vmatpush1.bf16.msra.mxu0 %v20323_v39  ;;  %20566 = vmatprep.mubr.bf16.mxu0 %v31445_v57  ;;  %v30997_v14 = vpop.permute.xlu0 %21091 }
 0x503   : > { %23730 = vmatprep.subr.msk.bf16.mxu0 %vm343_vm0, %v20284_v63  ;;  %v30999_v29 = vpop.permute.xlu1 %21093  ;;  %v21124_v40 = vsel %vm6189_vm8, %v30978_v32, %v30997_v14  ;;  %v21123_v63 = vsel %vm6189_vm8, %v30976_v61, %v30978_v32 }
 0x504   : > { %v21179_v8 = vsel %vm343_vm0, %v21123_v63, 0  ;;  %v21125_v44 = vsel %vm6189_vm8, %v30997_v14, %v30999_v29 }
 0x505   : > { %23725 = vmatmul.mubr.msk.bf16.vlgmr.msra.gmra.mrb[4].mxu1 %vm339_vm1, %v30902_v21  ;;  %v21185_v20 = vsel %vm343_vm0, %v21125_v44, 0 }
 0x506   : > { %20576 = vmatpush1.bf16.msra.mxu1 %v20329_v45  ;;  %20607 = vmatprep.mubr.bf16.mxu1 %v31445_v57  ;;  %v31017_v33 = vpop.permute.xlu0 %21095 }
 0x507   : > { %23732 = vmatprep.subr.msk.bf16.mxu1 %vm343_vm0, %v20286_v18  ;;  %v31019_v22 = vpop.permute.xlu1 %21097  ;;  %v21126_v39 = vsel %vm6189_vm8, %v30999_v29, %v31017_v33 }
 0x508   : > { %v21127_v12 = vsel %vm6189_vm8, %v31017_v33, %v31019_v22 }
 0x509   : > { %23727 = vmatmul.mubr.msk.bf16.vlgmr.msra.gmra.mrb[8].mxu0 %vm339_vm1, %v30902_v21  ;;  %v21191_v61 = vsel %vm343_vm0, %v21127_v12, 0 }
 0x50a   : > { %20617 = vmatpush1.bf16.msra.mxu0 %v20335_v6  ;;  %20648 = vmatprep.mubr.bf16.mxu0 %v31445_v57  ;;  %v31041_v58 = vpop.permute.xlu0 %21099 }
 0x50b   : > { %23734 = vmatprep.subr.msk.bf16.mxu0 %vm343_vm0, %v20288_v55  ;;  %v31043_v16 = vpop.permute.xlu1 %21101  ;;  %v21128_v3 = vsel %vm6189_vm8, %v31019_v22, %v31041_v58 }
 0x50c   : > { %v21129_v32 = vsel %vm6189_vm8, %v31041_v58, %v31043_v16  ;;  %v31207_v58 = vld [vmem:[%s31422_s1 + $0x68] sm:$0xf] }
 0x50d   : > { %23729 = vmatmul.mubr.msk.bf16.vlgmr.msra.gmra.mrb[8].mxu1 %vm339_vm1, %v30902_v21 }
 0x50e   : > { %20658 = vmatpush1.bf16.msra.mxu1 %v20341_v28  ;;  %20689 = vmatprep.mubr.bf16.mxu1 %v31445_v57  ;;  %v31059_v31 = vpop.permute.xlu0 %21103  ;;  %v21197_v28 = vsel %vm343_vm0, %v21129_v32, 0 }
 0x50f   : > { %23736 = vmatprep.subr.msk.bf16.mxu1 %vm343_vm0, %v20290_v38  ;;  %v31061_v27 = vpop.permute.xlu1 %21105  ;;  %v21130_v55 = vsel %vm6189_vm8, %v31043_v16, %v31059_v31 }
 0x511   : > { %23731 = vmatmul.mubr.msk.bf16.vlgmr.msra.gmra.mrb[12].mxu0 %vm339_vm1, %v30902_v21 }
 0x512   : > { %20699 = vmatpush1.bf16.msra.mxu0 %v20347_v26  ;;  %20730 = vmatprep.mubr.bf16.mxu0 %v31445_v57  ;;  %v21108_v34 = vpop.permute.xlu0 %21107  ;;  %v21131_v26 = vsel %vm6189_vm8, %v31059_v31, %v31061_v27 }
 0x513   : > { %23738 = vmatprep.subr.msk.bf16.mxu0 %vm343_vm0, %v20292_v54  ;;  %v31087_v2 = vpop.permute.xlu1 %21897  ;;  %v21132_v38 = vsel %vm6189_vm8, %v31061_v27, %v21108_v34  ;;  %v21203_v29 = vsel %vm343_vm0, %v21131_v26, 0 }
 0x515   : > { %23733 = vmatmul.mubr.msk.bf16.vlgmr.msra.gmra.mrb[12].mxu1 %vm339_vm1, %v30902_v21 }
 0x516   : > { %20740 = vmatpush1.bf16.msra.mxu1 %v20353_v51  ;;  %20771 = vmatprep.mubr.bf16.mxu1 %v31445_v57  ;;  %v21900_v23 = vpop.permute.xlu0 %21899 }
 0x517   : > { %23740 = vmatprep.subr.msk.bf16.mxu1 %vm343_vm0, %v20294_v60  ;;  %v31103_v0 = vpop.permute.xlu1 %21901  ;;  %v21947_v25 = vsel %vm7028_vm9, %v31087_v2, %v21900_v23 }
 0x518   : > { %v21948_v14 = vsel %vm7028_vm9, %v21900_v23, %v31103_v0  ;;  %v21975_v33 = vsel %vm343_vm0, %v21947_v25, 0 }
 0x519   : > { %23735 = vmatmul.mubr.msk.bf16.vlgmr.msra.gmra.mrb[16].mxu0 %vm339_vm1, %v30902_v21 }
 0x51a   : > { %20781 = vmatpush1.bf16.msra.mxu0 %v20359_v9  ;;  %20812 = vmatprep.mubr.bf16.mxu0 %v31445_v57  ;;  %v21904_v59 = vpop.permute.xlu0 %21903 }
 0x51b   : > { %23744 = vmatprep.subr.msk.bf16.mxu0 %vm343_vm0, %v21110_v53  ;;  %v31124_v10 = vpop.permute.xlu1 %21905  ;;  %v21949_v22 = vsel %vm7028_vm9, %v31103_v0, %v21904_v59 }
 0x51c   : > { %v21950_v60 = vsel %vm7028_vm9, %v21904_v59, %v31124_v10  ;;  %v21981_v9 = vsel %vm343_vm0, %v21949_v22, 0 }
 0x51d   : > { %23737 = vmatmul.mubr.msk.bf16.vlgmr.msra.gmra.mrb[16].mxu1 %vm339_vm1, %v30902_v21 }
 0x51e   : > { %20822 = vmatpush1.bf16.msra.mxu1 %v20365_v48  ;;  %20853 = vmatprep.mubr.bf16.mxu1 %v31445_v57  ;;  %v21908_v18 = vpop.permute.xlu0 %21907 }
 0x51f   : > { %23746 = vmatprep.subr.msk.bf16.mxu1 %vm343_vm0, %v21112_v19  ;;  %v21910_v45 = vpop.permute.xlu1 %21909  ;;  %v21951_v19 = vsel %vm7028_vm9, %v31124_v10, %v21908_v18 }
 0x520   : > { %v21952_v53 = vsel %vm7028_vm9, %v21908_v18, %v21910_v45  ;;  %v21987_v16 = vsel %vm343_vm0, %v21951_v19, 0 }
 0x521   : > { %23739 = vmatmul.mubr.msk.bf16.vlgmr.msra.gmra.mrb[20].mxu0 %vm339_vm1, %v30902_v21 }
 0x522   : > { %21209 = vmatpush1.bf16.msra.mxu0 %v21137_v1  ;;  %21240 = vmatprep.mubr.bf16.mxu0 %v31445_v57  ;;  %v21912_v6 = vpop.permute.xlu0 %21911 }
 0x523   : > { %23748 = vmatprep.subr.msk.bf16.mxu0 %vm343_vm0, %v21114_v43  ;;  %v21914_v30 = vpop.permute.xlu1 %21913  ;;  %v21953_v1 = vsel %vm7028_vm9, %v21910_v45, %v21912_v6 }
 0x524   : > { %v21954_v48 = vsel %vm7028_vm9, %v21912_v6, %v21914_v30  ;;  %v21993_v31 = vsel %vm343_vm0, %v21953_v1, 0 }
 0x525   : > { %23741 = vmatmul.mubr.msk.bf16.vlgmr.msra.gmra.mrb[20].mxu1 %vm339_vm1, %v30902_v21  ;;  %v21161_v21 = vsel %vm343_vm0, %v21117_v7, 0 }
 0x526   : > { %21250 = vmatpush1.bf16.msra.mxu1 %v21143_v41  ;;  %21281 = vmatprep.mubr.bf16.mxu1 %v31445_v57  ;;  %v21916_v4 = vpop.permute.xlu0 %21915 }
 0x527   : > { %23750 = vmatprep.subr.msk.bf16.mxu1 %vm343_vm0, %v21116_v50  ;;  %v21918_v54 = vpop.permute.xlu1 %21917  ;;  %v21955_v27 = vsel %vm7028_vm9, %v21914_v30, %v21916_v4 }
 0x528   : > { %v21956_v11 = vsel %vm7028_vm9, %v21916_v4, %v21918_v54  ;;  %v21999_v50 = vsel %vm343_vm0, %v21955_v27, 0 }
 0x529   : > { %23745 = vmatmul.mubr.msk.bf16.vlgmr.msra.gmra.mrb[0].mxu0 %vm339_vm1, %v31074_v17 }
 0x52a   : > { %21291 = vmatpush1.bf16.msra.mxu0 %v21149_v35  ;;  %21322 = vmatprep.mubr.bf16.mxu0 %v31445_v57  ;;  %v21920_v51 = vpop.permute.xlu0 %21919 }
 0x52b   : > { %23752 = vmatprep.subr.msk.bf16.mxu0 %vm343_vm0, %v21118_v49  ;;  %v21922_v37 = vpop.permute.xlu1 %21921  ;;  %v21957_v24 = vsel %vm7028_vm9, %v21918_v54, %v21920_v51 }
 0x52c   : > { %v21958_v46 = vsel %vm7028_vm9, %v21920_v51, %v21922_v37  ;;  %v22005_v34 = vsel %vm343_vm0, %v21957_v24, 0 }
 0x52d   : > { %23747 = vmatmul.mubr.msk.bf16.vlgmr.msra.gmra.mrb[0].mxu1 %vm339_vm1, %v31074_v17 }
 0x52e   : > { %21332 = vmatpush1.bf16.msra.mxu1 %v21155_v15  ;;  %21363 = vmatprep.mubr.bf16.mxu1 %v31445_v57  ;;  %v21924_v52 = vpop.permute.xlu0 %21923 }
 0x52f   : > { %23754 = vmatprep.subr.msk.bf16.mxu1 %vm343_vm0, %v21120_v13  ;;  %v21926_v36 = vpop.permute.xlu1 %21925  ;;  %v21959_v2 = vsel %vm7028_vm9, %v21922_v37, %v21924_v52 }
 0x530   : > { %v21960_v49 = vsel %vm7028_vm9, %v21924_v52, %v21926_v36 }
 0x531   : > { %23749 = vmatmul.mubr.msk.bf16.vlgmr.msra.gmra.mrb[4].mxu0 %vm339_vm1, %v31074_v17 }
 0x532   : > { %21373 = vmatpush1.bf16.msra.mxu0 %v21161_v21  ;;  %21404 = vmatprep.mubr.bf16.mxu0 %v31445_v57  ;;  %v21928_v43 = vpop.permute.xlu0 %21927  ;;  %v22011_v21 = vsel %vm343_vm0, %v21959_v2, 0 }
 0x533   : > { %23756 = vmatprep.subr.msk.bf16.mxu0 %vm343_vm0, %v21122_v56  ;;  %v21930_v41 = vpop.permute.xlu1 %21929  ;;  %v21961_v23 = vsel %vm7028_vm9, %v21926_v36, %v21928_v43 }
 0x534   : > { %v21962_v15 = vsel %vm7028_vm9, %v21928_v43, %v21930_v41  ;;  %v22017_v62 = vsel %vm343_vm0, %v21961_v23, 0 }
 0x535   : > { %23751 = vmatmul.mubr.msk.bf16.vlgmr.msra.gmra.mrb[4].mxu1 %vm339_vm1, %v31074_v17 }
 0x536   : > { %21414 = vmatpush1.bf16.msra.mxu1 %v21167_v47  ;;  %21445 = vmatprep.mubr.bf16.mxu1 %v31445_v57 }
 0x537   : > { %23758 = vmatprep.subr.msk.bf16.mxu1 %vm343_vm0, %v21124_v40  ;;  %v21934_v35 = vpop.permute.xlu1 %21933 }
 0x539   : > { %23753 = vmatmul.mubr.msk.bf16.vlgmr.msra.gmra.mrb[8].mxu0 %vm339_vm1, %v31074_v17 }
 0x53a   : > { %21455 = vmatpush1.bf16.msra.mxu0 %v21173_v42  ;;  %21486 = vmatprep.mubr.bf16.mxu0 %v31445_v57 }
 0x53b   : > { %23760 = vmatprep.subr.msk.bf16.mxu0 %vm343_vm0, %v21126_v39  ;;  %v21938_v13 = vpop.permute.xlu1 %21937 }
 0x53d   : > { %23755 = vmatmul.mubr.msk.bf16.vlgmr.msra.gmra.mrb[8].mxu1 %vm339_vm1, %v31074_v17 }
 0x53e   : > { %21496 = vmatpush1.bf16.msra.mxu1 %v21179_v8  ;;  %21527 = vmatprep.mubr.bf16.mxu1 %v31445_v57 }
 0x53f   : > { %23762 = vmatprep.subr.msk.bf16.mxu1 %vm343_vm0, %v21128_v3  ;;  %v21942_v47 = vpop.permute.xlu1 %21941 }
 0x541   : > { %23757 = vmatmul.mubr.msk.bf16.vlgmr.msra.gmra.mrb[12].mxu0 %vm339_vm1, %v31074_v17 }
 0x542   : > { %21537 = vmatpush1.bf16.msra.mxu0 %v21185_v20  ;;  %21568 = vmatprep.mubr.bf16.mxu0 %v31445_v57 }
 0x543   : > { %23764 = vmatprep.subr.msk.bf16.mxu0 %vm343_vm0, %v21130_v55  ;;  %v21946_v39 = vpop.permute.xlu1 %21945 }
 0x545   : > { %23759 = vmatmul.mubr.msk.bf16.vlgmr.msra.gmra.mrb[12].mxu1 %vm339_vm1, %v31074_v17 }
 0x546   : > { %21578 = vmatpush1.bf16.msra.mxu1 %v21191_v61  ;;  %21609 = vmatprep.mubr.bf16.mxu1 %v31445_v57 }
 0x547   : > { %23766 = vmatprep.subr.msk.bf16.mxu1 %vm343_vm0, %v21132_v38 }
 0x549   : > { %23761 = vmatmul.mubr.msk.bf16.vlgmr.msra.gmra.mrb[16].mxu0 %vm339_vm1, %v31074_v17 }
 0x54a   : > { %21619 = vmatpush1.bf16.msra.mxu0 %v21197_v28  ;;  %21650 = vmatprep.mubr.bf16.mxu0 %v31445_v57 }
 0x54b   : > { %23770 = vmatprep.subr.msk.bf16.mxu0 %vm343_vm0, %v21948_v14 }
 0x54d   : > { %23763 = vmatmul.mubr.msk.bf16.vlgmr.msra.gmra.mrb[16].mxu1 %vm339_vm1, %v31074_v17 }
 0x54e   : > { %21660 = vmatpush1.bf16.msra.mxu1 %v21203_v29  ;;  %21691 = vmatprep.mubr.bf16.mxu1 %v31445_v57 }
 0x54f   : > { %23772 = vmatprep.subr.msk.bf16.mxu1 %vm343_vm0, %v21950_v60 }
 0x551   : > { %23765 = vmatmul.mubr.msk.bf16.vlgmr.msra.gmra.mrb[20].mxu0 %vm339_vm1, %v31074_v17 }
 0x552   : > { %22047 = vmatpush1.bf16.msra.mxu0 %v21975_v33  ;;  %22078 = vmatprep.mubr.bf16.mxu0 %v31445_v57 }
 0x553   : > { %23774 = vmatprep.subr.msk.bf16.mxu0 %vm343_vm0, %v21952_v53 }
 0x555   : > { %23767 = vmatmul.mubr.msk.bf16.vlgmr.msra.gmra.mrb[20].mxu1 %vm339_vm1, %v31074_v17  ;;  %v21932_v17 = vpop.permute.xlu0 %21931 }
 0x556   : > { %22088 = vmatpush1.bf16.msra.mxu1 %v21981_v9  ;;  %22119 = vmatprep.mubr.bf16.mxu1 %v31445_v57  ;;  %v21964_v0 = vsel %vm7028_vm9, %v21932_v17, %v21934_v35  ;;  %v21963_v5 = vsel %vm7028_vm9, %v21930_v41, %v21932_v17 }
 0x557   : > { %23776 = vmatprep.subr.msk.bf16.mxu1 %vm343_vm0, %v21954_v48  ;;  %v22023_v59 = vsel %vm343_vm0, %v21963_v5, 0 }
 0x559   : > { %23771 = vmatmul.mubr.msk.bf16.vlgmr.msra.gmra.mrb[0].mxu0 %vm339_vm1, %v31207_v58  ;;  %v21936_v7 = vpop.permute.xlu0 %21935 }
 0x55a   : > { %22129 = vmatpush1.bf16.msra.mxu0 %v21987_v16  ;;  %22160 = vmatprep.mubr.bf16.mxu0 %v31445_v57  ;;  %v21966_v40 = vsel %vm7028_vm9, %v21936_v7, %v21938_v13  ;;  %v21965_v10 = vsel %vm7028_vm9, %v21934_v35, %v21936_v7 }
 0x55b   : > { %23778 = vmatprep.subr.msk.bf16.mxu0 %vm343_vm0, %v21956_v11  ;;  %v22029_v8 = vsel %vm343_vm0, %v21965_v10, 0 }
 0x55d   : > { %23773 = vmatmul.mubr.msk.bf16.vlgmr.msra.gmra.mrb[0].mxu1 %vm339_vm1, %v31207_v58  ;;  %v21940_v56 = vpop.permute.xlu0 %21939 }
 0x55e   : > { %22170 = vmatpush1.bf16.msra.mxu1 %v21993_v31  ;;  %22201 = vmatprep.mubr.bf16.mxu1 %v31445_v57  ;;  %v21968_v42 = vsel %vm7028_vm9, %v21940_v56, %v21942_v47  ;;  %v21967_v18 = vsel %vm7028_vm9, %v21938_v13, %v21940_v56 }
 0x55f   : > { %23780 = vmatprep.subr.msk.bf16.mxu1 %vm343_vm0, %v21958_v46  ;;  %v22035_v44 = vsel %vm343_vm0, %v21967_v18, 0 }
 0x561   : > { %23775 = vmatmul.mubr.msk.bf16.vlgmr.msra.gmra.mrb[4].mxu0 %vm339_vm1, %v31207_v58  ;;  %v21944_v63 = vpop.permute.xlu0 %21943 }
 0x562   : > { %22211 = vmatpush1.bf16.msra.mxu0 %v21999_v50  ;;  %22242 = vmatprep.mubr.bf16.mxu0 %v31445_v57  ;;  %v21970_v45 = vsel %vm7028_vm9, %v21944_v63, %v21946_v39  ;;  %v21969_v3 = vsel %vm7028_vm9, %v21942_v47, %v21944_v63 }
 0x563   : > { %23782 = vmatprep.subr.msk.bf16.mxu0 %vm343_vm0, %v21960_v49  ;;  %v22041_v20 = vsel %vm343_vm0, %v21969_v3, 0 }
 0x565   : > { %23777 = vmatmul.mubr.msk.bf16.vlgmr.msra.gmra.mrb[4].mxu1 %vm339_vm1, %v31207_v58  ;;  %v31280_v12 = vpop.permute.xlu0 %173 }
 0x566   : > { %22252 = vmatpush1.bf16.msra.mxu1 %v22005_v34  ;;  %22283 = vmatprep.mubr.bf16.mxu1 %v31445_v57 }
 0x567   : > { %23784 = vmatprep.subr.msk.bf16.mxu1 %vm343_vm0, %v21962_v15 }
 0x569   : > { %23779 = vmatmul.mubr.msk.bf16.vlgmr.msra.gmra.mrb[8].mxu0 %vm339_vm1, %v31207_v58 }
 0x56a   : > { %22293 = vmatpush1.bf16.msra.mxu0 %v22011_v21  ;;  %22324 = vmatprep.mubr.bf16.mxu0 %v31445_v57 }
 0x56b   : > { %23786 = vmatprep.subr.msk.bf16.mxu0 %vm343_vm0, %v21964_v0 }
 0x56d   : > { %23781 = vmatmul.mubr.msk.bf16.vlgmr.msra.gmra.mrb[8].mxu1 %vm339_vm1, %v31207_v58 }
 0x56e   : > { %22334 = vmatpush1.bf16.msra.mxu1 %v22017_v62  ;;  %22365 = vmatprep.mubr.bf16.mxu1 %v31445_v57 }
 0x56f   : > { %23788 = vmatprep.subr.msk.bf16.mxu1 %vm343_vm0, %v21966_v40 }
 0x571   : > { %23783 = vmatmul.mubr.msk.bf16.vlgmr.msra.gmra.mrb[12].mxu0 %vm339_vm1, %v31207_v58 }
 0x572   : > { %22375 = vmatpush1.bf16.msra.mxu0 %v22023_v59  ;;  %22406 = vmatprep.mubr.bf16.mxu0 %v31445_v57 }
 0x573   : > { %23790 = vmatprep.subr.msk.bf16.mxu0 %vm343_vm0, %v21968_v42 }
 0x575   : > { %23785 = vmatmul.mubr.msk.bf16.vlgmr.msra.gmra.mrb[12].mxu1 %vm339_vm1, %v31207_v58 }
 0x576   : > { %22416 = vmatpush1.bf16.msra.mxu1 %v22029_v8  ;;  %22447 = vmatprep.mubr.bf16.mxu1 %v31445_v57 }
 0x577   : > { %23792 = vmatprep.subr.msk.bf16.mxu1 %vm343_vm0, %v21970_v45 }
 0x579   : > { %23787 = vmatmul.mubr.msk.bf16.vlgmr.msra.gmra.mrb[16].mxu0 %vm339_vm1, %v31207_v58 }
 0x57a   : > { %22457 = vmatpush1.bf16.msra.mxu0 %v22035_v44  ;;  %22488 = vmatprep.mubr.bf16.mxu0 %v31445_v57 }
 0x57d   : > { %23789 = vmatmul.mubr.msk.bf16.vlgmr.msra.gmra.mrb[16].mxu1 %vm339_vm1, %v31207_v58 }
 0x57e   : > { %22498 = vmatpush1.bf16.msra.mxu1 %v22041_v20  ;;  %22529 = vmatprep.mubr.bf16.mxu1 %v31445_v57 }
 0x581   : > { %23791 = vmatmul.mubr.msk.bf16.vlgmr.msra.gmra.mrb[20].mxu0 %vm339_vm1, %v31207_v58 }
 0x585   : > { %23793 = vmatmul.mubr.msk.bf16.vlgmr.msra.gmra.mrb[20].mxu1 %vm339_vm1, %v31207_v58 }
 0x62c   : > { %v22080_v55 = vpop.f32.mrb[0].mxu0 }
 0x62d   : > { %v23835_v6 = vadd.f32 %v22080_v55, %v31280_v12  ;;  %v22082_v30 = vpop.f32.mrb[1].mxu0 }
 0x62e   : > { %v23836_v61 = vadd.f32 %v22082_v30, %v31280_v12  ;;  %v22084_v32 = vpop.f32.mrb[2].mxu0 }
 0x62f   : > { %25216 = vtanh.f32 %v23835_v6  ;;  %v23794_v38 = vmul.f32 -1.442695, %v23835_v6  ;;  %v22085_v28 = vpop.f32.mrb[3].mxu0 }
 0x630   : > { %25218 = vtanh.f32 %v23836_v61  ;;  %v23795_v57 = vmul.f32 -1.442695, %v23836_v61  ;;  %v22121_v4 = vpop.f32.mrb[0].mxu1 }
 0x631   : > { %25220 = vpow2.f32 %v23794_v38  ;;  %v23837_v54 = vadd.f32 %v22121_v4, %v31280_v12  ;;  %v22123_v26 = vpop.f32.mrb[1].mxu1 }
 0x632   : > { %25222 = vpow2.f32 %v23795_v57  ;;  %v23838_v14 = vadd.f32 %v22123_v26, %v31280_v12  ;;  %v22125_v29 = vpop.f32.mrb[2].mxu1 }
 0x633   : > { %25224 = vtanh.f32 %v23837_v54  ;;  %v23796_v25 = vmul.f32 -1.442695, %v23837_v54  ;;  %v22126_v60 = vpop.f32.mrb[3].mxu1 }
 0x634   : > { %25226 = vtanh.f32 %v23838_v14  ;;  %v23797_v51 = vmul.f32 -1.442695, %v23838_v14  ;;  %v22162_v37 = vpop.f32.mrb[4].mxu0 }
 0x635   : > { %25228 = vpow2.f32 %v23796_v25  ;;  %v23839_v33 = vadd.f32 %v22162_v37, %v31280_v12  ;;  %v22164_v22 = vpop.f32.mrb[5].mxu0 }
 0x636   : > { %25230 = vpow2.f32 %v23797_v51  ;;  %v23840_v53 = vadd.f32 %v22164_v22, %v31280_v12  ;;  %v22166_v9 = vpop.f32.mrb[6].mxu0 }
 0x637   : > { %25232 = vtanh.f32 %v23839_v33  ;;  %v23798_v52 = vmul.f32 -1.442695, %v23839_v33  ;;  %v22167_v36 = vpop.f32.mrb[7].mxu0 }
 0x638   : > { %25234 = vtanh.f32 %v23840_v53  ;;  %v23799_v19 = vmul.f32 -1.442695, %v23840_v53  ;;  %v22203_v48 = vpop.f32.mrb[4].mxu1 }
 0x639   : > { %v25217_v58 = vpop.eup %25216  ;;  %25236 = vpow2.f32 %v23798_v52  ;;  %v23841_v16 = vadd.f32 %v22203_v48, %v31280_v12  ;;  %v22205_v1 = vpop.f32.mrb[5].mxu1 }
 0x63a   : > { %v25219_v11 = vpop.eup %25218  ;;  %25238 = vpow2.f32 %v23799_v19  ;;  %v23842_v43 = vadd.f32 %v22205_v1, %v31280_v12  ;;  %v22207_v41 = vpop.f32.mrb[6].mxu1 }
 0x63b   : > { %v25221_v31 = vpop.eup %25220  ;;  %v31290_v27 = vcombine.low %v25217_v58, %v25219_v11  ;;  %25240 = vtanh.f32 %v23841_v16  ;;  %v23800_v46 = vmul.f32 -1.442695, %v23841_v16  ;;  %v22208_v50 = vpop.f32.mrb[7].mxu1 }
 0x63c   : > { %v25223_v17 = vpop.eup %25222  ;;  %v22607_v35 = vadd.f32 1.0, %v25221_v31  ;;  %25242 = vtanh.f32 %v23842_v43  ;;  %v23801_v24 = vmul.f32 -1.442695, %v23842_v43  ;;  %v22244_v49 = vpop.f32.mrb[8].mxu0 }
 0x63d   : > { %v25225_v34 = vpop.eup %25224  ;;  %v22608_v2 = vadd.f32 1.0, %v25223_v17  ;;  %25244 = vpow2.f32 %v23800_v46  ;;  %v23843_v15 = vadd.f32 %v22244_v49, %v31280_v12  ;;  %v22246_v7 = vpop.f32.mrb[9].mxu0  ;;  %v22916_v9 = vsub.f32 0.0, %v31290_v27 }
 0x63e   : > { %v25227_v13 = vpop.eup %25226  ;;  %25246 = vrcp.f32 %v22607_v35  ;;  %22597 = vst [vmem:[#allocation3 + $0x8] sm:$0xf] %v25225_v34  ;;  %v22248_v21 = vpop.f32.mrb[10].mxu0  ;;  %v23844_v5 = vadd.f32 %v22246_v7, %v31280_v12 }
 0x63f   : > { %v25229_v23 = vpop.eup %25228  ;;  %25248 = vrcp.f32 %v22608_v2  ;;  %v22249_v0 = vpop.f32.mrb[11].mxu0  ;;  %v23802_v47 = vmul.f32 -1.442695, %v23843_v15 }
 0x640   : > { %v25231_v62 = vpop.eup %25230  ;;  %v22609_v56 = vadd.f32 1.0, %v25229_v23  ;;  %25250 = vpow2.f32 %v23801_v24  ;;  %v22285_v40 = vpop.f32.mrb[8].mxu1  ;;  %v23803_v55 = vmul.f32 -1.442695, %v23844_v5 }
 0x641   : > { %v25233_v59 = vpop.eup %25232  ;;  %v22647_v10 = vadd.f32 1.0, %v25231_v62  ;;  %25252 = vtanh.f32 %v23843_v15  ;;  %v22287_v42 = vpop.f32.mrb[9].mxu1  ;;  %v23845_v45 = vadd.f32 %v22285_v40, %v31280_v12 }
 0x642   : > { %v25235_v63 = vpop.eup %25234  ;;  %25254 = vrcp.f32 %v22609_v56  ;;  %v31294_v39 = vcombine.low %v25227_v13, %v25233_v59  ;;  %v22289_v8 = vpop.f32.mrb[10].mxu1  ;;  %v23846_v28 = vadd.f32 %v22287_v42, %v31280_v12 }
 0x643   : > { %v25237_v18 = vpop.eup %25236  ;;  %25256 = vrcp.f32 %v22647_v10  ;;  %22637 = vst [vmem:[#allocation3 + $0x14] sm:$0xf] %v25235_v63  ;;  %v22290_v44 = vpop.f32.mrb[11].mxu1  ;;  %v23804_v26 = vmul.f32 -1.442695, %v23845_v45 }
 0x644   : > { %v25239_v3 = vpop.eup %25238  ;;  %v22648_v20 = vadd.f32 1.0, %v25237_v18  ;;  %25258 = vpow2.f32 %v23802_v47  ;;  %v22326_v6 = vpop.f32.mrb[12].mxu0  ;;  %v23805_v52 = vmul.f32 -1.442695, %v23846_v28 }
 0x645   : > { %v25241_v30 = vpop.eup %25240  ;;  %v22649_v61 = vadd.f32 1.0, %v25239_v3  ;;  %25260 = vtanh.f32 %v23844_v5  ;;  %v22328_v32 = vpop.f32.mrb[13].mxu0  ;;  %v23847_v60 = vadd.f32 %v22326_v6, %v31280_v12  ;;  %v22913_v5 = vld [vmem:[#allocation3 + $0x8] sm:$0xf] }
 0x646   : > { %v25243_v38 = vpop.eup %25242  ;;  %25262 = vrcp.f32 %v22648_v20  ;;  %v22330_v57 = vpop.f32.mrb[14].mxu0  ;;  %v23848_v58 = vadd.f32 %v22328_v32, %v31280_v12  ;;  %v22917_v6 = vsub.f32 0.0, %v22913_v5 }
 0x647   : > { %v25245_v4 = vpop.eup %25244  ;;  %25264 = vrcp.f32 %v22649_v61  ;;  %v31299_v54 = vcombine.low %v25241_v30, %v25243_v38  ;;  %v22331_v14 = vpop.f32.mrb[15].mxu0  ;;  %v23806_v43 = vmul.f32 -1.442695, %v23847_v60 }
 0x648   : > { %v25247_v29 = vpop.eup %25246  ;;  %v22688_v25 = vadd.f32 1.0, %v25245_v4  ;;  %25266 = vpow2.f32 %v23803_v55  ;;  %v22367_v51 = vpop.f32.mrb[12].mxu1  ;;  %v23807_v15 = vmul.f32 -1.442695, %v23848_v58 }
 0x649   : > { %v25249_v37 = vpop.eup %25248  ;;  %25268 = vtanh.f32 %v23845_v45  ;;  %v22369_v33 = vpop.f32.mrb[13].mxu1  ;;  %v23849_v24 = vadd.f32 %v22367_v51, %v31280_v12 }
 0x64a   : > { %v25251_v22 = vpop.eup %25250  ;;  %v22619_v53 = vcombine.high %v25247_v29, %v25249_v37  ;;  %25270 = vrcp.f32 %v22688_v25  ;;  %v22371_v36 = vpop.f32.mrb[14].mxu1  ;;  %v23850_v62 = vadd.f32 %v22369_v33, %v31280_v12 }
 0x64b   : > { %v25253_v19 = vpop.eup %25252  ;;  %v22689_v48 = vadd.f32 1.0, %v25251_v22  ;;  %25272 = vpow2.f32 %v23804_v26  ;;  %v22372_v16 = vpop.f32.mrb[15].mxu1  ;;  %v23808_v59 = vmul.f32 -1.442695, %v23849_v24 }
 0x64c   : > { %v25255_v1 = vpop.eup %25254  ;;  %v22918_v11 = vmul.f32 %v22916_v9, %v22619_v53  ;;  %22678 = vst [vmem:[#allocation3 + $0x20] sm:$0xf] %v25253_v19  ;;  %25274 = vtanh.f32 %v23846_v28  ;;  %v22408_v41 = vpop.f32.mrb[16].mxu0  ;;  %v23809_v61 = vmul.f32 -1.442695, %v23850_v62 }
 0x64d   : > { %v25257_v31 = vpop.eup %25256  ;;  %v22620_v46 = vcombine.high %v25255_v1, %v25255_v1  ;;  %25276 = vrcp.f32 %v22689_v48  ;;  %v22410_v50 = vpop.f32.mrb[17].mxu0  ;;  %v23851_v3 = vadd.f32 %v22408_v41, %v31280_v12  ;;  %v22925_v19 = vld [vmem:[#allocation3 + $0x14] sm:$0xf] }
 0x64e   : > { %v25259_v17 = vpop.eup %25258  ;;  %v22920_v35 = vadd.f32 %v22918_v11, %v31290_v27  ;;  %25278 = vpow2.f32 %v23805_v52  ;;  %v22412_v49 = vpop.f32.mrb[18].mxu0  ;;  %v23852_v25 = vadd.f32 %v22410_v50, %v31280_v12 }
 0x64f   : > { %v25261_v34 = vpop.eup %25260  ;;  %22624 = vst [vmem:[#allocation4 + $0x8] sm:$0xf] %v22620_v46  ;;  %v22690_v2 = vadd.f32 1.0, %v25259_v17  ;;  %25280 = vtanh.f32 %v23847_v60  ;;  %v22413_v7 = vpop.f32.mrb[19].mxu0  ;;  %v23810_v37 = vmul.f32 -1.442695, %v23851_v3 }
 0x650   : > { %v25263_v13 = vpop.eup %25262  ;;  %22922 = vst [vmem:[%s31311_s9] sm:$0xff] %v22920_v35  ;;  %v22928_v21 = vsub.f32 %v22920_v35, %v31294_v39  ;;  %25282 = vpow2.f32 %v23806_v43  ;;  %v22449_v23 = vpop.f32.mrb[16].mxu1 }
 0x651   : > { %v25265_v27 = vpop.eup %25264  ;;  %v22659_v0 = vcombine.high %v25257_v31, %v25263_v13  ;;  %25284 = vrcp.f32 %v22690_v2  ;;  %v31316_v56 = vpop.f32.mrb[17].mxu1  ;;  %v23811_v31 = vmul.f32 -1.442695, %v23852_v25 }
 0x652   : > { %v25267_v47 = vpop.eup %25266  ;;  %v22660_v40 = vcombine.high %v25265_v27, %v25265_v27  ;;  %25286 = vtanh.f32 %v23848_v58  ;;  %v22453_v10 = vpop.f32.mrb[18].mxu1  ;;  %v23853_v58 = vadd.f32 %v22449_v23, %v31280_v12  ;;  %v23854_v2 = vadd.f32 %v31316_v56, %v31280_v12 }
 0x653   : > { %v25269_v42 = vpop.eup %25268  ;;  %v22930_v63 = vmul.f32 %v22928_v21, %v22659_v0  ;;  %v22729_v8 = vadd.f32 1.0, %v25267_v47  ;;  %25288 = vpow2.f32 %v23807_v15  ;;  %v22454_v18 = vpop.f32.mrb[19].mxu1  ;;  %v22938_v56 = vld [vmem:[#allocation3 + $0x20] sm:$0xf] }
 0x654   : > { %v25271_v45 = vpop.eup %25270  ;;  %22665 = vst [vmem:[#allocation4 + $0x14] sm:$0xf] %v22660_v40  ;;  %v31318_v44 = vcombine.low %v25261_v34, %v25269_v42  ;;  %25290 = vtanh.f32 %v23849_v24  ;;  %v31321_v20 = vpop.f32.mrb[20].mxu0  ;;  %v23812_v21 = vmul.f32 -1.442695, %v23853_v58 }
 0x655   : > { %v25273_v55 = vpop.eup %25272  ;;  %v22932_v30 = vadd.f32 %v22930_v63, %v31294_v39  ;;  %25292 = vrcp.f32 %v22729_v8  ;;  %v31324_v32 = vpop.f32.mrb[21].mxu0  ;;  %v23855_v0 = vadd.f32 %v31321_v20, %v31280_v12 }
 0x656   : > { %v25275_v38 = vpop.eup %25274  ;;  %v22915_v28 = vld [vmem:[#allocation4 + $0x8] sm:$0xf]  ;;  %v22730_v57 = vadd.f32 1.0, %v25273_v55  ;;  %25294 = vpow2.f32 %v23808_v59  ;;  %v22494_v4 = vpop.f32.mrb[22].mxu0  ;;  %v23856_v63 = vadd.f32 %v31324_v32, %v31280_v12 }
 0x657   : > { %v25277_v26 = vpop.eup %25276  ;;  %v22919_v14 = vmul.f32 %v22917_v6, %v22915_v28  ;;  %23818 = vst [vmem:[%s31311_s9 + $0xc] sm:$0xff] %v22932_v30  ;;  %v22941_v29 = vsub.f32 %v22932_v30, %v31299_v54  ;;  %22719 = vst [vmem:[#allocation3 + $0x2c] sm:$0xf] %v25275_v38  ;;  %25296 = vtanh.f32 %v23850_v62  ;;  %v22495_v60 = vpop.f32.mrb[23].mxu0 }
 0x658   : > { %v25279_v39 = vpop.eup %25278  ;;  %v22700_v51 = vcombine.high %v25271_v45, %v25277_v26  ;;  %25298 = vrcp.f32 %v22730_v57  ;;  %v31329_v33 = vpop.f32.mrb[20].mxu1  ;;  %v23814_v45 = vmul.f32 -1.442695, %v23855_v0  ;;  %v23815_v26 = vmul.f32 -1.442695, %v23856_v63 }
 0x659   : > { %v25281_v22 = vpop.eup %25280  ;;  %v22921_v53 = vadd.f32 %v22919_v14, %v22913_v5  ;;  %v22731_v9 = vadd.f32 1.0, %v25279_v39  ;;  %25300 = vpow2.f32 %v23809_v61  ;;  %v31331_v52 = vpop.f32.mrb[21].mxu1  ;;  %v23813_v5 = vmul.f32 -1.442695, %v23854_v2 }
 0x65a   : > { %v25283_v36 = vpop.eup %25282  ;;  %v22943_v48 = vmul.f32 %v22941_v29, %v22700_v51  ;;  %25302 = vtanh.f32 %v23851_v3  ;;  %v22535_v16 = vpop.f32.mrb[22].mxu1  ;;  %v23857_v28 = vadd.f32 %v31329_v33, %v31280_v12  ;;  %v23858_v39 = vadd.f32 %v31331_v52, %v31280_v12 }
 0x65b   : > { %v25285_v1 = vpop.eup %25284  ;;  %22923 = vst [vmem:[%s31311_s9 + $0x8] sm:$0xf] %v22921_v53  ;;  %v22927_v11 = vld [vmem:[#allocation4 + $0x14] sm:$0xf]  ;;  %v22929_v43 = vsub.f32 %v22921_v53, %v22925_v19  ;;  %25304 = vrcp.f32 %v22731_v9  ;;  %v22770_v41 = vadd.f32 1.0, %v25283_v36  ;;  %v22536_v46 = vpop.f32.mrb[23].mxu1 }
 0x65c   : > { %v25287_v50 = vpop.eup %25286  ;;  %v22945_v17 = vadd.f32 %v22943_v48, %v31299_v54  ;;  %v22701_v35 = vcombine.high %v25285_v1, %v25285_v1  ;;  %25306 = vpow2.f32 %v23810_v37  ;;  %v23817_v16 = vmul.f32 -1.442695, %v23858_v39 }
 0x65d   : > { %v25289_v24 = vpop.eup %25288  ;;  %v22931_v49 = vmul.f32 %v22929_v43, %v22927_v11  ;;  %25308 = vrcp.f32 %v22770_v41  ;;  %v31336_v34 = vcombine.low %v25281_v22, %v25287_v50 }
 0x65e   : > { %v25291_v15 = vpop.eup %25290  ;;  %23820 = vst [vmem:[%s31311_s9 + $0x18] sm:$0xff] %v22945_v17  ;;  %22706 = vst [vmem:[#allocation4 + $0x20] sm:$0xf] %v22701_v35  ;;  %v22954_v7 = vsub.f32 %v22945_v17, %v31318_v44  ;;  %v22771_v13 = vadd.f32 1.0, %v25289_v24  ;;  %25310 = vtanh.f32 %v23852_v25  ;;  %v22951_v22 = vld [vmem:[#allocation3 + $0x2c] sm:$0xf] }
 0x65f   : > { %v25293_v54 = vpop.eup %25292  ;;  %v22933_v23 = vadd.f32 %v22931_v49, %v22925_v19  ;;  %22760 = vst [vmem:[#allocation3 + $0x38] sm:$0xf] %v25291_v15  ;;  %25312 = vpow2.f32 %v23811_v31 }
 0x660   : > { %v25295_v27 = vpop.eup %25294  ;;  %25314 = vrcp.f32 %v22771_v13 }
 0x661   : > { %v25297_v62 = vpop.eup %25296  ;;  %23819 = vst [vmem:[%s31311_s9 + $0x14] sm:$0xf] %v22933_v23  ;;  %v22772_v47 = vadd.f32 1.0, %v25295_v27  ;;  %25316 = vtanh.f32 %v23853_v58  ;;  %v22942_v59 = vsub.f32 %v22933_v23, %v22938_v56 }
 0x662   : > { %v25299_v40 = vpop.eup %25298  ;;  %25318 = vpow2.f32 %v23812_v21 }
 0x663   : > { %v25301_v10 = vpop.eup %25300  ;;  %v22741_v42 = vcombine.high %v25293_v54, %v25299_v40  ;;  %25320 = vrcp.f32 %v22772_v47 }
 0x664   : > { %v25303_v8 = vpop.eup %25302  ;;  %v22811_v18 = vadd.f32 1.0, %v25301_v10  ;;  %25322 = vtanh.f32 %v23854_v2 }
 0x665   : > { %v25305_v3 = vpop.eup %25304  ;;  %v22940_v20 = vld [vmem:[#allocation4 + $0x20] sm:$0xf]  ;;  %v22956_v55 = vmul.f32 %v22954_v7, %v22741_v42  ;;  %v31347_v6 = vcombine.low %v25297_v62, %v25303_v8  ;;  %25324 = vpow2.f32 %v23813_v5 }
 0x666   : > { %v25307_v30 = vpop.eup %25306  ;;  %v22944_v61 = vmul.f32 %v22942_v59, %v22940_v20  ;;  %v22742_v38 = vcombine.high %v25305_v3, %v25305_v3  ;;  %25326 = vrcp.f32 %v22811_v18  ;;  %v22964_v15 = vld [vmem:[#allocation3 + $0x38] sm:$0xf] }
 0x667   : > { %v25309_v57 = vpop.eup %25308  ;;  %v22958_v32 = vadd.f32 %v22956_v55, %v31318_v44  ;;  %v22812_v4 = vadd.f32 1.0, %v25307_v30  ;;  %25328 = vtanh.f32 %v23855_v0  ;;  %v23816_v44 = vmul.f32 -1.442695, %v23857_v28 }
 0x668   : > { %v25311_v14 = vpop.eup %25310  ;;  %v22946_v29 = vadd.f32 %v22944_v61, %v22938_v56  ;;  %22747 = vst [vmem:[#allocation4 + $0x2c] sm:$0xf] %v22742_v38  ;;  %25330 = vpow2.f32 %v23814_v45 }
 0x669   : > { %v25313_v25 = vpop.eup %25312  ;;  %23822 = vst [vmem:[%s31311_s9 + $0x24] sm:$0xff] %v22958_v32  ;;  %v22967_v60 = vsub.f32 %v22958_v32, %v31336_v34  ;;  %25332 = vrcp.f32 %v22812_v4  ;;  %22801 = vst [vmem:[#allocation3 + $0x44] sm:$0xf] %v25311_v14 }
 0x66a   : > { %v25315_v51 = vpop.eup %25314  ;;  %23821 = vst [vmem:[%s31311_s9 + $0x20] sm:$0xf] %v22946_v29  ;;  %v22813_v37 = vadd.f32 1.0, %v25313_v25  ;;  %25334 = vtanh.f32 %v23856_v63  ;;  %v22955_v36 = vsub.f32 %v22946_v29, %v22951_v22 }
 0x66b   : > { %v25317_v33 = vpop.eup %25316  ;;  %v22782_v53 = vcombine.high %v25309_v57, %v25315_v51  ;;  %25336 = vpow2.f32 %v23815_v26 }
 0x66c   : > { %v25319_v9 = vpop.eup %25318  ;;  %25338 = vrcp.f32 %v22813_v37 }
 0x66d   : > { %v25321_v19 = vpop.eup %25320  ;;  %v22969_v48 = vmul.f32 %v22967_v60, %v22782_v53  ;;  %v22852_v58 = vadd.f32 1.0, %v25319_v9  ;;  %25340 = vtanh.f32 %v23857_v28 }
 0x66e   : > { %v25323_v1 = vpop.eup %25322  ;;  %v22783_v12 = vcombine.high %v25321_v19, %v25321_v19  ;;  %25342 = vpow2.f32 %v23816_v44 }
 0x66f   : > { %v25325_v52 = vpop.eup %25324  ;;  %v22953_v11 = vld [vmem:[#allocation4 + $0x2c] sm:$0xf]  ;;  %v22971_v43 = vadd.f32 %v22969_v48, %v31336_v34  ;;  %25344 = vrcp.f32 %v22852_v58  ;;  %v22838_v41 = vcombine.low %v25317_v33, %v25323_v1 }
 0x670   : > { %v25327_v31 = vpop.eup %25326  ;;  %v22957_v46 = vmul.f32 %v22955_v36, %v22953_v11  ;;  %22788 = vst [vmem:[#allocation4 + $0x38] sm:$0xf] %v22783_v12  ;;  %v22853_v50 = vadd.f32 1.0, %v25325_v52  ;;  %25346 = vtanh.f32 %v23858_v39  ;;  %v22977_v55 = vld [vmem:[#allocation3 + $0x44] sm:$0xf] }
 0x671   : > { %v25329_v17 = vpop.eup %25328  ;;  %23824 = vst [vmem:[%s31311_s9 + $0x30] sm:$0xff] %v22971_v43  ;;  %v22980_v35 = vsub.f32 %v22971_v43, %v31347_v6  ;;  %25348 = vpow2.f32 %v23817_v16 }
 0x672   : > { %v25331_v24 = vpop.eup %25330  ;;  %v22959_v49 = vadd.f32 %v22957_v46, %v22951_v22  ;;  %25350 = vrcp.f32 %v22853_v50  ;;  %22842 = vst [vmem:[#allocation3 + $0x50] sm:$0xf] %v25329_v17 }
 0x673   : > { %v25333_v2 = vpop.eup %25332  ;;  %v22854_v34 = vadd.f32 1.0, %v25331_v24 }
 0x674   : > { %v25335_v7 = vpop.eup %25334  ;;  %23823 = vst [vmem:[%s31311_s9 + $0x2c] sm:$0xf] %v22959_v49  ;;  %v22968_v13 = vsub.f32 %v22959_v49, %v22964_v15  ;;  %v22823_v21 = vcombine.high %v25327_v31, %v25333_v2 }
 0x675   : > { %v25337_v54 = vpop.eup %25336  ;;  %25352 = vrcp.f32 %v22854_v34 }
 0x676   : > { %v25339_v23 = vpop.eup %25338  ;;  %v22982_v27 = vmul.f32 %v22980_v35, %v22823_v21  ;;  %v22893_v0 = vadd.f32 1.0, %v25337_v54 }
 0x677   : > { %v25341_v62 = vpop.eup %25340  ;;  %v22966_v56 = vld [vmem:[#allocation4 + $0x38] sm:$0xf]  ;;  %v22824_v47 = vcombine.high %v25339_v23, %v25339_v23 }
 0x678   : > { %v25343_v5 = vpop.eup %25342  ;;  %v22970_v40 = vmul.f32 %v22968_v13, %v22966_v56  ;;  %v22984_v59 = vadd.f32 %v22982_v27, %v31347_v6  ;;  %v22879_v10 = vcombine.low %v25335_v7, %v25341_v62  ;;  %25354 = vrcp.f32 %v22893_v0 }
 0x679   : > { %v25345_v42 = vpop.eup %25344  ;;  %22829 = vst [vmem:[#allocation4 + $0x44] sm:$0xf] %v22824_v47  ;;  %v22894_v63 = vadd.f32 1.0, %v25343_v5  ;;  %v22990_v39 = vld [vmem:[#allocation3 + $0x50] sm:$0xf] }
 0x67a   : > { %v25347_v8 = vpop.eup %25346  ;;  %v22972_v18 = vadd.f32 %v22970_v40, %v22964_v15  ;;  %23826 = vst [vmem:[%s31311_s9 + $0x3c] sm:$0xff] %v22984_v59  ;;  %v22993_v45 = vsub.f32 %v22984_v59, %v22838_v41 }
 0x67b   : > { %v25349_v3 = vpop.eup %25348  ;;  %25356 = vrcp.f32 %v22894_v63  ;;  %22883 = vst [vmem:[#allocation3 + $0x5c] sm:$0xf] %v25347_v8 }
 0x67c   : > { %v25351_v20 = vpop.eup %25350  ;;  %23825 = vst [vmem:[%s31311_s9 + $0x38] sm:$0xf] %v22972_v18  ;;  %v22895_v30 = vadd.f32 1.0, %v25349_v3  ;;  %v22981_v61 = vsub.f32 %v22972_v18, %v22977_v55 }
 0x67d   : > { %v22864_v6 = vcombine.high %v25345_v42, %v25351_v20 }
 0x67e   : > { %25358 = vrcp.f32 %v22895_v30 }
 0x67f   : > { %v25353_v38 = vpop.eup %25352  ;;  %v22995_v28 = vmul.f32 %v22993_v45, %v22864_v6 }
 0x680   : > { %v22979_v57 = vld [vmem:[#allocation4 + $0x44] sm:$0xf]  ;;  %v22865_v32 = vcombine.high %v25353_v38, %v25353_v38 }
 0x681   : > { %v22983_v4 = vmul.f32 %v22981_v61, %v22979_v57  ;;  %v22997_v26 = vadd.f32 %v22995_v28, %v22838_v41 }
 0x682   : > { %22870 = vst [vmem:[#allocation4 + $0x50] sm:$0xf] %v22865_v32  ;;  %v25355_v25 = vpop.eup %25354  ;;  %v23003_v48 = vld [vmem:[#allocation3 + $0x5c] sm:$0xf] }
 0x683   : > { %v22985_v14 = vadd.f32 %v22983_v4, %v22977_v55  ;;  %23828 = vst [vmem:[%s31311_s9 + $0x48] sm:$0xff] %v22997_v26  ;;  %v23006_v29 = vsub.f32 %v22997_v26, %v22879_v10 }
 0x685   : > { %v25357_v60 = vpop.eup %25356  ;;  %23827 = vst [vmem:[%s31311_s9 + $0x44] sm:$0xf] %v22985_v14  ;;  %v22994_v51 = vsub.f32 %v22985_v14, %v22990_v39 }
 0x686   : > { %v22905_v37 = vcombine.high %v25355_v25, %v25357_v60 }
 0x688   : > { %v25359_v44 = vpop.eup %25358  ;;  %v23008_v33 = vmul.f32 %v23006_v29, %v22905_v37 }
 0x689   : > { %v22992_v22 = vld [vmem:[#allocation4 + $0x50] sm:$0xf]  ;;  %v22906_v53 = vcombine.high %v25359_v44, %v25359_v44 }
 0x68a   : > { %v22996_v9 = vmul.f32 %v22994_v51, %v22992_v22  ;;  %v23010_v36 = vadd.f32 %v23008_v33, %v22879_v10 }
 0x68b   : > { %22911 = vst [vmem:[#allocation4 + $0x5c] sm:$0xf] %v22906_v53 }
 0x68c   : > { %v22998_v19 = vadd.f32 %v22996_v9, %v22990_v39  ;;  %23830 = vst [vmem:[%s31311_s9 + $0x54] sm:$0xff] %v23010_v36 }
 0x68e   : > { %23829 = vst [vmem:[%s31311_s9 + $0x50] sm:$0xf] %v22998_v19  ;;  %v23007_v58 = vsub.f32 %v22998_v19, %v23003_v48 }
 0x692   : > { %v23005_v16 = vld [vmem:[#allocation4 + $0x5c] sm:$0xf] }
 0x693   : > { %v23009_v1 = vmul.f32 %v23007_v58, %v23005_v16 }
 0x695   : > { %v23011_v12 = vadd.f32 %v23009_v1, %v23003_v48 }
 0x697   : > { %23831 = vst [vmem:[%s31311_s9 + $0x5c] sm:$0xf] %v23011_v12 }
 0x698   : > { %25373 = shalt.err (!%p25370_p3)
}
 0x699   : > { %s25374_s11 = scalar_lea.hbm %s31373_s8, 1536  ;;  %s25378_s20 = scalar_lea.hbm %s31424_s3, 3072 }
 0x69a   : > { %p25375_p4 = scmp.ne.s32.totalorder %s31373_s8, %s25374_s11  ;;  %p25379_p9 = scmp.lt.u32.totalorder %s31373_s8, %s31424_s3 }
 0x69b   : > { %p25380_p10 = scmp.lt.u32.totalorder %s25378_s20, %s25374_s11  ;;  %p25382_p12 = scmp.lt.u32.totalorder %s25374_s11, %s31373_s8 }
 0x69c   : > { %p25376_p7 = pnand %p25375_p4, %p25495_p5 }
 0x69d   : > { %p25381_p11 = por %p25380_p10, %p25379_p9 }
 0x69e   : > { %p25377_p8 = pneg %p25376_p7 }
 0x69f   : > { %p25383_p13 = por %p25382_p12, %p25381_p11 }
 0x6a1   : > { %p25384_p0 = pnand %p25383_p13, %p25377_p8 }
 0x6a3   : > { %25387 = shalt.err (!%p25384_p0)
}
 0x6a4   : > { %s25435_s6 = smov 192   ;;  %s25436_s26 = smov 12  }
 0x6a5   : > { %25110 = dma.vmem_to_hbm [thread:$0]  (%p25495_p5), %s31375_s17, 1536, %s31373_s8, %s31380_s28, %s25435_s6, %s25435_s6, %s25436_s26  }
 0x6a6 PF: > { %p25116_p1 = scmp.ge.s32.totalorder %s25422_s15, 2  ;;  %s23044_s9 = sand.u32 1, %s25410_s12  }
 0x6a7   : > { %s23045_s30 = scalar_lea.sflag [#allocation6], %s23044_s9 }
 0x6a8   : > { %p25113_p2 = pnand %p25116_p1, %p25499_p6 }
 0x6aa   : > { %25405 = dma.done.wait (!%p25113_p2), %s23045_s30, 1536  }
 0x6ab   : > { %25407 = vsyncadd (!%p25113_p2), %s23045_s30, 4294965760  ;;  %p13_p3 = scmp.ge.s32.totalorder %s25482_s18, 4   ;;  %s31464_s12 = smov %s25414_s13 }
 0x6ac   : > { %s31465_s13 = smov %s25418_s14  ;;  %s31466_s14 = smov %s25493_s21 }
 0x6ad   : > { %s31467_s15 = smov %s25482_s18  ;;  %15 = sbr.rel (!%p13_p3) target bundleno = 3 (0x3), region = 114 }
 0x6b4   :  { %23050 = vsyncpa [#allocation6], 1 }
 0x6b5   :  { %23052 = vsyncpa [#allocation6 + $0x1], 1 }

</bundles_post_ra>
